<compile_context>
chip_gen: v7x
topology: tpu7x:2x2x1
jax: 0.10.0
libtpu: 0.0.40
codegen_flags: <defaults>
</compile_context>

<pallas_src>
import jax
import jax.numpy as jnp
import numpy as np
from jax.experimental import pallas as pl
from jax.experimental.pallas import tpu as pltpu

C_IN = 512          # fixed by conv1d_c512
NUM_CLASSES = 4     # stands in for cfg.DATASET.NUM_CLASSES
REG_CHANNELS = 2
LANE = 128          # lane-dense padded width for the narrow pred outputs


def _fused_kernel(x_ref,
                  w1c_ref, b1c_ref, w2c_ref, b2c_ref, wpc_ref, bpc_ref,
                  w1r_ref, b1r_ref, w2r_ref, b2r_ref, wpr_ref, bpr_ref,
                  cls_ref, reg_ref):
    """Both PredHeadBranches (cls + reg) on one block of NB samples."""
    NB, T, _ = x_ref.shape
    M = NB * T

    # Within-sample time index of every flattened row (samples are stacked
    # along the matmul row axis; conv shifts must not cross sample boundaries).
    t_idx = jax.lax.broadcasted_iota(jnp.int32, (M, 1), 0) % T

    def conv3(f, w_ref, b_ref):
        # f: (M, Cin) f32; w_ref: (3, Cin, Cout) bf16; b_ref: (1, Cout) f32
        # Circular shifts; wrapped / cross-sample rows are zeroed by the mask,
        # which reproduces Conv1d(padding=1) exactly.
        f_prev = jnp.where(t_idx == 0, 0.0, jnp.roll(f, 1, axis=0))      # f[t-1]
        f_next = jnp.where(t_idx == T - 1, 0.0, jnp.roll(f, -1, axis=0))  # f[t+1]
        acc = jnp.dot(f_prev.astype(jnp.bfloat16), w_ref[0],
                      preferred_element_type=jnp.float32)
        acc = acc + jnp.dot(f.astype(jnp.bfloat16), w_ref[1],
                            preferred_element_type=jnp.float32)
        acc = acc + jnp.dot(f_next.astype(jnp.bfloat16), w_ref[2],
                            preferred_element_type=jnp.float32)
        return acc + b_ref[...]

    x = x_ref[...].reshape(M, C_IN).astype(jnp.float32)

    def branch(w1_ref, b1_ref, w2_ref, b2_ref, wp_ref, bp_ref):
        feat1 = jnp.maximum(conv3(x, w1_ref, b1_ref), 0.0)       # conv1 + ReLU
        feat2 = jnp.maximum(conv3(feat1, w2_ref, b2_ref), 0.0)   # conv2 + ReLU
        return conv3(feat2, wp_ref, bp_ref)                      # (M, LANE) f32

    cls = branch(w1c_ref, b1c_ref, w2c_ref, b2c_ref, wpc_ref, bpc_ref)
    reg = branch(w1r_ref, b1r_ref, w2r_ref, b2r_ref, wpr_ref, bpr_ref)
    cls_ref[...] = cls.reshape(NB, T, LANE).astype(cls_ref.dtype)
    reg_ref[...] = reg.reshape(NB, T, LANE).astype(reg_ref.dtype)


def _prep_branch(branch_params):
    """Cast conv weights to bf16 and zero-pad the pred conv to LANE outputs."""
    w1, b1, w2, b2, wp, bp = branch_params
    c_out = wp.shape[-1]
    wp_pad = jnp.zeros((3, C_IN, LANE), jnp.bfloat16).at[:, :, :c_out].set(
        wp.astype(jnp.bfloat16))
    bp_pad = jnp.zeros((1, LANE), jnp.float32).at[:, :c_out].set(
        bp.astype(jnp.float32))
    return (w1.astype(jnp.bfloat16), b1.astype(jnp.float32),
            w2.astype(jnp.bfloat16), b2.astype(jnp.float32),
            wp_pad, bp_pad)


def pred_head(x_nct, params):
    """Full PredHead forward.  x_nct: (N, 512, T) — PyTorch conv layout."""
    N, _, T = x_nct.shape
    # TODO(synk): accept NTC input directly from the producer to avoid this
    # extra HBM transpose pass (kept since the PyTorch spec hands us (N,C,T)).
    x_ntc = jnp.transpose(x_nct, (0, 2, 1)).astype(jnp.bfloat16)

    cls_p = _prep_branch(params["cls"])
    reg_p = _prep_branch(params["reg"])
    n_cls = params["cls"][4].shape[-1]
    n_reg = params["reg"][4].shape[-1]

    # Pack batch rows so the matmul M-dimension (NB*T rows) fills the MXU.
    # TODO(synk): for very long T, add T-tiling with a 3-row halo instead of
    # full-T blocks.
    NB = max(1, min(N, 256 // max(T, 1)))
    grid = (pl.cdiv(N, NB),)

    wspec = pl.BlockSpec((3, C_IN, C_IN), lambda n: (0, 0, 0))
    bspec = pl.BlockSpec((1, C_IN), lambda n: (0, 0))
    wpspec = pl.BlockSpec((3, C_IN, LANE), lambda n: (0, 0, 0))
    bpspec = pl.BlockSpec((1, LANE), lambda n: (0, 0))

    cls_pad, reg_pad = pl.pallas_call(
        _fused_kernel,
        out_shape=(jax.ShapeDtypeStruct((N, T, LANE), jnp.float32),
                   jax.ShapeDtypeStruct((N, T, LANE), jnp.float32)),
        grid_spec=pltpu.PrefetchScalarGridSpec(
            num_scalar_prefetch=0,
            grid=grid,
            in_specs=[
                pl.BlockSpec((NB, T, C_IN), lambda n: (n, 0, 0)),
                wspec, bspec, wspec, bspec, wpspec, bpspec,   # cls branch
                wspec, bspec, wspec, bspec, wpspec, bpspec,   # reg branch
            ],
            out_specs=[
                pl.BlockSpec((NB, T, LANE), lambda n: (n, 0, 0)),
                pl.BlockSpec((NB, T, LANE), lambda n: (n, 0, 0)),
            ],
        ),
        compiler_params=pltpu.CompilerParams(
            dimension_semantics=("parallel",),
            # bf16 weights double-buffered are ~14 MiB; 48 MiB fits v7x's
            # 64 MiB physical VMEM with headroom (previous 100 MiB did not).
            vmem_limit_bytes=48 << 20,
        ),
    )(x_ntc, *cls_p, *reg_p)

    return cls_pad[:, :, :n_cls], reg_pad[:, :, :n_reg]


# ---------------- parameter setup (deterministic, synthetic) ----------------

def _make_branch_params(key, pred_channels):
    ks = jax.random.split(key, 6)
    scale = 0.02

    def conv_w(k, cout):
        # PyTorch Conv1d weight is (Cout, Cin, K); store as (K, Cin, Cout).
        w_torch = scale * jax.random.normal(k, (cout, C_IN, 3), jnp.float32)
        return jnp.transpose(w_torch, (2, 1, 0))

    w1 = conv_w(ks[0], C_IN)
    b1 = scale * jax.random.normal(ks[1], (1, C_IN), jnp.float32)
    w2 = conv_w(ks[2], C_IN)
    b2 = scale * jax.random.normal(ks[3], (1, C_IN), jnp.float32)
    wp = conv_w(ks[4], pred_channels)
    bp = scale * jax.random.normal(ks[5], (1, pred_channels), jnp.float32)
    return (w1, b1, w2, b2, wp, bp)


# ---------------- pure-JAX reference (for correctness check) ----------------

def _conv1d_ref(x_nct, w_kio, b):
    # x_nct: (N, Cin, T); w_kio: (K, Cin, Cout); b: (1, Cout)
    w_oik = jnp.transpose(w_kio, (2, 1, 0))  # (Cout, Cin, K) - PyTorch layout
    y = jax.lax.conv_general_dilated(
        x_nct, w_oik, window_strides=(1,), padding=[(1, 1)],
        dimension_numbers=("NCH", "OIH", "NCH"),
        precision=jax.lax.Precision.HIGHEST)
    return y + b[0][None, :, None]


def _branch_ref(x_nct, w1, b1, w2, b2, wp, bp):
    f1 = jax.nn.relu(_conv1d_ref(x_nct, w1, b1))
    f2 = jax.nn.relu(_conv1d_ref(f1, w2, b2))
    p = _conv1d_ref(f2, wp, bp)
    return jnp.transpose(p, (0, 2, 1))  # (N, T, Cout)


if __name__ == "__main__":
    key = jax.random.PRNGKey(0)
    k_x, k_cls, k_reg = jax.random.split(key, 3)

    N, T = 2, 16
    x = jax.random.normal(k_x, (N, C_IN, T), jnp.float32)  # PyTorch (N, C, T)

    params = {
        "cls": _make_branch_params(k_cls, NUM_CLASSES),
        "reg": _make_branch_params(k_reg, REG_CHANNELS),
    }

    cls_out, reg_out = jax.block_until_ready(pred_head(x, params))

    assert cls_out.shape == (N, T, NUM_CLASSES)
    assert reg_out.shape == (N, T, REG_CHANNELS)

    cls_ref = _branch_ref(x, *params["cls"])
    reg_ref = _branch_ref(x, *params["reg"])
    np.testing.assert_allclose(np.asarray(cls_out), np.asarray(cls_ref),
                               rtol=2e-2, atol=2e-2)
    np.testing.assert_allclose(np.asarray(reg_out), np.asarray(reg_ref),
                               rtol=2e-2, atol=2e-2)

    print("KERNEL_OK")
</pallas_src>

<mosaic_0001>
module attributes {stable_mosaic.version = 11 : i64} {
  func.func @_fused_kernel(%arg0: i32, %arg1: memref<2x16x512xbf16, #tpu.memory_space<vmem>>, %arg2: memref<3x512x512xbf16, #tpu.memory_space<vmem>>, %arg3: memref<1x512xf32, #tpu.memory_space<vmem>>, %arg4: memref<3x512x512xbf16, #tpu.memory_space<vmem>>, %arg5: memref<1x512xf32, #tpu.memory_space<vmem>>, %arg6: memref<3x512x128xbf16, #tpu.memory_space<vmem>>, %arg7: memref<1x128xf32, #tpu.memory_space<vmem>>, %arg8: memref<3x512x512xbf16, #tpu.memory_space<vmem>>, %arg9: memref<1x512xf32, #tpu.memory_space<vmem>>, %arg10: memref<3x512x512xbf16, #tpu.memory_space<vmem>>, %arg11: memref<1x512xf32, #tpu.memory_space<vmem>>, %arg12: memref<3x512x128xbf16, #tpu.memory_space<vmem>>, %arg13: memref<1x128xf32, #tpu.memory_space<vmem>>, %arg14: memref<2x16x128xf32, #tpu.memory_space<vmem>>, %arg15: memref<2x16x128xf32, #tpu.memory_space<vmem>>) attributes {dimension_semantics = [#tpu.dimension_semantics<parallel>], iteration_bounds = array<i64: 1>, scalar_prefetch = 0 : i64, scratch_operands = 0 : i64, tpu.core_type = #tpu.core_type<tc>, window_params = [{transform_indices = @transform_0, window_bounds = array<i64: 2, 16, 512>}, {pipeline_mode = #tpu.pipeline_mode<synchronous>, transform_indices = @transform_1, window_bounds = array<i64: 3, 512, 512>}, {pipeline_mode = #tpu.pipeline_mode<synchronous>, transform_indices = @transform_2, window_bounds = array<i64: 1, 512>}, {pipeline_mode = #tpu.pipeline_mode<synchronous>, transform_indices = @transform_3, window_bounds = array<i64: 3, 512, 512>}, {pipeline_mode = #tpu.pipeline_mode<synchronous>, transform_indices = @transform_4, window_bounds = array<i64: 1, 512>}, {pipeline_mode = #tpu.pipeline_mode<synchronous>, transform_indices = @transform_5, window_bounds = array<i64: 3, 512, 128>}, {pipeline_mode = #tpu.pipeline_mode<synchronous>, transform_indices = @transform_6, window_bounds = array<i64: 1, 128>}, {pipeline_mode = #tpu.pipeline_mode<synchronous>, transform_indices = @transform_7, window_bounds = array<i64: 3, 512, 512>}, {pipeline_mode = #tpu.pipeline_mode<synchronous>, transform_indices = @transform_8, window_bounds = array<i64: 1, 512>}, {pipeline_mode = #tpu.pipeline_mode<synchronous>, transform_indices = @transform_9, window_bounds = array<i64: 3, 512, 512>}, {pipeline_mode = #tpu.pipeline_mode<synchronous>, transform_indices = @transform_10, window_bounds = array<i64: 1, 512>}, {pipeline_mode = #tpu.pipeline_mode<synchronous>, transform_indices = @transform_11, window_bounds = array<i64: 3, 512, 128>}, {pipeline_mode = #tpu.pipeline_mode<synchronous>, transform_indices = @transform_12, window_bounds = array<i64: 1, 128>}, {transform_indices = @transform_13, window_bounds = array<i64: 2, 16, 128>}, {transform_indices = @transform_14, window_bounds = array<i64: 2, 16, 128>}]} {
    %0 = tpu.iota {dimensions = array<i32: 0>} : vector<32x1xi32>
    %c16_i32 = arith.constant 16 : i32
    %c0_i32 = arith.constant 0 : i32
    %1 = arith.cmpi eq, %c16_i32, %c0_i32 : i32
    %c1_i32 = arith.constant 1 : i32
    %2 = arith.select %1, %c1_i32, %c16_i32 : i32
    %3 = vector.broadcast %2 : i32 to vector<32x1xi32>
    %4 = arith.remsi %0, %3 : vector<32x1xi32>
    %c0_i32_0 = arith.constant 0 : i32
    %5 = vector.broadcast %c0_i32_0 : i32 to vector<32x1xi32>
    %6 = arith.cmpi ne, %4, %5 : vector<32x1xi32>
    %c0_i32_1 = arith.constant 0 : i32
    %7 = vector.broadcast %c0_i32_1 : i32 to vector<32x1xi32>
    %8 = arith.cmpi slt, %4, %7 : vector<32x1xi32>
    %c0_i32_2 = arith.constant 0 : i32
    %9 = arith.cmpi slt, %2, %c0_i32_2 : i32
    %10 = vector.broadcast %9 : i1 to vector<32x1xi1>
    %11 = vector.broadcast %10 : vector<32x1xi1> to vector<32x1xi1>
    %12 = arith.xori %8, %11 : vector<32x1xi1>
    %13 = arith.andi %12, %6 : vector<32x1xi1>
    %14 = vector.broadcast %2 : i32 to vector<32x1xi32>
    %15 = arith.addi %4, %14 : vector<32x1xi32>
    %16 = arith.select %13, %15, %4 : vector<32x1xi1>, vector<32x1xi32>
    %c0 = arith.constant 0 : index
    %c0_3 = arith.constant 0 : index
    %c0_4 = arith.constant 0 : index
    %17 = vector.load %arg1[%c0, %c0_3, %c0_4] : memref<2x16x512xbf16, #tpu.memory_space<vmem>>, vector<2x16x512xbf16>
    %18 = vector.shape_cast %17 : vector<2x16x512xbf16> to vector<32x512xbf16>
    %19 = arith.extf %18 : vector<32x512xbf16> to vector<32x512xf32>
    %c0_i32_5 = arith.constant 0 : i32
    %20 = vector.broadcast %c0_i32_5 : i32 to vector<32x1xi32>
    %21 = arith.cmpi eq, %16, %20 : vector<32x1xi32>
    %22 = vector.extract_strided_slice %19 {offsets = [31, 0], sizes = [1, 512], strides = [1, 1]} : vector<32x512xf32> to vector<1x512xf32>
    %23 = vector.extract_strided_slice %19 {offsets = [0, 0], sizes = [31, 512], strides = [1, 1]} : vector<32x512xf32> to vector<31x512xf32>
    %24 = tpu.concatenate %22, %23 in 0 : vector<1x512xf32>, vector<31x512xf32> -> vector<32x512xf32>
    %cst = arith.constant 0.000000e+00 : f32
    %25 = vector.shape_cast %21 : vector<32x1xi1> to vector<32x1xi1>
    %26 = vector.broadcast %25 : vector<32x1xi1> to vector<32x512xi1>
    %27 = vector.broadcast %cst : f32 to vector<32x512xf32>
    %28 = arith.select %26, %27, %24 : vector<32x512xi1>, vector<32x512xf32>
    %c15_i32 = arith.constant 15 : i32
    %29 = vector.broadcast %c15_i32 : i32 to vector<32x1xi32>
    %30 = arith.cmpi eq, %16, %29 : vector<32x1xi32>
    %31 = vector.extract_strided_slice %19 {offsets = [1, 0], sizes = [31, 512], strides = [1, 1]} : vector<32x512xf32> to vector<31x512xf32>
    %32 = vector.extract_strided_slice %19 {offsets = [0, 0], sizes = [1, 512], strides = [1, 1]} : vector<32x512xf32> to vector<1x512xf32>
    %33 = tpu.concatenate %31, %32 in 0 : vector<31x512xf32>, vector<1x512xf32> -> vector<32x512xf32>
    %cst_6 = arith.constant 0.000000e+00 : f32
    %34 = vector.shape_cast %30 : vector<32x1xi1> to vector<32x1xi1>
    %35 = vector.broadcast %34 : vector<32x1xi1> to vector<32x512xi1>
    %36 = vector.broadcast %cst_6 : f32 to vector<32x512xf32>
    %37 = arith.select %35, %36, %33 : vector<32x512xi1>, vector<32x512xf32>
    %38 = arith.truncf %28 : vector<32x512xf32> to vector<32x512xbf16>
    %c0_7 = arith.constant 0 : index
    %c0_8 = arith.constant 0 : index
    %c0_9 = arith.constant 0 : index
    %39 = vector.load %arg2[%c0_7, %c0_8, %c0_9] : memref<3x512x512xbf16, #tpu.memory_space<vmem>>, vector<1x512x512xbf16>
    %40 = vector.shape_cast %39 : vector<1x512x512xbf16> to vector<512x512xbf16>
    %cst_10 = arith.constant dense<0.000000e+00> : vector<32x512xf32>
    %41 = tpu.matmul %38, %40, %cst_10 {dimension_numbers = #tpu.dot_dimension_numbers<[1], [0], [0], [1], [0, 0, 1, 1], [], []>} : vector<32x512xbf16>, vector<512x512xbf16>, vector<32x512xf32> -> vector<32x512xf32>
    %42 = arith.truncf %19 : vector<32x512xf32> to vector<32x512xbf16>
    %c1 = arith.constant 1 : index
    %c0_11 = arith.constant 0 : index
    %c0_12 = arith.constant 0 : index
    %43 = vector.load %arg2[%c1, %c0_11, %c0_12] : memref<3x512x512xbf16, #tpu.memory_space<vmem>>, vector<1x512x512xbf16>
    %44 = vector.shape_cast %43 : vector<1x512x512xbf16> to vector<512x512xbf16>
    %cst_13 = arith.constant dense<0.000000e+00> : vector<32x512xf32>
    %45 = tpu.matmul %42, %44, %cst_13 {dimension_numbers = #tpu.dot_dimension_numbers<[1], [0], [0], [1], [0, 0, 1, 1], [], []>} : vector<32x512xbf16>, vector<512x512xbf16>, vector<32x512xf32> -> vector<32x512xf32>
    %46 = arith.addf %41, %45 : vector<32x512xf32>
    %47 = arith.truncf %37 : vector<32x512xf32> to vector<32x512xbf16>
    %c2 = arith.constant 2 : index
    %c0_14 = arith.constant 0 : index
    %c0_15 = arith.constant 0 : index
    %48 = vector.load %arg2[%c2, %c0_14, %c0_15] : memref<3x512x512xbf16, #tpu.memory_space<vmem>>, vector<1x512x512xbf16>
    %49 = vector.shape_cast %48 : vector<1x512x512xbf16> to vector<512x512xbf16>
    %cst_16 = arith.constant dense<0.000000e+00> : vector<32x512xf32>
    %50 = tpu.matmul %47, %49, %cst_16 {dimension_numbers = #tpu.dot_dimension_numbers<[1], [0], [0], [1], [0, 0, 1, 1], [], []>} : vector<32x512xbf16>, vector<512x512xbf16>, vector<32x512xf32> -> vector<32x512xf32>
    %51 = arith.addf %46, %50 : vector<32x512xf32>
    %c0_17 = arith.constant 0 : index
    %c0_18 = arith.constant 0 : index
    %52 = vector.load %arg3[%c0_17, %c0_18] : memref<1x512xf32, #tpu.memory_space<vmem>>, vector<1x512xf32>
    %53 = vector.broadcast %52 : vector<1x512xf32> to vector<32x512xf32>
    %54 = arith.addf %51, %53 : vector<32x512xf32>
    %cst_19 = arith.constant 0.000000e+00 : f32
    %55 = vector.broadcast %cst_19 : f32 to vector<32x512xf32>
    %56 = arith.maximumf %54, %55 : vector<32x512xf32>
    %c0_i32_20 = arith.constant 0 : i32
    %57 = vector.broadcast %c0_i32_20 : i32 to vector<32x1xi32>
    %58 = arith.cmpi eq, %16, %57 : vector<32x1xi32>
    %59 = vector.extract_strided_slice %56 {offsets = [31, 0], sizes = [1, 512], strides = [1, 1]} : vector<32x512xf32> to vector<1x512xf32>
    %60 = vector.extract_strided_slice %56 {offsets = [0, 0], sizes = [31, 512], strides = [1, 1]} : vector<32x512xf32> to vector<31x512xf32>
    %61 = tpu.concatenate %59, %60 in 0 : vector<1x512xf32>, vector<31x512xf32> -> vector<32x512xf32>
    %cst_21 = arith.constant 0.000000e+00 : f32
    %62 = vector.shape_cast %58 : vector<32x1xi1> to vector<32x1xi1>
    %63 = vector.broadcast %62 : vector<32x1xi1> to vector<32x512xi1>
    %64 = vector.broadcast %cst_21 : f32 to vector<32x512xf32>
    %65 = arith.select %63, %64, %61 : vector<32x512xi1>, vector<32x512xf32>
    %c15_i32_22 = arith.constant 15 : i32
    %66 = vector.broadcast %c15_i32_22 : i32 to vector<32x1xi32>
    %67 = arith.cmpi eq, %16, %66 : vector<32x1xi32>
    %68 = vector.extract_strided_slice %56 {offsets = [1, 0], sizes = [31, 512], strides = [1, 1]} : vector<32x512xf32> to vector<31x512xf32>
    %69 = vector.extract_strided_slice %56 {offsets = [0, 0], sizes = [1, 512], strides = [1, 1]} : vector<32x512xf32> to vector<1x512xf32>
    %70 = tpu.concatenate %68, %69 in 0 : vector<31x512xf32>, vector<1x512xf32> -> vector<32x512xf32>
    %cst_23 = arith.constant 0.000000e+00 : f32
    %71 = vector.shape_cast %67 : vector<32x1xi1> to vector<32x1xi1>
    %72 = vector.broadcast %71 : vector<32x1xi1> to vector<32x512xi1>
    %73 = vector.broadcast %cst_23 : f32 to vector<32x512xf32>
    %74 = arith.select %72, %73, %70 : vector<32x512xi1>, vector<32x512xf32>
    %75 = arith.truncf %65 : vector<32x512xf32> to vector<32x512xbf16>
    %c0_24 = arith.constant 0 : index
    %c0_25 = arith.constant 0 : index
    %c0_26 = arith.constant 0 : index
    %76 = vector.load %arg4[%c0_24, %c0_25, %c0_26] : memref<3x512x512xbf16, #tpu.memory_space<vmem>>, vector<1x512x512xbf16>
    %77 = vector.shape_cast %76 : vector<1x512x512xbf16> to vector<512x512xbf16>
    %cst_27 = arith.constant dense<0.000000e+00> : vector<32x512xf32>
    %78 = tpu.matmul %75, %77, %cst_27 {dimension_numbers = #tpu.dot_dimension_numbers<[1], [0], [0], [1], [0, 0, 1, 1], [], []>} : vector<32x512xbf16>, vector<512x512xbf16>, vector<32x512xf32> -> vector<32x512xf32>
    %79 = arith.truncf %56 : vector<32x512xf32> to vector<32x512xbf16>
    %c1_28 = arith.constant 1 : index
    %c0_29 = arith.constant 0 : index
    %c0_30 = arith.constant 0 : index
    %80 = vector.load %arg4[%c1_28, %c0_29, %c0_30] : memref<3x512x512xbf16, #tpu.memory_space<vmem>>, vector<1x512x512xbf16>
    %81 = vector.shape_cast %80 : vector<1x512x512xbf16> to vector<512x512xbf16>
    %cst_31 = arith.constant dense<0.000000e+00> : vector<32x512xf32>
    %82 = tpu.matmul %79, %81, %cst_31 {dimension_numbers = #tpu.dot_dimension_numbers<[1], [0], [0], [1], [0, 0, 1, 1], [], []>} : vector<32x512xbf16>, vector<512x512xbf16>, vector<32x512xf32> -> vector<32x512xf32>
    %83 = arith.addf %78, %82 : vector<32x512xf32>
    %84 = arith.truncf %74 : vector<32x512xf32> to vector<32x512xbf16>
    %c2_32 = arith.constant 2 : index
    %c0_33 = arith.constant 0 : index
    %c0_34 = arith.constant 0 : index
    %85 = vector.load %arg4[%c2_32, %c0_33, %c0_34] : memref<3x512x512xbf16, #tpu.memory_space<vmem>>, vector<1x512x512xbf16>
    %86 = vector.shape_cast %85 : vector<1x512x512xbf16> to vector<512x512xbf16>
    %cst_35 = arith.constant dense<0.000000e+00> : vector<32x512xf32>
    %87 = tpu.matmul %84, %86, %cst_35 {dimension_numbers = #tpu.dot_dimension_numbers<[1], [0], [0], [1], [0, 0, 1, 1], [], []>} : vector<32x512xbf16>, vector<512x512xbf16>, vector<32x512xf32> -> vector<32x512xf32>
    %88 = arith.addf %83, %87 : vector<32x512xf32>
    %c0_36 = arith.constant 0 : index
    %c0_37 = arith.constant 0 : index
    %89 = vector.load %arg5[%c0_36, %c0_37] : memref<1x512xf32, #tpu.memory_space<vmem>>, vector<1x512xf32>
    %90 = vector.broadcast %89 : vector<1x512xf32> to vector<32x512xf32>
    %91 = arith.addf %88, %90 : vector<32x512xf32>
    %cst_38 = arith.constant 0.000000e+00 : f32
    %92 = vector.broadcast %cst_38 : f32 to vector<32x512xf32>
    %93 = arith.maximumf %91, %92 : vector<32x512xf32>
    %c0_i32_39 = arith.constant 0 : i32
    %94 = vector.broadcast %c0_i32_39 : i32 to vector<32x1xi32>
    %95 = arith.cmpi eq, %16, %94 : vector<32x1xi32>
    %96 = vector.extract_strided_slice %93 {offsets = [31, 0], sizes = [1, 512], strides = [1, 1]} : vector<32x512xf32> to vector<1x512xf32>
    %97 = vector.extract_strided_slice %93 {offsets = [0, 0], sizes = [31, 512], strides = [1, 1]} : vector<32x512xf32> to vector<31x512xf32>
    %98 = tpu.concatenate %96, %97 in 0 : vector<1x512xf32>, vector<31x512xf32> -> vector<32x512xf32>
    %cst_40 = arith.constant 0.000000e+00 : f32
    %99 = vector.shape_cast %95 : vector<32x1xi1> to vector<32x1xi1>
    %100 = vector.broadcast %99 : vector<32x1xi1> to vector<32x512xi1>
    %101 = vector.broadcast %cst_40 : f32 to vector<32x512xf32>
    %102 = arith.select %100, %101, %98 : vector<32x512xi1>, vector<32x512xf32>
    %c15_i32_41 = arith.constant 15 : i32
    %103 = vector.broadcast %c15_i32_41 : i32 to vector<32x1xi32>
    %104 = arith.cmpi eq, %16, %103 : vector<32x1xi32>
    %105 = vector.extract_strided_slice %93 {offsets = [1, 0], sizes = [31, 512], strides = [1, 1]} : vector<32x512xf32> to vector<31x512xf32>
    %106 = vector.extract_strided_slice %93 {offsets = [0, 0], sizes = [1, 512], strides = [1, 1]} : vector<32x512xf32> to vector<1x512xf32>
    %107 = tpu.concatenate %105, %106 in 0 : vector<31x512xf32>, vector<1x512xf32> -> vector<32x512xf32>
    %cst_42 = arith.constant 0.000000e+00 : f32
    %108 = vector.shape_cast %104 : vector<32x1xi1> to vector<32x1xi1>
    %109 = vector.broadcast %108 : vector<32x1xi1> to vector<32x512xi1>
    %110 = vector.broadcast %cst_42 : f32 to vector<32x512xf32>
    %111 = arith.select %109, %110, %107 : vector<32x512xi1>, vector<32x512xf32>
    %112 = arith.truncf %102 : vector<32x512xf32> to vector<32x512xbf16>
    %c0_43 = arith.constant 0 : index
    %c0_44 = arith.constant 0 : index
    %c0_45 = arith.constant 0 : index
    %113 = vector.load %arg6[%c0_43, %c0_44, %c0_45] : memref<3x512x128xbf16, #tpu.memory_space<vmem>>, vector<1x512x128xbf16>
    %114 = vector.shape_cast %113 : vector<1x512x128xbf16> to vector<512x128xbf16>
    %cst_46 = arith.constant dense<0.000000e+00> : vector<32x128xf32>
    %115 = tpu.matmul %112, %114, %cst_46 {dimension_numbers = #tpu.dot_dimension_numbers<[1], [0], [0], [1], [0, 0, 1, 1], [], []>} : vector<32x512xbf16>, vector<512x128xbf16>, vector<32x128xf32> -> vector<32x128xf32>
    %116 = arith.truncf %93 : vector<32x512xf32> to vector<32x512xbf16>
    %c1_47 = arith.constant 1 : index
    %c0_48 = arith.constant 0 : index
    %c0_49 = arith.constant 0 : index
    %117 = vector.load %arg6[%c1_47, %c0_48, %c0_49] : memref<3x512x128xbf16, #tpu.memory_space<vmem>>, vector<1x512x128xbf16>
    %118 = vector.shape_cast %117 : vector<1x512x128xbf16> to vector<512x128xbf16>
    %cst_50 = arith.constant dense<0.000000e+00> : vector<32x128xf32>
    %119 = tpu.matmul %116, %118, %cst_50 {dimension_numbers = #tpu.dot_dimension_numbers<[1], [0], [0], [1], [0, 0, 1, 1], [], []>} : vector<32x512xbf16>, vector<512x128xbf16>, vector<32x128xf32> -> vector<32x128xf32>
    %120 = arith.addf %115, %119 : vector<32x128xf32>
    %121 = arith.truncf %111 : vector<32x512xf32> to vector<32x512xbf16>
    %c2_51 = arith.constant 2 : index
    %c0_52 = arith.constant 0 : index
    %c0_53 = arith.constant 0 : index
    %122 = vector.load %arg6[%c2_51, %c0_52, %c0_53] : memref<3x512x128xbf16, #tpu.memory_space<vmem>>, vector<1x512x128xbf16>
    %123 = vector.shape_cast %122 : vector<1x512x128xbf16> to vector<512x128xbf16>
    %cst_54 = arith.constant dense<0.000000e+00> : vector<32x128xf32>
    %124 = tpu.matmul %121, %123, %cst_54 {dimension_numbers = #tpu.dot_dimension_numbers<[1], [0], [0], [1], [0, 0, 1, 1], [], []>} : vector<32x512xbf16>, vector<512x128xbf16>, vector<32x128xf32> -> vector<32x128xf32>
    %125 = arith.addf %120, %124 : vector<32x128xf32>
    %c0_55 = arith.constant 0 : index
    %c0_56 = arith.constant 0 : index
    %126 = vector.load %arg7[%c0_55, %c0_56] : memref<1x128xf32, #tpu.memory_space<vmem>>, vector<1x128xf32>
    %127 = vector.broadcast %126 : vector<1x128xf32> to vector<32x128xf32>
    %128 = arith.addf %125, %127 : vector<32x128xf32>
    %c0_i32_57 = arith.constant 0 : i32
    %129 = vector.broadcast %c0_i32_57 : i32 to vector<32x1xi32>
    %130 = arith.cmpi eq, %16, %129 : vector<32x1xi32>
    %131 = vector.extract_strided_slice %19 {offsets = [31, 0], sizes = [1, 512], strides = [1, 1]} : vector<32x512xf32> to vector<1x512xf32>
    %132 = vector.extract_strided_slice %19 {offsets = [0, 0], sizes = [31, 512], strides = [1, 1]} : vector<32x512xf32> to vector<31x512xf32>
    %133 = tpu.concatenate %131, %132 in 0 : vector<1x512xf32>, vector<31x512xf32> -> vector<32x512xf32>
    %cst_58 = arith.constant 0.000000e+00 : f32
    %134 = vector.shape_cast %130 : vector<32x1xi1> to vector<32x1xi1>
    %135 = vector.broadcast %134 : vector<32x1xi1> to vector<32x512xi1>
    %136 = vector.broadcast %cst_58 : f32 to vector<32x512xf32>
    %137 = arith.select %135, %136, %133 : vector<32x512xi1>, vector<32x512xf32>
    %c15_i32_59 = arith.constant 15 : i32
    %138 = vector.broadcast %c15_i32_59 : i32 to vector<32x1xi32>
    %139 = arith.cmpi eq, %16, %138 : vector<32x1xi32>
    %140 = vector.extract_strided_slice %19 {offsets = [1, 0], sizes = [31, 512], strides = [1, 1]} : vector<32x512xf32> to vector<31x512xf32>
    %141 = vector.extract_strided_slice %19 {offsets = [0, 0], sizes = [1, 512], strides = [1, 1]} : vector<32x512xf32> to vector<1x512xf32>
    %142 = tpu.concatenate %140, %141 in 0 : vector<31x512xf32>, vector<1x512xf32> -> vector<32x512xf32>
    %cst_60 = arith.constant 0.000000e+00 : f32
    %143 = vector.shape_cast %139 : vector<32x1xi1> to vector<32x1xi1>
    %144 = vector.broadcast %143 : vector<32x1xi1> to vector<32x512xi1>
    %145 = vector.broadcast %cst_60 : f32 to vector<32x512xf32>
    %146 = arith.select %144, %145, %142 : vector<32x512xi1>, vector<32x512xf32>
    %147 = arith.truncf %137 : vector<32x512xf32> to vector<32x512xbf16>
    %c0_61 = arith.constant 0 : index
    %c0_62 = arith.constant 0 : index
    %c0_63 = arith.constant 0 : index
    %148 = vector.load %arg8[%c0_61, %c0_62, %c0_63] : memref<3x512x512xbf16, #tpu.memory_space<vmem>>, vector<1x512x512xbf16>
    %149 = vector.shape_cast %148 : vector<1x512x512xbf16> to vector<512x512xbf16>
    %cst_64 = arith.constant dense<0.000000e+00> : vector<32x512xf32>
    %150 = tpu.matmul %147, %149, %cst_64 {dimension_numbers = #tpu.dot_dimension_numbers<[1], [0], [0], [1], [0, 0, 1, 1], [], []>} : vector<32x512xbf16>, vector<512x512xbf16>, vector<32x512xf32> -> vector<32x512xf32>
    %151 = arith.truncf %19 : vector<32x512xf32> to vector<32x512xbf16>
    %c1_65 = arith.constant 1 : index
    %c0_66 = arith.constant 0 : index
    %c0_67 = arith.constant 0 : index
    %152 = vector.load %arg8[%c1_65, %c0_66, %c0_67] : memref<3x512x512xbf16, #tpu.memory_space<vmem>>, vector<1x512x512xbf16>
    %153 = vector.shape_cast %152 : vector<1x512x512xbf16> to vector<512x512xbf16>
    %cst_68 = arith.constant dense<0.000000e+00> : vector<32x512xf32>
    %154 = tpu.matmul %151, %153, %cst_68 {dimension_numbers = #tpu.dot_dimension_numbers<[1], [0], [0], [1], [0, 0, 1, 1], [], []>} : vector<32x512xbf16>, vector<512x512xbf16>, vector<32x512xf32> -> vector<32x512xf32>
    %155 = arith.addf %150, %154 : vector<32x512xf32>
    %156 = arith.truncf %146 : vector<32x512xf32> to vector<32x512xbf16>
    %c2_69 = arith.constant 2 : index
    %c0_70 = arith.constant 0 : index
    %c0_71 = arith.constant 0 : index
    %157 = vector.load %arg8[%c2_69, %c0_70, %c0_71] : memref<3x512x512xbf16, #tpu.memory_space<vmem>>, vector<1x512x512xbf16>
    %158 = vector.shape_cast %157 : vector<1x512x512xbf16> to vector<512x512xbf16>
    %cst_72 = arith.constant dense<0.000000e+00> : vector<32x512xf32>
    %159 = tpu.matmul %156, %158, %cst_72 {dimension_numbers = #tpu.dot_dimension_numbers<[1], [0], [0], [1], [0, 0, 1, 1], [], []>} : vector<32x512xbf16>, vector<512x512xbf16>, vector<32x512xf32> -> vector<32x512xf32>
    %160 = arith.addf %155, %159 : vector<32x512xf32>
    %c0_73 = arith.constant 0 : index
    %c0_74 = arith.constant 0 : index
    %161 = vector.load %arg9[%c0_73, %c0_74] : memref<1x512xf32, #tpu.memory_space<vmem>>, vector<1x512xf32>
    %162 = vector.broadcast %161 : vector<1x512xf32> to vector<32x512xf32>
    %163 = arith.addf %160, %162 : vector<32x512xf32>
    %cst_75 = arith.constant 0.000000e+00 : f32
    %164 = vector.broadcast %cst_75 : f32 to vector<32x512xf32>
    %165 = arith.maximumf %163, %164 : vector<32x512xf32>
    %c0_i32_76 = arith.constant 0 : i32
    %166 = vector.broadcast %c0_i32_76 : i32 to vector<32x1xi32>
    %167 = arith.cmpi eq, %16, %166 : vector<32x1xi32>
    %168 = vector.extract_strided_slice %165 {offsets = [31, 0], sizes = [1, 512], strides = [1, 1]} : vector<32x512xf32> to vector<1x512xf32>
    %169 = vector.extract_strided_slice %165 {offsets = [0, 0], sizes = [31, 512], strides = [1, 1]} : vector<32x512xf32> to vector<31x512xf32>
    %170 = tpu.concatenate %168, %169 in 0 : vector<1x512xf32>, vector<31x512xf32> -> vector<32x512xf32>
    %cst_77 = arith.constant 0.000000e+00 : f32
    %171 = vector.shape_cast %167 : vector<32x1xi1> to vector<32x1xi1>
    %172 = vector.broadcast %171 : vector<32x1xi1> to vector<32x512xi1>
    %173 = vector.broadcast %cst_77 : f32 to vector<32x512xf32>
    %174 = arith.select %172, %173, %170 : vector<32x512xi1>, vector<32x512xf32>
    %c15_i32_78 = arith.constant 15 : i32
    %175 = vector.broadcast %c15_i32_78 : i32 to vector<32x1xi32>
    %176 = arith.cmpi eq, %16, %175 : vector<32x1xi32>
    %177 = vector.extract_strided_slice %165 {offsets = [1, 0], sizes = [31, 512], strides = [1, 1]} : vector<32x512xf32> to vector<31x512xf32>
    %178 = vector.extract_strided_slice %165 {offsets = [0, 0], sizes = [1, 512], strides = [1, 1]} : vector<32x512xf32> to vector<1x512xf32>
    %179 = tpu.concatenate %177, %178 in 0 : vector<31x512xf32>, vector<1x512xf32> -> vector<32x512xf32>
    %cst_79 = arith.constant 0.000000e+00 : f32
    %180 = vector.shape_cast %176 : vector<32x1xi1> to vector<32x1xi1>
    %181 = vector.broadcast %180 : vector<32x1xi1> to vector<32x512xi1>
    %182 = vector.broadcast %cst_79 : f32 to vector<32x512xf32>
    %183 = arith.select %181, %182, %179 : vector<32x512xi1>, vector<32x512xf32>
    %184 = arith.truncf %174 : vector<32x512xf32> to vector<32x512xbf16>
    %c0_80 = arith.constant 0 : index
    %c0_81 = arith.constant 0 : index
    %c0_82 = arith.constant 0 : index
    %185 = vector.load %arg10[%c0_80, %c0_81, %c0_82] : memref<3x512x512xbf16, #tpu.memory_space<vmem>>, vector<1x512x512xbf16>
    %186 = vector.shape_cast %185 : vector<1x512x512xbf16> to vector<512x512xbf16>
    %cst_83 = arith.constant dense<0.000000e+00> : vector<32x512xf32>
    %187 = tpu.matmul %184, %186, %cst_83 {dimension_numbers = #tpu.dot_dimension_numbers<[1], [0], [0], [1], [0, 0, 1, 1], [], []>} : vector<32x512xbf16>, vector<512x512xbf16>, vector<32x512xf32> -> vector<32x512xf32>
    %188 = arith.truncf %165 : vector<32x512xf32> to vector<32x512xbf16>
    %c1_84 = arith.constant 1 : index
    %c0_85 = arith.constant 0 : index
    %c0_86 = arith.constant 0 : index
    %189 = vector.load %arg10[%c1_84, %c0_85, %c0_86] : memref<3x512x512xbf16, #tpu.memory_space<vmem>>, vector<1x512x512xbf16>
    %190 = vector.shape_cast %189 : vector<1x512x512xbf16> to vector<512x512xbf16>
    %cst_87 = arith.constant dense<0.000000e+00> : vector<32x512xf32>
    %191 = tpu.matmul %188, %190, %cst_87 {dimension_numbers = #tpu.dot_dimension_numbers<[1], [0], [0], [1], [0, 0, 1, 1], [], []>} : vector<32x512xbf16>, vector<512x512xbf16>, vector<32x512xf32> -> vector<32x512xf32>
    %192 = arith.addf %187, %191 : vector<32x512xf32>
    %193 = arith.truncf %183 : vector<32x512xf32> to vector<32x512xbf16>
    %c2_88 = arith.constant 2 : index
    %c0_89 = arith.constant 0 : index
    %c0_90 = arith.constant 0 : index
    %194 = vector.load %arg10[%c2_88, %c0_89, %c0_90] : memref<3x512x512xbf16, #tpu.memory_space<vmem>>, vector<1x512x512xbf16>
    %195 = vector.shape_cast %194 : vector<1x512x512xbf16> to vector<512x512xbf16>
    %cst_91 = arith.constant dense<0.000000e+00> : vector<32x512xf32>
    %196 = tpu.matmul %193, %195, %cst_91 {dimension_numbers = #tpu.dot_dimension_numbers<[1], [0], [0], [1], [0, 0, 1, 1], [], []>} : vector<32x512xbf16>, vector<512x512xbf16>, vector<32x512xf32> -> vector<32x512xf32>
    %197 = arith.addf %192, %196 : vector<32x512xf32>
    %c0_92 = arith.constant 0 : index
    %c0_93 = arith.constant 0 : index
    %198 = vector.load %arg11[%c0_92, %c0_93] : memref<1x512xf32, #tpu.memory_space<vmem>>, vector<1x512xf32>
    %199 = vector.broadcast %198 : vector<1x512xf32> to vector<32x512xf32>
    %200 = arith.addf %197, %199 : vector<32x512xf32>
    %cst_94 = arith.constant 0.000000e+00 : f32
    %201 = vector.broadcast %cst_94 : f32 to vector<32x512xf32>
    %202 = arith.maximumf %200, %201 : vector<32x512xf32>
    %c0_i32_95 = arith.constant 0 : i32
    %203 = vector.broadcast %c0_i32_95 : i32 to vector<32x1xi32>
    %204 = arith.cmpi eq, %16, %203 : vector<32x1xi32>
    %205 = vector.extract_strided_slice %202 {offsets = [31, 0], sizes = [1, 512], strides = [1, 1]} : vector<32x512xf32> to vector<1x512xf32>
    %206 = vector.extract_strided_slice %202 {offsets = [0, 0], sizes = [31, 512], strides = [1, 1]} : vector<32x512xf32> to vector<31x512xf32>
    %207 = tpu.concatenate %205, %206 in 0 : vector<1x512xf32>, vector<31x512xf32> -> vector<32x512xf32>
    %cst_96 = arith.constant 0.000000e+00 : f32
    %208 = vector.shape_cast %204 : vector<32x1xi1> to vector<32x1xi1>
    %209 = vector.broadcast %208 : vector<32x1xi1> to vector<32x512xi1>
    %210 = vector.broadcast %cst_96 : f32 to vector<32x512xf32>
    %211 = arith.select %209, %210, %207 : vector<32x512xi1>, vector<32x512xf32>
    %c15_i32_97 = arith.constant 15 : i32
    %212 = vector.broadcast %c15_i32_97 : i32 to vector<32x1xi32>
    %213 = arith.cmpi eq, %16, %212 : vector<32x1xi32>
    %214 = vector.extract_strided_slice %202 {offsets = [1, 0], sizes = [31, 512], strides = [1, 1]} : vector<32x512xf32> to vector<31x512xf32>
    %215 = vector.extract_strided_slice %202 {offsets = [0, 0], sizes = [1, 512], strides = [1, 1]} : vector<32x512xf32> to vector<1x512xf32>
    %216 = tpu.concatenate %214, %215 in 0 : vector<31x512xf32>, vector<1x512xf32> -> vector<32x512xf32>
    %cst_98 = arith.constant 0.000000e+00 : f32
    %217 = vector.shape_cast %213 : vector<32x1xi1> to vector<32x1xi1>
    %218 = vector.broadcast %217 : vector<32x1xi1> to vector<32x512xi1>
    %219 = vector.broadcast %cst_98 : f32 to vector<32x512xf32>
    %220 = arith.select %218, %219, %216 : vector<32x512xi1>, vector<32x512xf32>
    %221 = arith.truncf %211 : vector<32x512xf32> to vector<32x512xbf16>
    %c0_99 = arith.constant 0 : index
    %c0_100 = arith.constant 0 : index
    %c0_101 = arith.constant 0 : index
    %222 = vector.load %arg12[%c0_99, %c0_100, %c0_101] : memref<3x512x128xbf16, #tpu.memory_space<vmem>>, vector<1x512x128xbf16>
    %223 = vector.shape_cast %222 : vector<1x512x128xbf16> to vector<512x128xbf16>
    %cst_102 = arith.constant dense<0.000000e+00> : vector<32x128xf32>
    %224 = tpu.matmul %221, %223, %cst_102 {dimension_numbers = #tpu.dot_dimension_numbers<[1], [0], [0], [1], [0, 0, 1, 1], [], []>} : vector<32x512xbf16>, vector<512x128xbf16>, vector<32x128xf32> -> vector<32x128xf32>
    %225 = arith.truncf %202 : vector<32x512xf32> to vector<32x512xbf16>
    %c1_103 = arith.constant 1 : index
    %c0_104 = arith.constant 0 : index
    %c0_105 = arith.constant 0 : index
    %226 = vector.load %arg12[%c1_103, %c0_104, %c0_105] : memref<3x512x128xbf16, #tpu.memory_space<vmem>>, vector<1x512x128xbf16>
    %227 = vector.shape_cast %226 : vector<1x512x128xbf16> to vector<512x128xbf16>
    %cst_106 = arith.constant dense<0.000000e+00> : vector<32x128xf32>
    %228 = tpu.matmul %225, %227, %cst_106 {dimension_numbers = #tpu.dot_dimension_numbers<[1], [0], [0], [1], [0, 0, 1, 1], [], []>} : vector<32x512xbf16>, vector<512x128xbf16>, vector<32x128xf32> -> vector<32x128xf32>
    %229 = arith.addf %224, %228 : vector<32x128xf32>
    %230 = arith.truncf %220 : vector<32x512xf32> to vector<32x512xbf16>
    %c2_107 = arith.constant 2 : index
    %c0_108 = arith.constant 0 : index
    %c0_109 = arith.constant 0 : index
    %231 = vector.load %arg12[%c2_107, %c0_108, %c0_109] : memref<3x512x128xbf16, #tpu.memory_space<vmem>>, vector<1x512x128xbf16>
    %232 = vector.shape_cast %231 : vector<1x512x128xbf16> to vector<512x128xbf16>
    %cst_110 = arith.constant dense<0.000000e+00> : vector<32x128xf32>
    %233 = tpu.matmul %230, %232, %cst_110 {dimension_numbers = #tpu.dot_dimension_numbers<[1], [0], [0], [1], [0, 0, 1, 1], [], []>} : vector<32x512xbf16>, vector<512x128xbf16>, vector<32x128xf32> -> vector<32x128xf32>
    %234 = arith.addf %229, %233 : vector<32x128xf32>
    %c0_111 = arith.constant 0 : index
    %c0_112 = arith.constant 0 : index
    %235 = vector.load %arg13[%c0_111, %c0_112] : memref<1x128xf32, #tpu.memory_space<vmem>>, vector<1x128xf32>
    %236 = vector.broadcast %235 : vector<1x128xf32> to vector<32x128xf32>
    %237 = arith.addf %234, %236 : vector<32x128xf32>
    %238 = vector.shape_cast %128 : vector<32x128xf32> to vector<2x16x128xf32>
    %c0_113 = arith.constant 0 : index
    %c0_114 = arith.constant 0 : index
    %c0_115 = arith.constant 0 : index
    %239 = vector.load %arg14[%c0_113, %c0_114, %c0_115] : memref<2x16x128xf32, #tpu.memory_space<vmem>>, vector<2x16x128xf32>
    tpu.vector_store %arg14[%c0_113, %c0_114, %c0_115], %238 {strides = array<i32>} : memref<2x16x128xf32, #tpu.memory_space<vmem>>, vector<2x16x128xf32>,
    %240 = vector.shape_cast %237 : vector<32x128xf32> to vector<2x16x128xf32>
    %c0_116 = arith.constant 0 : index
    %c0_117 = arith.constant 0 : index
    %c0_118 = arith.constant 0 : index
    %241 = vector.load %arg15[%c0_116, %c0_117, %c0_118] : memref<2x16x128xf32, #tpu.memory_space<vmem>>, vector<2x16x128xf32>
    tpu.vector_store %arg15[%c0_116, %c0_117, %c0_118], %240 {strides = array<i32>} : memref<2x16x128xf32, #tpu.memory_space<vmem>>, vector<2x16x128xf32>,
    return
  }
  func.func @transform_0(%arg0: i32) -> (i32, i32, i32) {
    %c0_i32 = arith.constant 0 : i32
    %c0_i32_0 = arith.constant 0 : i32
    %c0_i32_1 = arith.constant 0 : i32
    return %arg0, %c0_i32, %c0_i32_0 : i32, i32, i32
  }
  func.func @transform_1(%arg0: i32) -> (i32, i32, i32) {
    %c0_i32 = arith.constant 0 : i32
    %c0_i32_0 = arith.constant 0 : i32
    %c0_i32_1 = arith.constant 0 : i32
    %c0_i32_2 = arith.constant 0 : i32
    return %c0_i32, %c0_i32_0, %c0_i32_1 : i32, i32, i32
  }
  func.func @transform_2(%arg0: i32) -> (i32, i32) {
    %c0_i32 = arith.constant 0 : i32
    %c0_i32_0 = arith.constant 0 : i32
    %c0_i32_1 = arith.constant 0 : i32
    return %c0_i32, %c0_i32_0 : i32, i32
  }
  func.func @transform_3(%arg0: i32) -> (i32, i32, i32) {
    %c0_i32 = arith.constant 0 : i32
    %c0_i32_0 = arith.constant 0 : i32
    %c0_i32_1 = arith.constant 0 : i32
    %c0_i32_2 = arith.constant 0 : i32
    return %c0_i32, %c0_i32_0, %c0_i32_1 : i32, i32, i32
  }
  func.func @transform_4(%arg0: i32) -> (i32, i32) {
    %c0_i32 = arith.constant 0 : i32
    %c0_i32_0 = arith.constant 0 : i32
    %c0_i32_1 = arith.constant 0 : i32
    return %c0_i32, %c0_i32_0 : i32, i32
  }
  func.func @transform_5(%arg0: i32) -> (i32, i32, i32) {
    %c0_i32 = arith.constant 0 : i32
    %c0_i32_0 = arith.constant 0 : i32
    %c0_i32_1 = arith.constant 0 : i32
    %c0_i32_2 = arith.constant 0 : i32
    return %c0_i32, %c0_i32_0, %c0_i32_1 : i32, i32, i32
  }
  func.func @transform_6(%arg0: i32) -> (i32, i32) {
    %c0_i32 = arith.constant 0 : i32
    %c0_i32_0 = arith.constant 0 : i32
    %c0_i32_1 = arith.constant 0 : i32
    return %c0_i32, %c0_i32_0 : i32, i32
  }
  func.func @transform_7(%arg0: i32) -> (i32, i32, i32) {
    %c0_i32 = arith.constant 0 : i32
    %c0_i32_0 = arith.constant 0 : i32
    %c0_i32_1 = arith.constant 0 : i32
    %c0_i32_2 = arith.constant 0 : i32
    return %c0_i32, %c0_i32_0, %c0_i32_1 : i32, i32, i32
  }
  func.func @transform_8(%arg0: i32) -> (i32, i32) {
    %c0_i32 = arith.constant 0 : i32
    %c0_i32_0 = arith.constant 0 : i32
    %c0_i32_1 = arith.constant 0 : i32
    return %c0_i32, %c0_i32_0 : i32, i32
  }
  func.func @transform_9(%arg0: i32) -> (i32, i32, i32) {
    %c0_i32 = arith.constant 0 : i32
    %c0_i32_0 = arith.constant 0 : i32
    %c0_i32_1 = arith.constant 0 : i32
    %c0_i32_2 = arith.constant 0 : i32
    return %c0_i32, %c0_i32_0, %c0_i32_1 : i32, i32, i32
  }
  func.func @transform_10(%arg0: i32) -> (i32, i32) {
    %c0_i32 = arith.constant 0 : i32
    %c0_i32_0 = arith.constant 0 : i32
    %c0_i32_1 = arith.constant 0 : i32
    return %c0_i32, %c0_i32_0 : i32, i32
  }
  func.func @transform_11(%arg0: i32) -> (i32, i32, i32) {
    %c0_i32 = arith.constant 0 : i32
    %c0_i32_0 = arith.constant 0 : i32
    %c0_i32_1 = arith.constant 0 : i32
    %c0_i32_2 = arith.constant 0 : i32
    return %c0_i32, %c0_i32_0, %c0_i32_1 : i32, i32, i32
  }
  func.func @transform_12(%arg0: i32) -> (i32, i32) {
    %c0_i32 = arith.constant 0 : i32
    %c0_i32_0 = arith.constant 0 : i32
    %c0_i32_1 = arith.constant 0 : i32
    return %c0_i32, %c0_i32_0 : i32, i32
  }
  func.func @transform_13(%arg0: i32) -> (i32, i32, i32) {
    %c0_i32 = arith.constant 0 : i32
    %c0_i32_0 = arith.constant 0 : i32
    %c0_i32_1 = arith.constant 0 : i32
    return %arg0, %c0_i32, %c0_i32_0 : i32, i32, i32
  }
  func.func @transform_14(%arg0: i32) -> (i32, i32, i32) {
    %c0_i32 = arith.constant 0 : i32
    %c0_i32_0 = arith.constant 0 : i32
    %c0_i32_1 = arith.constant 0 : i32
    return %arg0, %c0_i32, %c0_i32_0 : i32, i32, i32
  }
}

</mosaic_0001>

<bundles_post_ra>
// kernel: tpu_custom_call.1
= control target key start
LH: loop header
LB: loop body
LE: loop exit
PB: predicated region body
PF: predicated region fallthrough
CT: control target
= control target key end

     0   :  { %20 = vsyncpa [#allocation3], 0  ;;  %s23639_s0 = inlined_call_operand.hbm [shape: bf16[2,16,512], index: 0, kind: input, shape index: {}]   ;;  %s23640_s1 = inlined_call_operand.hbm [shape: bf16[3,512,512], index: 1, kind: input, shape index: {}]   ;;  %s23641_s2 = inlined_call_operand.hbm [shape: f32[1,512], index: 2, kind: input, shape index: {}]   ;;  %s23642_s3 = inlined_call_operand.hbm [shape: bf16[3,512,512], index: 3, kind: input, shape index: {}]   ;;  %s23643_s4 = inlined_call_operand.hbm [shape: f32[1,512], index: 4, kind: input, shape index: {}]   ;;  %s23644_s5 = inlined_call_operand.hbm [shape: bf16[3,512,128], index: 5, kind: input, shape index: {}]   ;;  %s23645_s6 = inlined_call_operand.hbm [shape: f32[1,128], index: 6, kind: input, shape index: {}]   ;;  %s23646_s7 = inlined_call_operand.hbm [shape: bf16[3,512,512], index: 7, kind: input, shape index: {}]   ;;  %s23647_s8 = inlined_call_operand.hbm [shape: f32[1,512], index: 8, kind: input, shape index: {}]   ;;  %s23648_s9 = inlined_call_operand.hbm [shape: bf16[3,512,512], index: 9, kind: input, shape index: {}]   ;;  %s23649_s10 = inlined_call_operand.hbm [shape: f32[1,512], index: 10, kind: input, shape index: {}]   ;;  %s23650_s11 = inlined_call_operand.hbm [shape: bf16[3,512,128], index: 11, kind: input, shape index: {}]   ;;  %s23651_s12 = inlined_call_operand.hbm [shape: f32[1,128], index: 12, kind: input, shape index: {}]   ;;  %s23652_s13 = inlined_call_operand.hbm [shape: f32[2,16,128], index: 13, kind: output, shape index: {0}]   ;;  %s23653_s14 = inlined_call_operand.hbm [shape: f32[2,16,128], index: 14, kind: output, shape index: {1}]  }
   0x1   :  { %21 = vsyncpa [#allocation6], 0 }
   0x2   :  { %22 = vsyncpa [#allocation9], 0 }
   0x3   :  { %23 = vsyncpa [#allocation12], 0 }
   0x4   :  { %24 = vsyncpa [#allocation15], 0 }
   0x5   :  { %25 = vsyncpa [#allocation18], 0 }
   0x6   :  { %26 = vsyncpa [#allocation21], 0 }
   0x7   :  { %27 = vsyncpa [#allocation4], 0 }
   0x8   :  { %28 = vsyncpa [#allocation25], 0  ;;  %s21393_s29 = smov [#allocation5]   ;;  %s21394_s15 = smov [#allocation8]  }
   0x9   :  { %s46_s30 = sshll.u32 %s21393_s29, 4  ;;  %s68_s16 = sshll.u32 %s21394_s15, 4  ;;  %s47_s30 = int_to_ptr.vmem [resolvable:$true] %s46_s30  ;;  %s21490_s16 = int_to_ptr.vmem [resolvable:$true] %s68_s16 }
   0xa   :  { %s21045_s19 = scalar_lea.hbm %s23640_s1, 49152 }
   0xb   :  { %p21046_p0 = scmp.ne.s32.totalorder %s23640_s1, %s21045_s19  ;;  %p21049_p1 = scmp.lt.u32.totalorder %s21045_s19, %s23640_s1 }
   0xd   :  { %p21051_p2 = pnand %p21049_p1, %p21046_p0 }
   0xf   :  { %21054 = shalt.err (!%p21051_p2)
}
  0x10   :  { %s21055_s24 = scalar_lea.vmem %s47_s30, 49152  ;;  %p21060_p4 = scmp.lt.s32.totalorder %s47_s30, %s47_s30 }
  0x11   :  { %p21056_p3 = scmp.ne.s32.totalorder %s47_s30, %s21055_s24  ;;  %p21061_p5 = scmp.lt.s32.totalorder %s21055_s24, %s21055_s24 }
  0x13   :  { %p21062_p6 = por %p21061_p5, %p21060_p4 }
  0x15   :  { %p21063_p7 = pnand %p21062_p6, %p21056_p3 }
  0x17   :  { %21066 = shalt.err (!%p21063_p7)
}
  0x18   :  { %s21395_s25 = smov 256   ;;  %s21396_s26 = smov 16  }
  0x19   :  { %52 = dma.hbm_to_vmem [thread:$0]  %s23640_s1, 49152, %s47_s30, [#allocation6], %s21395_s25, %s21395_s25, %s21396_s26  }
  0x1a   :  { %s21067_s17 = scalar_lea.hbm %s23642_s3, 49152 }
  0x1b   :  { %p21068_p8 = scmp.ne.s32.totalorder %s23642_s3, %s21067_s17  ;;  %p21071_p9 = scmp.lt.u32.totalorder %s21067_s17, %s23642_s3 }
  0x1d   :  { %p21073_p10 = pnand %p21071_p9, %p21068_p8 }
  0x1f   :  { %21076 = shalt.err (!%p21073_p10)
}
  0x20   :  { %s21077_s22 = scalar_lea.vmem %s21490_s16, 49152  ;;  %p21082_p12 = scmp.lt.s32.totalorder %s21490_s16, %s21490_s16 }
  0x21   :  { %p21078_p11 = scmp.ne.s32.totalorder %s21490_s16, %s21077_s22  ;;  %p21083_p13 = scmp.lt.s32.totalorder %s21077_s22, %s21077_s22 }
  0x23   :  { %p21084_p0 = por %p21083_p13, %p21082_p12 }
  0x25   :  { %p21085_p1 = pnand %p21084_p0, %p21078_p11 }
  0x27   :  { %21088 = shalt.err (!%p21085_p1)
}
  0x28   :  { %74 = dma.hbm_to_vmem [thread:$0]  %s23642_s3, 49152, %s21490_s16, [#allocation9], %s21395_s25, %s21395_s25, %s21396_s26  }
  0x29   :  { %s21397_s23 = smov [#allocation11]   ;;  %s21089_s29 = scalar_lea.hbm %s23644_s5, 12288 }
  0x2a   :  { %s90_s24 = sshll.u32 %s21397_s23, 4  ;;  %p21090_p2 = scmp.ne.s32.totalorder %s23644_s5, %s21089_s29  ;;  %s91_s24 = int_to_ptr.vmem [resolvable:$true] %s90_s24 }
  0x2b   :  { %p21093_p3 = scmp.lt.u32.totalorder %s21089_s29, %s23644_s5 }
  0x2d   :  { %p21095_p4 = pnand %p21093_p3, %p21090_p2 }
  0x2f   :  { %21098 = shalt.err (!%p21095_p4)
}
  0x30   :  { %s21099_s20 = scalar_lea.vmem %s91_s24, 12288  ;;  %p21104_p6 = scmp.lt.s32.totalorder %s91_s24, %s91_s24 }
  0x31   :  { %p21100_p5 = scmp.ne.s32.totalorder %s91_s24, %s21099_s20  ;;  %p21105_p7 = scmp.lt.s32.totalorder %s21099_s20, %s21099_s20 }
  0x33   :  { %p21106_p8 = por %p21105_p7, %p21104_p6 }
  0x35   :  { %p21107_p9 = pnand %p21106_p8, %p21100_p5 }
  0x37   :  { %21110 = shalt.err (!%p21107_p9)
}
  0x38   :  { %s21398_s3 = smov 64   ;;  %s21399_s16 = smov 4  }
  0x39   :  { %96 = dma.hbm_to_vmem [thread:$0]  %s23644_s5, 12288, %s91_s24, [#allocation12], %s21398_s3, %s21398_s3, %s21399_s16  }
  0x3a   :  { %s21400_s1 = smov [#allocation14]   ;;  %s21401_s23 = smov [#allocation17]  }
  0x3b   :  { %s112_s30 = sshll.u32 %s21400_s1, 4  ;;  %s134_s27 = sshll.u32 %s21401_s23, 4  ;;  %s113_s30 = int_to_ptr.vmem [resolvable:$true] %s112_s30  ;;  %s135_s27 = int_to_ptr.vmem [resolvable:$true] %s134_s27 }
  0x3c   :  { %s21111_s15 = scalar_lea.hbm %s23646_s7, 49152 }
  0x3d   :  { %p21112_p10 = scmp.ne.s32.totalorder %s23646_s7, %s21111_s15  ;;  %p21115_p11 = scmp.lt.u32.totalorder %s21111_s15, %s23646_s7 }
  0x3f   :  { %p21117_p12 = pnand %p21115_p11, %p21112_p10 }
  0x41   :  { %21120 = shalt.err (!%p21117_p12)
}
  0x42   :  { %s21121_s5 = scalar_lea.vmem %s113_s30, 49152  ;;  %p21126_p0 = scmp.lt.s32.totalorder %s113_s30, %s113_s30 }
  0x43   :  { %p21122_p13 = scmp.ne.s32.totalorder %s113_s30, %s21121_s5  ;;  %p21127_p1 = scmp.lt.s32.totalorder %s21121_s5, %s21121_s5 }
  0x45   :  { %p21128_p2 = por %p21127_p1, %p21126_p0 }
  0x47   :  { %p21129_p3 = pnand %p21128_p2, %p21122_p13 }
  0x49   :  { %21132 = shalt.err (!%p21129_p3)
}
  0x4a   :  { %118 = dma.hbm_to_vmem [thread:$0]  %s23646_s7, 49152, %s113_s30, [#allocation15], %s21395_s25, %s21395_s25, %s21396_s26  }
  0x4b   :  { %s21133_s23 = scalar_lea.hbm %s23648_s9, 49152 }
  0x4c   :  { %p21134_p4 = scmp.ne.s32.totalorder %s23648_s9, %s21133_s23  ;;  %p21137_p5 = scmp.lt.u32.totalorder %s21133_s23, %s23648_s9 }
  0x4e   :  { %p21139_p6 = pnand %p21137_p5, %p21134_p4 }
  0x50   :  { %21142 = shalt.err (!%p21139_p6)
}
  0x51   :  { %s21143_s18 = scalar_lea.vmem %s135_s27, 49152  ;;  %p21148_p8 = scmp.lt.s32.totalorder %s135_s27, %s135_s27 }
  0x52   :  { %p21144_p7 = scmp.ne.s32.totalorder %s135_s27, %s21143_s18  ;;  %p21149_p9 = scmp.lt.s32.totalorder %s21143_s18, %s21143_s18 }
  0x54   :  { %p21150_p10 = por %p21149_p9, %p21148_p8 }
  0x56   :  { %p21151_p11 = pnand %p21150_p10, %p21144_p7 }
  0x58   :  { %21154 = shalt.err (!%p21151_p11)
}
  0x59   :  { %140 = dma.hbm_to_vmem [thread:$0]  %s23648_s9, 49152, %s135_s27, [#allocation18], %s21395_s25, %s21395_s25, %s21396_s26  }
  0x5a   :  { %s21402_s19 = smov [#allocation20]   ;;  %s21403_s5 = smov [#allocation2]  }
  0x5b   :  { %s156_s20 = sshll.u32 %s21402_s19, 4  ;;  %s34_s24 = sshll.u32 %s21403_s5, 4  ;;  %s157_s20 = int_to_ptr.vmem [resolvable:$true] %s156_s20  ;;  %s35_s24 = int_to_ptr.vmem [resolvable:$true] %s34_s24 }
  0x5c   :  { %s21155_s1 = scalar_lea.hbm %s23650_s11, 12288 }
  0x5d   :  { %p21156_p12 = scmp.ne.s32.totalorder %s23650_s11, %s21155_s1  ;;  %p21159_p13 = scmp.lt.u32.totalorder %s21155_s1, %s23650_s11 }
  0x5f   :  { %p21161_p0 = pnand %p21159_p13, %p21156_p12 }
  0x61   :  { %21164 = shalt.err (!%p21161_p0)
}
  0x62   :  { %s21165_s9 = scalar_lea.vmem %s157_s20, 12288  ;;  %p21170_p2 = scmp.lt.s32.totalorder %s157_s20, %s157_s20 }
  0x63   :  { %p21166_p1 = scmp.ne.s32.totalorder %s157_s20, %s21165_s9  ;;  %p21171_p3 = scmp.lt.s32.totalorder %s21165_s9, %s21165_s9 }
  0x65   :  { %p21172_p4 = por %p21171_p3, %p21170_p2 }
  0x67   :  { %p21173_p5 = pnand %p21172_p4, %p21166_p1 }
  0x69   :  { %21176 = shalt.err (!%p21173_p5)
}
  0x6a   :  { %162 = dma.hbm_to_vmem [thread:$0]  %s23650_s11, 12288, %s157_s20, [#allocation21], %s21398_s3, %s21398_s3, %s21399_s16  }
  0x6b   :  { %s21177_s30 = scalar_lea.hbm %s23639_s0, 1024 }
  0x6c   :  { %p21178_p6 = scmp.ne.s32.totalorder %s23639_s0, %s21177_s30  ;;  %p21181_p7 = scmp.lt.u32.totalorder %s21177_s30, %s23639_s0 }
  0x6e   :  { %p21183_p8 = pnand %p21181_p7, %p21178_p6 }
  0x70   :  { %21186 = shalt.err (!%p21183_p8)
}
  0x71   :  { %s21187_s1 = scalar_lea.vmem %s35_s24, 1024  ;;  %p21192_p10 = scmp.lt.s32.totalorder %s35_s24, %s35_s24 }
  0x72   :  { %p21188_p9 = scmp.ne.s32.totalorder %s35_s24, %s21187_s1  ;;  %p21193_p11 = scmp.lt.s32.totalorder %s21187_s1, %s21187_s1 }
  0x74   :  { %p21194_p12 = por %p21193_p11, %p21192_p10 }
  0x76   :  { %p21195_p13 = pnand %p21194_p12, %p21188_p9 }
  0x78   :  { %21198 = shalt.err (!%p21195_p13)
}
  0x79   :  { %40 = dma.hbm_to_vmem [thread:$0]  %s23639_s0, 1024, %s35_s24, [#allocation3], %s21395_s25, %s21395_s25, %s21396_s26  }
  0x7a   :  { %s21404_s16 = smov [#allocation7]   ;;  %s21405_s23 = smov [#allocation10]  }
  0x7b   :  { %s59_s20 = sshll.u32 %s21404_s16, 4  ;;  %s81_s28 = sshll.u32 %s21405_s23, 4  ;;  %s60_s20 = int_to_ptr.vmem [resolvable:$true] %s59_s20  ;;  %s82_s28 = int_to_ptr.vmem [resolvable:$true] %s81_s28 }
  0x7c   :  { %s21199_s9 = scalar_lea.hbm %s23641_s2, 64 }
  0x7d   :  { %p21200_p0 = scmp.ne.s32.totalorder %s23641_s2, %s21199_s9  ;;  %p21203_p1 = scmp.lt.u32.totalorder %s21199_s9, %s23641_s2 }
  0x7f   :  { %p21205_p2 = pnand %p21203_p1, %p21200_p0 }
  0x81   :  { %21208 = shalt.err (!%p21205_p2)
}
  0x82   :  { %s21209_s0 = scalar_lea.vmem %s60_s20, 64  ;;  %p21214_p4 = scmp.lt.s32.totalorder %s60_s20, %s60_s20 }
  0x83   :  { %p21210_p3 = scmp.ne.s32.totalorder %s60_s20, %s21209_s0  ;;  %p21215_p5 = scmp.lt.s32.totalorder %s21209_s0, %s21209_s0 }
  0x85   :  { %p21216_p6 = por %p21215_p5, %p21214_p4 }
  0x87   :  { %p21217_p7 = pnand %p21216_p6, %p21210_p3 }
  0x89   :  { %21220 = shalt.err (!%p21217_p7)
}
  0x8a   :  { %62 = dma.hbm_to_vmem [thread:$0]  %s23641_s2, 64, %s60_s20, [#allocation6]  }
  0x8b   :  { %s21221_s19 = scalar_lea.hbm %s23643_s4, 64 }
  0x8c   :  { %p21222_p8 = scmp.ne.s32.totalorder %s23643_s4, %s21221_s19  ;;  %p21225_p9 = scmp.lt.u32.totalorder %s21221_s19, %s23643_s4 }
  0x8e   :  { %p21227_p10 = pnand %p21225_p9, %p21222_p8 }
  0x90   :  { %21230 = shalt.err (!%p21227_p10)
}
  0x91   :  { %s21231_s11 = scalar_lea.vmem %s82_s28, 64  ;;  %p21236_p12 = scmp.lt.s32.totalorder %s82_s28, %s82_s28 }
  0x92   :  { %p21232_p11 = scmp.ne.s32.totalorder %s82_s28, %s21231_s11  ;;  %p21237_p13 = scmp.lt.s32.totalorder %s21231_s11, %s21231_s11 }
  0x94   :  { %p21238_p0 = por %p21237_p13, %p21236_p12 }
  0x96   :  { %p21239_p1 = pnand %p21238_p0, %p21232_p11 }
  0x98   :  { %21242 = shalt.err (!%p21239_p1)
}
  0x99   :  { %84 = dma.hbm_to_vmem [thread:$0]  %s23643_s4, 64, %s82_s28, [#allocation9]  }
  0x9a   :  { %s21406_s16 = smov [#allocation13]   ;;  %s21407_s23 = smov [#allocation16]  }
  0x9b   :  { %s103_s20 = sshll.u32 %s21406_s16, 4  ;;  %s125_s29 = sshll.u32 %s21407_s23, 4  ;;  %s104_s20 = int_to_ptr.vmem [resolvable:$true] %s103_s20  ;;  %s126_s29 = int_to_ptr.vmem [resolvable:$true] %s125_s29 }
  0x9c   :  { %s21243_s27 = scalar_lea.hbm %s23645_s6, 16 }
  0x9d   :  { %p21244_p2 = scmp.ne.s32.totalorder %s23645_s6, %s21243_s27  ;;  %p21247_p3 = scmp.lt.u32.totalorder %s21243_s27, %s23645_s6 }
  0x9f   :  { %p21249_p4 = pnand %p21247_p3, %p21244_p2 }
  0xa1   :  { %21252 = shalt.err (!%p21249_p4)
}
  0xa2   :  { %s21253_s4 = scalar_lea.vmem %s104_s20, 16  ;;  %s21257_s28 = scalar_lea.vmem %s104_s20, 32 }
  0xa3   :  { %p21254_p5 = scmp.ne.s32.totalorder %s104_s20, %s21253_s4  ;;  %p21258_p6 = scmp.lt.s32.totalorder %s104_s20, %s104_s20 }
  0xa4   :  { %p21259_p7 = scmp.lt.s32.totalorder %s21257_s28, %s21253_s4 }
  0xa6   :  { %p21260_p8 = por %p21259_p7, %p21258_p6 }
  0xa8   :  { %p21261_p9 = pnand %p21260_p8, %p21254_p5 }
  0xaa   :  { %21264 = shalt.err (!%p21261_p9)
}
  0xab   :  { %106 = dma.hbm_to_vmem [thread:$0]  %s23645_s6, 16, %s104_s20, [#allocation12]  }
  0xac   :  { %s21265_s19 = scalar_lea.hbm %s23647_s8, 64 }
  0xad   :  { %p21266_p10 = scmp.ne.s32.totalorder %s23647_s8, %s21265_s19  ;;  %p21269_p11 = scmp.lt.u32.totalorder %s21265_s19, %s23647_s8 }
  0xaf   :  { %p21271_p12 = pnand %p21269_p11, %p21266_p10 }
  0xb1   :  { %21274 = shalt.err (!%p21271_p12)
}
  0xb2   :  { %s21275_s11 = scalar_lea.vmem %s126_s29, 64  ;;  %p21280_p0 = scmp.lt.s32.totalorder %s126_s29, %s126_s29 }
  0xb3   :  { %p21276_p13 = scmp.ne.s32.totalorder %s126_s29, %s21275_s11  ;;  %p21281_p1 = scmp.lt.s32.totalorder %s21275_s11, %s21275_s11 }
  0xb5   :  { %p21282_p2 = por %p21281_p1, %p21280_p0 }
  0xb7   :  { %p21283_p3 = pnand %p21282_p2, %p21276_p13 }
  0xb9   :  { %21286 = shalt.err (!%p21283_p3)
}
  0xba   :  { %128 = dma.hbm_to_vmem [thread:$0]  %s23647_s8, 64, %s126_s29, [#allocation15]  }
  0xbb   :  { %s21408_s3 = smov [#allocation19]   ;;  %s21409_s20 = smov [#allocation22]  }
  0xbc   :  { %s147_s16 = sshll.u32 %s21408_s3, 4  ;;  %s169_s23 = sshll.u32 %s21409_s20, 4  ;;  %s148_s16 = int_to_ptr.vmem [resolvable:$true] %s147_s16  ;;  %s170_s23 = int_to_ptr.vmem [resolvable:$true] %s169_s23 }
  0xbd   :  { %s21287_s27 = scalar_lea.hbm %s23649_s10, 64 }
  0xbe   :  { %p21288_p4 = scmp.ne.s32.totalorder %s23649_s10, %s21287_s27  ;;  %p21291_p5 = scmp.lt.u32.totalorder %s21287_s27, %s23649_s10 }
  0xc0   :  { %p21293_p6 = pnand %p21291_p5, %p21288_p4 }
  0xc2   :  { %21296 = shalt.err (!%p21293_p6)
}
  0xc3   :  { %s21297_s8 = scalar_lea.vmem %s148_s16, 64  ;;  %p21302_p8 = scmp.lt.s32.totalorder %s148_s16, %s148_s16 }
  0xc4   :  { %p21298_p7 = scmp.ne.s32.totalorder %s148_s16, %s21297_s8  ;;  %p21303_p9 = scmp.lt.s32.totalorder %s21297_s8, %s21297_s8 }
  0xc6   :  { %p21304_p10 = por %p21303_p9, %p21302_p8 }
  0xc8   :  { %p21305_p11 = pnand %p21304_p10, %p21298_p7 }
  0xca   :  { %21308 = shalt.err (!%p21305_p11)
}
  0xcb   :  { %150 = dma.hbm_to_vmem [thread:$0]  %s23649_s10, 64, %s148_s16, [#allocation18]  }
  0xcc   :  { %s21309_s26 = scalar_lea.hbm %s23651_s12, 16 }
  0xcd   :  { %p21310_p12 = scmp.ne.s32.totalorder %s23651_s12, %s21309_s26  ;;  %p21313_p13 = scmp.lt.u32.totalorder %s21309_s26, %s23651_s12 }
  0xcf   :  { %p21315_p0 = pnand %p21313_p13, %p21310_p12 }
  0xd1   :  { %21318 = shalt.err (!%p21315_p0)
}
  0xd2   :  { %s21319_s21 = scalar_lea.vmem %s170_s23, 16  ;;  %s21323_s22 = scalar_lea.vmem %s170_s23, 32 }
  0xd3   :  { %p21320_p1 = scmp.ne.s32.totalorder %s170_s23, %s21319_s21  ;;  %p21324_p2 = scmp.lt.s32.totalorder %s170_s23, %s170_s23 }
  0xd4   :  { %p21325_p3 = scmp.lt.s32.totalorder %s21323_s22, %s21319_s21 }
  0xd6   :  { %p21326_p4 = por %p21325_p3, %p21324_p2 }
  0xd8   :  { %p21327_p5 = pnand %p21326_p4, %p21320_p1 }
  0xda   :  { %21330 = shalt.err (!%p21327_p5)
}
  0xdb   :  { %172 = dma.hbm_to_vmem [thread:$0]  %s23651_s12, 16, %s170_s23, [#allocation21]  }
  0xdc   :  { %21375 = dma.done.wait [#allocation3], 1024  }
  0xdd   :  { %21376 = vsyncadd [#allocation3], 4294966272 }
  0xde   :  { %21377 = dma.done.wait [#allocation6], 49216  }
  0xdf   :  { %21378 = vsyncadd [#allocation6], 4294918080 }
  0xe0   :  { %21379 = dma.done.wait [#allocation9], 49216  }
  0xe1   :  { %21380 = vsyncadd [#allocation9], 4294918080 }
  0xe2   :  { %21381 = dma.done.wait [#allocation12], 12304  }
  0xe3   :  { %21382 = vsyncadd [#allocation12], 4294954992 }
  0xe4   :  { %21383 = dma.done.wait [#allocation15], 49216  }
  0xe5   :  { %21384 = vsyncadd [#allocation15], 4294918080 }
  0xe6   :  { %21385 = dma.done.wait [#allocation18], 49216  }
  0xe7   :  { %21386 = vsyncadd [#allocation18], 4294918080 }
  0xe8   :  { %21387 = dma.done.wait [#allocation21], 12304  }
  0xe9   :  { %21388 = vsyncadd [#allocation21], 4294954992  ;;  %v18541_v0 = vld [vmem:[#allocation5 + $0x404] ss:$16 sps:$4 sm:$0xff]   ;;  %v18543_v1 = vld [vmem:[#allocation5 + $0x40c] ss:$16 sps:$4 sm:$0xff]  }
  0xea   :  { %1413 = vmatprep.subr.bf16.mxu0 %v18541_v0  ;;  %v18545_v2 = vld [vmem:[#allocation5 + $0x400] ss:$16 sps:$4 sm:$0xff]   ;;  %v18546_v3 = vld [vmem:[#allocation5 + $0x408] ss:$16 sps:$4 sm:$0xff]   ;;  %1519 = vmatprep.subr.bf16.mxu1 %v18543_v1  ;;  %v18547_v4 = vld [vmem:[#allocation5 + $0x424] ss:$16 sps:$4 sm:$0xff]  }
  0xeb   :  { %1414 = vmatpush1.bf16.msra.mxu0 %v18545_v2  ;;  %1520 = vmatpush1.bf16.msra.mxu1 %v18546_v3  ;;  %v18549_v5 = vld [vmem:[#allocation5 + $0x42c] ss:$16 sps:$4 sm:$0xff]   ;;  %v18551_v6 = vld [vmem:[#allocation5 + $0x420] ss:$16 sps:$4 sm:$0xff]   ;;  %v18552_v7 = vld [vmem:[#allocation5 + $0x428] ss:$16 sps:$4 sm:$0xff]  }
  0xec   :  { %1415 = vmatprep.subr.bf16.mxu0 %v18547_v4  ;;  %1521 = vmatprep.subr.bf16.mxu1 %v18549_v5  ;;  %v18553_v8 = vld [vmem:[#allocation5 + $0x444] ss:$16 sps:$4 sm:$0xff]   ;;  %v18555_v9 = vld [vmem:[#allocation5 + $0x44c] ss:$16 sps:$4 sm:$0xff]   ;;  %v18557_v10 = vld [vmem:[#allocation5 + $0x440] ss:$16 sps:$4 sm:$0xff]  }
  0xed   :  { %v18558_v11 = vld [vmem:[#allocation5 + $0x448] ss:$16 sps:$4 sm:$0xff]   ;;  %v18559_v12 = vld [vmem:[#allocation5 + $0x464] ss:$16 sps:$4 sm:$0xff]   ;;  %v18561_v13 = vld [vmem:[#allocation5 + $0x46c] ss:$16 sps:$4 sm:$0xff]  }
  0xee   :  { %v18563_v14 = vld [vmem:[#allocation5 + $0x460] ss:$16 sps:$4 sm:$0xff]   ;;  %v18564_v15 = vld [vmem:[#allocation5 + $0x468] ss:$16 sps:$4 sm:$0xff]   ;;  %v18565_v16 = vld [vmem:[#allocation5 + $0x484] ss:$16 sps:$4 sm:$0xff]  }
  0xef   :  { %1416 = vmatpush1.bf16.msra.mxu0 %v18551_v6  ;;  %1522 = vmatpush1.bf16.msra.mxu1 %v18552_v7  ;;  %v18567_v17 = vld [vmem:[#allocation5 + $0x48c] ss:$16 sps:$4 sm:$0xff]   ;;  %v18569_v18 = vld [vmem:[#allocation5 + $0x480] ss:$16 sps:$4 sm:$0xff]   ;;  %v18570_v19 = vld [vmem:[#allocation5 + $0x488] ss:$16 sps:$4 sm:$0xff]  }
  0xf0   :  { %1417 = vmatprep.subr.bf16.mxu0 %v18553_v8  ;;  %1523 = vmatprep.subr.bf16.mxu1 %v18555_v9  ;;  %v18571_v20 = vld [vmem:[#allocation5 + $0x4a4] ss:$16 sps:$4 sm:$0xff]   ;;  %v18573_v21 = vld [vmem:[#allocation5 + $0x4ac] ss:$16 sps:$4 sm:$0xff]   ;;  %v18575_v22 = vld [vmem:[#allocation5 + $0x4a0] ss:$16 sps:$4 sm:$0xff]  }
  0xf1   :  { %v18576_v23 = vld [vmem:[#allocation5 + $0x4a8] ss:$16 sps:$4 sm:$0xff]   ;;  %v18577_v24 = vld [vmem:[#allocation5 + $0x4c4] ss:$16 sps:$4 sm:$0xff]   ;;  %v18579_v25 = vld [vmem:[#allocation5 + $0x4cc] ss:$16 sps:$4 sm:$0xff]  }
  0xf2   :  { %v18581_v26 = vld [vmem:[#allocation5 + $0x4c0] ss:$16 sps:$4 sm:$0xff]   ;;  %v18582_v27 = vld [vmem:[#allocation5 + $0x4c8] ss:$16 sps:$4 sm:$0xff]   ;;  %v18583_v28 = vld [vmem:[#allocation5 + $0x4e4] ss:$16 sps:$4 sm:$0xff]  }
  0xf3   :  { %1418 = vmatpush1.bf16.msra.mxu0 %v18557_v10  ;;  %1524 = vmatpush1.bf16.msra.mxu1 %v18558_v11  ;;  %v18585_v29 = vld [vmem:[#allocation5 + $0x4ec] ss:$16 sps:$4 sm:$0xff]   ;;  %v18587_v30 = vld [vmem:[#allocation5 + $0x4e0] ss:$16 sps:$4 sm:$0xff]   ;;  %v18588_v31 = vld [vmem:[#allocation5 + $0x4e8] ss:$16 sps:$4 sm:$0xff]  }
  0xf4   :  { %1419 = vmatprep.subr.bf16.mxu0 %v18559_v12  ;;  %1525 = vmatprep.subr.bf16.mxu1 %v18561_v13  ;;  %v18589_v32 = vld [vmem:[#allocation5 + $0x504] ss:$16 sps:$4 sm:$0xff]   ;;  %v18591_v33 = vld [vmem:[#allocation5 + $0x50c] ss:$16 sps:$4 sm:$0xff]   ;;  %v18593_v34 = vld [vmem:[#allocation5 + $0x500] ss:$16 sps:$4 sm:$0xff]  }
  0xf5   :  { %v18594_v35 = vld [vmem:[#allocation5 + $0x508] ss:$16 sps:$4 sm:$0xff]   ;;  %v18595_v36 = vld [vmem:[#allocation5 + $0x524] ss:$16 sps:$4 sm:$0xff]   ;;  %v18597_v37 = vld [vmem:[#allocation5 + $0x52c] ss:$16 sps:$4 sm:$0xff]  }
  0xf6   :  { %v18599_v38 = vld [vmem:[#allocation5 + $0x520] ss:$16 sps:$4 sm:$0xff]   ;;  %v18600_v39 = vld [vmem:[#allocation5 + $0x528] ss:$16 sps:$4 sm:$0xff]   ;;  %v18601_v40 = vld [vmem:[#allocation5 + $0x544] ss:$16 sps:$4 sm:$0xff]  }
  0xf7   :  { %1420 = vmatpush1.bf16.msra.mxu0 %v18563_v14  ;;  %1526 = vmatpush1.bf16.msra.mxu1 %v18564_v15  ;;  %v18603_v41 = vld [vmem:[#allocation5 + $0x54c] ss:$16 sps:$4 sm:$0xff]   ;;  %v18605_v42 = vld [vmem:[#allocation5 + $0x540] ss:$16 sps:$4 sm:$0xff]   ;;  %v18606_v43 = vld [vmem:[#allocation5 + $0x548] ss:$16 sps:$4 sm:$0xff]  }
  0xf8   :  { %1421 = vmatprep.subr.bf16.mxu0 %v18565_v16  ;;  %1527 = vmatprep.subr.bf16.mxu1 %v18567_v17  ;;  %v18607_v44 = vld [vmem:[#allocation5 + $0x564] ss:$16 sps:$4 sm:$0xff]   ;;  %v18609_v45 = vld [vmem:[#allocation5 + $0x56c] ss:$16 sps:$4 sm:$0xff]   ;;  %v18611_v46 = vld [vmem:[#allocation5 + $0x560] ss:$16 sps:$4 sm:$0xff]  }
  0xf9   :  { %v21674_v47 = vld [vmem:[#allocation2] sm:$0xff]  ;;  %v21676_v48 = vld [vmem:[#allocation2 + $0x10] sm:$0xff]  ;;  %v18612_v49 = vld [vmem:[#allocation5 + $0x568] ss:$16 sps:$4 sm:$0xff]   ;;  %vm318_vm0 = vcmask 1040384   ;;  %vm21410_vm2 = vmmov 1  }
  0xfa   :  { %v18613_v50 = vld [vmem:[#allocation5 + $0x584] ss:$16 sps:$4 sm:$0xff]   ;;  %v21680_v51 = vcombine.high %v21674_v47, %v21676_v48  ;;  %v18615_v52 = vld [vmem:[#allocation5 + $0x58c] ss:$16 sps:$4 sm:$0xff]   ;;  %v18617_v53 = vld [vmem:[#allocation5 + $0x580] ss:$16 sps:$4 sm:$0xff]   ;;  %v274_v1 = vunpack.c.l.bf16 %v21674_v47  ;;  %v278_v2 = vunpack.c.l.bf16 %v21676_v48  ;;  %v21696_v9 = vcombine.low %v21674_v47, %v21676_v48 }
  0xfb   :  { %1422 = vmatpush1.bf16.msra.mxu0 %v18569_v18  ;;  %1528 = vmatpush1.bf16.msra.mxu1 %v18570_v19  ;;  %v18618_v54 = vld [vmem:[#allocation5 + $0x588] ss:$16 sps:$4 sm:$0xff]   ;;  %v18619_v55 = vld [vmem:[#allocation5 + $0x5a4] ss:$16 sps:$4 sm:$0xff]   ;;  %v18621_v56 = vld [vmem:[#allocation5 + $0x5ac] ss:$16 sps:$4 sm:$0xff]  }
  0xfc   :  { %1423 = vmatprep.subr.bf16.mxu0 %v18571_v20  ;;  %1529 = vmatprep.subr.bf16.mxu1 %v18573_v21  ;;  %v18623_v57 = vld [vmem:[#allocation5 + $0x5a0] ss:$16 sps:$4 sm:$0xff]   ;;  %v18624_v58 = vld [vmem:[#allocation5 + $0x5a8] ss:$16 sps:$4 sm:$0xff]   ;;  %v18625_v59 = vld [vmem:[#allocation5 + $0x5c4] ss:$16 sps:$4 sm:$0xff]  }
  0xfd   :  { %1445 = vmatprep.mubr.bf16.mxu0 %v21680_v51  ;;  %1551 = vmatprep.mubr.bf16.mxu1 %v21680_v51  ;;  %v18627_v60 = vld [vmem:[#allocation5 + $0x5cc] ss:$16 sps:$4 sm:$0xff]   ;;  %v18629_v61 = vld [vmem:[#allocation5 + $0x5c0] ss:$16 sps:$4 sm:$0xff]   ;;  %v18630_v62 = vld [vmem:[#allocation5 + $0x5c8] ss:$16 sps:$4 sm:$0xff]  }
  0xfe   :  { %v18631_v63 = vld [vmem:[#allocation5 + $0x5e4] ss:$16 sps:$4 sm:$0xff]   ;;  %v18633_v0 = vld [vmem:[#allocation5 + $0x5ec] ss:$16 sps:$4 sm:$0xff]   ;;  %v18635_v3 = vld [vmem:[#allocation5 + $0x5e0] ss:$16 sps:$4 sm:$0xff]  }
  0xff   :  { %1424 = vmatpush1.bf16.msra.mxu0 %v18575_v22  ;;  %1530 = vmatpush1.bf16.msra.mxu1 %v18576_v23  ;;  %v18636_v4 = vld [vmem:[#allocation5 + $0x5e8] ss:$16 sps:$4 sm:$0xff]   ;;  %v18640_v5 = vld [vmem:[#allocation5 + $0x604] ss:$16 sps:$4 sm:$0xff]   ;;  %v21688_v6 = vrot.slane %v274_v1, 7  ;;  %v21692_v7 = vrot.slane %v278_v2, 7 }
 0x100   :  { %1425 = vmatprep.subr.bf16.mxu0 %v18577_v24  ;;  %1531 = vmatprep.subr.bf16.mxu1 %v18579_v25  ;;  %v18643_v8 = vld [vmem:[#allocation5 + $0x60c] ss:$16 sps:$4 sm:$0xff]   ;;  %v18638_v10 = vld [vmem:[#allocation5 + $0x600] ss:$16 sps:$4 sm:$0xff]   ;;  %v18641_v11 = vld [vmem:[#allocation5 + $0x608] ss:$16 sps:$4 sm:$0xff]  }
 0x101   :  { %v18647_v12 = vld [vmem:[#allocation5 + $0x624] ss:$16 sps:$4 sm:$0xff]   ;;  %v18650_v13 = vld [vmem:[#allocation5 + $0x62c] ss:$16 sps:$4 sm:$0xff]   ;;  %v324_v14 = vsel %vm318_vm0, %v21688_v6, %v21692_v7  ;;  %v18645_v15 = vld [vmem:[#allocation5 + $0x620] ss:$16 sps:$4 sm:$0xff]  }
 0x102   :  { %v18648_v16 = vld [vmem:[#allocation5 + $0x628] ss:$16 sps:$4 sm:$0xff]   ;;  %v18653_v17 = vld [vmem:[#allocation5 + $0x644] ss:$16 sps:$4 sm:$0xff]   ;;  %v18656_v18 = vld [vmem:[#allocation5 + $0x64c] ss:$16 sps:$4 sm:$0xff]  }
 0x103   :  { %1426 = vmatpush1.bf16.msra.mxu0 %v18581_v26  ;;  %1532 = vmatpush1.bf16.msra.mxu1 %v18582_v27  ;;  %v18651_v19 = vld [vmem:[#allocation5 + $0x640] ss:$16 sps:$4 sm:$0xff]   ;;  %v18654_v20 = vld [vmem:[#allocation5 + $0x648] ss:$16 sps:$4 sm:$0xff]   ;;  %v18659_v21 = vld [vmem:[#allocation5 + $0x664] ss:$16 sps:$4 sm:$0xff]  }
 0x104   :  { %1427 = vmatprep.subr.bf16.mxu0 %v18583_v28  ;;  %1533 = vmatprep.subr.bf16.mxu1 %v18585_v29  ;;  %v18662_v22 = vld [vmem:[#allocation5 + $0x66c] ss:$16 sps:$4 sm:$0xff]   ;;  %v18657_v23 = vld [vmem:[#allocation5 + $0x660] ss:$16 sps:$4 sm:$0xff]   ;;  %v18660_v24 = vld [vmem:[#allocation5 + $0x668] ss:$16 sps:$4 sm:$0xff]  }
 0x105   :  { %v18665_v25 = vld [vmem:[#allocation5 + $0x684] ss:$16 sps:$4 sm:$0xff]   ;;  %v18668_v26 = vld [vmem:[#allocation5 + $0x68c] ss:$16 sps:$4 sm:$0xff]   ;;  %v18663_v27 = vld [vmem:[#allocation5 + $0x680] ss:$16 sps:$4 sm:$0xff]  }
 0x106   :  { %v18666_v28 = vld [vmem:[#allocation5 + $0x688] ss:$16 sps:$4 sm:$0xff]   ;;  %v18671_v29 = vld [vmem:[#allocation5 + $0x6a4] ss:$16 sps:$4 sm:$0xff]   ;;  %vm391_vm4 = vcmask 1046528   ;;  %s21411_s12 = smov [#allocation23]  }
 0x107   :  { %1428 = vmatpush1.bf16.msra.mxu0 %v18587_v30  ;;  %1534 = vmatpush1.bf16.msra.mxu1 %v18588_v31  ;;  %v18674_v30 = vld [vmem:[#allocation5 + $0x6ac] ss:$16 sps:$4 sm:$0xff]   ;;  %v21703_v31 = vld [vmem:[#allocation2 + $0x20] sm:$0xff]  ;;  %s15447_s11 = sshll.u32 %s21411_s12, 4  ;;  %s15448_s11 = int_to_ptr.vmem [resolvable:$true] %s15447_s11 }
 0x108   :  { %1429 = vmatprep.subr.bf16.mxu0 %v18589_v32  ;;  %1535 = vmatprep.subr.bf16.mxu1 %v18591_v33  ;;  %v21705_v32 = vld [vmem:[#allocation2 + $0x30] sm:$0xff]  ;;  %s21331_s6 = scalar_lea.vmem %s15448_s11, 512  ;;  %p21336_p7 = scmp.lt.s32.totalorder %s15448_s11, %s15448_s11 }
 0x109   :  { %v286_v33 = vunpack.c.l.bf16 %v21705_v32  ;;  %p21332_p6 = scmp.ne.s32.totalorder %s15448_s11, %s21331_s6  ;;  %p21337_p8 = scmp.lt.s32.totalorder %s21331_s6, %s21331_s6 }
 0x10b   :  { %1430 = vmatpush1.bf16.msra.mxu0 %v18593_v34  ;;  %1536 = vmatpush1.bf16.msra.mxu1 %v18594_v35  ;;  %v21710_v34 = vcombine.high %v21703_v31, %v21705_v32  ;;  %v18669_v35 = vld [vmem:[#allocation5 + $0x6a0] ss:$16 sps:$4 sm:$0xff]   ;;  %p21338_p9 = por %p21337_p8, %p21336_p7 }
 0x10c   :  { %1431 = vmatprep.subr.bf16.mxu0 %v18595_v36  ;;  %1537 = vmatprep.subr.bf16.mxu1 %v18597_v37  ;;  %v18672_v36 = vld [vmem:[#allocation5 + $0x6a8] ss:$16 sps:$4 sm:$0xff]   ;;  %v21714_v37 = vcombine.low %v21703_v31, %v21705_v32 }
 0x10d   :  { %p21339_p10 = pnand %p21338_p9, %p21332_p6 }
 0x10f   :  { %1432 = vmatpush1.bf16.msra.mxu0 %v18599_v38  ;;  %1538 = vmatpush1.bf16.msra.mxu1 %v18600_v39  ;;  %v18677_v38 = vld [vmem:[#allocation5 + $0x6c4] ss:$16 sps:$4 sm:$0xff]   ;;  %v21718_v39 = vrot.slane %v286_v33, 7 }
 0x110   :  { %1433 = vmatprep.subr.bf16.mxu0 %v18601_v40  ;;  %1539 = vmatprep.subr.bf16.mxu1 %v18603_v41  ;;  %v18680_v40 = vld [vmem:[#allocation5 + $0x6cc] ss:$16 sps:$4 sm:$0xff]   ;;  %v18675_v41 = vld [vmem:[#allocation5 + $0x6c0] ss:$16 sps:$4 sm:$0xff]  }
 0x113   :  { %1434 = vmatpush1.bf16.msra.mxu0 %v18605_v42  ;;  %1540 = vmatpush1.bf16.msra.mxu1 %v18606_v43  ;;  %v21722_v42 = vld [vmem:[#allocation2 + $0x8] sm:$0xff]  ;;  %v359_v43 = vsel %vm318_vm0, %v21718_v39, %v21688_v6 }
 0x114   :  { %1435 = vmatprep.subr.bf16.mxu0 %v18607_v44  ;;  %1541 = vmatprep.subr.bf16.mxu1 %v18609_v45  ;;  %v21729_v44 = vld [vmem:[#allocation2 + $0x18] sm:$0xff]  ;;  %v21731_v45 = vpack.c.bf16 %v324_v14, %v359_v43  ;;  %v213_v43 = vlaneseq }
 0x115   :  { %v18710_v6 = vld [vmem:[#allocation5 + $0x76c] ss:$16 sps:$4 sm:$0xff]   ;;  %v18714_v14 = vld [vmem:[#allocation5 + $0x788] ss:$16 sps:$4 sm:$0xff]  }
 0x116   :  { %23712 = vst [vmem:[#allocation35_spill] sm:$0xff] %v21731_v45 }
 0x117   :  { %1436 = vmatpush1.bf16.msra.mxu0 %v18611_v46  ;;  %1542 = vmatpush1.bf16.msra.mxu1 %v18612_v49  ;;  %v18678_v46 = vld [vmem:[#allocation5 + $0x6c8] ss:$16 sps:$4 sm:$0xff]   ;;  %v18683_v49 = vld [vmem:[#allocation5 + $0x6e4] ss:$16 sps:$4 sm:$0xff]  }
 0x118   :  { %1437 = vmatprep.subr.bf16.mxu0 %v18613_v50  ;;  %1543 = vmatprep.subr.bf16.mxu1 %v18615_v52  ;;  %v21735_v50 = vcombine.high %v21722_v42, %v21729_v44  ;;  %v18686_v52 = vld [vmem:[#allocation5 + $0x6ec] ss:$16 sps:$4 sm:$0xff]  }
 0x11b   :  { %1438 = vmatpush1.bf16.msra.mxu0 %v18617_v53  ;;  %1544 = vmatpush1.bf16.msra.mxu1 %v18618_v54  ;;  %v18681_v53 = vld [vmem:[#allocation5 + $0x6e0] ss:$16 sps:$4 sm:$0xff]   ;;  %v18684_v54 = vld [vmem:[#allocation5 + $0x6e8] ss:$16 sps:$4 sm:$0xff]  }
 0x11c   :  { %1439 = vmatprep.subr.bf16.mxu0 %v18619_v55  ;;  %1545 = vmatprep.subr.bf16.mxu1 %v18621_v56  ;;  %v18689_v55 = vld [vmem:[#allocation5 + $0x704] ss:$16 sps:$4 sm:$0xff]   ;;  %v18692_v56 = vld [vmem:[#allocation5 + $0x70c] ss:$16 sps:$4 sm:$0xff]  }
 0x11f   :  { %1440 = vmatpush1.bf16.msra.mxu0 %v18623_v57  ;;  %1546 = vmatpush1.bf16.msra.mxu1 %v18624_v58  ;;  %v18687_v57 = vld [vmem:[#allocation5 + $0x700] ss:$16 sps:$4 sm:$0xff]   ;;  %v18690_v58 = vld [vmem:[#allocation5 + $0x708] ss:$16 sps:$4 sm:$0xff]  }
 0x120   :  { %1441 = vmatprep.subr.bf16.mxu0 %v18625_v59  ;;  %1547 = vmatprep.subr.bf16.mxu1 %v18627_v60  ;;  %v18695_v59 = vld [vmem:[#allocation5 + $0x724] ss:$16 sps:$4 sm:$0xff]   ;;  %v18698_v60 = vld [vmem:[#allocation5 + $0x72c] ss:$16 sps:$4 sm:$0xff]  }
 0x123   :  { %1442 = vmatpush1.bf16.msra.mxu0 %v18629_v61  ;;  %1548 = vmatpush1.bf16.msra.mxu1 %v18630_v62  ;;  %v18693_v61 = vld [vmem:[#allocation5 + $0x720] ss:$16 sps:$4 sm:$0xff]   ;;  %v18696_v62 = vld [vmem:[#allocation5 + $0x728] ss:$16 sps:$4 sm:$0xff]  }
 0x124   :  { %1443 = vmatprep.subr.bf16.mxu0 %v18631_v63  ;;  %1549 = vmatprep.subr.bf16.mxu1 %v18633_v0  ;;  %v18701_v63 = vld [vmem:[#allocation5 + $0x744] ss:$16 sps:$4 sm:$0xff]   ;;  %v18704_v0 = vld [vmem:[#allocation5 + $0x74c] ss:$16 sps:$4 sm:$0xff]  }
 0x127   :  { %1444 = vmatpush1.bf16.msra.mxu0 %v18635_v3  ;;  %1550 = vmatpush1.bf16.msra.mxu1 %v18636_v4  ;;  %v18699_v3 = vld [vmem:[#allocation5 + $0x740] ss:$16 sps:$4 sm:$0xff]   ;;  %v18702_v4 = vld [vmem:[#allocation5 + $0x748] ss:$16 sps:$4 sm:$0xff]  }
 0x128   :  { %1466 = vmatprep.subr.bf16.mxu0 %v18640_v5  ;;  %1572 = vmatprep.subr.bf16.mxu1 %v18643_v8  ;;  %v18707_v5 = vld [vmem:[#allocation5 + $0x764] ss:$16 sps:$4 sm:$0xff]   ;;  %v18705_v8 = vld [vmem:[#allocation5 + $0x760] ss:$16 sps:$4 sm:$0xff]  }
 0x12a   :  { %1446 = vmatmul.mubr.bf16.vlgmr.msra.gmra.mrb[0].mxu0 %v21696_v9  ;;  %1552 = vmatmul.mubr.bf16.vlgmr.msra.gmra.mrb[0].mxu1 %v21696_v9 }
 0x12b   :  { %1467 = vmatpush1.bf16.msra.mxu0 %v18638_v10  ;;  %1573 = vmatpush1.bf16.msra.mxu1 %v18641_v11  ;;  %v18708_v10 = vld [vmem:[#allocation5 + $0x768] ss:$16 sps:$4 sm:$0xff]   ;;  %v18713_v11 = vld [vmem:[#allocation5 + $0x784] ss:$16 sps:$4 sm:$0xff]  }
 0x12c   :  { %1468 = vmatprep.subr.bf16.mxu0 %v18647_v12  ;;  %1574 = vmatprep.subr.bf16.mxu1 %v18650_v13  ;;  %v18716_v12 = vld [vmem:[#allocation5 + $0x78c] ss:$16 sps:$4 sm:$0xff]   ;;  %v18711_v13 = vld [vmem:[#allocation5 + $0x780] ss:$16 sps:$4 sm:$0xff]  }
 0x12d   :  { %1455 = vmatprep.mubr.bf16.mxu0 %v21710_v34  ;;  %1561 = vmatprep.mubr.bf16.mxu1 %v21710_v34 }
 0x12f   :  { %1469 = vmatpush1.bf16.msra.mxu0 %v18645_v15  ;;  %1575 = vmatpush1.bf16.msra.mxu1 %v18648_v16  ;;  %v18719_v15 = vld [vmem:[#allocation5 + $0x7a4] ss:$16 sps:$4 sm:$0xff]   ;;  %v18722_v16 = vld [vmem:[#allocation5 + $0x7ac] ss:$16 sps:$4 sm:$0xff]  }
 0x130   :  { %1470 = vmatprep.subr.bf16.mxu0 %v18653_v17  ;;  %1576 = vmatprep.subr.bf16.mxu1 %v18656_v18  ;;  %v18717_v17 = vld [vmem:[#allocation5 + $0x7a0] ss:$16 sps:$4 sm:$0xff]   ;;  %v18720_v18 = vld [vmem:[#allocation5 + $0x7a8] ss:$16 sps:$4 sm:$0xff]  }
 0x132   :  { %1456 = vmatmul.mubr.bf16.gmra.mrb[4].mxu0 %v21714_v37  ;;  %1562 = vmatmul.mubr.bf16.gmra.mrb[4].mxu1 %v21714_v37 }
 0x133   :  { %1471 = vmatpush1.bf16.msra.mxu0 %v18651_v19  ;;  %1577 = vmatpush1.bf16.msra.mxu1 %v18654_v20  ;;  %v18726_v19 = vld [vmem:[#allocation5 + $0x7c4] ss:$16 sps:$4 sm:$0xff]   ;;  %v18729_v20 = vld [vmem:[#allocation5 + $0x7cc] ss:$16 sps:$4 sm:$0xff]  }
 0x134   :  { %1472 = vmatprep.subr.bf16.mxu0 %v18659_v21  ;;  %1578 = vmatprep.subr.bf16.mxu1 %v18662_v22  ;;  %v282_v21 = vunpack.c.l.bf16 %v21703_v31 }
 0x135   :  { %1498 = vmatprep.mubr.bf16.mxu0 %v21735_v50  ;;  %1604 = vmatprep.mubr.bf16.mxu1 %v21735_v50 }
 0x136   :  { %v331_v22 = vrot.slane %v282_v21, 7 }
 0x137   :  { %1473 = vmatpush1.bf16.msra.mxu0 %v18657_v23  ;;  %1579 = vmatpush1.bf16.msra.mxu1 %v18660_v24  ;;  %v18724_v23 = vld [vmem:[#allocation5 + $0x7c0] ss:$16 sps:$4 sm:$0xff]   ;;  %v18727_v24 = vld [vmem:[#allocation5 + $0x7c8] ss:$16 sps:$4 sm:$0xff]  }
 0x138   :  { %1474 = vmatprep.subr.bf16.mxu0 %v18665_v25  ;;  %1580 = vmatprep.subr.bf16.mxu1 %v18668_v26  ;;  %v18733_v25 = vld [vmem:[#allocation5 + $0x7e4] ss:$16 sps:$4 sm:$0xff]   ;;  %v18736_v26 = vld [vmem:[#allocation5 + $0x7ec] ss:$16 sps:$4 sm:$0xff]  }
 0x13b   :  { %1475 = vmatpush1.bf16.msra.mxu0 %v18663_v27  ;;  %1581 = vmatpush1.bf16.msra.mxu1 %v18666_v28  ;;  %v276_v27 = vunpack.c.l.bf16 %v21722_v42  ;;  %v280_v28 = vunpack.c.l.bf16 %v21729_v44 }
 0x13c   :  { %1476 = vmatprep.subr.bf16.mxu0 %v18671_v29  ;;  %1582 = vmatprep.subr.bf16.mxu1 %v18674_v30  ;;  %v332_v29 = vsel %vm318_vm0, %v21692_v7, %v331_v22  ;;  %v339_v30 = vsel %vm318_vm0, %v331_v22, %v21718_v39  ;;  %v18738_v39 = vld [vmem:[#allocation5] ss:$16 sps:$4 sm:$0xff]   ;;  %v18762_v22 = vld [vmem:[#allocation5 + $0x6c] ss:$16 sps:$4 sm:$0xff]  }
 0x13d   :  { %v21754_v7 = vrot.slane %v280_v28, 7 }
 0x13f   :  { %1477 = vmatpush1.bf16.msra.mxu0 %v18669_v35  ;;  %1583 = vmatpush1.bf16.msra.mxu1 %v18672_v36  ;;  %v21748_v35 = vpack.c.bf16 %v339_v30, %v332_v29  ;;  %v18731_v36 = vld [vmem:[#allocation5 + $0x7e0] ss:$16 sps:$4 sm:$0xff]   ;;  %v18765_v29 = vld [vmem:[#allocation5 + $0x84] ss:$16 sps:$4 sm:$0xff]   ;;  %v18768_v30 = vld [vmem:[#allocation5 + $0x8c] ss:$16 sps:$4 sm:$0xff]  }
 0x140   :  { %1478 = vmatprep.subr.bf16.mxu0 %v18677_v38  ;;  %1584 = vmatprep.subr.bf16.mxu1 %v18680_v40  ;;  %v18734_v38 = vld [vmem:[#allocation5 + $0x7e8] ss:$16 sps:$4 sm:$0xff]   ;;  %v18740_v40 = vld [vmem:[#allocation5 + $0x4] ss:$16 sps:$4 sm:$0xff]  }
 0x141   :  { %23713 = vst [vmem:[#allocation36_spill] sm:$0xff] %v21748_v35 }
 0x143   :  { %1479 = vmatpush1.bf16.msra.mxu0 %v18675_v41  ;;  %1585 = vmatpush1.bf16.msra.mxu1 %v18678_v46  ;;  %v18743_v41 = vld [vmem:[#allocation5 + $0xc] ss:$16 sps:$4 sm:$0xff]   ;;  %v321_v46 = vrot.slane %v276_v27, 7 }
 0x144   :  { %1480 = vmatprep.subr.bf16.mxu0 %v18683_v49  ;;  %1586 = vmatprep.subr.bf16.mxu1 %v18686_v52  ;;  %v21756_v49 = vld [vmem:[#allocation2 + $0x38] sm:$0xff] }
 0x145   :  { %v288_v52 = vunpack.c.l.bf16 %v21756_v49 }
 0x147   :  { %1481 = vmatpush1.bf16.msra.mxu0 %v18681_v53  ;;  %1587 = vmatpush1.bf16.msra.mxu1 %v18684_v54  ;;  %v275_v53 = vunpack.c.h.bf16 %v21674_v47  ;;  %v18741_v54 = vld [vmem:[#allocation5 + $0x8] ss:$16 sps:$4 sm:$0xff]  }
 0x148   :  { %1482 = vmatprep.subr.bf16.mxu0 %v18689_v55  ;;  %1588 = vmatprep.subr.bf16.mxu1 %v18692_v56  ;;  %v21762_v55 = vcombine.low %v21722_v42, %v21729_v44  ;;  %v21764_v56 = vld [vmem:[#allocation2 + $0x28] sm:$0xff] }
 0x14b   :  { %1483 = vmatpush1.bf16.msra.mxu0 %v18687_v57  ;;  %1589 = vmatpush1.bf16.msra.mxu1 %v18690_v58  ;;  %v279_v57 = vunpack.c.h.bf16 %v21676_v48  ;;  %v287_v58 = vunpack.c.h.bf16 %v21705_v32 }
 0x14c   :  { %1484 = vmatprep.subr.bf16.mxu0 %v18695_v59  ;;  %1590 = vmatprep.subr.bf16.mxu1 %v18698_v60  ;;  %v18747_v59 = vld [vmem:[#allocation5 + $0x24] ss:$16 sps:$4 sm:$0xff]   ;;  %v21770_v60 = vrot.slane %v288_v52, 7 }
 0x14f   :  { %1485 = vmatpush1.bf16.msra.mxu0 %v18693_v61  ;;  %1591 = vmatpush1.bf16.msra.mxu1 %v18696_v62  ;;  %v21772_v61 = vshrl.u32 %v213_v43, 7  ;;  %v18750_v62 = vld [vmem:[#allocation5 + $0x2c] ss:$16 sps:$4 sm:$0xff]   ;;  %v18769_v43 = vld [vmem:[#allocation5 + $0xa0] ss:$16 sps:$4 sm:$0xff]  }
 0x150   :  { %1486 = vmatprep.subr.bf16.mxu0 %v18701_v63  ;;  %1592 = vmatprep.subr.bf16.mxu1 %v18704_v0  ;;  %v328_v63 = vsel %vm318_vm0, %v321_v46, %v21754_v7  ;;  %v21778_v0 = vcombine.high %v21764_v56, %v21756_v49 }
 0x153   :  { %1487 = vmatpush1.bf16.msra.mxu0 %v18699_v3  ;;  %1593 = vmatpush1.bf16.msra.mxu1 %v18702_v4  ;;  %v320_v3 = vrot.slane %v275_v53, 7  ;;  %v361_v4 = vsel %vm318_vm0, %v21770_v60, %v321_v46  ;;  %v18772_v46 = vld [vmem:[#allocation5 + $0xa8] ss:$16 sps:$4 sm:$0xff]  }
 0x154   :  { %1488 = vmatprep.subr.bf16.mxu0 %v18707_v5  ;;  %1594 = vmatprep.subr.bf16.mxu1 %v18710_v6  ;;  %v18745_v5 = vld [vmem:[#allocation5 + $0x20] ss:$16 sps:$4 sm:$0xff]   ;;  %v21788_v6 = vrot.slane %v287_v58, 7 }
 0x157   :  { %1489 = vmatpush1.bf16.msra.mxu0 %v18705_v8  ;;  %1595 = vmatpush1.bf16.msra.mxu1 %v18708_v10  ;;  %v21792_v8 = vrot.slane %v279_v57, 7  ;;  %v21794_v10 = vpack.c.bf16 %v328_v63, %v361_v4  ;;  %v18783_v63 = vld [vmem:[#allocation5 + $0xe4] ss:$16 sps:$4 sm:$0xff]   ;;  %v18781_v4 = vld [vmem:[#allocation5 + $0xe0] ss:$16 sps:$4 sm:$0xff]  }
 0x158   :  { %1490 = vmatprep.subr.bf16.mxu0 %v18713_v11  ;;  %1596 = vmatprep.subr.bf16.mxu1 %v18716_v12  ;;  %v18748_v11 = vld [vmem:[#allocation5 + $0x28] ss:$16 sps:$4 sm:$0xff]   ;;  %v222_v12 = vand.u32 15, %v21772_v61 }
 0x159   :  { %23714 = vst [vmem:[#allocation37_spill] sm:$0xff] %v21794_v10 }
 0x15a   :  { %vm17859_vm1 = vcmp.ne.s32.totalorder %v222_v12, 0  ;;  %v18792_v12 = vld [vmem:[#allocation5 + $0x10c] ss:$16 sps:$4 sm:$0xff]  }
 0x15b   :  { %1491 = vmatpush1.bf16.msra.mxu0 %v18711_v13  ;;  %1597 = vmatpush1.bf16.msra.mxu1 %v18714_v14  ;;  %v18753_v13 = vld [vmem:[#allocation5 + $0x44] ss:$16 sps:$4 sm:$0xff]   ;;  %v18756_v14 = vld [vmem:[#allocation5 + $0x4c] ss:$16 sps:$4 sm:$0xff]   ;;  %vm21812_vm3 = vmpackc.low %vm21410_vm2, %vm17859_vm1 }
 0x15c   :  { %1492 = vmatprep.subr.bf16.mxu0 %v18719_v15  ;;  %1598 = vmatprep.subr.bf16.mxu1 %v18722_v16  ;;  %v18751_v15 = vld [vmem:[#allocation5 + $0x40] ss:$16 sps:$4 sm:$0xff]   ;;  %v21801_v16 = vcombine.low %v21764_v56, %v21756_v49 }
 0x15e   :  { %23715 = vst [vmem:[#allocation38_spill] sm:$0xff] %v21801_v16 }
 0x15f   :  { %1493 = vmatpush1.bf16.msra.mxu0 %v18717_v17  ;;  %1599 = vmatpush1.bf16.msra.mxu1 %v18720_v18  ;;  %v326_v17 = vsel %vm318_vm0, %v320_v3, %v21792_v8  ;;  %v360_v18 = vsel %vm318_vm0, %v21788_v6, %v320_v3  ;;  %v18786_v3 = vld [vmem:[#allocation5 + $0xec] ss:$16 sps:$4 sm:$0xff]  }
 0x160   :  { %1494 = vmatprep.subr.bf16.mxu0 %v18726_v19  ;;  %1600 = vmatprep.subr.bf16.mxu1 %v18729_v20  ;;  %v18754_v19 = vld [vmem:[#allocation5 + $0x48] ss:$16 sps:$4 sm:$0xff]   ;;  %v18759_v20 = vld [vmem:[#allocation5 + $0x64] ss:$16 sps:$4 sm:$0xff]  }
 0x163   :  { %1495 = vmatpush1.bf16.msra.mxu0 %v18724_v23  ;;  %1601 = vmatpush1.bf16.msra.mxu1 %v18727_v24  ;;  %v18757_v23 = vld [vmem:[#allocation5 + $0x60] ss:$16 sps:$4 sm:$0xff]   ;;  %v21807_v24 = vpack.c.bf16 %v326_v17, %v360_v18  ;;  %v18798_v17 = vld [vmem:[#allocation5 + $0x12c] ss:$16 sps:$4 sm:$0xff]  }
 0x164   :  { %1496 = vmatprep.subr.bf16.mxu0 %v18733_v25  ;;  %1602 = vmatprep.subr.bf16.mxu1 %v18736_v26  ;;  %v18760_v26 = vld [vmem:[#allocation5 + $0x68] ss:$16 sps:$4 sm:$0xff]   ;;  %v18793_v18 = vld [vmem:[#allocation5 + $0x120] ss:$16 sps:$4 sm:$0xff]  }
 0x165   :  { %23716 = vst [vmem:[#allocation39_spill] sm:$0xff] %v21807_v24  ;;  %v21022_v25 = vld [vmem:[#allocation20 + $0x2d0] sm:$0xff]  }
 0x167   :  { %1497 = vmatpush1.bf16.msra.mxu0 %v18731_v36  ;;  %1603 = vmatpush1.bf16.msra.mxu1 %v18734_v38  ;;  %v18763_v36 = vld [vmem:[#allocation5 + $0x80] ss:$16 sps:$4 sm:$0xff]   ;;  %v18766_v38 = vld [vmem:[#allocation5 + $0x88] ss:$16 sps:$4 sm:$0xff]  }
 0x168   :  { %2265 = vmatprep.subr.bf16.mxu0 %v18740_v40  ;;  %2371 = vmatprep.subr.bf16.mxu1 %v18743_v41  ;;  %v18771_v40 = vld [vmem:[#allocation5 + $0xa4] ss:$16 sps:$4 sm:$0xff]   ;;  %v18774_v41 = vld [vmem:[#allocation5 + $0xac] ss:$16 sps:$4 sm:$0xff]  }
 0x16a   :  { %1499 = vmatmul.mubr.bf16.vlgmr.msra.gmra.mrb[0].mxu0 %v21762_v55  ;;  %1605 = vmatmul.mubr.bf16.vlgmr.msra.gmra.mrb[0].mxu1 %v21762_v55 }
 0x16b   :  { %2266 = vmatpush1.bf16.msra.mxu0 %v18738_v39  ;;  %2372 = vmatpush1.bf16.msra.mxu1 %v18741_v54  ;;  %v18777_v39 = vld [vmem:[#allocation5 + $0xc4] ss:$16 sps:$4 sm:$0xff]   ;;  %v18780_v54 = vld [vmem:[#allocation5 + $0xcc] ss:$16 sps:$4 sm:$0xff]  }
 0x16c   :  { %2267 = vmatprep.subr.bf16.mxu0 %v18747_v59  ;;  %2373 = vmatprep.subr.bf16.mxu1 %v18750_v62  ;;  %v18775_v59 = vld [vmem:[#allocation5 + $0xc0] ss:$16 sps:$4 sm:$0xff]   ;;  %v18778_v62 = vld [vmem:[#allocation5 + $0xc8] ss:$16 sps:$4 sm:$0xff]  }
 0x16d   :  { %1508 = vmatprep.mubr.bf16.mxu0 %v21778_v0  ;;  %1614 = vmatprep.mubr.bf16.mxu1 %v21778_v0 }
 0x16f   :  { %2268 = vmatpush1.bf16.msra.mxu0 %v18745_v5  ;;  %2374 = vmatpush1.bf16.msra.mxu1 %v18748_v11  ;;  %v18784_v5 = vld [vmem:[#allocation5 + $0xe8] ss:$16 sps:$4 sm:$0xff]   ;;  %v18789_v11 = vld [vmem:[#allocation5 + $0x104] ss:$16 sps:$4 sm:$0xff]  }
 0x170   :  { %2269 = vmatprep.subr.bf16.mxu0 %v18753_v13  ;;  %2375 = vmatprep.subr.bf16.mxu1 %v18756_v14  ;;  %v18787_v13 = vld [vmem:[#allocation5 + $0x100] ss:$16 sps:$4 sm:$0xff]   ;;  %v18790_v14 = vld [vmem:[#allocation5 + $0x108] ss:$16 sps:$4 sm:$0xff]  }
 0x172   :  { %1509 = vmatmul.mubr.bf16.gmra.mrb[4].mxu0 %v21801_v16  ;;  %1615 = vmatmul.mubr.bf16.gmra.mrb[4].mxu1 %v21801_v16 }
 0x173   :  { %2270 = vmatpush1.bf16.msra.mxu0 %v18751_v15  ;;  %2376 = vmatpush1.bf16.msra.mxu1 %v18754_v19  ;;  %v18795_v15 = vld [vmem:[#allocation5 + $0x124] ss:$16 sps:$4 sm:$0xff]   ;;  %v18796_v19 = vld [vmem:[#allocation5 + $0x128] ss:$16 sps:$4 sm:$0xff]  }
 0x174   :  { %2271 = vmatprep.subr.bf16.mxu0 %v18759_v20  ;;  %2377 = vmatprep.subr.bf16.mxu1 %v18762_v22  ;;  %v18801_v20 = vld [vmem:[#allocation5 + $0x144] ss:$16 sps:$4 sm:$0xff]   ;;  %v18804_v22 = vld [vmem:[#allocation5 + $0x14c] ss:$16 sps:$4 sm:$0xff]  }
 0x175   :  { %15748 = vmatprep.mubr.msk.bf16.mxu0 %vm21812_vm3, %v21807_v24  ;;  %15780 = vmatprep.mubr.msk.bf16.mxu1 %vm21812_vm3, %v21807_v24 }
 0x177   :  { %2272 = vmatpush1.bf16.msra.mxu0 %v18757_v23  ;;  %2378 = vmatpush1.bf16.msra.mxu1 %v18760_v26  ;;  %v18799_v23 = vld [vmem:[#allocation5 + $0x140] ss:$16 sps:$4 sm:$0xff]   ;;  %v18802_v26 = vld [vmem:[#allocation5 + $0x148] ss:$16 sps:$4 sm:$0xff]  }
 0x178   :  { %2273 = vmatprep.subr.bf16.mxu0 %v18765_v29  ;;  %2379 = vmatprep.subr.bf16.mxu1 %v18768_v30  ;;  %v18807_v29 = vld [vmem:[#allocation5 + $0x164] ss:$16 sps:$4 sm:$0xff]   ;;  %v18810_v30 = vld [vmem:[#allocation5 + $0x16c] ss:$16 sps:$4 sm:$0xff]  }
 0x17b   :  { %2274 = vmatpush1.bf16.msra.mxu0 %v18763_v36  ;;  %2380 = vmatpush1.bf16.msra.mxu1 %v18766_v38  ;;  %v18805_v36 = vld [vmem:[#allocation5 + $0x160] ss:$16 sps:$4 sm:$0xff]   ;;  %v18808_v38 = vld [vmem:[#allocation5 + $0x168] ss:$16 sps:$4 sm:$0xff]  }
 0x17c   :  { %2275 = vmatprep.subr.bf16.mxu0 %v18771_v40  ;;  %2381 = vmatprep.subr.bf16.mxu1 %v18774_v41  ;;  %v18813_v40 = vld [vmem:[#allocation5 + $0x184] ss:$16 sps:$4 sm:$0xff]   ;;  %v18816_v41 = vld [vmem:[#allocation5 + $0x18c] ss:$16 sps:$4 sm:$0xff]  }
 0x17f   :  { %2276 = vmatpush1.bf16.msra.mxu0 %v18769_v43  ;;  %2382 = vmatpush1.bf16.msra.mxu1 %v18772_v46  ;;  %v18811_v43 = vld [vmem:[#allocation5 + $0x180] ss:$16 sps:$4 sm:$0xff]   ;;  %v18814_v46 = vld [vmem:[#allocation5 + $0x188] ss:$16 sps:$4 sm:$0xff]  }
 0x180   :  { %2277 = vmatprep.subr.bf16.mxu0 %v18777_v39  ;;  %2383 = vmatprep.subr.bf16.mxu1 %v18780_v54  ;;  %v18819_v39 = vld [vmem:[#allocation5 + $0x1a4] ss:$16 sps:$4 sm:$0xff]   ;;  %v18822_v54 = vld [vmem:[#allocation5 + $0x1ac] ss:$16 sps:$4 sm:$0xff]  }
 0x183   :  { %2278 = vmatpush1.bf16.msra.mxu0 %v18775_v59  ;;  %2384 = vmatpush1.bf16.msra.mxu1 %v18778_v62  ;;  %v18817_v59 = vld [vmem:[#allocation5 + $0x1a0] ss:$16 sps:$4 sm:$0xff]   ;;  %v18820_v62 = vld [vmem:[#allocation5 + $0x1a8] ss:$16 sps:$4 sm:$0xff]  }
 0x184   :  { %2279 = vmatprep.subr.bf16.mxu0 %v18783_v63  ;;  %2385 = vmatprep.subr.bf16.mxu1 %v18786_v3  ;;  %v18826_v63 = vld [vmem:[#allocation5 + $0x1c4] ss:$16 sps:$4 sm:$0xff]   ;;  %v18829_v3 = vld [vmem:[#allocation5 + $0x1cc] ss:$16 sps:$4 sm:$0xff]  }
 0x187   :  { %2280 = vmatpush1.bf16.msra.mxu0 %v18781_v4  ;;  %2386 = vmatpush1.bf16.msra.mxu1 %v18784_v5  ;;  %v284_v4 = vunpack.c.l.bf16 %v21764_v56  ;;  %v283_v5 = vunpack.c.h.bf16 %v21703_v31  ;;  %v18953_v31 = vld [vmem:[#allocation5 + $0x864] ss:$16 sps:$4 sm:$0xff]  }
 0x188   :  { %2281 = vmatprep.subr.bf16.mxu0 %v18789_v11  ;;  %2387 = vmatprep.subr.bf16.mxu1 %v18792_v12  ;;  %v18824_v12 = vld [vmem:[#allocation5 + $0x1c0] ss:$16 sps:$4 sm:$0xff]  }
 0x189   :  { %v335_v11 = vrot.slane %v284_v4, 7 }
 0x18b   :  { %2282 = vmatpush1.bf16.msra.mxu0 %v18787_v13  ;;  %2388 = vmatpush1.bf16.msra.mxu1 %v18790_v14  ;;  %v18827_v13 = vld [vmem:[#allocation5 + $0x1c8] ss:$16 sps:$4 sm:$0xff]   ;;  %v216_v14 = vadd.s32 16, %v21772_v61 }
 0x18c   :  { %2283 = vmatprep.subr.bf16.mxu0 %v18795_v15  ;;  %2389 = vmatprep.subr.bf16.mxu1 %v18798_v17  ;;  %v18833_v15 = vld [vmem:[#allocation5 + $0x1e4] ss:$16 sps:$4 sm:$0xff]   ;;  %v18836_v17 = vld [vmem:[#allocation5 + $0x1ec] ss:$16 sps:$4 sm:$0xff]  }
 0x18f   :  { %2284 = vmatpush1.bf16.msra.mxu0 %v18793_v18  ;;  %2390 = vmatpush1.bf16.msra.mxu1 %v18796_v19  ;;  %v336_v18 = vsel %vm318_vm0, %v21754_v7, %v335_v11  ;;  %v341_v19 = vsel %vm318_vm0, %v335_v11, %v21770_v60  ;;  %v236_v7 = vand.u32 15, %v216_v14  ;;  %v18839_v60 = vld [vmem:[#allocation5 + $0x204] ss:$16 sps:$4 sm:$0xff]   ;;  %v18846_v14 = vld [vmem:[#allocation5 + $0x228] ss:$16 sps:$4 sm:$0xff]  }
 0x190   :  { %2285 = vmatprep.subr.bf16.mxu0 %v18801_v20  ;;  %2391 = vmatprep.subr.bf16.mxu1 %v18804_v22  ;;  %v333_v20 = vrot.slane %v283_v5, 7  ;;  %v21833_v22 = vpack.c.bf16 %v341_v19, %v336_v18 }
 0x191   :  { %vm17860_vm5 = vcmp.ne.s32.totalorder %v236_v7, 0 }
 0x192   :  { %23719 = vst [vmem:[#allocation40_spill] sm:$0xff] %v21833_v22  ;;  %vm21867_vm6 = vmpackc.low %vm21410_vm2, %vm17860_vm5 }
 0x193   :  { %2286 = vmatpush1.bf16.msra.mxu0 %v18799_v23  ;;  %2392 = vmatpush1.bf16.msra.mxu1 %v18802_v26  ;;  %v21837_v23 = vrot.slane %v274_v1, 1  ;;  %v393_v26 = vrot.slane %v278_v2, 1  ;;  %v334_v1 = vsel %vm318_vm0, %v21792_v8, %v333_v20  ;;  %v277_v2 = vunpack.c.h.bf16 %v21722_v42  ;;  %v19049_v42 = vld [vmem:[#allocation5 + $0xa64] ss:$16 sps:$4 sm:$0xff]  }
 0x194   :  { %2287 = vmatprep.subr.bf16.mxu0 %v18807_v29  ;;  %2393 = vmatprep.subr.bf16.mxu1 %v18810_v30  ;;  %v18831_v29 = vld [vmem:[#allocation5 + $0x1e0] ss:$16 sps:$4 sm:$0xff]   ;;  %v18834_v30 = vld [vmem:[#allocation5 + $0x1e8] ss:$16 sps:$4 sm:$0xff]  }
 0x195   :  { %v394_v8 = vsel %vm391_vm4, %v21837_v23, %v393_v26  ;;  %v322_v11 = vrot.slane %v277_v2, 7 }
 0x197   :  { %2288 = vmatpush1.bf16.msra.mxu0 %v18805_v36  ;;  %2394 = vmatpush1.bf16.msra.mxu1 %v18808_v38  ;;  %v18842_v36 = vld [vmem:[#allocation5 + $0x20c] ss:$16 sps:$4 sm:$0xff]   ;;  %v21843_v38 = vrot.slane %v282_v21, 1  ;;  %v18845_v21 = vld [vmem:[#allocation5 + $0x224] ss:$16 sps:$4 sm:$0xff]  }
 0x198   :  { %2289 = vmatprep.subr.bf16.mxu0 %v18813_v40  ;;  %2395 = vmatprep.subr.bf16.mxu1 %v18816_v41  ;;  %v340_v40 = vsel %vm318_vm0, %v333_v20, %v21788_v6  ;;  %v281_v41 = vunpack.c.h.bf16 %v21729_v44  ;;  %v18849_v20 = vld [vmem:[#allocation5 + $0x240] ss:$16 sps:$4 sm:$0xff]   ;;  %v19052_v44 = vld [vmem:[#allocation5 + $0xa6c] ss:$16 sps:$4 sm:$0xff]  }
 0x199   :  { %v405_v6 = vsel %vm391_vm4, %v393_v26, %v21843_v38  ;;  %v18852_v26 = vld [vmem:[#allocation5 + $0x248] ss:$16 sps:$4 sm:$0xff]  }
 0x19b   :  { %2290 = vmatpush1.bf16.msra.mxu0 %v18811_v43  ;;  %2396 = vmatpush1.bf16.msra.mxu1 %v18814_v46  ;;  %v289_v43 = vunpack.c.h.bf16 %v21756_v49  ;;  %v18837_v46 = vld [vmem:[#allocation5 + $0x200] ss:$16 sps:$4 sm:$0xff]  }
 0x19c   :  { %2291 = vmatprep.subr.bf16.mxu0 %v18819_v39  ;;  %2397 = vmatprep.subr.bf16.mxu1 %v18822_v54  ;;  %v18840_v39 = vld [vmem:[#allocation5 + $0x208] ss:$16 sps:$4 sm:$0xff]   ;;  %v18848_v54 = vld [vmem:[#allocation5 + $0x22c] ss:$16 sps:$4 sm:$0xff]  }
 0x19f   :  { %2292 = vmatpush1.bf16.msra.mxu0 %v18817_v59  ;;  %2398 = vmatpush1.bf16.msra.mxu1 %v18820_v62  ;;  %v21856_v59 = vpack.c.bf16 %v340_v40, %v334_v1  ;;  %v21858_v62 = vpack.c.bf16 %v405_v6, %v394_v8  ;;  %v18863_v1 = vld [vmem:[#allocation5 + $0x284] ss:$16 sps:$4 sm:$0xff]   ;;  %v18866_v40 = vld [vmem:[#allocation5 + $0x28c] ss:$16 sps:$4 sm:$0xff]   ;;  %v18867_v8 = vld [vmem:[#allocation5 + $0x2a0] ss:$16 sps:$4 sm:$0xff]  }
 0x1a0   :  { %2293 = vmatprep.subr.bf16.mxu0 %v18826_v63  ;;  %2399 = vmatprep.subr.bf16.mxu1 %v18829_v3  ;;  %v21873_v3 = vrot.slane %v289_v43, 7  ;;  %v18870_v6 = vld [vmem:[#allocation5 + $0x2a8] ss:$16 sps:$4 sm:$0xff]  }
 0x1a1   :  { %23720 = vst [vmem:[#allocation41_spill] sm:$0xff] %v21856_v59  ;;  %23721 = vst [vmem:[#allocation42_spill] sm:$0xff] %v21858_v62  ;;  %v21030_v63 = vld [vmem:[#allocation20 + $0x2e0] sm:$0xff]  }
 0x1a2   :  { %v362_v19 = vsel %vm318_vm0, %v21873_v3, %v322_v11 }
 0x1a3   :  { %2294 = vmatpush1.bf16.msra.mxu0 %v18824_v12  ;;  %2400 = vmatpush1.bf16.msra.mxu1 %v18827_v13  ;;  %v21879_v12 = vrot.slane %v281_v41, 7  ;;  %v18843_v13 = vld [vmem:[#allocation5 + $0x220] ss:$16 sps:$4 sm:$0xff]  }
 0x1a4   :  { %2295 = vmatprep.subr.bf16.mxu0 %v18833_v15  ;;  %2401 = vmatprep.subr.bf16.mxu1 %v18836_v17  ;;  %v18851_v15 = vld [vmem:[#allocation5 + $0x244] ss:$16 sps:$4 sm:$0xff]   ;;  %v18854_v17 = vld [vmem:[#allocation5 + $0x24c] ss:$16 sps:$4 sm:$0xff]  }
 0x1a5   :  { %v330_v18 = vsel %vm318_vm0, %v322_v11, %v21879_v12  ;;  %v18875_v11 = vld [vmem:[#allocation5 + $0x2c4] ss:$16 sps:$4 sm:$0xff]  }
 0x1a6   :  { %v21891_v7 = vpack.c.bf16 %v330_v18, %v362_v19  ;;  %v18884_v18 = vld [vmem:[#allocation5 + $0x2ec] ss:$16 sps:$4 sm:$0xff]   ;;  %v18879_v19 = vld [vmem:[#allocation5 + $0x2e0] ss:$16 sps:$4 sm:$0xff]  }
 0x1a7   :  { %2296 = vmatpush1.bf16.msra.mxu0 %v18831_v29  ;;  %2402 = vmatpush1.bf16.msra.mxu1 %v18834_v30  ;;  %v18857_v29 = vld [vmem:[#allocation5 + $0x264] ss:$16 sps:$4 sm:$0xff]   ;;  %v18860_v30 = vld [vmem:[#allocation5 + $0x26c] ss:$16 sps:$4 sm:$0xff]  }
 0x1a8   :  { %2318 = vmatprep.subr.bf16.mxu0 %v18839_v60  ;;  %2424 = vmatprep.subr.bf16.mxu1 %v18842_v36  ;;  %23724 = vst [vmem:[#allocation43_spill] sm:$0xff] %v21891_v7  ;;  %v18855_v60 = vld [vmem:[#allocation5 + $0x260] ss:$16 sps:$4 sm:$0xff]   ;;  %v18858_v36 = vld [vmem:[#allocation5 + $0x268] ss:$16 sps:$4 sm:$0xff]  }
 0x1aa   :  { %15752 = vmatmul.mubr.msk.bf16.vlgmr.msra.gmra.mrb[0].mxu0 %vm21812_vm3, %v21731_v45  ;;  %15784 = vmatmul.mubr.msk.bf16.vlgmr.msra.gmra.mrb[0].mxu1 %vm21812_vm3, %v21731_v45 }
 0x1ab   :  { %2319 = vmatpush1.bf16.msra.mxu0 %v18837_v46  ;;  %2425 = vmatpush1.bf16.msra.mxu1 %v18840_v39  ;;  %v18861_v46 = vld [vmem:[#allocation5 + $0x280] ss:$16 sps:$4 sm:$0xff]   ;;  %v18864_v39 = vld [vmem:[#allocation5 + $0x288] ss:$16 sps:$4 sm:$0xff]  }
 0x1ac   :  { %2320 = vmatprep.subr.bf16.mxu0 %v18845_v21  ;;  %2426 = vmatprep.subr.bf16.mxu1 %v18848_v54  ;;  %v18869_v21 = vld [vmem:[#allocation5 + $0x2a4] ss:$16 sps:$4 sm:$0xff]   ;;  %v18872_v54 = vld [vmem:[#allocation5 + $0x2ac] ss:$16 sps:$4 sm:$0xff]  }
 0x1ad   :  { %15756 = vmatprep.mubr.msk.bf16.mxu0 %vm21867_vm6, %v21856_v59  ;;  %15788 = vmatprep.mubr.msk.bf16.mxu1 %vm21867_vm6, %v21856_v59  ;;  %v19239_v59 = vld [vmem:[#allocation8 + $0x660] ss:$16 sps:$4 sm:$0xff]  }
 0x1af   :  { %2321 = vmatpush1.bf16.msra.mxu0 %v18843_v13  ;;  %2427 = vmatpush1.bf16.msra.mxu1 %v18846_v14  ;;  %v18878_v13 = vld [vmem:[#allocation5 + $0x2cc] ss:$16 sps:$4 sm:$0xff]   ;;  %v18873_v14 = vld [vmem:[#allocation5 + $0x2c0] ss:$16 sps:$4 sm:$0xff]  }
 0x1b0   :  { %2322 = vmatprep.subr.bf16.mxu0 %v18851_v15  ;;  %2428 = vmatprep.subr.bf16.mxu1 %v18854_v17  ;;  %v18876_v15 = vld [vmem:[#allocation5 + $0x2c8] ss:$16 sps:$4 sm:$0xff]   ;;  %v18881_v17 = vld [vmem:[#allocation5 + $0x2e4] ss:$16 sps:$4 sm:$0xff]  }
 0x1b2   :  { %15760 = vmatmul.mubr.msk.bf16.gmra.mrb[4].mxu0 %vm21867_vm6, %v21748_v35  ;;  %15792 = vmatmul.mubr.msk.bf16.gmra.mrb[4].mxu1 %vm21867_vm6, %v21748_v35 }
 0x1b3   :  { %2323 = vmatpush1.bf16.msra.mxu0 %v18849_v20  ;;  %2429 = vmatpush1.bf16.msra.mxu1 %v18852_v26  ;;  %v18882_v20 = vld [vmem:[#allocation5 + $0x2e8] ss:$16 sps:$4 sm:$0xff]   ;;  %v18887_v26 = vld [vmem:[#allocation5 + $0x304] ss:$16 sps:$4 sm:$0xff]  }
 0x1b4   :  { %2324 = vmatprep.subr.bf16.mxu0 %v18857_v29  ;;  %2430 = vmatprep.subr.bf16.mxu1 %v18860_v30  ;;  %v18890_v29 = vld [vmem:[#allocation5 + $0x30c] ss:$16 sps:$4 sm:$0xff]   ;;  %v18885_v30 = vld [vmem:[#allocation5 + $0x300] ss:$16 sps:$4 sm:$0xff]  }
 0x1b5   :  { %15764 = vmatprep.mubr.msk.bf16.mxu0 %vm21812_vm3, %v21891_v7  ;;  %15796 = vmatprep.mubr.msk.bf16.mxu1 %vm21812_vm3, %v21891_v7 }
 0x1b7   :  { %2325 = vmatpush1.bf16.msra.mxu0 %v18855_v60  ;;  %2431 = vmatpush1.bf16.msra.mxu1 %v18858_v36  ;;  %v18888_v60 = vld [vmem:[#allocation5 + $0x308] ss:$16 sps:$4 sm:$0xff]   ;;  %v18893_v36 = vld [vmem:[#allocation5 + $0x324] ss:$16 sps:$4 sm:$0xff]  }
 0x1b8   :  { %2326 = vmatprep.subr.bf16.mxu0 %v18863_v1  ;;  %2432 = vmatprep.subr.bf16.mxu1 %v18866_v40  ;;  %v18896_v1 = vld [vmem:[#allocation5 + $0x32c] ss:$16 sps:$4 sm:$0xff]   ;;  %v18891_v40 = vld [vmem:[#allocation5 + $0x320] ss:$16 sps:$4 sm:$0xff]  }
 0x1bb   :  { %2327 = vmatpush1.bf16.msra.mxu0 %v18861_v46  ;;  %2433 = vmatpush1.bf16.msra.mxu1 %v18864_v39  ;;  %v18894_v46 = vld [vmem:[#allocation5 + $0x328] ss:$16 sps:$4 sm:$0xff]   ;;  %v18899_v39 = vld [vmem:[#allocation5 + $0x344] ss:$16 sps:$4 sm:$0xff]  }
 0x1bc   :  { %2328 = vmatprep.subr.bf16.mxu0 %v18869_v21  ;;  %2434 = vmatprep.subr.bf16.mxu1 %v18872_v54  ;;  %v18902_v21 = vld [vmem:[#allocation5 + $0x34c] ss:$16 sps:$4 sm:$0xff]   ;;  %v18897_v54 = vld [vmem:[#allocation5 + $0x340] ss:$16 sps:$4 sm:$0xff]  }
 0x1bf   :  { %2329 = vmatpush1.bf16.msra.mxu0 %v18867_v8  ;;  %2435 = vmatpush1.bf16.msra.mxu1 %v18870_v6  ;;  %v18900_v8 = vld [vmem:[#allocation5 + $0x348] ss:$16 sps:$4 sm:$0xff]   ;;  %v18905_v6 = vld [vmem:[#allocation5 + $0x364] ss:$16 sps:$4 sm:$0xff]  }
 0x1c0   :  { %2330 = vmatprep.subr.bf16.mxu0 %v18875_v11  ;;  %2436 = vmatprep.subr.bf16.mxu1 %v18878_v13  ;;  %v18908_v11 = vld [vmem:[#allocation5 + $0x36c] ss:$16 sps:$4 sm:$0xff]   ;;  %v18903_v13 = vld [vmem:[#allocation5 + $0x360] ss:$16 sps:$4 sm:$0xff]  }
 0x1c3   :  { %2331 = vmatpush1.bf16.msra.mxu0 %v18873_v14  ;;  %2437 = vmatpush1.bf16.msra.mxu1 %v18876_v15  ;;  %v18906_v14 = vld [vmem:[#allocation5 + $0x368] ss:$16 sps:$4 sm:$0xff]   ;;  %v18911_v15 = vld [vmem:[#allocation5 + $0x384] ss:$16 sps:$4 sm:$0xff]  }
 0x1c4   :  { %2332 = vmatprep.subr.bf16.mxu0 %v18881_v17  ;;  %2438 = vmatprep.subr.bf16.mxu1 %v18884_v18  ;;  %v18914_v17 = vld [vmem:[#allocation5 + $0x38c] ss:$16 sps:$4 sm:$0xff]   ;;  %v18909_v18 = vld [vmem:[#allocation5 + $0x380] ss:$16 sps:$4 sm:$0xff]  }
 0x1c7   :  { %2333 = vmatpush1.bf16.msra.mxu0 %v18879_v19  ;;  %2439 = vmatpush1.bf16.msra.mxu1 %v18882_v20  ;;  %v18912_v19 = vld [vmem:[#allocation5 + $0x388] ss:$16 sps:$4 sm:$0xff]   ;;  %v18917_v20 = vld [vmem:[#allocation5 + $0x3a4] ss:$16 sps:$4 sm:$0xff]  }
 0x1c8   :  { %2334 = vmatprep.subr.bf16.mxu0 %v18887_v26  ;;  %2440 = vmatprep.subr.bf16.mxu1 %v18890_v29  ;;  %v18920_v26 = vld [vmem:[#allocation5 + $0x3ac] ss:$16 sps:$4 sm:$0xff]   ;;  %v18915_v29 = vld [vmem:[#allocation5 + $0x3a0] ss:$16 sps:$4 sm:$0xff]  }
 0x1cb   :  { %2335 = vmatpush1.bf16.msra.mxu0 %v18885_v30  ;;  %2441 = vmatpush1.bf16.msra.mxu1 %v18888_v60  ;;  %v18918_v30 = vld [vmem:[#allocation5 + $0x3a8] ss:$16 sps:$4 sm:$0xff]   ;;  %v18923_v60 = vld [vmem:[#allocation5 + $0x3c4] ss:$16 sps:$4 sm:$0xff]  }
 0x1cc   :  { %2336 = vmatprep.subr.bf16.mxu0 %v18893_v36  ;;  %2442 = vmatprep.subr.bf16.mxu1 %v18896_v1  ;;  %v18926_v36 = vld [vmem:[#allocation5 + $0x3cc] ss:$16 sps:$4 sm:$0xff]   ;;  %v412_v1 = vrot.slane %v286_v33, 1  ;;  %v398_v33 = vrot.slane %v276_v27, 1 }
 0x1cf   :  { %2337 = vmatpush1.bf16.msra.mxu0 %v18891_v40  ;;  %2443 = vmatpush1.bf16.msra.mxu1 %v18894_v46  ;;  %v18921_v40 = vld [vmem:[#allocation5 + $0x3c0] ss:$16 sps:$4 sm:$0xff]   ;;  %v285_v46 = vunpack.c.h.bf16 %v21764_v56 }
 0x1d0   :  { %2338 = vmatprep.subr.bf16.mxu0 %v18899_v39  ;;  %2444 = vmatprep.subr.bf16.mxu1 %v18902_v21  ;;  %v18924_v39 = vld [vmem:[#allocation5 + $0x3c8] ss:$16 sps:$4 sm:$0xff]   ;;  %v18929_v21 = vld [vmem:[#allocation5 + $0x3e4] ss:$16 sps:$4 sm:$0xff]  }
 0x1d3   :  { %2339 = vmatpush1.bf16.msra.mxu0 %v18897_v54  ;;  %2445 = vmatpush1.bf16.msra.mxu1 %v18900_v8  ;;  %v413_v54 = vsel %vm391_vm4, %v21843_v38, %v412_v1  ;;  %v440_v8 = vsel %vm391_vm4, %v412_v1, %v21837_v23  ;;  %v18930_v38 = vld [vmem:[#allocation5 + $0x3e8] ss:$16 sps:$4 sm:$0xff]   ;;  %v408_v23 = vrot.slane %v284_v4, 1  ;;  %v18939_v1 = vld [vmem:[#allocation5 + $0x820] ss:$16 sps:$4 sm:$0xff]  }
 0x1d4   :  { %2340 = vmatprep.subr.bf16.mxu0 %v18905_v6  ;;  %2446 = vmatprep.subr.bf16.mxu1 %v18908_v11  ;;  %v18932_v6 = vld [vmem:[#allocation5 + $0x3ec] ss:$16 sps:$4 sm:$0xff]   ;;  %v21912_v11 = vpack.c.bf16 %v440_v8, %v413_v54  ;;  %v396_v54 = vrot.slane %v279_v57, 1  ;;  %v21947_v8 = vrot.slane %v283_v5, 1 }
 0x1d6   :  { %23725 = vst [vmem:[#allocation44_spill] sm:$0xff] %v21912_v11  ;;  %v407_v57 = vsel %vm391_vm4, %v396_v54, %v21947_v8 }
 0x1d7   :  { %2341 = vmatpush1.bf16.msra.mxu0 %v18903_v13  ;;  %2447 = vmatpush1.bf16.msra.mxu1 %v18906_v14  ;;  %v399_v13 = vrot.slane %v280_v28, 1  ;;  %v18927_v14 = vld [vmem:[#allocation5 + $0x3e0] ss:$16 sps:$4 sm:$0xff]  }
 0x1d8   :  { %2342 = vmatprep.subr.bf16.mxu0 %v18911_v15  ;;  %2448 = vmatprep.subr.bf16.mxu1 %v18914_v17  ;;  %v337_v15 = vrot.slane %v285_v46, 7  ;;  %v18935_v17 = vld [vmem:[#allocation5 + $0x804] ss:$16 sps:$4 sm:$0xff]  }
 0x1d9   :  { %v409_v4 = vsel %vm391_vm4, %v399_v13, %v408_v23 }
 0x1da   :  { %v338_v27 = vsel %vm318_vm0, %v21879_v12, %v337_v15  ;;  %v342_v28 = vsel %vm318_vm0, %v337_v15, %v21873_v3  ;;  %v18947_v3 = vld [vmem:[#allocation5 + $0x844] ss:$16 sps:$4 sm:$0xff]   ;;  %v18948_v15 = vld [vmem:[#allocation5 + $0x848] ss:$16 sps:$4 sm:$0xff]  }
 0x1db   :  { %2343 = vmatpush1.bf16.msra.mxu0 %v18909_v18  ;;  %2449 = vmatpush1.bf16.msra.mxu1 %v18912_v19  ;;  %v18938_v18 = vld [vmem:[#allocation5 + $0x80c] ss:$16 sps:$4 sm:$0xff]   ;;  %v18933_v19 = vld [vmem:[#allocation5 + $0x800] ss:$16 sps:$4 sm:$0xff]   ;;  %v21931_v12 = vpack.c.bf16 %v342_v28, %v338_v27  ;;  %v18960_v27 = vld [vmem:[#allocation5 + $0x888] ss:$16 sps:$4 sm:$0xff]  }
 0x1dc   :  { %2344 = vmatprep.subr.bf16.mxu0 %v18917_v20  ;;  %2450 = vmatprep.subr.bf16.mxu1 %v18920_v26  ;;  %v18936_v20 = vld [vmem:[#allocation5 + $0x808] ss:$16 sps:$4 sm:$0xff]   ;;  %v18941_v26 = vld [vmem:[#allocation5 + $0x824] ss:$16 sps:$4 sm:$0xff]  }
 0x1dd   :  { %23727 = vst [vmem:[#allocation46_spill] sm:$0xff] %v21931_v12  ;;  %v18965_v28 = vld [vmem:[#allocation5 + $0x8a4] ss:$16 sps:$4 sm:$0xff]  }
 0x1df   :  { %2345 = vmatpush1.bf16.msra.mxu0 %v18915_v29  ;;  %2451 = vmatpush1.bf16.msra.mxu1 %v18918_v30  ;;  %v215_v29 = vadd.s32 8, %v21772_v61  ;;  %v400_v30 = vsel %vm391_vm4, %v398_v33, %v399_v13  ;;  %v416_v13 = vrot.slane %v288_v52, 1 }
 0x1e0   :  { %2346 = vmatprep.subr.bf16.mxu0 %v18923_v60  ;;  %2452 = vmatprep.subr.bf16.mxu1 %v18926_v36  ;;  %v18944_v60 = vld [vmem:[#allocation5 + $0x82c] ss:$16 sps:$4 sm:$0xff]   ;;  %v21929_v36 = vpack.c.bf16 %v409_v4, %v400_v30  ;;  %v18966_v30 = vld [vmem:[#allocation5 + $0x8a8] ss:$16 sps:$4 sm:$0xff]   ;;  %v18971_v4 = vld [vmem:[#allocation5 + $0x8c4] ss:$16 sps:$4 sm:$0xff]  }
 0x1e1   :  { %v417_v47 = vsel %vm391_vm4, %v408_v23, %v416_v13  ;;  %v442_v48 = vsel %vm391_vm4, %v416_v13, %v398_v33  ;;  %v18954_v23 = vld [vmem:[#allocation5 + $0x868] ss:$16 sps:$4 sm:$0xff]   ;;  %v18983_v13 = vld [vmem:[#allocation5 + $0x904] ss:$16 sps:$4 sm:$0xff]  }
 0x1e2   :  { %23726 = vst [vmem:[#allocation45_spill] sm:$0xff] %v21929_v36  ;;  %v21963_v5 = vpack.c.bf16 %v442_v48, %v417_v47  ;;  %v18984_v47 = vld [vmem:[#allocation5 + $0x908] ss:$16 sps:$4 sm:$0xff]   ;;  %v18989_v48 = vld [vmem:[#allocation5 + $0x924] ss:$16 sps:$4 sm:$0xff]  }
 0x1e3   :  { %2347 = vmatpush1.bf16.msra.mxu0 %v18921_v40  ;;  %2453 = vmatpush1.bf16.msra.mxu1 %v18924_v39  ;;  %v18942_v40 = vld [vmem:[#allocation5 + $0x828] ss:$16 sps:$4 sm:$0xff]   ;;  %v18950_v39 = vld [vmem:[#allocation5 + $0x84c] ss:$16 sps:$4 sm:$0xff]  }
 0x1e4   :  { %2348 = vmatprep.subr.bf16.mxu0 %v18929_v21  ;;  %2454 = vmatprep.subr.bf16.mxu1 %v18932_v6  ;;  %v21941_v21 = vrot.slane %v275_v53, 1  ;;  %v229_v6 = vand.u32 15, %v215_v29  ;;  %v18956_v53 = vld [vmem:[#allocation5 + $0x86c] ss:$16 sps:$4 sm:$0xff]   ;;  %23728 = vst [vmem:[#allocation47_spill] sm:$0xff] %v21963_v5 }
 0x1e5   :  { %v18963_v29 = vld [vmem:[#allocation5 + $0x8a0] ss:$16 sps:$4 sm:$0xff]  }
 0x1e6   :  { %v397_v52 = vsel %vm391_vm4, %v21941_v21, %v396_v54  ;;  %vm17861_vm7 = vcmp.ne.s32.totalorder %v229_v6, 15  ;;  %v18975_v54 = vld [vmem:[#allocation5 + $0x8e0] ss:$16 sps:$4 sm:$0xff]   ;;  %v18978_v6 = vld [vmem:[#allocation5 + $0x8e8] ss:$16 sps:$4 sm:$0xff]  }
 0x1e7   :  { %2349 = vmatpush1.bf16.msra.mxu0 %v18927_v14  ;;  %2455 = vmatpush1.bf16.msra.mxu1 %v18930_v38  ;;  %v18945_v14 = vld [vmem:[#allocation5 + $0x840] ss:$16 sps:$4 sm:$0xff]   ;;  %v21965_v38 = vpack.c.bf16 %v407_v57, %v397_v52  ;;  %vm21974_vm8 = vmpackc.low %vm17861_vm7, %vm21410_vm2  ;;  %v18990_v52 = vld [vmem:[#allocation5 + $0x928] ss:$16 sps:$4 sm:$0xff]  }
 0x1e8   :  { %3254 = vmatprep.subr.bf16.mxu0 %v18935_v17  ;;  %3360 = vmatprep.subr.bf16.mxu1 %v18938_v18  ;;  %v18951_v17 = vld [vmem:[#allocation5 + $0x860] ss:$16 sps:$4 sm:$0xff]   ;;  %v18959_v18 = vld [vmem:[#allocation5 + $0x884] ss:$16 sps:$4 sm:$0xff]  }
 0x1e9   :  { %23729 = vst [vmem:[#allocation48_spill] sm:$0xff] %v21965_v38  ;;  %v18995_v57 = vld [vmem:[#allocation5 + $0x944] ss:$16 sps:$4 sm:$0xff]  }
 0x1ea   :  { %15768 = vmatmul.mubr.msk.bf16.vlgmr.msra.gmra.mrb[0].mxu0 %vm21812_vm3, %v21794_v10  ;;  %15800 = vmatmul.mubr.msk.bf16.vlgmr.msra.gmra.mrb[0].mxu1 %vm21812_vm3, %v21794_v10 }
 0x1eb   :  { %3255 = vmatpush1.bf16.msra.mxu0 %v18933_v19  ;;  %3361 = vmatpush1.bf16.msra.mxu1 %v18936_v20  ;;  %v18962_v19 = vld [vmem:[#allocation5 + $0x88c] ss:$16 sps:$4 sm:$0xff]   ;;  %v18957_v20 = vld [vmem:[#allocation5 + $0x880] ss:$16 sps:$4 sm:$0xff]  }
 0x1ec   :  { %3256 = vmatprep.subr.bf16.mxu0 %v18941_v26  ;;  %3362 = vmatprep.subr.bf16.mxu1 %v18944_v60  ;;  %v18968_v26 = vld [vmem:[#allocation5 + $0x8ac] ss:$16 sps:$4 sm:$0xff]  }
 0x1ed   :  { %15772 = vmatprep.mubr.msk.bf16.mxu0 %vm21867_vm6, %v21931_v12  ;;  %15804 = vmatprep.mubr.msk.bf16.mxu1 %vm21867_vm6, %v21931_v12  ;;  %v18974_v60 = vld [vmem:[#allocation5 + $0x8cc] ss:$16 sps:$4 sm:$0xff]  }
 0x1ef   :  { %3257 = vmatpush1.bf16.msra.mxu0 %v18939_v1  ;;  %3363 = vmatpush1.bf16.msra.mxu1 %v18942_v40  ;;  %v18969_v1 = vld [vmem:[#allocation5 + $0x8c0] ss:$16 sps:$4 sm:$0xff]   ;;  %v18972_v40 = vld [vmem:[#allocation5 + $0x8c8] ss:$16 sps:$4 sm:$0xff]  }
 0x1f0   :  { %3258 = vmatprep.subr.bf16.mxu0 %v18947_v3  ;;  %3364 = vmatprep.subr.bf16.mxu1 %v18950_v39  ;;  %v18977_v3 = vld [vmem:[#allocation5 + $0x8e4] ss:$16 sps:$4 sm:$0xff]   ;;  %v18980_v39 = vld [vmem:[#allocation5 + $0x8ec] ss:$16 sps:$4 sm:$0xff]  }
 0x1f2   :  { %15776 = vmatmul.mubr.msk.bf16.gmra.mrb[4].mxu0 %vm21867_vm6, %v21833_v22  ;;  %15808 = vmatmul.mubr.msk.bf16.gmra.mrb[4].mxu1 %vm21867_vm6, %v21833_v22  ;;  %v19229_v22 = vld [vmem:[#allocation8 + $0x624] ss:$16 sps:$4 sm:$0xff]  }
 0x1f3   :  { %3259 = vmatpush1.bf16.msra.mxu0 %v18945_v14  ;;  %3365 = vmatpush1.bf16.msra.mxu1 %v18948_v15  ;;  %v18986_v14 = vld [vmem:[#allocation5 + $0x90c] ss:$16 sps:$4 sm:$0xff]   ;;  %v18981_v15 = vld [vmem:[#allocation5 + $0x900] ss:$16 sps:$4 sm:$0xff]  }
 0x1f4   :  { %3260 = vmatprep.subr.bf16.mxu0 %v18953_v31  ;;  %3366 = vmatprep.subr.bf16.mxu1 %v18956_v53  ;;  %v18992_v31 = vld [vmem:[#allocation5 + $0x92c] ss:$16 sps:$4 sm:$0xff]   ;;  %v18987_v53 = vld [vmem:[#allocation5 + $0x920] ss:$16 sps:$4 sm:$0xff]  }
 0x1f5   :  { %15940 = vmatprep.mubr.msk.bf16.mxu0 %vm21974_vm8, %v21965_v38  ;;  %15972 = vmatprep.mubr.msk.bf16.mxu1 %vm21974_vm8, %v21965_v38  ;;  %v19224_v38 = vld [vmem:[#allocation8 + $0x608] ss:$16 sps:$4 sm:$0xff]  }
 0x1f7   :  { %3261 = vmatpush1.bf16.msra.mxu0 %v18951_v17  ;;  %3367 = vmatpush1.bf16.msra.mxu1 %v18954_v23  ;;  %v18998_v17 = vld [vmem:[#allocation5 + $0x94c] ss:$16 sps:$4 sm:$0xff]   ;;  %v18993_v23 = vld [vmem:[#allocation5 + $0x940] ss:$16 sps:$4 sm:$0xff]  }
 0x1f8   :  { %3262 = vmatprep.subr.bf16.mxu0 %v18959_v18  ;;  %3368 = vmatprep.subr.bf16.mxu1 %v18962_v19  ;;  %v18996_v18 = vld [vmem:[#allocation5 + $0x948] ss:$16 sps:$4 sm:$0xff]   ;;  %v19001_v19 = vld [vmem:[#allocation5 + $0x964] ss:$16 sps:$4 sm:$0xff]  }
 0x1fb   :  { %3263 = vmatpush1.bf16.msra.mxu0 %v18957_v20  ;;  %3369 = vmatpush1.bf16.msra.mxu1 %v18960_v27  ;;  %v19004_v20 = vld [vmem:[#allocation5 + $0x96c] ss:$16 sps:$4 sm:$0xff]   ;;  %v18999_v27 = vld [vmem:[#allocation5 + $0x960] ss:$16 sps:$4 sm:$0xff]  }
 0x1fc   :  { %3264 = vmatprep.subr.bf16.mxu0 %v18965_v28  ;;  %3370 = vmatprep.subr.bf16.mxu1 %v18968_v26  ;;  %v19002_v28 = vld [vmem:[#allocation5 + $0x968] ss:$16 sps:$4 sm:$0xff]   ;;  %v19007_v26 = vld [vmem:[#allocation5 + $0x984] ss:$16 sps:$4 sm:$0xff]  }
 0x1ff   :  { %3265 = vmatpush1.bf16.msra.mxu0 %v18963_v29  ;;  %3371 = vmatpush1.bf16.msra.mxu1 %v18966_v30  ;;  %v19010_v29 = vld [vmem:[#allocation5 + $0x98c] ss:$16 sps:$4 sm:$0xff]   ;;  %v19005_v30 = vld [vmem:[#allocation5 + $0x980] ss:$16 sps:$4 sm:$0xff]  }
 0x200   :  { %3266 = vmatprep.subr.bf16.mxu0 %v18971_v4  ;;  %3372 = vmatprep.subr.bf16.mxu1 %v18974_v60  ;;  %v19008_v4 = vld [vmem:[#allocation5 + $0x988] ss:$16 sps:$4 sm:$0xff]   ;;  %v217_v60 = vadd.s32 24, %v21772_v61 }
 0x203   :  { %3267 = vmatpush1.bf16.msra.mxu0 %v18969_v1  ;;  %3373 = vmatpush1.bf16.msra.mxu1 %v18972_v40  ;;  %v19013_v1 = vld [vmem:[#allocation5 + $0x9a4] ss:$16 sps:$4 sm:$0xff]   ;;  %v19016_v40 = vld [vmem:[#allocation5 + $0x9ac] ss:$16 sps:$4 sm:$0xff]  }
 0x204   :  { %3268 = vmatprep.subr.bf16.mxu0 %v18977_v3  ;;  %3374 = vmatprep.subr.bf16.mxu1 %v18980_v39  ;;  %v19011_v3 = vld [vmem:[#allocation5 + $0x9a0] ss:$16 sps:$4 sm:$0xff]   ;;  %v19014_v39 = vld [vmem:[#allocation5 + $0x9a8] ss:$16 sps:$4 sm:$0xff]  }
 0x207   :  { %3269 = vmatpush1.bf16.msra.mxu0 %v18975_v54  ;;  %3375 = vmatpush1.bf16.msra.mxu1 %v18978_v6  ;;  %v243_v54 = vand.u32 15, %v217_v60  ;;  %v19019_v6 = vld [vmem:[#allocation5 + $0x9c4] ss:$16 sps:$4 sm:$0xff]   ;;  %v22012_v60 = vrot.slane %v285_v46, 1  ;;  %v19050_v46 = vld [vmem:[#allocation5 + $0xa68] ss:$16 sps:$4 sm:$0xff]  }
 0x208   :  { %3270 = vmatprep.subr.bf16.mxu0 %v18983_v13  ;;  %3376 = vmatprep.subr.bf16.mxu1 %v18986_v14  ;;  %v19022_v13 = vld [vmem:[#allocation5 + $0x9cc] ss:$16 sps:$4 sm:$0xff]   ;;  %v19017_v14 = vld [vmem:[#allocation5 + $0x9c0] ss:$16 sps:$4 sm:$0xff]  }
 0x209   :  { %vm17862_vm9 = vcmp.ne.s32.totalorder %v243_v54, 15  ;;  %v19058_v54 = vld [vmem:[#allocation5 + $0xa8c] ss:$16 sps:$4 sm:$0xff]  }
 0x20a   :  { %vm21988_vm10 = vmpackc.low %vm17862_vm9, %vm21410_vm2 }
 0x20b   :  { %3271 = vmatpush1.bf16.msra.mxu0 %v18981_v15  ;;  %3377 = vmatpush1.bf16.msra.mxu1 %v18984_v47  ;;  %v19020_v15 = vld [vmem:[#allocation5 + $0x9c8] ss:$16 sps:$4 sm:$0xff]   ;;  %v19025_v47 = vld [vmem:[#allocation5 + $0x9e4] ss:$16 sps:$4 sm:$0xff]  }
 0x20c   :  { %3272 = vmatprep.subr.bf16.mxu0 %v18989_v48  ;;  %3378 = vmatprep.subr.bf16.mxu1 %v18992_v31  ;;  %v19028_v48 = vld [vmem:[#allocation5 + $0x9ec] ss:$16 sps:$4 sm:$0xff]   ;;  %v19023_v31 = vld [vmem:[#allocation5 + $0x9e0] ss:$16 sps:$4 sm:$0xff]  }
 0x20f   :  { %3273 = vmatpush1.bf16.msra.mxu0 %v18987_v53  ;;  %3379 = vmatpush1.bf16.msra.mxu1 %v18990_v52  ;;  %v19026_v53 = vld [vmem:[#allocation5 + $0x9e8] ss:$16 sps:$4 sm:$0xff]   ;;  %v19031_v52 = vld [vmem:[#allocation5 + $0xa04] ss:$16 sps:$4 sm:$0xff]  }
 0x210   :  { %3274 = vmatprep.subr.bf16.mxu0 %v18995_v57  ;;  %3380 = vmatprep.subr.bf16.mxu1 %v18998_v17  ;;  %v19034_v57 = vld [vmem:[#allocation5 + $0xa0c] ss:$16 sps:$4 sm:$0xff]   ;;  %v414_v17 = vrot.slane %v287_v58, 1  ;;  %v19035_v58 = vld [vmem:[#allocation5 + $0xa20] ss:$16 sps:$4 sm:$0xff]  }
 0x212   :  { %v441_v32 = vsel %vm391_vm4, %v414_v17, %v21941_v21  ;;  %v22006_v21 = vrot.slane %v277_v2, 1 }
 0x213   :  { %3275 = vmatpush1.bf16.msra.mxu0 %v18993_v23  ;;  %3381 = vmatpush1.bf16.msra.mxu1 %v18996_v18  ;;  %v19029_v18 = vld [vmem:[#allocation5 + $0xa00] ss:$16 sps:$4 sm:$0xff]  }
 0x214   :  { %3276 = vmatprep.subr.bf16.mxu0 %v19001_v19  ;;  %3382 = vmatprep.subr.bf16.mxu1 %v19004_v20  ;;  %v19032_v19 = vld [vmem:[#allocation5 + $0xa08] ss:$16 sps:$4 sm:$0xff]   ;;  %v19037_v20 = vld [vmem:[#allocation5 + $0xa24] ss:$16 sps:$4 sm:$0xff]  }
 0x217   :  { %3277 = vmatpush1.bf16.msra.mxu0 %v18999_v27  ;;  %3383 = vmatpush1.bf16.msra.mxu1 %v19002_v28  ;;  %v19040_v27 = vld [vmem:[#allocation5 + $0xa2c] ss:$16 sps:$4 sm:$0xff]   ;;  %v415_v28 = vsel %vm391_vm4, %v21947_v8, %v414_v17  ;;  %v19043_v8 = vld [vmem:[#allocation5 + $0xa44] ss:$16 sps:$4 sm:$0xff]  }
 0x218   :  { %3278 = vmatprep.subr.bf16.mxu0 %v19007_v26  ;;  %3384 = vmatprep.subr.bf16.mxu1 %v19010_v29  ;;  %v19038_v26 = vld [vmem:[#allocation5 + $0xa28] ss:$16 sps:$4 sm:$0xff]   ;;  %v21996_v29 = vpack.c.bf16 %v441_v32, %v415_v28  ;;  %v19073_v17 = vld [vmem:[#allocation5 + $0xae4] ss:$16 sps:$4 sm:$0xff]   ;;  %v19082_v28 = vld [vmem:[#allocation5 + $0xb0c] ss:$16 sps:$4 sm:$0xff]  }
 0x219   :  { %v19077_v32 = vld [vmem:[#allocation5 + $0xb00] ss:$16 sps:$4 sm:$0xff]  }
 0x21a   :  { %23734 = vst [vmem:[#allocation49_spill] sm:$0xff] %v21996_v29 }
 0x21b   :  { %3279 = vmatpush1.bf16.msra.mxu0 %v19005_v30  ;;  %3385 = vmatpush1.bf16.msra.mxu1 %v19008_v4  ;;  %v19046_v30 = vld [vmem:[#allocation5 + $0xa4c] ss:$16 sps:$4 sm:$0xff]   ;;  %v402_v4 = vrot.slane %v281_v41, 1  ;;  %v19047_v41 = vld [vmem:[#allocation5 + $0xa60] ss:$16 sps:$4 sm:$0xff]  }
 0x21c   :  { %3280 = vmatprep.subr.bf16.mxu0 %v19013_v1  ;;  %3386 = vmatprep.subr.bf16.mxu1 %v19016_v40  ;;  %v19041_v1 = vld [vmem:[#allocation5 + $0xa40] ss:$16 sps:$4 sm:$0xff]   ;;  %v19044_v40 = vld [vmem:[#allocation5 + $0xa48] ss:$16 sps:$4 sm:$0xff]  }
 0x21d   :  { %v403_v56 = vsel %vm391_vm4, %v22006_v21, %v402_v4  ;;  %v411_v2 = vsel %vm391_vm4, %v402_v4, %v22012_v60  ;;  %v19086_v4 = vld [vmem:[#allocation5 + $0xb28] ss:$16 sps:$4 sm:$0xff]  }
 0x21f   :  { %3281 = vmatpush1.bf16.msra.mxu0 %v19011_v3  ;;  %3387 = vmatpush1.bf16.msra.mxu1 %v19014_v39  ;;  %v22024_v3 = vpack.c.bf16 %v411_v2, %v403_v56  ;;  %v19055_v39 = vld [vmem:[#allocation5 + $0xa84] ss:$16 sps:$4 sm:$0xff]   ;;  %v19100_v2 = vld [vmem:[#allocation5 + $0xb6c] ss:$16 sps:$4 sm:$0xff]  }
 0x220   :  { %3282 = vmatprep.subr.bf16.mxu0 %v19019_v6  ;;  %3388 = vmatprep.subr.bf16.mxu1 %v19022_v13  ;;  %v19053_v6 = vld [vmem:[#allocation5 + $0xa80] ss:$16 sps:$4 sm:$0xff]   ;;  %v19056_v13 = vld [vmem:[#allocation5 + $0xa88] ss:$16 sps:$4 sm:$0xff]   ;;  %v19097_v56 = vld [vmem:[#allocation5 + $0xb64] ss:$16 sps:$4 sm:$0xff]  }
 0x221   :  { %23735 = vst [vmem:[#allocation50_spill] sm:$0xff] %v22024_v3 }
 0x223   :  { %3283 = vmatpush1.bf16.msra.mxu0 %v19017_v14  ;;  %3389 = vmatpush1.bf16.msra.mxu1 %v19020_v15  ;;  %v19061_v14 = vld [vmem:[#allocation5 + $0xaa4] ss:$16 sps:$4 sm:$0xff]   ;;  %v19064_v15 = vld [vmem:[#allocation5 + $0xaac] ss:$16 sps:$4 sm:$0xff]  }
 0x224   :  { %3284 = vmatprep.subr.bf16.mxu0 %v19025_v47  ;;  %3390 = vmatprep.subr.bf16.mxu1 %v19028_v48  ;;  %v19059_v47 = vld [vmem:[#allocation5 + $0xaa0] ss:$16 sps:$4 sm:$0xff]   ;;  %v19062_v48 = vld [vmem:[#allocation5 + $0xaa8] ss:$16 sps:$4 sm:$0xff]  }
 0x227   :  { %3285 = vmatpush1.bf16.msra.mxu0 %v19023_v31  ;;  %3391 = vmatpush1.bf16.msra.mxu1 %v19026_v53  ;;  %v19067_v31 = vld [vmem:[#allocation5 + $0xac4] ss:$16 sps:$4 sm:$0xff]   ;;  %v19070_v53 = vld [vmem:[#allocation5 + $0xacc] ss:$16 sps:$4 sm:$0xff]  }
 0x228   :  { %3307 = vmatprep.subr.bf16.mxu0 %v19031_v52  ;;  %3413 = vmatprep.subr.bf16.mxu1 %v19034_v57  ;;  %v19065_v52 = vld [vmem:[#allocation5 + $0xac0] ss:$16 sps:$4 sm:$0xff]   ;;  %v19068_v57 = vld [vmem:[#allocation5 + $0xac8] ss:$16 sps:$4 sm:$0xff]  }
 0x22a   :  { %15944 = vmatmul.mubr.msk.bf16.vlgmr.msra.gmra.mrb[0].mxu0 %vm21974_vm8, %v21858_v62  ;;  %15976 = vmatmul.mubr.msk.bf16.vlgmr.msra.gmra.mrb[0].mxu1 %vm21974_vm8, %v21858_v62 }
 0x22b   :  { %3308 = vmatpush1.bf16.msra.mxu0 %v19029_v18  ;;  %3414 = vmatpush1.bf16.msra.mxu1 %v19032_v19  ;;  %v19076_v18 = vld [vmem:[#allocation5 + $0xaec] ss:$16 sps:$4 sm:$0xff]   ;;  %v19071_v19 = vld [vmem:[#allocation5 + $0xae0] ss:$16 sps:$4 sm:$0xff]  }
 0x22c   :  { %3309 = vmatprep.subr.bf16.mxu0 %v19037_v20  ;;  %3415 = vmatprep.subr.bf16.mxu1 %v19040_v27  ;;  %v19074_v20 = vld [vmem:[#allocation5 + $0xae8] ss:$16 sps:$4 sm:$0xff]   ;;  %v19079_v27 = vld [vmem:[#allocation5 + $0xb04] ss:$16 sps:$4 sm:$0xff]  }
 0x22d   :  { %15948 = vmatprep.mubr.msk.bf16.mxu0 %vm21988_vm10, %v21996_v29  ;;  %15980 = vmatprep.mubr.msk.bf16.mxu1 %vm21988_vm10, %v21996_v29 }
 0x22f   :  { %3310 = vmatpush1.bf16.msra.mxu0 %v19035_v58  ;;  %3416 = vmatpush1.bf16.msra.mxu1 %v19038_v26  ;;  %v19080_v58 = vld [vmem:[#allocation5 + $0xb08] ss:$16 sps:$4 sm:$0xff]   ;;  %v19085_v26 = vld [vmem:[#allocation5 + $0xb24] ss:$16 sps:$4 sm:$0xff]  }
 0x230   :  { %3311 = vmatprep.subr.bf16.mxu0 %v19043_v8  ;;  %3417 = vmatprep.subr.bf16.mxu1 %v19046_v30  ;;  %v19088_v8 = vld [vmem:[#allocation5 + $0xb2c] ss:$16 sps:$4 sm:$0xff]   ;;  %v19083_v30 = vld [vmem:[#allocation5 + $0xb20] ss:$16 sps:$4 sm:$0xff]  }
 0x232   :  { %15952 = vmatmul.mubr.msk.bf16.gmra.mrb[4].mxu0 %vm21988_vm10, %v21912_v11  ;;  %15984 = vmatmul.mubr.msk.bf16.gmra.mrb[4].mxu1 %vm21988_vm10, %v21912_v11 }
 0x233   :  { %3312 = vmatpush1.bf16.msra.mxu0 %v19041_v1  ;;  %3418 = vmatpush1.bf16.msra.mxu1 %v19044_v40  ;;  %v19091_v1 = vld [vmem:[#allocation5 + $0xb44] ss:$16 sps:$4 sm:$0xff]   ;;  %v19094_v40 = vld [vmem:[#allocation5 + $0xb4c] ss:$16 sps:$4 sm:$0xff]  }
 0x234   :  { %3313 = vmatprep.subr.bf16.mxu0 %v19049_v42  ;;  %3419 = vmatprep.subr.bf16.mxu1 %v19052_v44  ;;  %v19089_v42 = vld [vmem:[#allocation5 + $0xb40] ss:$16 sps:$4 sm:$0xff]   ;;  %v19092_v44 = vld [vmem:[#allocation5 + $0xb48] ss:$16 sps:$4 sm:$0xff]  }
 0x235   :  { %15956 = vmatprep.mubr.msk.bf16.mxu0 %vm21974_vm8, %v22024_v3  ;;  %15988 = vmatprep.mubr.msk.bf16.mxu1 %vm21974_vm8, %v22024_v3 }
 0x237   :  { %3314 = vmatpush1.bf16.msra.mxu0 %v19047_v41  ;;  %3420 = vmatpush1.bf16.msra.mxu1 %v19050_v46  ;;  %v19095_v41 = vld [vmem:[#allocation5 + $0xb60] ss:$16 sps:$4 sm:$0xff]   ;;  %v19098_v46 = vld [vmem:[#allocation5 + $0xb68] ss:$16 sps:$4 sm:$0xff]  }
 0x238   :  { %3315 = vmatprep.subr.bf16.mxu0 %v19055_v39  ;;  %3421 = vmatprep.subr.bf16.mxu1 %v19058_v54  ;;  %v19103_v39 = vld [vmem:[#allocation5 + $0xb84] ss:$16 sps:$4 sm:$0xff]   ;;  %v19106_v54 = vld [vmem:[#allocation5 + $0xb8c] ss:$16 sps:$4 sm:$0xff]  }
 0x23b   :  { %3316 = vmatpush1.bf16.msra.mxu0 %v19053_v6  ;;  %3422 = vmatpush1.bf16.msra.mxu1 %v19056_v13  ;;  %v19101_v6 = vld [vmem:[#allocation5 + $0xb80] ss:$16 sps:$4 sm:$0xff]   ;;  %v19104_v13 = vld [vmem:[#allocation5 + $0xb88] ss:$16 sps:$4 sm:$0xff]  }
 0x23c   :  { %3317 = vmatprep.subr.bf16.mxu0 %v19061_v14  ;;  %3423 = vmatprep.subr.bf16.mxu1 %v19064_v15  ;;  %v19109_v14 = vld [vmem:[#allocation5 + $0xba4] ss:$16 sps:$4 sm:$0xff]   ;;  %v19112_v15 = vld [vmem:[#allocation5 + $0xbac] ss:$16 sps:$4 sm:$0xff]  }
 0x23f   :  { %3318 = vmatpush1.bf16.msra.mxu0 %v19059_v47  ;;  %3424 = vmatpush1.bf16.msra.mxu1 %v19062_v48  ;;  %v19107_v47 = vld [vmem:[#allocation5 + $0xba0] ss:$16 sps:$4 sm:$0xff]   ;;  %v19110_v48 = vld [vmem:[#allocation5 + $0xba8] ss:$16 sps:$4 sm:$0xff]  }
 0x240   :  { %3319 = vmatprep.subr.bf16.mxu0 %v19067_v31  ;;  %3425 = vmatprep.subr.bf16.mxu1 %v19070_v53  ;;  %v19115_v31 = vld [vmem:[#allocation5 + $0xbc4] ss:$16 sps:$4 sm:$0xff]   ;;  %v19118_v53 = vld [vmem:[#allocation5 + $0xbcc] ss:$16 sps:$4 sm:$0xff]  }
 0x243   :  { %3320 = vmatpush1.bf16.msra.mxu0 %v19065_v52  ;;  %3426 = vmatpush1.bf16.msra.mxu1 %v19068_v57  ;;  %v19113_v52 = vld [vmem:[#allocation5 + $0xbc0] ss:$16 sps:$4 sm:$0xff]   ;;  %v19116_v57 = vld [vmem:[#allocation5 + $0xbc8] ss:$16 sps:$4 sm:$0xff]  }
 0x244   :  { %3321 = vmatprep.subr.bf16.mxu0 %v19073_v17  ;;  %3427 = vmatprep.subr.bf16.mxu1 %v19076_v18  ;;  %v19121_v17 = vld [vmem:[#allocation5 + $0xbe4] ss:$16 sps:$4 sm:$0xff]   ;;  %v19124_v18 = vld [vmem:[#allocation5 + $0xbec] ss:$16 sps:$4 sm:$0xff]  }
 0x247   :  { %3322 = vmatpush1.bf16.msra.mxu0 %v19071_v19  ;;  %3428 = vmatpush1.bf16.msra.mxu1 %v19074_v20  ;;  %v418_v19 = vrot.slane %v289_v43, 1  ;;  %v19119_v20 = vld [vmem:[#allocation5 + $0xbe0] ss:$16 sps:$4 sm:$0xff]   ;;  %v19133_v43 = vld [vmem:[#allocation8 + $0x424] ss:$16 sps:$4 sm:$0xff]  }
 0x248   :  { %3323 = vmatprep.subr.bf16.mxu0 %v19079_v27  ;;  %3429 = vmatprep.subr.bf16.mxu1 %v19082_v28  ;;  %v19122_v27 = vld [vmem:[#allocation5 + $0xbe8] ss:$16 sps:$4 sm:$0xff]  }
 0x249   :  { %v19127_v28 = vld [vmem:[#allocation8 + $0x404] ss:$16 sps:$4 sm:$0xff]  }
 0x24b   :  { %3324 = vmatpush1.bf16.msra.mxu0 %v19077_v32  ;;  %3430 = vmatpush1.bf16.msra.mxu1 %v19080_v58  ;;  %v19130_v32 = vld [vmem:[#allocation8 + $0x40c] ss:$16 sps:$4 sm:$0xff]   ;;  %v419_v58 = vsel %vm391_vm4, %v22012_v60, %v418_v19  ;;  %v19131_v60 = vld [vmem:[#allocation8 + $0x420] ss:$16 sps:$4 sm:$0xff]  }
 0x24c   :  { %3325 = vmatprep.subr.bf16.mxu0 %v19085_v26  ;;  %3431 = vmatprep.subr.bf16.mxu1 %v19088_v8  ;;  %v443_v26 = vsel %vm391_vm4, %v418_v19, %v22006_v21  ;;  %v19125_v8 = vld [vmem:[#allocation8 + $0x400] ss:$16 sps:$4 sm:$0xff]   ;;  %v19134_v21 = vld [vmem:[#allocation8 + $0x428] ss:$16 sps:$4 sm:$0xff]  }
 0x24d   :  { %v22044_v49 = vpack.c.bf16 %v443_v26, %v419_v58  ;;  %v19167_v19 = vld [vmem:[#allocation8 + $0x4e0] ss:$16 sps:$4 sm:$0xff]   ;;  %v19176_v58 = vld [vmem:[#allocation8 + $0x508] ss:$16 sps:$4 sm:$0xff]   ;;  %v19181_v26 = vld [vmem:[#allocation8 + $0x524] ss:$16 sps:$4 sm:$0xff]  }
 0x24f   :  { %3326 = vmatpush1.bf16.msra.mxu0 %v19083_v30  ;;  %3432 = vmatpush1.bf16.msra.mxu1 %v19086_v4  ;;  %v19128_v30 = vld [vmem:[#allocation8 + $0x408] ss:$16 sps:$4 sm:$0xff]   ;;  %23736 = vst [vmem:[#allocation51_spill] sm:$0xff] %v22044_v49  ;;  %v19136_v4 = vld [vmem:[#allocation8 + $0x42c] ss:$16 sps:$4 sm:$0xff]  }
 0x250   :  { %3327 = vmatprep.subr.bf16.mxu0 %v19091_v1  ;;  %3433 = vmatprep.subr.bf16.mxu1 %v19094_v40  ;;  %v19139_v1 = vld [vmem:[#allocation8 + $0x444] ss:$16 sps:$4 sm:$0xff]   ;;  %v19142_v40 = vld [vmem:[#allocation8 + $0x44c] ss:$16 sps:$4 sm:$0xff]  }
 0x253   :  { %3328 = vmatpush1.bf16.msra.mxu0 %v19089_v42  ;;  %3434 = vmatpush1.bf16.msra.mxu1 %v19092_v44  ;;  %v19137_v42 = vld [vmem:[#allocation8 + $0x440] ss:$16 sps:$4 sm:$0xff]   ;;  %v19140_v44 = vld [vmem:[#allocation8 + $0x448] ss:$16 sps:$4 sm:$0xff]  }
 0x254   :  { %3329 = vmatprep.subr.bf16.mxu0 %v19097_v56  ;;  %3435 = vmatprep.subr.bf16.mxu1 %v19100_v2  ;;  %v19145_v56 = vld [vmem:[#allocation8 + $0x464] ss:$16 sps:$4 sm:$0xff]   ;;  %v19148_v2 = vld [vmem:[#allocation8 + $0x46c] ss:$16 sps:$4 sm:$0xff]  }
 0x257   :  { %3330 = vmatpush1.bf16.msra.mxu0 %v19095_v41  ;;  %3436 = vmatpush1.bf16.msra.mxu1 %v19098_v46  ;;  %v19143_v41 = vld [vmem:[#allocation8 + $0x460] ss:$16 sps:$4 sm:$0xff]   ;;  %v19146_v46 = vld [vmem:[#allocation8 + $0x468] ss:$16 sps:$4 sm:$0xff]  }
 0x258   :  { %3331 = vmatprep.subr.bf16.mxu0 %v19103_v39  ;;  %3437 = vmatprep.subr.bf16.mxu1 %v19106_v54  ;;  %v19151_v39 = vld [vmem:[#allocation8 + $0x484] ss:$16 sps:$4 sm:$0xff]   ;;  %v19154_v54 = vld [vmem:[#allocation8 + $0x48c] ss:$16 sps:$4 sm:$0xff]  }
 0x25b   :  { %3332 = vmatpush1.bf16.msra.mxu0 %v19101_v6  ;;  %3438 = vmatpush1.bf16.msra.mxu1 %v19104_v13  ;;  %v19149_v6 = vld [vmem:[#allocation8 + $0x480] ss:$16 sps:$4 sm:$0xff]   ;;  %v19152_v13 = vld [vmem:[#allocation8 + $0x488] ss:$16 sps:$4 sm:$0xff]  }
 0x25c   :  { %3333 = vmatprep.subr.bf16.mxu0 %v19109_v14  ;;  %3439 = vmatprep.subr.bf16.mxu1 %v19112_v15  ;;  %v19157_v14 = vld [vmem:[#allocation8 + $0x4a4] ss:$16 sps:$4 sm:$0xff]   ;;  %v19160_v15 = vld [vmem:[#allocation8 + $0x4ac] ss:$16 sps:$4 sm:$0xff]  }
 0x25f   :  { %3334 = vmatpush1.bf16.msra.mxu0 %v19107_v47  ;;  %3440 = vmatpush1.bf16.msra.mxu1 %v19110_v48  ;;  %v19155_v47 = vld [vmem:[#allocation8 + $0x4a0] ss:$16 sps:$4 sm:$0xff]   ;;  %v19158_v48 = vld [vmem:[#allocation8 + $0x4a8] ss:$16 sps:$4 sm:$0xff]  }
 0x260   :  { %3335 = vmatprep.subr.bf16.mxu0 %v19115_v31  ;;  %3441 = vmatprep.subr.bf16.mxu1 %v19118_v53  ;;  %v19163_v31 = vld [vmem:[#allocation8 + $0x4c4] ss:$16 sps:$4 sm:$0xff]   ;;  %v19166_v53 = vld [vmem:[#allocation8 + $0x4cc] ss:$16 sps:$4 sm:$0xff]  }
 0x263   :  { %3336 = vmatpush1.bf16.msra.mxu0 %v19113_v52  ;;  %3442 = vmatpush1.bf16.msra.mxu1 %v19116_v57  ;;  %v19161_v52 = vld [vmem:[#allocation8 + $0x4c0] ss:$16 sps:$4 sm:$0xff]   ;;  %v19164_v57 = vld [vmem:[#allocation8 + $0x4c8] ss:$16 sps:$4 sm:$0xff]  }
 0x264   :  { %3337 = vmatprep.subr.bf16.mxu0 %v19121_v17  ;;  %3443 = vmatprep.subr.bf16.mxu1 %v19124_v18  ;;  %v19169_v17 = vld [vmem:[#allocation8 + $0x4e4] ss:$16 sps:$4 sm:$0xff]   ;;  %v19172_v18 = vld [vmem:[#allocation8 + $0x4ec] ss:$16 sps:$4 sm:$0xff]  }
 0x267   :  { %3338 = vmatpush1.bf16.msra.mxu0 %v19119_v20  ;;  %3444 = vmatpush1.bf16.msra.mxu1 %v19122_v27  ;;  %v19170_v20 = vld [vmem:[#allocation8 + $0x4e8] ss:$16 sps:$4 sm:$0xff]   ;;  %v19175_v27 = vld [vmem:[#allocation8 + $0x504] ss:$16 sps:$4 sm:$0xff]  }
 0x268   :  { %4601 = vmatprep.subr.bf16.mxu0 %v19127_v28  ;;  %4707 = vmatprep.subr.bf16.mxu1 %v19130_v32  ;;  %v19178_v28 = vld [vmem:[#allocation8 + $0x50c] ss:$16 sps:$4 sm:$0xff]   ;;  %v19173_v32 = vld [vmem:[#allocation8 + $0x500] ss:$16 sps:$4 sm:$0xff]  }
 0x26a   :  { %15960 = vmatmul.mubr.msk.bf16.vlgmr.msra.gmra.mrb[0].mxu0 %vm21974_vm8, %v21929_v36  ;;  %15992 = vmatmul.mubr.msk.bf16.vlgmr.msra.gmra.mrb[0].mxu1 %vm21974_vm8, %v21929_v36 }
 0x26b   :  { %15964 = vmatprep.mubr.msk.bf16.mxu0 %vm21988_vm10, %v22044_v49  ;;  %15996 = vmatprep.mubr.msk.bf16.mxu1 %vm21988_vm10, %v22044_v49 }
 0x26c   :  { %4602 = vmatpush1.bf16.msra.mxu0 %v19125_v8  ;;  %4708 = vmatpush1.bf16.msra.mxu1 %v19128_v30  ;;  %v19184_v8 = vld [vmem:[#allocation8 + $0x52c] ss:$16 sps:$4 sm:$0xff]   ;;  %v19179_v30 = vld [vmem:[#allocation8 + $0x520] ss:$16 sps:$4 sm:$0xff]  }
 0x26d   :  { %4603 = vmatprep.subr.bf16.mxu0 %v19133_v43  ;;  %4709 = vmatprep.subr.bf16.mxu1 %v19136_v4  ;;  %v19182_v43 = vld [vmem:[#allocation8 + $0x528] ss:$16 sps:$4 sm:$0xff]   ;;  %v19187_v4 = vld [vmem:[#allocation8 + $0x544] ss:$16 sps:$4 sm:$0xff]  }
 0x270   :  { %4604 = vmatpush1.bf16.msra.mxu0 %v19131_v60  ;;  %4710 = vmatpush1.bf16.msra.mxu1 %v19134_v21  ;;  %v19190_v60 = vld [vmem:[#allocation8 + $0x54c] ss:$16 sps:$4 sm:$0xff]   ;;  %v19185_v21 = vld [vmem:[#allocation8 + $0x540] ss:$16 sps:$4 sm:$0xff]  }
 0x271   :  { %4605 = vmatprep.subr.bf16.mxu0 %v19139_v1  ;;  %4711 = vmatprep.subr.bf16.mxu1 %v19142_v40  ;;  %v19188_v1 = vld [vmem:[#allocation8 + $0x548] ss:$16 sps:$4 sm:$0xff]   ;;  %v19193_v40 = vld [vmem:[#allocation8 + $0x564] ss:$16 sps:$4 sm:$0xff]  }
 0x272   :  { %15968 = vmatmul.mubr.msk.bf16.gmra.mrb[4].mxu0 %vm21988_vm10, %v21963_v5  ;;  %16000 = vmatmul.mubr.msk.bf16.gmra.mrb[4].mxu1 %vm21988_vm10, %v21963_v5 }
 0x274   :  { %4606 = vmatpush1.bf16.msra.mxu0 %v19137_v42  ;;  %4712 = vmatpush1.bf16.msra.mxu1 %v19140_v44  ;;  %v19196_v42 = vld [vmem:[#allocation8 + $0x56c] ss:$16 sps:$4 sm:$0xff]   ;;  %v19191_v44 = vld [vmem:[#allocation8 + $0x560] ss:$16 sps:$4 sm:$0xff]  }
 0x275   :  { %4607 = vmatprep.subr.bf16.mxu0 %v19145_v56  ;;  %4713 = vmatprep.subr.bf16.mxu1 %v19148_v2  ;;  %v19194_v56 = vld [vmem:[#allocation8 + $0x568] ss:$16 sps:$4 sm:$0xff]   ;;  %v19199_v2 = vld [vmem:[#allocation8 + $0x584] ss:$16 sps:$4 sm:$0xff]  }
 0x278   :  { %4608 = vmatpush1.bf16.msra.mxu0 %v19143_v41  ;;  %4714 = vmatpush1.bf16.msra.mxu1 %v19146_v46  ;;  %v19202_v41 = vld [vmem:[#allocation8 + $0x58c] ss:$16 sps:$4 sm:$0xff]   ;;  %v19197_v46 = vld [vmem:[#allocation8 + $0x580] ss:$16 sps:$4 sm:$0xff]  }
 0x279   :  { %4609 = vmatprep.subr.bf16.mxu0 %v19151_v39  ;;  %4715 = vmatprep.subr.bf16.mxu1 %v19154_v54  ;;  %v19200_v39 = vld [vmem:[#allocation8 + $0x588] ss:$16 sps:$4 sm:$0xff]   ;;  %v19205_v54 = vld [vmem:[#allocation8 + $0x5a4] ss:$16 sps:$4 sm:$0xff]  }
 0x27c   :  { %4610 = vmatpush1.bf16.msra.mxu0 %v19149_v6  ;;  %4716 = vmatpush1.bf16.msra.mxu1 %v19152_v13  ;;  %v19208_v6 = vld [vmem:[#allocation8 + $0x5ac] ss:$16 sps:$4 sm:$0xff]   ;;  %v19203_v13 = vld [vmem:[#allocation8 + $0x5a0] ss:$16 sps:$4 sm:$0xff]  }
 0x27d   :  { %4611 = vmatprep.subr.bf16.mxu0 %v19157_v14  ;;  %4717 = vmatprep.subr.bf16.mxu1 %v19160_v15  ;;  %v19206_v14 = vld [vmem:[#allocation8 + $0x5a8] ss:$16 sps:$4 sm:$0xff]   ;;  %v19211_v15 = vld [vmem:[#allocation8 + $0x5c4] ss:$16 sps:$4 sm:$0xff]  }
 0x280   :  { %4612 = vmatpush1.bf16.msra.mxu0 %v19155_v47  ;;  %4718 = vmatpush1.bf16.msra.mxu1 %v19158_v48  ;;  %v19214_v47 = vld [vmem:[#allocation8 + $0x5cc] ss:$16 sps:$4 sm:$0xff]   ;;  %v19209_v48 = vld [vmem:[#allocation8 + $0x5c0] ss:$16 sps:$4 sm:$0xff]  }
 0x281   :  { %4613 = vmatprep.subr.bf16.mxu0 %v19163_v31  ;;  %4719 = vmatprep.subr.bf16.mxu1 %v19166_v53  ;;  %v19212_v31 = vld [vmem:[#allocation8 + $0x5c8] ss:$16 sps:$4 sm:$0xff]   ;;  %v19217_v53 = vld [vmem:[#allocation8 + $0x5e4] ss:$16 sps:$4 sm:$0xff]  }
 0x284   :  { %4614 = vmatpush1.bf16.msra.mxu0 %v19161_v52  ;;  %4720 = vmatpush1.bf16.msra.mxu1 %v19164_v57  ;;  %v19220_v52 = vld [vmem:[#allocation8 + $0x5ec] ss:$16 sps:$4 sm:$0xff]   ;;  %v19215_v57 = vld [vmem:[#allocation8 + $0x5e0] ss:$16 sps:$4 sm:$0xff]  }
 0x285   :  { %4615 = vmatprep.subr.bf16.mxu0 %v19169_v17  ;;  %4721 = vmatprep.subr.bf16.mxu1 %v19172_v18  ;;  %v19218_v17 = vld [vmem:[#allocation8 + $0x5e8] ss:$16 sps:$4 sm:$0xff]   ;;  %v19223_v18 = vld [vmem:[#allocation8 + $0x604] ss:$16 sps:$4 sm:$0xff]  }
 0x288   :  { %4616 = vmatpush1.bf16.msra.mxu0 %v19167_v19  ;;  %4722 = vmatpush1.bf16.msra.mxu1 %v19170_v20  ;;  %v19226_v19 = vld [vmem:[#allocation8 + $0x60c] ss:$16 sps:$4 sm:$0xff]  }
 0x289   :  { %4617 = vmatprep.subr.bf16.mxu0 %v19175_v27  ;;  %4723 = vmatprep.subr.bf16.mxu1 %v19178_v28  ;;  %v3482_v20 = vld [vmem:[#allocation7] sm:$0xf]  ;;  %v22065_v27 = vsub.s32 0, %v21772_v61  ;;  %v22068_v28 = vsub.s32 2, %v21772_v61 }
 0x28c   :  { %4618 = vmatpush1.bf16.msra.mxu0 %v19173_v32  ;;  %4724 = vmatpush1.bf16.msra.mxu1 %v19176_v58  ;;  %v22071_v32 = vsub.s32 1, %v21772_v61  ;;  %v22074_v58 = vsub.s32 3, %v21772_v61 }
 0x28d   :  { %4619 = vmatprep.subr.bf16.mxu0 %v19181_v26  ;;  %4725 = vmatprep.subr.bf16.mxu1 %v19184_v8  ;;  %v3487_v26 = vrot.slane %v3482_v20, %v22065_v27  ;;  %v3495_v8 = vrot.slane %v3482_v20, %v22068_v28 }
 0x28e   :  { %23737 = vst [vmem:[#allocation52_spill] sm:$0xff] %v22071_v32  ;;  %23738 = vst [vmem:[#allocation53_spill] sm:$0xff] %v22074_v58 }
 0x290   :  { %4620 = vmatpush1.bf16.msra.mxu0 %v19179_v30  ;;  %4726 = vmatpush1.bf16.msra.mxu1 %v19182_v43  ;;  %v22079_v30 = vrot.slane %v3482_v20, %v22071_v32  ;;  %v22082_v43 = vrot.slane %v3482_v20, %v22074_v58 }
 0x291   :  { %4621 = vmatprep.subr.bf16.mxu0 %v19187_v4  ;;  %4727 = vmatprep.subr.bf16.mxu1 %v19190_v60 }
 0x294   :  { %4622 = vmatpush1.bf16.msra.mxu0 %v19185_v21  ;;  %4728 = vmatpush1.bf16.msra.mxu1 %v19188_v1 }
 0x295   :  { %4623 = vmatprep.subr.bf16.mxu0 %v19193_v40  ;;  %4729 = vmatprep.subr.bf16.mxu1 %v19196_v42 }
 0x298   :  { %4624 = vmatpush1.bf16.msra.mxu0 %v19191_v44  ;;  %4730 = vmatpush1.bf16.msra.mxu1 %v19194_v56 }
 0x299   :  { %4625 = vmatprep.subr.bf16.mxu0 %v19199_v2  ;;  %4731 = vmatprep.subr.bf16.mxu1 %v19202_v41 }
 0x29c   :  { %4626 = vmatpush1.bf16.msra.mxu0 %v19197_v46  ;;  %4732 = vmatpush1.bf16.msra.mxu1 %v19200_v39 }
 0x29d   :  { %4627 = vmatprep.subr.bf16.mxu0 %v19205_v54  ;;  %4733 = vmatprep.subr.bf16.mxu1 %v19208_v6 }
 0x2a0   :  { %4628 = vmatpush1.bf16.msra.mxu0 %v19203_v13  ;;  %4734 = vmatpush1.bf16.msra.mxu1 %v19206_v14 }
 0x2a1   :  { %4629 = vmatprep.subr.bf16.mxu0 %v19211_v15  ;;  %4735 = vmatprep.subr.bf16.mxu1 %v19214_v47 }
 0x2a4   :  { %4630 = vmatpush1.bf16.msra.mxu0 %v19209_v48  ;;  %4736 = vmatpush1.bf16.msra.mxu1 %v19212_v31 }
 0x2a5   :  { %4631 = vmatprep.subr.bf16.mxu0 %v19217_v53  ;;  %4737 = vmatprep.subr.bf16.mxu1 %v19220_v52 }
 0x2a8   :  { %4632 = vmatpush1.bf16.msra.mxu0 %v19215_v57  ;;  %4738 = vmatpush1.bf16.msra.mxu1 %v19218_v17 }
 0x2a9   :  { %4654 = vmatprep.subr.bf16.mxu0 %v19223_v18  ;;  %4760 = vmatprep.subr.bf16.mxu1 %v19226_v19 }
 0x33d   :  { %v3341_v4 = vpop.f32.mrb[0].mxu0  ;;  %v3447_v60 = vpop.f32.mrb[0].mxu1 }
 0x33e   :  { %v3504_v21 = vadd.f32 %v3487_v26, %v3341_v4  ;;  %v3506_v1 = vadd.f32 %v3495_v8, %v3447_v60  ;;  %v3343_v40 = vpop.f32.mrb[1].mxu0  ;;  %v3449_v42 = vpop.f32.mrb[1].mxu1 }
 0x33f   :  { %v3505_v44 = vadd.f32 %v22079_v30, %v3343_v40  ;;  %v3345_v61 = vpop.f32.mrb[2].mxu0  ;;  %v3451_v56 = vpop.f32.mrb[2].mxu1  ;;  %v3507_v2 = vadd.f32 %v22082_v43, %v3449_v42 }
 0x340   :  { %v3508_v41 = vadd.f32 %v3487_v26, %v3345_v61  ;;  %v3510_v46 = vadd.f32 %v3495_v8, %v3451_v56  ;;  %v3347_v39 = vpop.f32.mrb[3].mxu0  ;;  %v3453_v54 = vpop.f32.mrb[3].mxu1  ;;  %v22086_v6 = vmax.f32 %v3504_v21, 0.0  ;;  %v22088_v13 = vmax.f32 %v3506_v1, 0.0 }
 0x341   :  { %v22090_v14 = vmax.f32 %v3505_v44, 0.0  ;;  %v3509_v15 = vadd.f32 %v22079_v30, %v3347_v39  ;;  %v22093_v47 = vmax.f32 %v3507_v2, 0.0  ;;  %v3511_v53 = vadd.f32 %v22082_v43, %v3453_v54 }
 0x342   :  { %v22095_v48 = vmax.f32 %v3508_v41, 0.0  ;;  %v22097_v31 = vmax.f32 %v3510_v46, 0.0  ;;  %v23663_v52 = vrot.slane %v22086_v6, 7  ;;  %v23666_v57 = vrot.slane %v22086_v6, 1 }
 0x343   :  { %v23676_v17 = vrot.slane %v22088_v13, 7  ;;  %v22115_v2 = vmax.f32 %v3509_v15, 0.0  ;;  %v23739_v39 = vrot.slane %v22088_v13, 1  ;;  %v22134_v36 = vmax.f32 %v3511_v53, 0.0 }
 0x344   :  { %v23662_v4 = vrot.slane %v22095_v48, 7  ;;  %v3621_v60 = vrot.slane %v22095_v48, 1  ;;  %v3824_v21 = vpack.c.bf16 %v22095_v48, %v22086_v6  ;;  %v23675_v1 = vrot.slane %v22097_v31, 7 }
 0x345   :  { %v3351_v19 = vpop.f32.mrb[4].mxu0  ;;  %v3457_v20 = vpop.f32.mrb[4].mxu1  ;;  %v3627_v61 = vrot.slane %v22097_v31, 1  ;;  %v22113_v56 = vpack.c.bf16 %v22097_v31, %v22088_v13  ;;  %v3825_v53 = vpack.c.bf16 %v22115_v2, %v22090_v14  ;;  %v23742_v7 = vrot.slane %v22090_v14, 7 }
 0x346   :  { %v3353_v40 = vpop.f32.mrb[5].mxu0  ;;  %v3459_v42 = vpop.f32.mrb[5].mxu1  ;;  %v3565_v54 = vsel %vm318_vm0, %v23663_v52, %v23662_v4  ;;  %v3622_v44 = vsel %vm391_vm4, %v23666_v57, %v3621_v60  ;;  %v3569_v15 = vsel %vm318_vm0, %v23676_v17, %v23675_v1  ;;  %v3512_v3 = vadd.f32 %v3487_v26, %v3351_v19  ;;  %v19221_v52 = vld [vmem:[#allocation8 + $0x600] ss:$16 sps:$4 sm:$0xff]   ;;  %v19232_v1 = vld [vmem:[#allocation8 + $0x62c] ss:$16 sps:$4 sm:$0xff]  }
 0x347   :  { %v3355_v41 = vpop.f32.mrb[6].mxu0  ;;  %v3461_v46 = vpop.f32.mrb[6].mxu1  ;;  %v3628_v49 = vsel %vm391_vm4, %v23739_v39, %v3627_v61  ;;  %v3514_v4 = vadd.f32 %v3495_v8, %v3457_v20  ;;  %v3513_v11 = vadd.f32 %v22079_v30, %v3353_v40  ;;  %v3515_v57 = vadd.f32 %v22082_v43, %v3459_v42  ;;  %4633 = vmatprep.mubr.bf16.mxu0 %v3825_v53  ;;  %v19235_v17 = vld [vmem:[#allocation8 + $0x644] ss:$16 sps:$4 sm:$0xff]  }
 0x348   :  { %v3357_v18 = vpop.f32.mrb[7].mxu0  ;;  %v3463_v5 = vpop.f32.mrb[7].mxu1  ;;  %v3516_v29 = vadd.f32 %v3487_v26, %v3355_v41  ;;  %v3518_v62 = vadd.f32 %v3495_v8, %v3461_v46  ;;  %v22139_v12 = vmax.f32 %v3512_v3, 0.0  ;;  %v3566_v8 = vrot.slane %v22115_v2, 7  ;;  %4739 = vmatprep.mubr.bf16.mxu1 %v3825_v53  ;;  %v19227_v41 = vld [vmem:[#allocation8 + $0x620] ss:$16 sps:$4 sm:$0xff]   ;;  %4634 = vmatmul.mubr.bf16.vlgmr.msra.gmra.mrb[8].mxu0 %v3824_v21 }
 0x349   :  { %v22141_v10 = vmax.f32 %v3514_v4, 0.0  ;;  %v22146_v20 = vmax.f32 %v3513_v11, 0.0  ;;  %v3517_v4 = vadd.f32 %v22079_v30, %v3357_v18  ;;  %v19230_v46 = vld [vmem:[#allocation8 + $0x628] ss:$16 sps:$4 sm:$0xff]   ;;  %4740 = vmatmul.mubr.bf16.vlgmr.msra.gmra.mrb[8].mxu1 %v3824_v21  ;;  %4655 = vmatpush1.bf16.msra.mxu0 %v19221_v52  ;;  %v19244_v11 = vld [vmem:[#allocation8 + $0x66c] ss:$16 sps:$4 sm:$0xff]   ;;  %v23743_v35 = vmov %v23742_v7 }
 0x34a   :  { %v22148_v40 = vmax.f32 %v3516_v29, 0.0  ;;  %v22150_v26 = vmax.f32 %v3518_v62, 0.0  ;;  %v23681_v42 = vrot.slane %v22139_v12, 1  ;;  %v22159_v62 = vmax.f32 %v3515_v57, 0.0  ;;  %4761 = vmatpush1.bf16.msra.mxu1 %v19224_v38  ;;  %4656 = vmatprep.subr.bf16.mxu0 %v19229_v22 }
 0x34b   :  { %v23682_v3 = vrot.slane %v22141_v10, 1  ;;  %v3572_v19 = vrot.slane %v22139_v12, 7  ;;  %v3574_v21 = vrot.slane %v22146_v20, 7  ;;  %4762 = vmatprep.subr.bf16.mxu1 %v19232_v1  ;;  %v3519_v38 = vadd.f32 %v22082_v43, %v3463_v5  ;;  %v19233_v1 = vld [vmem:[#allocation8 + $0x640] ss:$16 sps:$4 sm:$0xff]  }
 0x34c   :  { %v3633_v53 = vsel %vm391_vm4, %v3621_v60, %v23681_v42  ;;  %v3540_v18 = vrot.slane %v22148_v40, 7  ;;  %v23683_v29 = vrot.slane %v22150_v26, 7  ;;  %v19238_v60 = vld [vmem:[#allocation8 + $0x64c] ss:$16 sps:$4 sm:$0xff]   ;;  %v23740_v42 = vrot.slane %v22086_v6, 7 }
 0x34d   :  { %v3637_v30 = vsel %vm391_vm4, %v3627_v61, %v23682_v3  ;;  %v22169_v39 = vpack.c.bf16 %v3633_v53, %v3622_v44  ;;  %v22178_v3 = vmax.f32 %v3517_v4, 0.0  ;;  %v23741_v44 = vrot.slane %v22088_v13, 7  ;;  %4657 = vmatpush1.bf16.msra.mxu0 %v19227_v41 }
 0x34e   :  { %v22171_v57 = vpack.c.bf16 %v3637_v30, %v3628_v49  ;;  %v3600_v61 = vsel %vm318_vm0, %v3540_v18, %v23740_v42  ;;  %v3828_v49 = vpack.c.bf16 %v22148_v40, %v22139_v12  ;;  %v3827_v53 = vpack.c.bf16 %v22134_v36, %v22093_v47  ;;  %4763 = vmatpush1.bf16.msra.mxu1 %v19230_v46  ;;  %v19236_v30 = vld [vmem:[#allocation8 + $0x648] ss:$16 sps:$4 sm:$0xff]  }
 0x34f   :  { %v22183_v52 = vpack.c.bf16 %v3565_v54, %v3600_v61  ;;  %v3602_v22 = vsel %vm318_vm0, %v23683_v29, %v23741_v44  ;;  %v22194_v42 = vpack.c.bf16 %v22150_v26, %v22141_v10  ;;  %v3576_v5 = vrot.slane %v22141_v10, 7  ;;  %4658 = vmatprep.subr.bf16.mxu0 %v19235_v17  ;;  %4764 = vmatprep.subr.bf16.mxu1 %v19238_v60  ;;  %v19241_v29 = vld [vmem:[#allocation8 + $0x664] ss:$16 sps:$4 sm:$0xff]  }
 0x350   :  { %v22197_v43 = vpack.c.bf16 %v3569_v15, %v3602_v22  ;;  %v3541_v54 = vrot.slane %v22178_v3, 7  ;;  %v22200_v4 = vmax.f32 %v3519_v38, 0.0  ;;  %v3578_v61 = vrot.slane %v22159_v62, 7 }
 0x351   :  { %v3829_v44 = vpack.c.bf16 %v22178_v3, %v22146_v20  ;;  %v3567_v15 = vsel %vm318_vm0, %v23742_v7, %v3566_v8  ;;  %v3575_v22 = vsel %vm318_vm0, %v3566_v8, %v3574_v21  ;;  %v3634_v38 = vrot.slane %v22146_v20, 1  ;;  %4659 = vmatpush1.bf16.msra.mxu0 %v19233_v1 }
 0x352   :  { %v3543_v41 = vrot.slane %v22200_v4, 7  ;;  %v22213_v46 = vpack.c.bf16 %v22200_v4, %v22159_v62  ;;  %v3601_v17 = vsel %vm318_vm0, %v3541_v54, %v23743_v35  ;;  %v3638_v60 = vrot.slane %v22159_v62, 1  ;;  %4765 = vmatpush1.bf16.msra.mxu1 %v19236_v30  ;;  %4660 = vmatprep.subr.bf16.mxu0 %v19241_v29 }
 0x353   :  { %4643 = vmatprep.mubr.bf16.mxu0 %v3829_v44  ;;  %4749 = vmatprep.mubr.bf16.mxu1 %v3829_v44  ;;  %v22219_v7 = vpack.c.bf16 %v3567_v15, %v3601_v17  ;;  %v3581_v8 = vsel %vm318_vm0, %v3574_v21, %v3541_v54  ;;  %v23744_v20 = vrot.slane %v22095_v48, 7  ;;  %v3642_v24 = vrot.slane %v22178_v3, 1  ;;  %v19242_v48 = vld [vmem:[#allocation8 + $0x668] ss:$16 sps:$4 sm:$0xff]   ;;  %v19247_v54 = vld [vmem:[#allocation8 + $0x684] ss:$16 sps:$4 sm:$0xff]  }
 0x354   :  { %4644 = vmatmul.mubr.bf16.gmra.mrb[12].mxu0 %v3828_v49  ;;  %4750 = vmatmul.mubr.bf16.gmra.mrb[12].mxu1 %v3828_v49  ;;  %v22226_v16 = vpack.c.bf16 %v3581_v8, %v3575_v22  ;;  %v3580_v35 = vsel %vm318_vm0, %v3572_v19, %v3540_v18  ;;  %v23745_v62 = vrot.slane %v22134_v36, 7  ;;  %v23746_v44 = vrot.slane %v22093_v47, 7  ;;  %v19250_v8 = vld [vmem:[#allocation8 + $0x68c] ss:$16 sps:$4 sm:$0xff]  }
 0x355   :  { %v3573_v45 = vsel %vm318_vm0, %v23744_v20, %v3572_v19  ;;  %v3640_v21 = vrot.slane %v22148_v40, 1  ;;  %v3644_v22 = vrot.slane %v22150_v26, 1  ;;  %4686 = vmatprep.mubr.bf16.mxu0 %v3827_v53  ;;  %4792 = vmatprep.mubr.bf16.mxu1 %v3827_v53  ;;  %v3583_v1 = vsel %vm318_vm0, %v3578_v61, %v3543_v41 }
 0x356   :  { %v3571_v15 = vsel %vm318_vm0, %v23746_v44, %v23745_v62  ;;  %v22235_v17 = vpack.c.bf16 %v3580_v35, %v3573_v45  ;;  %v23747_v3 = vmov %v23746_v44  ;;  %v23748_v19 = vmov %v23745_v62  ;;  %4766 = vmatprep.subr.bf16.mxu1 %v19244_v11  ;;  %v19245_v35 = vld [vmem:[#allocation8 + $0x680] ss:$16 sps:$4 sm:$0xff]   ;;  %v19248_v62 = vld [vmem:[#allocation8 + $0x688] ss:$16 sps:$4 sm:$0xff]   ;;  %4661 = vmatpush1.bf16.msra.mxu0 %v19239_v59 }
 0x357   :  { %v3603_v49 = vsel %vm318_vm0, %v3543_v41, %v23747_v3  ;;  %v3579_v18 = vsel %vm318_vm0, %v23748_v19, %v3578_v61  ;;  %v23749_v45 = vrot.slane %v22097_v31, 7  ;;  %v3646_v20 = vrot.slane %v22200_v4, 1  ;;  %v19253_v41 = vld [vmem:[#allocation8 + $0x6a4] ss:$16 sps:$4 sm:$0xff]   ;;  %4767 = vmatpush1.bf16.msra.mxu1 %v19242_v48  ;;  %4662 = vmatprep.subr.bf16.mxu0 %v19247_v54 }
 0x358   :  { %v22244_v40 = vpack.c.bf16 %v3571_v15, %v3603_v49  ;;  %v22251_v44 = vpack.c.bf16 %v3583_v1, %v3579_v18  ;;  %v23750_v3 = vrot.slane %v22150_v26, 7  ;;  %v23751_v15 = vrot.slane %v22115_v2, 1  ;;  %v19256_v49 = vld [vmem:[#allocation8 + $0x6ac] ss:$16 sps:$4 sm:$0xff]   ;;  %4768 = vmatprep.subr.bf16.mxu1 %v19250_v8 }
 0x359   :  { %v3577_v30 = vsel %vm318_vm0, %v23749_v45, %v3576_v5  ;;  %v23752_v61 = vrot.slane %v22090_v14, 1  ;;  %v3643_v4 = vsel %vm391_vm4, %v3634_v38, %v3642_v24  ;;  %v23755_v45 = vrot.slane %v22139_v12, 1  ;;  %v19254_v12 = vld [vmem:[#allocation8 + $0x6a8] ss:$16 sps:$4 sm:$0xff]  }
 0x35a   :  { %v3582_v53 = vsel %vm318_vm0, %v3576_v5, %v23750_v3  ;;  %v23753_v11 = vmov %v23751_v15  ;;  %v23756_v2 = vrot.slane %v22086_v6, 1  ;;  %v23757_v14 = vrot.slane %v22134_v36, 1  ;;  %4663 = vmatpush1.bf16.msra.mxu0 %v19245_v35  ;;  %v19272_v35 = vld [vmem:[#allocation8 + $0x708] ss:$16 sps:$4 sm:$0xff]  }
 0x35b   :  { %v3625_v31 = vsel %vm391_vm4, %v23752_v61, %v23751_v15  ;;  %v22261_v19 = vpack.c.bf16 %v3582_v53, %v3577_v30  ;;  %v3635_v29 = vsel %vm391_vm4, %v23753_v11, %v3634_v38  ;;  %v23754_v26 = vmov %v23752_v61  ;;  %v19251_v53 = vld [vmem:[#allocation8 + $0x6a0] ss:$16 sps:$4 sm:$0xff]   ;;  %v19259_v61 = vld [vmem:[#allocation8 + $0x6c4] ss:$16 sps:$4 sm:$0xff]   ;;  %4769 = vmatpush1.bf16.msra.mxu1 %v19248_v62 }
 0x35c   :  { %v3669_v5 = vsel %vm391_vm4, %v3642_v24, %v23754_v26  ;;  %v22270_v18 = vpack.c.bf16 %v3635_v29, %v3625_v31  ;;  %v3641_v30 = vsel %vm391_vm4, %v23755_v45, %v3640_v21  ;;  %v3668_v38 = vsel %vm391_vm4, %v3640_v21, %v23756_v2  ;;  %v19262_v31 = vld [vmem:[#allocation8 + $0x6cc] ss:$16 sps:$4 sm:$0xff]   ;;  %4664 = vmatprep.subr.bf16.mxu0 %v19253_v41  ;;  %v19271_v2 = vld [vmem:[#allocation8 + $0x704] ss:$16 sps:$4 sm:$0xff]  }
 0x35d   :  { %v22272_v1 = vpack.c.bf16 %v3669_v5, %v3643_v4  ;;  %v23758_v24 = vrot.slane %v22093_v47, 1  ;;  %v23759_v48 = vmov %v23757_v14  ;;  %v22288_v15 = vpack.c.bf16 %v3668_v38, %v3641_v30  ;;  %4770 = vmatprep.subr.bf16.mxu1 %v19256_v49  ;;  %v19257_v47 = vld [vmem:[#allocation8 + $0x6c0] ss:$16 sps:$4 sm:$0xff]   ;;  %v19268_v45 = vld [vmem:[#allocation8 + $0x6ec] ss:$16 sps:$4 sm:$0xff]  }
 0x35e   :  { %v3639_v3 = vsel %vm391_vm4, %v23759_v48, %v3638_v60  ;;  %v3647_v6 = vsel %vm391_vm4, %v3638_v60, %v3646_v20  ;;  %v23761_v36 = vrot.slane %v22141_v10, 1  ;;  %v23762_v4 = vrot.slane %v22088_v13, 1  ;;  %v19260_v60 = vld [vmem:[#allocation8 + $0x6c8] ss:$16 sps:$4 sm:$0xff]   ;;  %4665 = vmatpush1.bf16.msra.mxu0 %v19251_v53  ;;  %v19263_v10 = vld [vmem:[#allocation8 + $0x6e0] ss:$16 sps:$4 sm:$0xff]  }
 0x35f   :  { %v3631_v59 = vsel %vm391_vm4, %v23758_v24, %v23757_v14  ;;  %v23760_v21 = vmov %v23758_v24  ;;  %4771 = vmatpush1.bf16.msra.mxu1 %v19254_v12  ;;  %4666 = vmatprep.subr.bf16.mxu0 %v19259_v61  ;;  %v19266_v30 = vld [vmem:[#allocation8 + $0x6e8] ss:$16 sps:$4 sm:$0xff]   ;;  %v19274_v13 = vld [vmem:[#allocation8 + $0x70c] ss:$16 sps:$4 sm:$0xff]   ;;  %v19277_v62 = vld [vmem:[#allocation8 + $0x724] ss:$16 sps:$4 sm:$0xff]  }
 0x360   :  { %v22290_v54 = vpack.c.bf16 %v3639_v3, %v3631_v59  ;;  %v3671_v8 = vsel %vm391_vm4, %v3646_v20, %v23760_v21  ;;  %v3645_v29 = vsel %vm391_vm4, %v23761_v36, %v3644_v22  ;;  %v3670_v26 = vsel %vm391_vm4, %v3644_v22, %v23762_v4  ;;  %v19265_v20 = vld [vmem:[#allocation8 + $0x6e4] ss:$16 sps:$4 sm:$0xff]   ;;  %4772 = vmatprep.subr.bf16.mxu1 %v19262_v31  ;;  %v19269_v22 = vld [vmem:[#allocation8 + $0x700] ss:$16 sps:$4 sm:$0xff]   ;;  %v19280_v41 = vld [vmem:[#allocation8 + $0x72c] ss:$16 sps:$4 sm:$0xff]  }
 0x361   :  { %v22296_v11 = vpack.c.bf16 %v3671_v8, %v3647_v6  ;;  %v22304_v5 = vpack.c.bf16 %v3670_v26, %v3645_v29  ;;  %v19275_v49 = vld [vmem:[#allocation8 + $0x720] ss:$16 sps:$4 sm:$0xff]   ;;  %v19278_v38 = vld [vmem:[#allocation8 + $0x728] ss:$16 sps:$4 sm:$0xff]   ;;  %v19283_v14 = vld [vmem:[#allocation8 + $0x744] ss:$16 sps:$4 sm:$0xff]  }
 0x362   :  { %4667 = vmatpush1.bf16.msra.mxu0 %v19257_v47  ;;  %v19286_v24 = vld [vmem:[#allocation8 + $0x74c] ss:$16 sps:$4 sm:$0xff]   ;;  %v19281_v59 = vld [vmem:[#allocation8 + $0x740] ss:$16 sps:$4 sm:$0xff]   ;;  %v19284_v48 = vld [vmem:[#allocation8 + $0x748] ss:$16 sps:$4 sm:$0xff]  }
 0x363   :  { %4773 = vmatpush1.bf16.msra.mxu1 %v19260_v60  ;;  %4668 = vmatprep.subr.bf16.mxu0 %v19265_v20  ;;  %v19289_v3 = vld [vmem:[#allocation8 + $0x764] ss:$16 sps:$4 sm:$0xff]   ;;  %v19292_v53 = vld [vmem:[#allocation8 + $0x76c] ss:$16 sps:$4 sm:$0xff]   ;;  %v19287_v12 = vld [vmem:[#allocation8 + $0x760] ss:$16 sps:$4 sm:$0xff]  }
 0x364   :  { %4774 = vmatprep.subr.bf16.mxu1 %v19268_v45  ;;  %v19290_v6 = vld [vmem:[#allocation8 + $0x768] ss:$16 sps:$4 sm:$0xff]   ;;  %v19295_v21 = vld [vmem:[#allocation8 + $0x784] ss:$16 sps:$4 sm:$0xff]   ;;  %v19298_v8 = vld [vmem:[#allocation8 + $0x78c] ss:$16 sps:$4 sm:$0xff]  }
 0x365   :  { %v19293_v61 = vld [vmem:[#allocation8 + $0x780] ss:$16 sps:$4 sm:$0xff]   ;;  %v19296_v31 = vld [vmem:[#allocation8 + $0x788] ss:$16 sps:$4 sm:$0xff]   ;;  %v19301_v36 = vld [vmem:[#allocation8 + $0x7a4] ss:$16 sps:$4 sm:$0xff]  }
 0x366   :  { %4669 = vmatpush1.bf16.msra.mxu0 %v19263_v10  ;;  %v19304_v29 = vld [vmem:[#allocation8 + $0x7ac] ss:$16 sps:$4 sm:$0xff]   ;;  %v19299_v4 = vld [vmem:[#allocation8 + $0x7a0] ss:$16 sps:$4 sm:$0xff]   ;;  %v19302_v26 = vld [vmem:[#allocation8 + $0x7a8] ss:$16 sps:$4 sm:$0xff]  }
 0x367   :  { %4775 = vmatpush1.bf16.msra.mxu1 %v19266_v30  ;;  %4670 = vmatprep.subr.bf16.mxu0 %v19271_v2  ;;  %v19307_v47 = vld [vmem:[#allocation8 + $0x7c4] ss:$16 sps:$4 sm:$0xff]   ;;  %v19310_v60 = vld [vmem:[#allocation8 + $0x7cc] ss:$16 sps:$4 sm:$0xff]   ;;  %v19305_v20 = vld [vmem:[#allocation8 + $0x7c0] ss:$16 sps:$4 sm:$0xff]  }
 0x368   :  { %4776 = vmatprep.subr.bf16.mxu1 %v19274_v13  ;;  %v19308_v45 = vld [vmem:[#allocation8 + $0x7c8] ss:$16 sps:$4 sm:$0xff]   ;;  %v19313_v10 = vld [vmem:[#allocation8 + $0x7e4] ss:$16 sps:$4 sm:$0xff]   ;;  %v19316_v30 = vld [vmem:[#allocation8 + $0x7ec] ss:$16 sps:$4 sm:$0xff]  }
 0x369   :  { %v19311_v2 = vld [vmem:[#allocation8 + $0x7e0] ss:$16 sps:$4 sm:$0xff]   ;;  %v19314_v13 = vld [vmem:[#allocation8 + $0x7e8] ss:$16 sps:$4 sm:$0xff]  }
 0x36a   :  { %4671 = vmatpush1.bf16.msra.mxu0 %v19269_v22  ;;  %v19319_v22 = vld [vmem:[#allocation8 + $0x4] ss:$16 sps:$4 sm:$0xff]  }
 0x36b   :  { %4777 = vmatpush1.bf16.msra.mxu1 %v19272_v35  ;;  %4672 = vmatprep.subr.bf16.mxu0 %v19277_v62  ;;  %v19322_v35 = vld [vmem:[#allocation8 + $0xc] ss:$16 sps:$4 sm:$0xff]   ;;  %v19317_v62 = vld [vmem:[#allocation8] ss:$16 sps:$4 sm:$0xff]  }
 0x36c   :  { %4778 = vmatprep.subr.bf16.mxu1 %v19280_v41  ;;  %v19320_v41 = vld [vmem:[#allocation8 + $0x8] ss:$16 sps:$4 sm:$0xff]  }
 0x36e   :  { %4673 = vmatpush1.bf16.msra.mxu0 %v19275_v49  ;;  %v19325_v49 = vld [vmem:[#allocation8 + $0x24] ss:$16 sps:$4 sm:$0xff]  }
 0x36f   :  { %4779 = vmatpush1.bf16.msra.mxu1 %v19278_v38  ;;  %4674 = vmatprep.subr.bf16.mxu0 %v19283_v14  ;;  %v19328_v38 = vld [vmem:[#allocation8 + $0x2c] ss:$16 sps:$4 sm:$0xff]   ;;  %v19323_v14 = vld [vmem:[#allocation8 + $0x20] ss:$16 sps:$4 sm:$0xff]  }
 0x370   :  { %4780 = vmatprep.subr.bf16.mxu1 %v19286_v24  ;;  %v19326_v24 = vld [vmem:[#allocation8 + $0x28] ss:$16 sps:$4 sm:$0xff]  }
 0x372   :  { %4675 = vmatpush1.bf16.msra.mxu0 %v19281_v59  ;;  %v19331_v59 = vld [vmem:[#allocation8 + $0x44] ss:$16 sps:$4 sm:$0xff]  }
 0x373   :  { %4781 = vmatpush1.bf16.msra.mxu1 %v19284_v48  ;;  %4676 = vmatprep.subr.bf16.mxu0 %v19289_v3  ;;  %v19334_v48 = vld [vmem:[#allocation8 + $0x4c] ss:$16 sps:$4 sm:$0xff]   ;;  %v19329_v3 = vld [vmem:[#allocation8 + $0x40] ss:$16 sps:$4 sm:$0xff]  }
 0x374   :  { %4782 = vmatprep.subr.bf16.mxu1 %v19292_v53  ;;  %v19332_v53 = vld [vmem:[#allocation8 + $0x48] ss:$16 sps:$4 sm:$0xff]  }
 0x376   :  { %4677 = vmatpush1.bf16.msra.mxu0 %v19287_v12  ;;  %v19337_v12 = vld [vmem:[#allocation8 + $0x64] ss:$16 sps:$4 sm:$0xff]  }
 0x377   :  { %4783 = vmatpush1.bf16.msra.mxu1 %v19290_v6  ;;  %4678 = vmatprep.subr.bf16.mxu0 %v19295_v21  ;;  %v19340_v6 = vld [vmem:[#allocation8 + $0x6c] ss:$16 sps:$4 sm:$0xff]   ;;  %v19343_v21 = vld [vmem:[#allocation8 + $0x84] ss:$16 sps:$4 sm:$0xff]  }
 0x378   :  { %4784 = vmatprep.subr.bf16.mxu1 %v19298_v8  ;;  %v19346_v8 = vld [vmem:[#allocation8 + $0x8c] ss:$16 sps:$4 sm:$0xff]  }
 0x37a   :  { %4679 = vmatpush1.bf16.msra.mxu0 %v19293_v61  ;;  %v19341_v61 = vld [vmem:[#allocation8 + $0x80] ss:$16 sps:$4 sm:$0xff]  }
 0x37b   :  { %4785 = vmatpush1.bf16.msra.mxu1 %v19296_v31  ;;  %4680 = vmatprep.subr.bf16.mxu0 %v19301_v36  ;;  %v19344_v31 = vld [vmem:[#allocation8 + $0x88] ss:$16 sps:$4 sm:$0xff]   ;;  %v19349_v36 = vld [vmem:[#allocation8 + $0xa4] ss:$16 sps:$4 sm:$0xff]  }
 0x37c   :  { %4786 = vmatprep.subr.bf16.mxu1 %v19304_v29  ;;  %v19347_v29 = vld [vmem:[#allocation8 + $0xa0] ss:$16 sps:$4 sm:$0xff]  }
 0x37e   :  { %4681 = vmatpush1.bf16.msra.mxu0 %v19299_v4  ;;  %v19350_v4 = vld [vmem:[#allocation8 + $0xa8] ss:$16 sps:$4 sm:$0xff]  }
 0x37f   :  { %4787 = vmatpush1.bf16.msra.mxu1 %v19302_v26  ;;  %4682 = vmatprep.subr.bf16.mxu0 %v19307_v47  ;;  %v19355_v26 = vld [vmem:[#allocation8 + $0xc4] ss:$16 sps:$4 sm:$0xff]   ;;  %v19353_v47 = vld [vmem:[#allocation8 + $0xc0] ss:$16 sps:$4 sm:$0xff]  }
 0x380   :  { %4788 = vmatprep.subr.bf16.mxu1 %v19310_v60  ;;  %v19356_v60 = vld [vmem:[#allocation8 + $0xc8] ss:$16 sps:$4 sm:$0xff]  }
 0x382   :  { %4683 = vmatpush1.bf16.msra.mxu0 %v19305_v20  ;;  %v19361_v20 = vld [vmem:[#allocation8 + $0xe4] ss:$16 sps:$4 sm:$0xff]  }
 0x383   :  { %4789 = vmatpush1.bf16.msra.mxu1 %v19308_v45  ;;  %4684 = vmatprep.subr.bf16.mxu0 %v19313_v10  ;;  %v19364_v45 = vld [vmem:[#allocation8 + $0xec] ss:$16 sps:$4 sm:$0xff]   ;;  %v19359_v10 = vld [vmem:[#allocation8 + $0xe0] ss:$16 sps:$4 sm:$0xff]  }
 0x384   :  { %4790 = vmatprep.subr.bf16.mxu1 %v19316_v30  ;;  %v19362_v30 = vld [vmem:[#allocation8 + $0xe8] ss:$16 sps:$4 sm:$0xff]  }
 0x386   :  { %4685 = vmatpush1.bf16.msra.mxu0 %v19311_v2  ;;  %v19367_v2 = vld [vmem:[#allocation8 + $0x104] ss:$16 sps:$4 sm:$0xff]  }
 0x387   :  { %4791 = vmatpush1.bf16.msra.mxu1 %v19314_v13  ;;  %5453 = vmatprep.subr.bf16.mxu0 %v19319_v22  ;;  %v19370_v13 = vld [vmem:[#allocation8 + $0x10c] ss:$16 sps:$4 sm:$0xff]   ;;  %v19365_v22 = vld [vmem:[#allocation8 + $0x100] ss:$16 sps:$4 sm:$0xff]  }
 0x388   :  { %5559 = vmatprep.subr.bf16.mxu1 %v19322_v35  ;;  %v19368_v35 = vld [vmem:[#allocation8 + $0x108] ss:$16 sps:$4 sm:$0xff]  }
 0x389   :  { %4687 = vmatmul.mubr.bf16.vlgmr.msra.gmra.mrb[8].mxu0 %v22113_v56 }
 0x38a   :  { %4793 = vmatmul.mubr.bf16.vlgmr.msra.gmra.mrb[8].mxu1 %v22113_v56  ;;  %4696 = vmatprep.mubr.bf16.mxu0 %v22213_v46  ;;  %v19335_v56 = vld [vmem:[#allocation8 + $0x60] ss:$16 sps:$4 sm:$0xff]  }
 0x38b   :  { %4802 = vmatprep.mubr.bf16.mxu1 %v22213_v46  ;;  %5454 = vmatpush1.bf16.msra.mxu0 %v19317_v62  ;;  %v19338_v46 = vld [vmem:[#allocation8 + $0x68] ss:$16 sps:$4 sm:$0xff]   ;;  %v19373_v62 = vld [vmem:[#allocation8 + $0x124] ss:$16 sps:$4 sm:$0xff]  }
 0x38c   :  { %5560 = vmatpush1.bf16.msra.mxu1 %v19320_v41  ;;  %5455 = vmatprep.subr.bf16.mxu0 %v19325_v49  ;;  %v19376_v41 = vld [vmem:[#allocation8 + $0x12c] ss:$16 sps:$4 sm:$0xff]   ;;  %v19371_v49 = vld [vmem:[#allocation8 + $0x120] ss:$16 sps:$4 sm:$0xff]  }
 0x38d   :  { %5561 = vmatprep.subr.bf16.mxu1 %v19328_v38  ;;  %v19374_v38 = vld [vmem:[#allocation8 + $0x128] ss:$16 sps:$4 sm:$0xff]  }
 0x38f   :  { %5456 = vmatpush1.bf16.msra.mxu0 %v19323_v14  ;;  %v19379_v14 = vld [vmem:[#allocation8 + $0x144] ss:$16 sps:$4 sm:$0xff]  }
 0x390   :  { %5562 = vmatpush1.bf16.msra.mxu1 %v19326_v24  ;;  %5457 = vmatprep.subr.bf16.mxu0 %v19331_v59  ;;  %v19382_v24 = vld [vmem:[#allocation8 + $0x14c] ss:$16 sps:$4 sm:$0xff]   ;;  %v19377_v59 = vld [vmem:[#allocation8 + $0x140] ss:$16 sps:$4 sm:$0xff]  }
 0x391   :  { %5563 = vmatprep.subr.bf16.mxu1 %v19334_v48  ;;  %4697 = vmatmul.mubr.bf16.gmra.mrb[12].mxu0 %v22194_v42  ;;  %v19380_v48 = vld [vmem:[#allocation8 + $0x148] ss:$16 sps:$4 sm:$0xff]  }
 0x392   :  { %4803 = vmatmul.mubr.bf16.gmra.mrb[12].mxu1 %v22194_v42  ;;  %16260 = vmatprep.mubr.msk.bf16.mxu0 %vm21812_vm3, %v22219_v7  ;;  %v19352_v42 = vld [vmem:[#allocation8 + $0xac] ss:$16 sps:$4 sm:$0xff]  }
 0x393   :  { %16292 = vmatprep.mubr.msk.bf16.mxu1 %vm21812_vm3, %v22219_v7  ;;  %5458 = vmatpush1.bf16.msra.mxu0 %v19329_v3  ;;  %v19358_v7 = vld [vmem:[#allocation8 + $0xcc] ss:$16 sps:$4 sm:$0xff]   ;;  %v19385_v3 = vld [vmem:[#allocation8 + $0x164] ss:$16 sps:$4 sm:$0xff]  }
 0x394   :  { %5564 = vmatpush1.bf16.msra.mxu1 %v19332_v53  ;;  %5459 = vmatprep.subr.bf16.mxu0 %v19337_v12  ;;  %v19388_v53 = vld [vmem:[#allocation8 + $0x16c] ss:$16 sps:$4 sm:$0xff]   ;;  %v19383_v12 = vld [vmem:[#allocation8 + $0x160] ss:$16 sps:$4 sm:$0xff]  }
 0x395   :  { %5565 = vmatprep.subr.bf16.mxu1 %v19340_v6  ;;  %v19386_v6 = vld [vmem:[#allocation8 + $0x168] ss:$16 sps:$4 sm:$0xff]  }
 0x397   :  { %5460 = vmatpush1.bf16.msra.mxu0 %v19335_v56  ;;  %v19391_v56 = vld [vmem:[#allocation8 + $0x184] ss:$16 sps:$4 sm:$0xff]  }
 0x398   :  { %5566 = vmatpush1.bf16.msra.mxu1 %v19338_v46  ;;  %5461 = vmatprep.subr.bf16.mxu0 %v19343_v21  ;;  %v19394_v46 = vld [vmem:[#allocation8 + $0x18c] ss:$16 sps:$4 sm:$0xff]   ;;  %v19389_v21 = vld [vmem:[#allocation8 + $0x180] ss:$16 sps:$4 sm:$0xff]  }
 0x399   :  { %5567 = vmatprep.subr.bf16.mxu1 %v19346_v8  ;;  %v19392_v8 = vld [vmem:[#allocation8 + $0x188] ss:$16 sps:$4 sm:$0xff]  }
 0x39b   :  { %5462 = vmatpush1.bf16.msra.mxu0 %v19341_v61  ;;  %v19397_v61 = vld [vmem:[#allocation8 + $0x1a4] ss:$16 sps:$4 sm:$0xff]  }
 0x39c   :  { %5568 = vmatpush1.bf16.msra.mxu1 %v19344_v31  ;;  %5463 = vmatprep.subr.bf16.mxu0 %v19349_v36  ;;  %v19400_v31 = vld [vmem:[#allocation8 + $0x1ac] ss:$16 sps:$4 sm:$0xff]   ;;  %v19395_v36 = vld [vmem:[#allocation8 + $0x1a0] ss:$16 sps:$4 sm:$0xff]  }
 0x39d   :  { %5569 = vmatprep.subr.bf16.mxu1 %v19352_v42  ;;  %v19398_v42 = vld [vmem:[#allocation8 + $0x1a8] ss:$16 sps:$4 sm:$0xff]  }
 0x39f   :  { %5464 = vmatpush1.bf16.msra.mxu0 %v19347_v29  ;;  %v19403_v29 = vld [vmem:[#allocation8 + $0x1c4] ss:$16 sps:$4 sm:$0xff]  }
 0x3a0   :  { %5570 = vmatpush1.bf16.msra.mxu1 %v19350_v4  ;;  %5465 = vmatprep.subr.bf16.mxu0 %v19355_v26  ;;  %v19406_v4 = vld [vmem:[#allocation8 + $0x1cc] ss:$16 sps:$4 sm:$0xff]   ;;  %v19401_v26 = vld [vmem:[#allocation8 + $0x1c0] ss:$16 sps:$4 sm:$0xff]  }
 0x3a1   :  { %5571 = vmatprep.subr.bf16.mxu1 %v19358_v7  ;;  %v19404_v7 = vld [vmem:[#allocation8 + $0x1c8] ss:$16 sps:$4 sm:$0xff]  }
 0x3a3   :  { %5466 = vmatpush1.bf16.msra.mxu0 %v19353_v47  ;;  %v19409_v47 = vld [vmem:[#allocation8 + $0x1e4] ss:$16 sps:$4 sm:$0xff]  }
 0x3a4   :  { %5572 = vmatpush1.bf16.msra.mxu1 %v19356_v60  ;;  %5467 = vmatprep.subr.bf16.mxu0 %v19361_v20  ;;  %v19412_v60 = vld [vmem:[#allocation8 + $0x1ec] ss:$16 sps:$4 sm:$0xff]   ;;  %v19407_v20 = vld [vmem:[#allocation8 + $0x1e0] ss:$16 sps:$4 sm:$0xff]  }
 0x3a5   :  { %5573 = vmatprep.subr.bf16.mxu1 %v19364_v45  ;;  %v19410_v45 = vld [vmem:[#allocation8 + $0x1e8] ss:$16 sps:$4 sm:$0xff]  }
 0x3a7   :  { %5468 = vmatpush1.bf16.msra.mxu0 %v19359_v10  ;;  %v19415_v10 = vld [vmem:[#allocation8 + $0x204] ss:$16 sps:$4 sm:$0xff]  }
 0x3a8   :  { %5574 = vmatpush1.bf16.msra.mxu1 %v19362_v30  ;;  %5469 = vmatprep.subr.bf16.mxu0 %v19367_v2  ;;  %v19418_v30 = vld [vmem:[#allocation8 + $0x20c] ss:$16 sps:$4 sm:$0xff]   ;;  %v19413_v2 = vld [vmem:[#allocation8 + $0x200] ss:$16 sps:$4 sm:$0xff]  }
 0x3a9   :  { %5575 = vmatprep.subr.bf16.mxu1 %v19370_v13  ;;  %v19416_v13 = vld [vmem:[#allocation8 + $0x208] ss:$16 sps:$4 sm:$0xff]  }
 0x3ab   :  { %5470 = vmatpush1.bf16.msra.mxu0 %v19365_v22  ;;  %v19421_v22 = vld [vmem:[#allocation8 + $0x224] ss:$16 sps:$4 sm:$0xff]  }
 0x3ac   :  { %5576 = vmatpush1.bf16.msra.mxu1 %v19368_v35  ;;  %5471 = vmatprep.subr.bf16.mxu0 %v19373_v62  ;;  %v19424_v35 = vld [vmem:[#allocation8 + $0x22c] ss:$16 sps:$4 sm:$0xff]   ;;  %v19419_v62 = vld [vmem:[#allocation8 + $0x220] ss:$16 sps:$4 sm:$0xff]  }
 0x3ad   :  { %5577 = vmatprep.subr.bf16.mxu1 %v19376_v41  ;;  %v19422_v41 = vld [vmem:[#allocation8 + $0x228] ss:$16 sps:$4 sm:$0xff]  }
 0x3af   :  { %5472 = vmatpush1.bf16.msra.mxu0 %v19371_v49  ;;  %v19427_v49 = vld [vmem:[#allocation8 + $0x244] ss:$16 sps:$4 sm:$0xff]  }
 0x3b0   :  { %5578 = vmatpush1.bf16.msra.mxu1 %v19374_v38  ;;  %5473 = vmatprep.subr.bf16.mxu0 %v19379_v14  ;;  %v19430_v38 = vld [vmem:[#allocation8 + $0x24c] ss:$16 sps:$4 sm:$0xff]   ;;  %v19425_v14 = vld [vmem:[#allocation8 + $0x240] ss:$16 sps:$4 sm:$0xff]  }
 0x3b1   :  { %5579 = vmatprep.subr.bf16.mxu1 %v19382_v24  ;;  %v19428_v24 = vld [vmem:[#allocation8 + $0x248] ss:$16 sps:$4 sm:$0xff]  }
 0x3b3   :  { %5474 = vmatpush1.bf16.msra.mxu0 %v19377_v59  ;;  %v19436_v59 = vld [vmem:[#allocation8 + $0x26c] ss:$16 sps:$4 sm:$0xff]  }
 0x3b4   :  { %5580 = vmatpush1.bf16.msra.mxu1 %v19380_v48  ;;  %5475 = vmatprep.subr.bf16.mxu0 %v19385_v3  ;;  %v19434_v48 = vld [vmem:[#allocation8 + $0x268] ss:$16 sps:$4 sm:$0xff]   ;;  %v19439_v3 = vld [vmem:[#allocation8 + $0x284] ss:$16 sps:$4 sm:$0xff]  }
 0x3b5   :  { %5581 = vmatprep.subr.bf16.mxu1 %v19388_v53  ;;  %v19442_v53 = vld [vmem:[#allocation8 + $0x28c] ss:$16 sps:$4 sm:$0xff]  }
 0x3b7   :  { %5476 = vmatpush1.bf16.msra.mxu0 %v19383_v12  ;;  %v19437_v12 = vld [vmem:[#allocation8 + $0x280] ss:$16 sps:$4 sm:$0xff]  }
 0x3b8   :  { %5582 = vmatpush1.bf16.msra.mxu1 %v19386_v6  ;;  %5477 = vmatprep.subr.bf16.mxu0 %v19391_v56  ;;  %v19440_v6 = vld [vmem:[#allocation8 + $0x288] ss:$16 sps:$4 sm:$0xff]   ;;  %v19445_v56 = vld [vmem:[#allocation8 + $0x2a4] ss:$16 sps:$4 sm:$0xff]  }
 0x3b9   :  { %5583 = vmatprep.subr.bf16.mxu1 %v19394_v46  ;;  %v19443_v46 = vld [vmem:[#allocation8 + $0x2a0] ss:$16 sps:$4 sm:$0xff]  }
 0x3bb   :  { %5478 = vmatpush1.bf16.msra.mxu0 %v19389_v21  ;;  %v19446_v21 = vld [vmem:[#allocation8 + $0x2a8] ss:$16 sps:$4 sm:$0xff]  }
 0x3bc   :  { %5584 = vmatpush1.bf16.msra.mxu1 %v19392_v8  ;;  %5479 = vmatprep.subr.bf16.mxu0 %v19397_v61  ;;  %v19451_v8 = vld [vmem:[#allocation8 + $0x2c4] ss:$16 sps:$4 sm:$0xff]   ;;  %v19454_v61 = vld [vmem:[#allocation8 + $0x2cc] ss:$16 sps:$4 sm:$0xff]  }
 0x3bd   :  { %5585 = vmatprep.subr.bf16.mxu1 %v19400_v31  ;;  %v19452_v31 = vld [vmem:[#allocation8 + $0x2c8] ss:$16 sps:$4 sm:$0xff]  }
 0x3bf   :  { %5480 = vmatpush1.bf16.msra.mxu0 %v19395_v36  ;;  %v19457_v36 = vld [vmem:[#allocation8 + $0x2e4] ss:$16 sps:$4 sm:$0xff]  }
 0x3c0   :  { %5586 = vmatpush1.bf16.msra.mxu1 %v19398_v42  ;;  %5481 = vmatprep.subr.bf16.mxu0 %v19403_v29  ;;  %v19460_v42 = vld [vmem:[#allocation8 + $0x2ec] ss:$16 sps:$4 sm:$0xff]   ;;  %v19455_v29 = vld [vmem:[#allocation8 + $0x2e0] ss:$16 sps:$4 sm:$0xff]  }
 0x3c1   :  { %5587 = vmatprep.subr.bf16.mxu1 %v19406_v4  ;;  %v19458_v4 = vld [vmem:[#allocation8 + $0x2e8] ss:$16 sps:$4 sm:$0xff]  }
 0x3c3   :  { %5482 = vmatpush1.bf16.msra.mxu0 %v19401_v26  ;;  %v19463_v26 = vld [vmem:[#allocation8 + $0x304] ss:$16 sps:$4 sm:$0xff]  }
 0x3c4   :  { %5588 = vmatpush1.bf16.msra.mxu1 %v19404_v7  ;;  %5483 = vmatprep.subr.bf16.mxu0 %v19409_v47  ;;  %v19466_v7 = vld [vmem:[#allocation8 + $0x30c] ss:$16 sps:$4 sm:$0xff]   ;;  %v19461_v47 = vld [vmem:[#allocation8 + $0x300] ss:$16 sps:$4 sm:$0xff]  }
 0x3c5   :  { %5589 = vmatprep.subr.bf16.mxu1 %v19412_v60  ;;  %v19464_v60 = vld [vmem:[#allocation8 + $0x308] ss:$16 sps:$4 sm:$0xff]  }
 0x3c7   :  { %5484 = vmatpush1.bf16.msra.mxu0 %v19407_v20  ;;  %v19469_v20 = vld [vmem:[#allocation8 + $0x324] ss:$16 sps:$4 sm:$0xff]  }
 0x3c8   :  { %5590 = vmatpush1.bf16.msra.mxu1 %v19410_v45  ;;  %5506 = vmatprep.subr.bf16.mxu0 %v19415_v10  ;;  %v19472_v45 = vld [vmem:[#allocation8 + $0x32c] ss:$16 sps:$4 sm:$0xff]   ;;  %v19467_v10 = vld [vmem:[#allocation8 + $0x320] ss:$16 sps:$4 sm:$0xff]  }
 0x3c9   :  { %5612 = vmatprep.subr.bf16.mxu1 %v19418_v30  ;;  %v19470_v30 = vld [vmem:[#allocation8 + $0x328] ss:$16 sps:$4 sm:$0xff]  }
 0x3ca   :  { %16264 = vmatmul.mubr.msk.bf16.vlgmr.msra.gmra.mrb[8].mxu0 %vm21812_vm3, %v22183_v52 }
 0x3cb   :  { %16296 = vmatmul.mubr.msk.bf16.vlgmr.msra.gmra.mrb[8].mxu1 %vm21812_vm3, %v22183_v52  ;;  %16268 = vmatprep.mubr.msk.bf16.mxu0 %vm21867_vm6, %v22226_v16  ;;  %v19433_v52 = vld [vmem:[#allocation8 + $0x264] ss:$16 sps:$4 sm:$0xff]  }
 0x3cc   :  { %5507 = vmatpush1.bf16.msra.mxu0 %v19413_v2  ;;  %16300 = vmatprep.mubr.msk.bf16.mxu1 %vm21867_vm6, %v22226_v16  ;;  %v19431_v16 = vld [vmem:[#allocation8 + $0x260] ss:$16 sps:$4 sm:$0xff]   ;;  %v19475_v2 = vld [vmem:[#allocation8 + $0x344] ss:$16 sps:$4 sm:$0xff]  }
 0x3cd   :  { %5613 = vmatpush1.bf16.msra.mxu1 %v19416_v13  ;;  %5508 = vmatprep.subr.bf16.mxu0 %v19421_v22  ;;  %v19478_v13 = vld [vmem:[#allocation8 + $0x34c] ss:$16 sps:$4 sm:$0xff]   ;;  %v19473_v22 = vld [vmem:[#allocation8 + $0x340] ss:$16 sps:$4 sm:$0xff]  }
 0x3ce   :  { %5614 = vmatprep.subr.bf16.mxu1 %v19424_v35  ;;  %v19476_v35 = vld [vmem:[#allocation8 + $0x348] ss:$16 sps:$4 sm:$0xff]  }
 0x3d0   :  { %5509 = vmatpush1.bf16.msra.mxu0 %v19419_v62  ;;  %v19481_v62 = vld [vmem:[#allocation8 + $0x364] ss:$16 sps:$4 sm:$0xff]  }
 0x3d1   :  { %5615 = vmatpush1.bf16.msra.mxu1 %v19422_v41  ;;  %5510 = vmatprep.subr.bf16.mxu0 %v19427_v49  ;;  %v19484_v41 = vld [vmem:[#allocation8 + $0x36c] ss:$16 sps:$4 sm:$0xff]   ;;  %v19479_v49 = vld [vmem:[#allocation8 + $0x360] ss:$16 sps:$4 sm:$0xff]  }
 0x3d2   :  { %5616 = vmatprep.subr.bf16.mxu1 %v19430_v38  ;;  %16272 = vmatmul.mubr.msk.bf16.gmra.mrb[12].mxu0 %vm21867_vm6, %v22235_v17  ;;  %v19482_v38 = vld [vmem:[#allocation8 + $0x368] ss:$16 sps:$4 sm:$0xff]  }
 0x3d3   :  { %16304 = vmatmul.mubr.msk.bf16.gmra.mrb[12].mxu1 %vm21867_vm6, %v22235_v17  ;;  %16276 = vmatprep.mubr.msk.bf16.mxu0 %vm21812_vm3, %v22244_v40  ;;  %v19448_v17 = vld [vmem:[#allocation8 + $0x2ac] ss:$16 sps:$4 sm:$0xff]  }
 0x3d4   :  { %5511 = vmatpush1.bf16.msra.mxu0 %v19425_v14  ;;  %16308 = vmatprep.mubr.msk.bf16.mxu1 %vm21812_vm3, %v22244_v40  ;;  %v19449_v40 = vld [vmem:[#allocation8 + $0x2c0] ss:$16 sps:$4 sm:$0xff]   ;;  %v19487_v14 = vld [vmem:[#allocation8 + $0x384] ss:$16 sps:$4 sm:$0xff]  }
 0x3d5   :  { %5617 = vmatpush1.bf16.msra.mxu1 %v19428_v24  ;;  %5512 = vmatprep.subr.bf16.mxu0 %v19433_v52  ;;  %v19490_v24 = vld [vmem:[#allocation8 + $0x38c] ss:$16 sps:$4 sm:$0xff]   ;;  %v19485_v52 = vld [vmem:[#allocation8 + $0x380] ss:$16 sps:$4 sm:$0xff]  }
 0x3d6   :  { %5618 = vmatprep.subr.bf16.mxu1 %v19436_v59  ;;  %v19488_v59 = vld [vmem:[#allocation8 + $0x388] ss:$16 sps:$4 sm:$0xff]  }
 0x3d8   :  { %5513 = vmatpush1.bf16.msra.mxu0 %v19431_v16  ;;  %v19493_v16 = vld [vmem:[#allocation8 + $0x3a4] ss:$16 sps:$4 sm:$0xff]  }
 0x3d9   :  { %5619 = vmatpush1.bf16.msra.mxu1 %v19434_v48  ;;  %5514 = vmatprep.subr.bf16.mxu0 %v19439_v3  ;;  %v19496_v48 = vld [vmem:[#allocation8 + $0x3ac] ss:$16 sps:$4 sm:$0xff]   ;;  %v19491_v3 = vld [vmem:[#allocation8 + $0x3a0] ss:$16 sps:$4 sm:$0xff]  }
 0x3da   :  { %5620 = vmatprep.subr.bf16.mxu1 %v19442_v53  ;;  %v19494_v53 = vld [vmem:[#allocation8 + $0x3a8] ss:$16 sps:$4 sm:$0xff]  }
 0x3dc   :  { %5515 = vmatpush1.bf16.msra.mxu0 %v19437_v12  ;;  %v19499_v12 = vld [vmem:[#allocation8 + $0x3c4] ss:$16 sps:$4 sm:$0xff]  }
 0x3dd   :  { %5621 = vmatpush1.bf16.msra.mxu1 %v19440_v6  ;;  %5516 = vmatprep.subr.bf16.mxu0 %v19445_v56  ;;  %v19502_v6 = vld [vmem:[#allocation8 + $0x3cc] ss:$16 sps:$4 sm:$0xff]   ;;  %v19497_v56 = vld [vmem:[#allocation8 + $0x3c0] ss:$16 sps:$4 sm:$0xff]  }
 0x3de   :  { %5622 = vmatprep.subr.bf16.mxu1 %v19448_v17  ;;  %v19500_v17 = vld [vmem:[#allocation8 + $0x3c8] ss:$16 sps:$4 sm:$0xff]  }
 0x3e0   :  { %5517 = vmatpush1.bf16.msra.mxu0 %v19443_v46  ;;  %v19505_v46 = vld [vmem:[#allocation8 + $0x3e4] ss:$16 sps:$4 sm:$0xff]  }
 0x3e1   :  { %5623 = vmatpush1.bf16.msra.mxu1 %v19446_v21  ;;  %5518 = vmatprep.subr.bf16.mxu0 %v19451_v8  ;;  %v19508_v21 = vld [vmem:[#allocation8 + $0x3ec] ss:$16 sps:$4 sm:$0xff]   ;;  %v19503_v8 = vld [vmem:[#allocation8 + $0x3e0] ss:$16 sps:$4 sm:$0xff]  }
 0x3e2   :  { %5624 = vmatprep.subr.bf16.mxu1 %v19454_v61  ;;  %v19506_v61 = vld [vmem:[#allocation8 + $0x3e8] ss:$16 sps:$4 sm:$0xff]  }
 0x3e4   :  { %5519 = vmatpush1.bf16.msra.mxu0 %v19449_v40  ;;  %v19511_v40 = vld [vmem:[#allocation8 + $0x804] ss:$16 sps:$4 sm:$0xff]  }
 0x3e5   :  { %5625 = vmatpush1.bf16.msra.mxu1 %v19452_v31  ;;  %5520 = vmatprep.subr.bf16.mxu0 %v19457_v36  ;;  %v19514_v31 = vld [vmem:[#allocation8 + $0x80c] ss:$16 sps:$4 sm:$0xff]   ;;  %v19509_v36 = vld [vmem:[#allocation8 + $0x800] ss:$16 sps:$4 sm:$0xff]  }
 0x3e6   :  { %5626 = vmatprep.subr.bf16.mxu1 %v19460_v42  ;;  %v19512_v42 = vld [vmem:[#allocation8 + $0x808] ss:$16 sps:$4 sm:$0xff]  }
 0x3e8   :  { %5521 = vmatpush1.bf16.msra.mxu0 %v19455_v29  ;;  %v19517_v29 = vld [vmem:[#allocation8 + $0x824] ss:$16 sps:$4 sm:$0xff]  }
 0x3e9   :  { %5627 = vmatpush1.bf16.msra.mxu1 %v19458_v4  ;;  %5522 = vmatprep.subr.bf16.mxu0 %v19463_v26  ;;  %v19520_v4 = vld [vmem:[#allocation8 + $0x82c] ss:$16 sps:$4 sm:$0xff]   ;;  %v19515_v26 = vld [vmem:[#allocation8 + $0x820] ss:$16 sps:$4 sm:$0xff]  }
 0x3ea   :  { %5628 = vmatprep.subr.bf16.mxu1 %v19466_v7  ;;  %v19518_v7 = vld [vmem:[#allocation8 + $0x828] ss:$16 sps:$4 sm:$0xff]  }
 0x3ec   :  { %5523 = vmatpush1.bf16.msra.mxu0 %v19461_v47  ;;  %v19523_v47 = vld [vmem:[#allocation8 + $0x844] ss:$16 sps:$4 sm:$0xff]  }
 0x3ed   :  { %5629 = vmatpush1.bf16.msra.mxu1 %v19464_v60  ;;  %5524 = vmatprep.subr.bf16.mxu0 %v19469_v20  ;;  %v19526_v60 = vld [vmem:[#allocation8 + $0x84c] ss:$16 sps:$4 sm:$0xff]   ;;  %v19521_v20 = vld [vmem:[#allocation8 + $0x840] ss:$16 sps:$4 sm:$0xff]  }
 0x3ee   :  { %5630 = vmatprep.subr.bf16.mxu1 %v19472_v45  ;;  %v19524_v45 = vld [vmem:[#allocation8 + $0x848] ss:$16 sps:$4 sm:$0xff]  }
 0x3f0   :  { %5525 = vmatpush1.bf16.msra.mxu0 %v19467_v10  ;;  %v19529_v10 = vld [vmem:[#allocation8 + $0x864] ss:$16 sps:$4 sm:$0xff]  }
 0x3f1   :  { %5631 = vmatpush1.bf16.msra.mxu1 %v19470_v30  ;;  %5526 = vmatprep.subr.bf16.mxu0 %v19475_v2  ;;  %v19527_v30 = vld [vmem:[#allocation8 + $0x860] ss:$16 sps:$4 sm:$0xff]   ;;  %v19535_v2 = vld [vmem:[#allocation8 + $0x884] ss:$16 sps:$4 sm:$0xff]  }
 0x3f2   :  { %5632 = vmatprep.subr.bf16.mxu1 %v19478_v13  ;;  %v19538_v13 = vld [vmem:[#allocation8 + $0x88c] ss:$16 sps:$4 sm:$0xff]  }
 0x3f4   :  { %5527 = vmatpush1.bf16.msra.mxu0 %v19473_v22  ;;  %v19533_v22 = vld [vmem:[#allocation8 + $0x880] ss:$16 sps:$4 sm:$0xff]  }
 0x3f5   :  { %5633 = vmatpush1.bf16.msra.mxu1 %v19476_v35  ;;  %5528 = vmatprep.subr.bf16.mxu0 %v19481_v62  ;;  %v19541_v35 = vld [vmem:[#allocation8 + $0x8a4] ss:$16 sps:$4 sm:$0xff]   ;;  %v19544_v62 = vld [vmem:[#allocation8 + $0x8ac] ss:$16 sps:$4 sm:$0xff]  }
 0x3f6   :  { %5634 = vmatprep.subr.bf16.mxu1 %v19484_v41  ;;  %v19539_v41 = vld [vmem:[#allocation8 + $0x8a0] ss:$16 sps:$4 sm:$0xff]  }
 0x3f8   :  { %5529 = vmatpush1.bf16.msra.mxu0 %v19479_v49  ;;  %v19542_v49 = vld [vmem:[#allocation8 + $0x8a8] ss:$16 sps:$4 sm:$0xff]  }
 0x3f9   :  { %5635 = vmatpush1.bf16.msra.mxu1 %v19482_v38  ;;  %5530 = vmatprep.subr.bf16.mxu0 %v19487_v14  ;;  %v19547_v38 = vld [vmem:[#allocation8 + $0x8c4] ss:$16 sps:$4 sm:$0xff]   ;;  %v19545_v14 = vld [vmem:[#allocation8 + $0x8c0] ss:$16 sps:$4 sm:$0xff]  }
 0x3fa   :  { %5636 = vmatprep.subr.bf16.mxu1 %v19490_v24  ;;  %v19548_v24 = vld [vmem:[#allocation8 + $0x8c8] ss:$16 sps:$4 sm:$0xff]  }
 0x3fc   :  { %5531 = vmatpush1.bf16.msra.mxu0 %v19485_v52  ;;  %v19553_v52 = vld [vmem:[#allocation8 + $0x8e4] ss:$16 sps:$4 sm:$0xff]  }
 0x3fd   :  { %5637 = vmatpush1.bf16.msra.mxu1 %v19488_v59  ;;  %5532 = vmatprep.subr.bf16.mxu0 %v19493_v16  ;;  %v19551_v59 = vld [vmem:[#allocation8 + $0x8e0] ss:$16 sps:$4 sm:$0xff]   ;;  %v19556_v16 = vld [vmem:[#allocation8 + $0x8ec] ss:$16 sps:$4 sm:$0xff]  }
 0x3fe   :  { %5638 = vmatprep.subr.bf16.mxu1 %v19496_v48  ;;  %v19554_v48 = vld [vmem:[#allocation8 + $0x8e8] ss:$16 sps:$4 sm:$0xff]  }
 0x400   :  { %5533 = vmatpush1.bf16.msra.mxu0 %v19491_v3  ;;  %v19559_v3 = vld [vmem:[#allocation8 + $0x904] ss:$16 sps:$4 sm:$0xff]  }
 0x401   :  { %5639 = vmatpush1.bf16.msra.mxu1 %v19494_v53  ;;  %5534 = vmatprep.subr.bf16.mxu0 %v19499_v12  ;;  %v19562_v53 = vld [vmem:[#allocation8 + $0x90c] ss:$16 sps:$4 sm:$0xff]   ;;  %v19557_v12 = vld [vmem:[#allocation8 + $0x900] ss:$16 sps:$4 sm:$0xff]  }
 0x402   :  { %5640 = vmatprep.subr.bf16.mxu1 %v19502_v6  ;;  %v19560_v6 = vld [vmem:[#allocation8 + $0x908] ss:$16 sps:$4 sm:$0xff]  }
 0x404   :  { %5535 = vmatpush1.bf16.msra.mxu0 %v19497_v56  ;;  %v19565_v56 = vld [vmem:[#allocation8 + $0x924] ss:$16 sps:$4 sm:$0xff]  }
 0x405   :  { %5641 = vmatpush1.bf16.msra.mxu1 %v19500_v17  ;;  %5536 = vmatprep.subr.bf16.mxu0 %v19505_v46  ;;  %v19568_v17 = vld [vmem:[#allocation8 + $0x92c] ss:$16 sps:$4 sm:$0xff]   ;;  %v19563_v46 = vld [vmem:[#allocation8 + $0x920] ss:$16 sps:$4 sm:$0xff]  }
 0x406   :  { %5642 = vmatprep.subr.bf16.mxu1 %v19508_v21  ;;  %v19566_v21 = vld [vmem:[#allocation8 + $0x928] ss:$16 sps:$4 sm:$0xff]  }
 0x408   :  { %5537 = vmatpush1.bf16.msra.mxu0 %v19503_v8  ;;  %v19571_v8 = vld [vmem:[#allocation8 + $0x944] ss:$16 sps:$4 sm:$0xff]  }
 0x409   :  { %5643 = vmatpush1.bf16.msra.mxu1 %v19506_v61  ;;  %6442 = vmatprep.subr.bf16.mxu0 %v19511_v40  ;;  %v19574_v61 = vld [vmem:[#allocation8 + $0x94c] ss:$16 sps:$4 sm:$0xff]   ;;  %v19569_v40 = vld [vmem:[#allocation8 + $0x940] ss:$16 sps:$4 sm:$0xff]  }
 0x40a   :  { %6548 = vmatprep.subr.bf16.mxu1 %v19514_v31  ;;  %v19572_v31 = vld [vmem:[#allocation8 + $0x948] ss:$16 sps:$4 sm:$0xff]  }
 0x40b   :  { %16280 = vmatmul.mubr.msk.bf16.vlgmr.msra.gmra.mrb[8].mxu0 %vm21812_vm3, %v22197_v43 }
 0x40c   :  { %16312 = vmatmul.mubr.msk.bf16.vlgmr.msra.gmra.mrb[8].mxu1 %vm21812_vm3, %v22197_v43  ;;  %16284 = vmatprep.mubr.msk.bf16.mxu0 %vm21867_vm6, %v22251_v44  ;;  %v19532_v43 = vld [vmem:[#allocation8 + $0x86c] ss:$16 sps:$4 sm:$0xff]  }
 0x40d   :  { %16316 = vmatprep.mubr.msk.bf16.mxu1 %vm21867_vm6, %v22251_v44  ;;  %6443 = vmatpush1.bf16.msra.mxu0 %v19509_v36  ;;  %v19530_v44 = vld [vmem:[#allocation8 + $0x868] ss:$16 sps:$4 sm:$0xff]   ;;  %v19577_v36 = vld [vmem:[#allocation8 + $0x964] ss:$16 sps:$4 sm:$0xff]  }
 0x40e   :  { %6549 = vmatpush1.bf16.msra.mxu1 %v19512_v42  ;;  %6444 = vmatprep.subr.bf16.mxu0 %v19517_v29  ;;  %v19580_v42 = vld [vmem:[#allocation8 + $0x96c] ss:$16 sps:$4 sm:$0xff]   ;;  %v19575_v29 = vld [vmem:[#allocation8 + $0x960] ss:$16 sps:$4 sm:$0xff]  }
 0x40f   :  { %6550 = vmatprep.subr.bf16.mxu1 %v19520_v4  ;;  %v19578_v4 = vld [vmem:[#allocation8 + $0x968] ss:$16 sps:$4 sm:$0xff]  }
 0x411   :  { %6445 = vmatpush1.bf16.msra.mxu0 %v19515_v26  ;;  %v19583_v26 = vld [vmem:[#allocation8 + $0x984] ss:$16 sps:$4 sm:$0xff]  }
 0x412   :  { %6551 = vmatpush1.bf16.msra.mxu1 %v19518_v7  ;;  %6446 = vmatprep.subr.bf16.mxu0 %v19523_v47  ;;  %v19586_v7 = vld [vmem:[#allocation8 + $0x98c] ss:$16 sps:$4 sm:$0xff]   ;;  %v19581_v47 = vld [vmem:[#allocation8 + $0x980] ss:$16 sps:$4 sm:$0xff]  }
 0x413   :  { %16288 = vmatmul.mubr.msk.bf16.gmra.mrb[12].mxu0 %vm21867_vm6, %v22261_v19  ;;  %6552 = vmatprep.subr.bf16.mxu1 %v19526_v60  ;;  %v19584_v60 = vld [vmem:[#allocation8 + $0x988] ss:$16 sps:$4 sm:$0xff]  }
 0x414   :  { %16320 = vmatmul.mubr.msk.bf16.gmra.mrb[12].mxu1 %vm21867_vm6, %v22261_v19  ;;  %16452 = vmatprep.mubr.msk.bf16.mxu0 %vm21974_vm8, %v22270_v18  ;;  %v19536_v19 = vld [vmem:[#allocation8 + $0x888] ss:$16 sps:$4 sm:$0xff]  }
 0x415   :  { %6447 = vmatpush1.bf16.msra.mxu0 %v19521_v20  ;;  %16484 = vmatprep.mubr.msk.bf16.mxu1 %vm21974_vm8, %v22270_v18  ;;  %v19550_v18 = vld [vmem:[#allocation8 + $0x8cc] ss:$16 sps:$4 sm:$0xff]   ;;  %v19589_v20 = vld [vmem:[#allocation8 + $0x9a4] ss:$16 sps:$4 sm:$0xff]  }
 0x416   :  { %6553 = vmatpush1.bf16.msra.mxu1 %v19524_v45  ;;  %6448 = vmatprep.subr.bf16.mxu0 %v19529_v10  ;;  %v19592_v45 = vld [vmem:[#allocation8 + $0x9ac] ss:$16 sps:$4 sm:$0xff]   ;;  %v19587_v10 = vld [vmem:[#allocation8 + $0x9a0] ss:$16 sps:$4 sm:$0xff]  }
 0x417   :  { %6554 = vmatprep.subr.bf16.mxu1 %v19532_v43  ;;  %v19590_v43 = vld [vmem:[#allocation8 + $0x9a8] ss:$16 sps:$4 sm:$0xff]  }
 0x419   :  { %6449 = vmatpush1.bf16.msra.mxu0 %v19527_v30  ;;  %v19595_v30 = vld [vmem:[#allocation8 + $0x9c4] ss:$16 sps:$4 sm:$0xff]  }
 0x41a   :  { %6555 = vmatpush1.bf16.msra.mxu1 %v19530_v44  ;;  %6450 = vmatprep.subr.bf16.mxu0 %v19535_v2  ;;  %v19598_v44 = vld [vmem:[#allocation8 + $0x9cc] ss:$16 sps:$4 sm:$0xff]   ;;  %v19593_v2 = vld [vmem:[#allocation8 + $0x9c0] ss:$16 sps:$4 sm:$0xff]  }
 0x41b   :  { %6556 = vmatprep.subr.bf16.mxu1 %v19538_v13  ;;  %v19596_v13 = vld [vmem:[#allocation8 + $0x9c8] ss:$16 sps:$4 sm:$0xff]  }
 0x41d   :  { %6451 = vmatpush1.bf16.msra.mxu0 %v19533_v22  ;;  %v19601_v22 = vld [vmem:[#allocation8 + $0x9e4] ss:$16 sps:$4 sm:$0xff]  }
 0x41e   :  { %6557 = vmatpush1.bf16.msra.mxu1 %v19536_v19  ;;  %6452 = vmatprep.subr.bf16.mxu0 %v19541_v35  ;;  %v19604_v19 = vld [vmem:[#allocation8 + $0x9ec] ss:$16 sps:$4 sm:$0xff]   ;;  %v19599_v35 = vld [vmem:[#allocation8 + $0x9e0] ss:$16 sps:$4 sm:$0xff]  }
 0x41f   :  { %6558 = vmatprep.subr.bf16.mxu1 %v19544_v62  ;;  %v19602_v62 = vld [vmem:[#allocation8 + $0x9e8] ss:$16 sps:$4 sm:$0xff]  }
 0x421   :  { %6453 = vmatpush1.bf16.msra.mxu0 %v19539_v41  ;;  %v19607_v41 = vld [vmem:[#allocation8 + $0xa04] ss:$16 sps:$4 sm:$0xff]  }
 0x422   :  { %6559 = vmatpush1.bf16.msra.mxu1 %v19542_v49  ;;  %6454 = vmatprep.subr.bf16.mxu0 %v19547_v38  ;;  %v19610_v49 = vld [vmem:[#allocation8 + $0xa0c] ss:$16 sps:$4 sm:$0xff]   ;;  %v19605_v38 = vld [vmem:[#allocation8 + $0xa00] ss:$16 sps:$4 sm:$0xff]  }
 0x423   :  { %6560 = vmatprep.subr.bf16.mxu1 %v19550_v18  ;;  %v19608_v18 = vld [vmem:[#allocation8 + $0xa08] ss:$16 sps:$4 sm:$0xff]  }
 0x425   :  { %6455 = vmatpush1.bf16.msra.mxu0 %v19545_v14  ;;  %v19613_v14 = vld [vmem:[#allocation8 + $0xa24] ss:$16 sps:$4 sm:$0xff]  }
 0x426   :  { %6561 = vmatpush1.bf16.msra.mxu1 %v19548_v24  ;;  %6456 = vmatprep.subr.bf16.mxu0 %v19553_v52  ;;  %v19616_v24 = vld [vmem:[#allocation8 + $0xa2c] ss:$16 sps:$4 sm:$0xff]   ;;  %v19611_v52 = vld [vmem:[#allocation8 + $0xa20] ss:$16 sps:$4 sm:$0xff]  }
 0x427   :  { %6562 = vmatprep.subr.bf16.mxu1 %v19556_v16  ;;  %v19619_v16 = vld [vmem:[#allocation8 + $0xa44] ss:$16 sps:$4 sm:$0xff]  }
 0x429   :  { %6457 = vmatpush1.bf16.msra.mxu0 %v19551_v59  ;;  %v19614_v59 = vld [vmem:[#allocation8 + $0xa28] ss:$16 sps:$4 sm:$0xff]  }
 0x42a   :  { %6563 = vmatpush1.bf16.msra.mxu1 %v19554_v48  ;;  %6458 = vmatprep.subr.bf16.mxu0 %v19559_v3  ;;  %v19622_v48 = vld [vmem:[#allocation8 + $0xa4c] ss:$16 sps:$4 sm:$0xff]   ;;  %v19617_v3 = vld [vmem:[#allocation8 + $0xa40] ss:$16 sps:$4 sm:$0xff]  }
 0x42b   :  { %6564 = vmatprep.subr.bf16.mxu1 %v19562_v53  ;;  %v19620_v53 = vld [vmem:[#allocation8 + $0xa48] ss:$16 sps:$4 sm:$0xff]  }
 0x42d   :  { %6459 = vmatpush1.bf16.msra.mxu0 %v19557_v12  ;;  %v19625_v12 = vld [vmem:[#allocation8 + $0xa64] ss:$16 sps:$4 sm:$0xff]  }
 0x42e   :  { %6565 = vmatpush1.bf16.msra.mxu1 %v19560_v6  ;;  %6460 = vmatprep.subr.bf16.mxu0 %v19565_v56  ;;  %v19623_v6 = vld [vmem:[#allocation8 + $0xa60] ss:$16 sps:$4 sm:$0xff]   ;;  %v19631_v56 = vld [vmem:[#allocation8 + $0xa84] ss:$16 sps:$4 sm:$0xff]  }
 0x42f   :  { %6566 = vmatprep.subr.bf16.mxu1 %v19568_v17  ;;  %v19634_v17 = vld [vmem:[#allocation8 + $0xa8c] ss:$16 sps:$4 sm:$0xff]  }
 0x431   :  { %6461 = vmatpush1.bf16.msra.mxu0 %v19563_v46  ;;  %v19629_v46 = vld [vmem:[#allocation8 + $0xa80] ss:$16 sps:$4 sm:$0xff]  }
 0x432   :  { %6567 = vmatpush1.bf16.msra.mxu1 %v19566_v21  ;;  %6462 = vmatprep.subr.bf16.mxu0 %v19571_v8  ;;  %v19632_v21 = vld [vmem:[#allocation8 + $0xa88] ss:$16 sps:$4 sm:$0xff]   ;;  %v19637_v8 = vld [vmem:[#allocation8 + $0xaa4] ss:$16 sps:$4 sm:$0xff]  }
 0x433   :  { %6568 = vmatprep.subr.bf16.mxu1 %v19574_v61  ;;  %v19635_v61 = vld [vmem:[#allocation8 + $0xaa0] ss:$16 sps:$4 sm:$0xff]  }
 0x435   :  { %6463 = vmatpush1.bf16.msra.mxu0 %v19569_v40  ;;  %v19638_v40 = vld [vmem:[#allocation8 + $0xaa8] ss:$16 sps:$4 sm:$0xff]  }
 0x436   :  { %6569 = vmatpush1.bf16.msra.mxu1 %v19572_v31  ;;  %6464 = vmatprep.subr.bf16.mxu0 %v19577_v36  ;;  %v19643_v31 = vld [vmem:[#allocation8 + $0xac4] ss:$16 sps:$4 sm:$0xff]   ;;  %v19646_v36 = vld [vmem:[#allocation8 + $0xacc] ss:$16 sps:$4 sm:$0xff]  }
 0x437   :  { %6570 = vmatprep.subr.bf16.mxu1 %v19580_v42  ;;  %v19644_v42 = vld [vmem:[#allocation8 + $0xac8] ss:$16 sps:$4 sm:$0xff]  }
 0x439   :  { %6465 = vmatpush1.bf16.msra.mxu0 %v19575_v29  ;;  %v19649_v29 = vld [vmem:[#allocation8 + $0xae4] ss:$16 sps:$4 sm:$0xff]  }
 0x43a   :  { %6571 = vmatpush1.bf16.msra.mxu1 %v19578_v4  ;;  %6466 = vmatprep.subr.bf16.mxu0 %v19583_v26  ;;  %v19652_v4 = vld [vmem:[#allocation8 + $0xaec] ss:$16 sps:$4 sm:$0xff]   ;;  %v19647_v26 = vld [vmem:[#allocation8 + $0xae0] ss:$16 sps:$4 sm:$0xff]  }
 0x43b   :  { %6572 = vmatprep.subr.bf16.mxu1 %v19586_v7  ;;  %v19650_v7 = vld [vmem:[#allocation8 + $0xae8] ss:$16 sps:$4 sm:$0xff]  }
 0x43d   :  { %6467 = vmatpush1.bf16.msra.mxu0 %v19581_v47  ;;  %v19655_v47 = vld [vmem:[#allocation8 + $0xb04] ss:$16 sps:$4 sm:$0xff]  }
 0x43e   :  { %6573 = vmatpush1.bf16.msra.mxu1 %v19584_v60  ;;  %6468 = vmatprep.subr.bf16.mxu0 %v19589_v20  ;;  %v19658_v60 = vld [vmem:[#allocation8 + $0xb0c] ss:$16 sps:$4 sm:$0xff]   ;;  %v19653_v20 = vld [vmem:[#allocation8 + $0xb00] ss:$16 sps:$4 sm:$0xff]  }
 0x43f   :  { %6574 = vmatprep.subr.bf16.mxu1 %v19592_v45  ;;  %v19656_v45 = vld [vmem:[#allocation8 + $0xb08] ss:$16 sps:$4 sm:$0xff]  }
 0x441   :  { %6469 = vmatpush1.bf16.msra.mxu0 %v19587_v10  ;;  %v19661_v10 = vld [vmem:[#allocation8 + $0xb24] ss:$16 sps:$4 sm:$0xff]  }
 0x442   :  { %6575 = vmatpush1.bf16.msra.mxu1 %v19590_v43  ;;  %6470 = vmatprep.subr.bf16.mxu0 %v19595_v30  ;;  %v19664_v43 = vld [vmem:[#allocation8 + $0xb2c] ss:$16 sps:$4 sm:$0xff]   ;;  %v19659_v30 = vld [vmem:[#allocation8 + $0xb20] ss:$16 sps:$4 sm:$0xff]  }
 0x443   :  { %6576 = vmatprep.subr.bf16.mxu1 %v19598_v44  ;;  %v19662_v44 = vld [vmem:[#allocation8 + $0xb28] ss:$16 sps:$4 sm:$0xff]  }
 0x445   :  { %6471 = vmatpush1.bf16.msra.mxu0 %v19593_v2  ;;  %v19667_v2 = vld [vmem:[#allocation8 + $0xb44] ss:$16 sps:$4 sm:$0xff]  }
 0x446   :  { %6577 = vmatpush1.bf16.msra.mxu1 %v19596_v13  ;;  %6472 = vmatprep.subr.bf16.mxu0 %v19601_v22  ;;  %v19670_v13 = vld [vmem:[#allocation8 + $0xb4c] ss:$16 sps:$4 sm:$0xff]   ;;  %v19665_v22 = vld [vmem:[#allocation8 + $0xb40] ss:$16 sps:$4 sm:$0xff]  }
 0x447   :  { %6578 = vmatprep.subr.bf16.mxu1 %v19604_v19  ;;  %v19668_v19 = vld [vmem:[#allocation8 + $0xb48] ss:$16 sps:$4 sm:$0xff]  }
 0x449   :  { %6473 = vmatpush1.bf16.msra.mxu0 %v19599_v35  ;;  %v19673_v35 = vld [vmem:[#allocation8 + $0xb64] ss:$16 sps:$4 sm:$0xff]  }
 0x44a   :  { %6579 = vmatpush1.bf16.msra.mxu1 %v19602_v62  ;;  %6495 = vmatprep.subr.bf16.mxu0 %v19607_v41  ;;  %v19676_v62 = vld [vmem:[#allocation8 + $0xb6c] ss:$16 sps:$4 sm:$0xff]   ;;  %v19671_v41 = vld [vmem:[#allocation8 + $0xb60] ss:$16 sps:$4 sm:$0xff]  }
 0x44b   :  { %6601 = vmatprep.subr.bf16.mxu1 %v19610_v49  ;;  %v19674_v49 = vld [vmem:[#allocation8 + $0xb68] ss:$16 sps:$4 sm:$0xff]  }
 0x44c   :  { %16456 = vmatmul.mubr.msk.bf16.vlgmr.msra.gmra.mrb[8].mxu0 %vm21974_vm8, %v22169_v39 }
 0x44d   :  { %16488 = vmatmul.mubr.msk.bf16.vlgmr.msra.gmra.mrb[8].mxu1 %vm21974_vm8, %v22169_v39  ;;  %16460 = vmatprep.mubr.msk.bf16.mxu0 %vm21988_vm10, %v22272_v1  ;;  %v19628_v39 = vld [vmem:[#allocation8 + $0xa6c] ss:$16 sps:$4 sm:$0xff]  }
 0x44e   :  { %6496 = vmatpush1.bf16.msra.mxu0 %v19605_v38  ;;  %16492 = vmatprep.mubr.msk.bf16.mxu1 %vm21988_vm10, %v22272_v1  ;;  %v19626_v1 = vld [vmem:[#allocation8 + $0xa68] ss:$16 sps:$4 sm:$0xff]   ;;  %v19679_v38 = vld [vmem:[#allocation8 + $0xb84] ss:$16 sps:$4 sm:$0xff]  }
 0x44f   :  { %6602 = vmatpush1.bf16.msra.mxu1 %v19608_v18  ;;  %6497 = vmatprep.subr.bf16.mxu0 %v19613_v14  ;;  %v19682_v18 = vld [vmem:[#allocation8 + $0xb8c] ss:$16 sps:$4 sm:$0xff]   ;;  %v19677_v14 = vld [vmem:[#allocation8 + $0xb80] ss:$16 sps:$4 sm:$0xff]  }
 0x450   :  { %6603 = vmatprep.subr.bf16.mxu1 %v19616_v24  ;;  %v19680_v24 = vld [vmem:[#allocation8 + $0xb88] ss:$16 sps:$4 sm:$0xff]  }
 0x452   :  { %6498 = vmatpush1.bf16.msra.mxu0 %v19611_v52  ;;  %v19685_v52 = vld [vmem:[#allocation8 + $0xba4] ss:$16 sps:$4 sm:$0xff]  }
 0x453   :  { %6604 = vmatpush1.bf16.msra.mxu1 %v19614_v59  ;;  %6499 = vmatprep.subr.bf16.mxu0 %v19619_v16  ;;  %v19688_v59 = vld [vmem:[#allocation8 + $0xbac] ss:$16 sps:$4 sm:$0xff]   ;;  %v19683_v16 = vld [vmem:[#allocation8 + $0xba0] ss:$16 sps:$4 sm:$0xff]  }
 0x454   :  { %16464 = vmatmul.mubr.msk.bf16.gmra.mrb[12].mxu0 %vm21988_vm10, %v22288_v15  ;;  %6605 = vmatprep.subr.bf16.mxu1 %v19622_v48  ;;  %v19686_v48 = vld [vmem:[#allocation8 + $0xba8] ss:$16 sps:$4 sm:$0xff]  }
 0x455   :  { %16496 = vmatmul.mubr.msk.bf16.gmra.mrb[12].mxu1 %vm21988_vm10, %v22288_v15  ;;  %16468 = vmatprep.mubr.msk.bf16.mxu0 %vm21974_vm8, %v22290_v54  ;;  %v19640_v15 = vld [vmem:[#allocation8 + $0xaac] ss:$16 sps:$4 sm:$0xff]  }
 0x456   :  { %6500 = vmatpush1.bf16.msra.mxu0 %v19617_v3  ;;  %16500 = vmatprep.mubr.msk.bf16.mxu1 %vm21974_vm8, %v22290_v54  ;;  %v19641_v54 = vld [vmem:[#allocation8 + $0xac0] ss:$16 sps:$4 sm:$0xff]   ;;  %v19691_v3 = vld [vmem:[#allocation8 + $0xbc4] ss:$16 sps:$4 sm:$0xff]  }
 0x457   :  { %6606 = vmatpush1.bf16.msra.mxu1 %v19620_v53  ;;  %6501 = vmatprep.subr.bf16.mxu0 %v19625_v12  ;;  %v19694_v53 = vld [vmem:[#allocation8 + $0xbcc] ss:$16 sps:$4 sm:$0xff]   ;;  %v19689_v12 = vld [vmem:[#allocation8 + $0xbc0] ss:$16 sps:$4 sm:$0xff]  }
 0x458   :  { %6607 = vmatprep.subr.bf16.mxu1 %v19628_v39  ;;  %v19692_v39 = vld [vmem:[#allocation8 + $0xbc8] ss:$16 sps:$4 sm:$0xff]  }
 0x45a   :  { %6502 = vmatpush1.bf16.msra.mxu0 %v19623_v6  ;;  %v19697_v6 = vld [vmem:[#allocation8 + $0xbe4] ss:$16 sps:$4 sm:$0xff]  }
 0x45b   :  { %6608 = vmatpush1.bf16.msra.mxu1 %v19626_v1  ;;  %6503 = vmatprep.subr.bf16.mxu0 %v19631_v56  ;;  %v19700_v1 = vld [vmem:[#allocation8 + $0xbec] ss:$16 sps:$4 sm:$0xff]   ;;  %v19695_v56 = vld [vmem:[#allocation8 + $0xbe0] ss:$16 sps:$4 sm:$0xff]  }
 0x45c   :  { %6609 = vmatprep.subr.bf16.mxu1 %v19634_v17  ;;  %v19698_v17 = vld [vmem:[#allocation8 + $0xbe8] ss:$16 sps:$4 sm:$0xff]  }
 0x45e   :  { %6504 = vmatpush1.bf16.msra.mxu0 %v19629_v46  ;;  %v19701_v46 = vld [vmem:[#allocation11 + $0x140] sm:$0xff]  }
 0x45f   :  { %6610 = vmatpush1.bf16.msra.mxu1 %v19632_v21  ;;  %6505 = vmatprep.subr.bf16.mxu0 %v19637_v8  ;;  %v19702_v21 = vld [vmem:[#allocation11 + $0x1c0] sm:$0xff]  }
 0x460   :  { %6611 = vmatprep.subr.bf16.mxu1 %v19640_v15  ;;  %v19703_v8 = vld [vmem:[#allocation11 + $0x100] sm:$0xff]  }
 0x461   :  { %v19704_v15 = vld [vmem:[#allocation11 + $0x180] sm:$0xff]  }
 0x462   :  { %6506 = vmatpush1.bf16.msra.mxu0 %v19635_v61  ;;  %v19705_v61 = vld [vmem:[#allocation11 + $0x148] sm:$0xff]  }
 0x463   :  { %6612 = vmatpush1.bf16.msra.mxu1 %v19638_v40  ;;  %6507 = vmatprep.subr.bf16.mxu0 %v19643_v31  ;;  %v19706_v40 = vld [vmem:[#allocation11 + $0x1c8] sm:$0xff]  }
 0x464   :  { %6613 = vmatprep.subr.bf16.mxu1 %v19646_v36  ;;  %v19707_v31 = vld [vmem:[#allocation11 + $0x108] sm:$0xff]  }
 0x465   :  { %v19708_v36 = vld [vmem:[#allocation11 + $0x188] sm:$0xff]  }
 0x466   :  { %6508 = vmatpush1.bf16.msra.mxu0 %v19641_v54  ;;  %v19709_v54 = vld [vmem:[#allocation11 + $0x150] sm:$0xff]  }
 0x467   :  { %6614 = vmatpush1.bf16.msra.mxu1 %v19644_v42  ;;  %6509 = vmatprep.subr.bf16.mxu0 %v19649_v29  ;;  %v19710_v42 = vld [vmem:[#allocation11 + $0x1d0] sm:$0xff]  }
 0x468   :  { %6615 = vmatprep.subr.bf16.mxu1 %v19652_v4  ;;  %v19711_v29 = vld [vmem:[#allocation11 + $0x110] sm:$0xff]   ;;  %v19713_v4 = vld [vmem:[#allocation11 + $0x158] sm:$0xff]  }
 0x46a   :  { %6510 = vmatpush1.bf16.msra.mxu0 %v19647_v26  ;;  %v19715_v26 = vld [vmem:[#allocation11 + $0x118] sm:$0xff]  }
 0x46b   :  { %6616 = vmatpush1.bf16.msra.mxu1 %v19650_v7  ;;  %6511 = vmatprep.subr.bf16.mxu0 %v19655_v47  ;;  %v19716_v7 = vld [vmem:[#allocation11 + $0x198] sm:$0xff]   ;;  %v19717_v47 = vld [vmem:[#allocation11 + $0x160] sm:$0xff]  }
 0x46c   :  { %6617 = vmatprep.subr.bf16.mxu1 %v19658_v60  ;;  %v19718_v60 = vld [vmem:[#allocation11 + $0x1e0] sm:$0xff]  }
 0x46e   :  { %6512 = vmatpush1.bf16.msra.mxu0 %v19653_v20  ;;  %v19719_v20 = vld [vmem:[#allocation11 + $0x120] sm:$0xff]  }
 0x46f   :  { %6618 = vmatpush1.bf16.msra.mxu1 %v19656_v45  ;;  %6513 = vmatprep.subr.bf16.mxu0 %v19661_v10  ;;  %v19720_v45 = vld [vmem:[#allocation11 + $0x1a0] sm:$0xff]   ;;  %v19721_v10 = vld [vmem:[#allocation11 + $0x168] sm:$0xff]  }
 0x470   :  { %6619 = vmatprep.subr.bf16.mxu1 %v19664_v43  ;;  %v19722_v43 = vld [vmem:[#allocation11 + $0x1e8] sm:$0xff]  }
 0x472   :  { %6514 = vmatpush1.bf16.msra.mxu0 %v19659_v30  ;;  %v19723_v30 = vld [vmem:[#allocation11 + $0x128] sm:$0xff]  }
 0x473   :  { %6620 = vmatpush1.bf16.msra.mxu1 %v19662_v44  ;;  %6515 = vmatprep.subr.bf16.mxu0 %v19667_v2  ;;  %v19725_v44 = vld [vmem:[#allocation11 + $0x170] sm:$0xff]  }
 0x474   :  { %6621 = vmatprep.subr.bf16.mxu1 %v19670_v13  ;;  %v19726_v2 = vld [vmem:[#allocation11 + $0x1f0] sm:$0xff]  }
 0x475   :  { %v19727_v13 = vld [vmem:[#allocation11 + $0x130] sm:$0xff]  }
 0x476   :  { %6516 = vmatpush1.bf16.msra.mxu0 %v19665_v22  ;;  %v19728_v22 = vld [vmem:[#allocation11 + $0x1b0] sm:$0xff]  }
 0x477   :  { %6622 = vmatpush1.bf16.msra.mxu1 %v19668_v19  ;;  %6517 = vmatprep.subr.bf16.mxu0 %v19673_v35  ;;  %v19729_v19 = vld [vmem:[#allocation11 + $0x178] sm:$0xff]  }
 0x478   :  { %6623 = vmatprep.subr.bf16.mxu1 %v19676_v62  ;;  %v19730_v35 = vld [vmem:[#allocation11 + $0x1f8] sm:$0xff]  }
 0x479   :  { %v19731_v62 = vld [vmem:[#allocation11 + $0x138] sm:$0xff]  }
 0x47a   :  { %6518 = vmatpush1.bf16.msra.mxu0 %v19671_v41  ;;  %v19732_v41 = vld [vmem:[#allocation11 + $0x1b8] sm:$0xff]  }
 0x47b   :  { %6624 = vmatpush1.bf16.msra.mxu1 %v19674_v49  ;;  %6519 = vmatprep.subr.bf16.mxu0 %v19679_v38  ;;  %v19733_v49 = vld [vmem:[#allocation11 + $0x40] sm:$0xff]  }
 0x47c   :  { %6625 = vmatprep.subr.bf16.mxu1 %v19682_v18  ;;  %v19734_v38 = vld [vmem:[#allocation11 + $0xc0] sm:$0xff]   ;;  %v6670_v18 = vld [vmem:[#allocation10] sm:$0xf] }
 0x47e   :  { %6520 = vmatpush1.bf16.msra.mxu0 %v19677_v14  ;;  %v22409_v14 = vrot.slane %v6670_v18, %v22065_v27 }
 0x47f   :  { %6626 = vmatpush1.bf16.msra.mxu1 %v19680_v24  ;;  %6521 = vmatprep.subr.bf16.mxu0 %v19685_v52  ;;  %v22412_v24 = vrot.slane %v6670_v18, %v22068_v28  ;;  %v22415_v52 = vrot.slane %v6670_v18, %v22071_v32  ;;  %v19745_v32 = vld [vmem:[#allocation11 + $0x58] sm:$0xff]  }
 0x480   :  { %6627 = vmatprep.subr.bf16.mxu1 %v19688_v59  ;;  %v22418_v59 = vrot.slane %v6670_v18, %v22074_v58 }
 0x482   :  { %6522 = vmatpush1.bf16.msra.mxu0 %v19683_v16 }
 0x483   :  { %6628 = vmatpush1.bf16.msra.mxu1 %v19686_v48  ;;  %6523 = vmatprep.subr.bf16.mxu0 %v19691_v3 }
 0x484   :  { %6629 = vmatprep.subr.bf16.mxu1 %v19694_v53 }
 0x486   :  { %6524 = vmatpush1.bf16.msra.mxu0 %v19689_v12 }
 0x487   :  { %6630 = vmatpush1.bf16.msra.mxu1 %v19692_v39  ;;  %6525 = vmatprep.subr.bf16.mxu0 %v19697_v6 }
 0x488   :  { %6631 = vmatprep.subr.bf16.mxu1 %v19700_v1 }
 0x48a   :  { %6526 = vmatpush1.bf16.msra.mxu0 %v19695_v56 }
 0x48b   :  { %6632 = vmatpush1.bf16.msra.mxu1 %v19698_v17  ;;  %17863 = vmatprep.subr.bf16.mxu0 %v19701_v46 }
 0x48c   :  { %17891 = vmatprep.subr.bf16.mxu1 %v19702_v21 }
 0x48d   :  { %16472 = vmatmul.mubr.msk.bf16.vlgmr.msra.gmra.mrb[8].mxu0 %vm21974_vm8, %v22171_v57 }
 0x48e   :  { %16504 = vmatmul.mubr.msk.bf16.vlgmr.msra.gmra.mrb[8].mxu1 %vm21974_vm8, %v22171_v57  ;;  %16476 = vmatprep.mubr.msk.bf16.mxu0 %vm21988_vm10, %v22296_v11  ;;  %v19712_v57 = vld [vmem:[#allocation11 + $0x190] sm:$0xff]  }
 0x48f   :  { %16508 = vmatprep.mubr.msk.bf16.mxu1 %vm21988_vm10, %v22296_v11  ;;  %17864 = vmatpush3.bf16.msra.mxu0 %v19703_v8  ;;  %v19714_v11 = vld [vmem:[#allocation11 + $0x1d8] sm:$0xff]  }
 0x490   :  { %17892 = vmatpush3.bf16.msra.mxu1 %v19704_v15  ;;  %17865 = vmatprep.subr.bf16.mxu0 %v19705_v61 }
 0x491   :  { %17893 = vmatprep.subr.bf16.mxu1 %v19706_v40 }
 0x493   :  { %17866 = vmatpush3.bf16.msra.mxu0 %v19707_v31 }
 0x494   :  { %17894 = vmatpush3.bf16.msra.mxu1 %v19708_v36  ;;  %17867 = vmatprep.subr.bf16.mxu0 %v19709_v54 }
 0x495   :  { %16480 = vmatmul.mubr.msk.bf16.gmra.mrb[12].mxu0 %vm21988_vm10, %v22304_v5  ;;  %17895 = vmatprep.subr.bf16.mxu1 %v19710_v42 }
 0x496   :  { %16512 = vmatmul.mubr.msk.bf16.gmra.mrb[12].mxu1 %vm21988_vm10, %v22304_v5  ;;  %v19724_v5 = vld [vmem:[#allocation11 + $0x1a8] sm:$0xff]  }
 0x497   :  { %17868 = vmatpush3.bf16.msra.mxu0 %v19711_v29 }
 0x498   :  { %17896 = vmatpush3.bf16.msra.mxu1 %v19712_v57  ;;  %17869 = vmatprep.subr.bf16.mxu0 %v19713_v4 }
 0x499   :  { %17897 = vmatprep.subr.bf16.mxu1 %v19714_v11 }
 0x49b   :  { %17870 = vmatpush3.bf16.msra.mxu0 %v19715_v26 }
 0x49c   :  { %17898 = vmatpush3.bf16.msra.mxu1 %v19716_v7  ;;  %17871 = vmatprep.subr.bf16.mxu0 %v19717_v47 }
 0x49d   :  { %17899 = vmatprep.subr.bf16.mxu1 %v19718_v60 }
 0x49f   :  { %17872 = vmatpush3.bf16.msra.mxu0 %v19719_v20 }
 0x4a0   :  { %17900 = vmatpush3.bf16.msra.mxu1 %v19720_v45  ;;  %17873 = vmatprep.subr.bf16.mxu0 %v19721_v10 }
 0x4a1   :  { %17901 = vmatprep.subr.bf16.mxu1 %v19722_v43 }
 0x4a3   :  { %17874 = vmatpush3.bf16.msra.mxu0 %v19723_v30 }
 0x4a4   :  { %17902 = vmatpush3.bf16.msra.mxu1 %v19724_v5  ;;  %17875 = vmatprep.subr.bf16.mxu0 %v19725_v44 }
 0x4a5   :  { %17903 = vmatprep.subr.bf16.mxu1 %v19726_v2 }
 0x4a7   :  { %17876 = vmatpush3.bf16.msra.mxu0 %v19727_v13 }
 0x4a8   :  { %17904 = vmatpush3.bf16.msra.mxu1 %v19728_v22  ;;  %17877 = vmatprep.subr.bf16.mxu0 %v19729_v19 }
 0x4a9   :  { %17905 = vmatprep.subr.bf16.mxu1 %v19730_v35 }
 0x4ab   :  { %17878 = vmatpush3.bf16.msra.mxu0 %v19731_v62 }
 0x4ac   :  { %17906 = vmatpush3.bf16.msra.mxu1 %v19732_v41  ;;  %17919 = vmatprep.subr.bf16.mxu0 %v19733_v49 }
 0x4ad   :  { %17947 = vmatprep.subr.bf16.mxu1 %v19734_v38 }
 0x560   :  { %v6529_v16 = vpop.f32.mrb[8].mxu0 }
 0x561   :  { %v6692_v48 = vadd.f32 %v22409_v14, %v6529_v16  ;;  %v6635_v3 = vpop.f32.mrb[8].mxu1  ;;  %v6531_v53 = vpop.f32.mrb[9].mxu0 }
 0x562   :  { %v6694_v12 = vadd.f32 %v22412_v24, %v6635_v3  ;;  %v6693_v39 = vadd.f32 %v22415_v52, %v6531_v53  ;;  %v6637_v6 = vpop.f32.mrb[9].mxu1  ;;  %v6533_v1 = vpop.f32.mrb[10].mxu0 }
 0x563   :  { %v22423_v56 = vmax.f32 %v6692_v48, 0.0  ;;  %v6695_v17 = vadd.f32 %v22418_v59, %v6637_v6  ;;  %v6696_v46 = vadd.f32 %v22409_v14, %v6533_v1  ;;  %v6639_v21 = vpop.f32.mrb[10].mxu1  ;;  %v6535_v8 = vpop.f32.mrb[11].mxu0 }
 0x564   :  { %v22427_v15 = vmax.f32 %v6694_v12, 0.0  ;;  %v6698_v61 = vadd.f32 %v22412_v24, %v6639_v21  ;;  %v6641_v40 = vpop.f32.mrb[11].mxu1  ;;  %v22433_v54 = vmax.f32 %v6693_v39, 0.0  ;;  %v6697_v42 = vadd.f32 %v22415_v52, %v6535_v8 }
 0x565   :  { %v22430_v31 = vmax.f32 %v6696_v46, 0.0  ;;  %v6748_v36 = vrot.slane %v22423_v56, 7  ;;  %v23697_v29 = vrot.slane %v22423_v56, 1  ;;  %v22437_v57 = vmax.f32 %v6695_v17, 0.0 }
 0x566   :  { %v6750_v26 = vrot.slane %v22427_v15, 7  ;;  %v22444_v47 = vmax.f32 %v6698_v61, 0.0  ;;  %v6699_v60 = vadd.f32 %v22418_v59, %v6641_v40  ;;  %v23696_v45 = vrot.slane %v22427_v15, 1 }
 0x567   :  { %v23701_v4 = vrot.slane %v22430_v31, 7  ;;  %v6809_v11 = vrot.slane %v22430_v31, 1  ;;  %v6948_v7 = vpack.c.bf16 %v22430_v31, %v22423_v56  ;;  %v22465_v19 = vmax.f32 %v6697_v42, 0.0 }
 0x568   :  { %v6539_v20 = vpop.f32.mrb[12].mxu0  ;;  %v23700_v2 = vrot.slane %v22444_v47, 7  ;;  %v6815_v13 = vrot.slane %v22444_v47, 1  ;;  %v6950_v22 = vpack.c.bf16 %v22444_v47, %v22427_v15  ;;  %v6749_v41 = vrot.slane %v22433_v54, 7 }
 0x569   :  { %v22453_v10 = vsel %vm318_vm0, %v6748_v36, %v23701_v4  ;;  %v22458_v43 = vsel %vm391_vm4, %v23697_v29, %v6809_v11  ;;  %v6700_v30 = vadd.f32 %v22409_v14, %v6539_v20  ;;  %v6645_v5 = vpop.f32.mrb[12].mxu1  ;;  %v6541_v44 = vpop.f32.mrb[13].mxu0  ;;  %v22468_v49 = vmax.f32 %v6699_v60, 0.0 }
 0x56a   :  { %v6647_v35 = vpop.f32.mrb[13].mxu1  ;;  %v6543_v62 = vpop.f32.mrb[14].mxu0  ;;  %v6702_v18 = vadd.f32 %v22412_v24, %v6645_v5  ;;  %v22478_v3 = vsel %vm318_vm0, %v6750_v26, %v23700_v2  ;;  %v22483_v53 = vsel %vm391_vm4, %v23696_v45, %v6815_v13  ;;  %v6701_v12 = vadd.f32 %v22415_v52, %v6541_v44  ;;  %v19735_v44 = vld [vmem:[#allocation11] sm:$0xff]   ;;  %v19738_v45 = vld [vmem:[#allocation11 + $0xc8] sm:$0xff]  }
 0x56b   :  { %v22470_v38 = vmax.f32 %v6700_v30, 0.0  ;;  %v6649_v16 = vpop.f32.mrb[14].mxu1  ;;  %v6545_v48 = vpop.f32.mrb[15].mxu0  ;;  %v6703_v39 = vadd.f32 %v22418_v59, %v6647_v35  ;;  %v23702_v17 = vrot.slane %v22437_v57, 7  ;;  %v6754_v8 = vrot.slane %v22465_v19, 7  ;;  %v19736_v35 = vld [vmem:[#allocation11 + $0x80] sm:$0xff]  }
 0x56c   :  { %v6651_v6 = vpop.f32.mrb[15].mxu1  ;;  %v22492_v61 = vmax.f32 %v6702_v18, 0.0  ;;  %v22494_v40 = vmax.f32 %v6701_v12, 0.0  ;;  %v6704_v42 = vadd.f32 %v22409_v14, %v6543_v62  ;;  %v6706_v20 = vadd.f32 %v22412_v24, %v6649_v16 }
 0x56d   :  { %v23698_v21 = vrot.slane %v22470_v38, 1  ;;  %v6949_v30 = vpack.c.bf16 %v22465_v19, %v22433_v54  ;;  %v6951_v5 = vpack.c.bf16 %v22468_v49, %v22437_v57  ;;  %v22511_v12 = vmax.f32 %v6703_v39, 0.0 }
 0x56e   :  { %v23699_v62 = vrot.slane %v22492_v61, 1  ;;  %v6758_v24 = vrot.slane %v22468_v49, 7  ;;  %v22523_v46 = vmax.f32 %v6706_v20, 0.0  ;;  %v6705_v39 = vadd.f32 %v22415_v52, %v6545_v48  ;;  %v19741_v48 = vld [vmem:[#allocation11 + $0x50] sm:$0xff]  }
 0x56f   :  { %v22500_v60 = vsel %vm391_vm4, %v6809_v11, %v23698_v21  ;;  %v19737_v11 = vld [vmem:[#allocation11 + $0x48] sm:$0xff]   ;;  %v22516_v21 = vmax.f32 %v6704_v42, 0.0  ;;  %7245 = vmatprep.mubr.bf16.mxu0 %v6949_v30  ;;  %7294 = vmatprep.mubr.bf16.mxu1 %v6951_v5  ;;  %v6707_v1 = vadd.f32 %v22418_v59, %v6651_v6  ;;  %v6762_v42 = vrot.slane %v22494_v40, 7  ;;  %v19742_v6 = vld [vmem:[#allocation11 + $0xd0] sm:$0xff]  }
 0x570   :  { %v22521_v14 = vsel %vm391_vm4, %v6815_v13, %v23699_v62  ;;  %7246 = vmatmul.mubr.bf16.vlgmr.msra.gmra.mrb[16].mxu0 %v6948_v7  ;;  %7295 = vmatmul.mubr.bf16.vlgmr.msra.gmra.mrb[16].mxu1 %v6950_v22  ;;  %v19739_v5 = vld [vmem:[#allocation11 + $0x8] sm:$0xff]   ;;  %v6766_v52 = vrot.slane %v22511_v12, 7  ;;  %v6730_v59 = vrot.slane %v22523_v46, 7  ;;  %v22535_v7 = vmax.f32 %v6705_v39, 0.0 }
 0x571   :  { %v6728_v30 = vrot.slane %v22516_v21, 7  ;;  %17920 = vmatpush3.bf16.msra.mxu0 %v19735_v44  ;;  %17948 = vmatpush3.bf16.msra.mxu1 %v19736_v35  ;;  %v19740_v13 = vld [vmem:[#allocation11 + $0x88] sm:$0xff]   ;;  %v6952_v20 = vpack.c.bf16 %v22516_v21, %v22470_v38  ;;  %v22537_v22 = vmax.f32 %v6707_v1, 0.0  ;;  %v6954_v35 = vpack.c.bf16 %v22523_v46, %v22492_v61 }
 0x572   :  { %17921 = vmatprep.subr.bf16.mxu0 %v19737_v11  ;;  %17949 = vmatprep.subr.bf16.mxu1 %v19738_v45  ;;  %v6755_v39 = vsel %vm318_vm0, %v6749_v41, %v6754_v8  ;;  %v6759_v45 = vsel %vm318_vm0, %v23702_v17, %v6758_v24  ;;  %v6764_v1 = vrot.slane %v22492_v61, 7  ;;  %v6729_v16 = vrot.slane %v22535_v7, 7  ;;  %v19743_v11 = vld [vmem:[#allocation11 + $0x10] sm:$0xff]  }
 0x573   :  { %v22542_v44 = vsel %vm318_vm0, %v6728_v30, %v6748_v36  ;;  %v22560_v36 = vsel %vm318_vm0, %v6730_v59, %v6750_v26  ;;  %v6822_v62 = vrot.slane %v22494_v40, 1  ;;  %v6731_v2 = vrot.slane %v22537_v22, 7  ;;  %v19744_v17 = vld [vmem:[#allocation11 + $0x90] sm:$0xff]  }
 0x574   :  { %v6953_v4 = vpack.c.bf16 %v22535_v7, %v22494_v40  ;;  %v6826_v29 = vrot.slane %v22511_v12, 1  ;;  %v6955_v26 = vpack.c.bf16 %v22537_v22, %v22511_v12  ;;  %v6789_v18 = vsel %vm318_vm0, %v6729_v16, %v6749_v41 }
 0x575   :  { %17922 = vmatpush3.bf16.msra.mxu0 %v19739_v5  ;;  %17950 = vmatpush3.bf16.msra.mxu1 %v19740_v13  ;;  %v22578_v5 = vsel %vm318_vm0, %v6754_v8, %v6762_v42  ;;  %v16579_v40 = vpack.c.bf16 %v6755_v39, %v6789_v18  ;;  %v23763_v13 = vrot.slane %v22437_v57, 7  ;;  %v22584_v12 = vsel %vm318_vm0, %v6762_v42, %v6729_v16  ;;  %v19746_v8 = vld [vmem:[#allocation11 + $0xd8] sm:$0xff]  }
 0x576   :  { %17923 = vmatprep.subr.bf16.mxu0 %v19741_v48  ;;  %17951 = vmatprep.subr.bf16.mxu1 %v19742_v6  ;;  %v22587_v48 = vsel %vm318_vm0, %v6758_v24, %v6766_v52  ;;  %v6830_v41 = vrot.slane %v22535_v7, 1  ;;  %v22593_v18 = vsel %vm318_vm0, %v6766_v52, %v6731_v2  ;;  %v6834_v39 = vrot.slane %v22537_v22, 1  ;;  %v19747_v16 = vld [vmem:[#allocation11 + $0x18] sm:$0xff]  }
 0x577   :  { %7253 = vmatprep.mubr.bf16.mxu0 %v6953_v4  ;;  %v6791_v58 = vsel %vm318_vm0, %v6731_v2, %v23763_v13  ;;  %7302 = vmatprep.mubr.bf16.mxu1 %v6955_v26  ;;  %v16587_v4 = vpack.c.bf16 %v22584_v12, %v22578_v5  ;;  %v16603_v24 = vpack.c.bf16 %v22593_v18, %v22587_v48  ;;  %v23764_v42 = vrot.slane %v22470_v38, 7  ;;  %v19748_v22 = vld [vmem:[#allocation11 + $0x98] sm:$0xff]   ;;  %v19776_v5 = vld [vmem:[#allocation11 + $0x290] sm:$0xff]  }
 0x578   :  { %7254 = vmatmul.mubr.bf16.gmra.mrb[20].mxu0 %v6952_v20  ;;  %v16595_v6 = vpack.c.bf16 %v6759_v45, %v6791_v58  ;;  %7303 = vmatmul.mubr.bf16.gmra.mrb[20].mxu1 %v6954_v35  ;;  %v23765_v20 = vrot.slane %v22430_v31, 7  ;;  %v6828_v52 = vrot.slane %v22516_v21, 1  ;;  %v19749_v35 = vld [vmem:[#allocation11 + $0x60] sm:$0xff]   ;;  %v23767_v31 = vrot.slane %v22444_v47, 7  ;;  %v19777_v12 = vld [vmem:[#allocation11 + $0x258] sm:$0xff]  }
 0x579   :  { %17924 = vmatpush3.bf16.msra.mxu0 %v19743_v11  ;;  %v23766_v7 = vmov %v23764_v42  ;;  %17952 = vmatpush3.bf16.msra.mxu1 %v19744_v17  ;;  %v22621_v26 = vsel %vm318_vm0, %v6764_v1, %v6730_v59  ;;  %v19750_v17 = vld [vmem:[#allocation11 + $0xe0] sm:$0xff]   ;;  %v23769_v47 = vrot.slane %v22433_v54, 1  ;;  %v19778_v48 = vld [vmem:[#allocation11 + $0x2d8] sm:$0xff]  }
 0x57a   :  { %v22603_v58 = vsel %vm318_vm0, %v23765_v20, %v23764_v42  ;;  %v22608_v2 = vsel %vm318_vm0, %v23766_v7, %v6728_v30  ;;  %16580 = vmatprep.mubr.msk.bf16.mxu0 %vm21812_vm3, %v16579_v40  ;;  %v22618_v11 = vsel %vm318_vm0, %v23767_v31, %v6764_v1  ;;  %v6832_v30 = vrot.slane %v22523_v46, 1  ;;  %16596 = vmatprep.mubr.msk.bf16.mxu1 %vm21812_vm3, %v16595_v6  ;;  %v19780_v18 = vld [vmem:[#allocation11 + $0x298] sm:$0xff]  }
 0x57b   :  { %v16591_v45 = vpack.c.bf16 %v22608_v2, %v22603_v58  ;;  %17925 = vmatprep.subr.bf16.mxu0 %v19745_v32  ;;  %v16607_v21 = vpack.c.bf16 %v22621_v26, %v22618_v11  ;;  %v23768_v40 = vrot.slane %v22465_v19, 1  ;;  %17953 = vmatprep.subr.bf16.mxu1 %v19746_v8  ;;  %v23771_v46 = vrot.slane %v22468_v49, 1  ;;  %v19751_v8 = vld [vmem:[#allocation11 + $0x20] sm:$0xff]   ;;  %v19785_v11 = vld [vmem:[#allocation11 + $0x268] sm:$0xff]  }
 0x57c   :  { %v23772_v6 = vrot.slane %v22437_v57, 1  ;;  %v22655_v19 = vsel %vm391_vm4, %v6822_v62, %v6830_v41  ;;  %v19754_v57 = vld [vmem:[#allocation11 + $0xe8] sm:$0xff]   ;;  %v19782_v58 = vld [vmem:[#allocation11 + $0x2e0] sm:$0xff]  }
 0x57d   :  { %v22633_v13 = vsel %vm391_vm4, %v23769_v47, %v23768_v40  ;;  %v23770_v59 = vmov %v23768_v40  ;;  %v23773_v20 = vmov %v23771_v46  ;;  %17926 = vmatpush3.bf16.msra.mxu0 %v19747_v16  ;;  %v23774_v40 = vmov %v23769_v47  ;;  %17954 = vmatpush3.bf16.msra.mxu1 %v19748_v22  ;;  %v19753_v16 = vld [vmem:[#allocation11 + $0x68] sm:$0xff]   ;;  %v19783_v2 = vld [vmem:[#allocation11 + $0x220] sm:$0xff]  }
 0x57e   :  { %v22638_v1 = vsel %vm391_vm4, %v23770_v59, %v6822_v62  ;;  %v22647_v42 = vsel %vm391_vm4, %v23772_v6, %v23771_v46  ;;  %v22652_v7 = vsel %vm391_vm4, %v23773_v20, %v6826_v29  ;;  %v22662_v47 = vsel %vm391_vm4, %v6830_v41, %v23774_v40  ;;  %17927 = vmatprep.subr.bf16.mxu0 %v19749_v35  ;;  %v19752_v62 = vld [vmem:[#allocation11 + $0xa0] sm:$0xff]   ;;  %v19786_v26 = vld [vmem:[#allocation11 + $0x2e8] sm:$0xff]  }
 0x57f   :  { %v16643_v32 = vpack.c.bf16 %v22638_v1, %v22633_v13  ;;  %v16659_v31 = vpack.c.bf16 %v22652_v7, %v22647_v42  ;;  %v22665_v59 = vsel %vm391_vm4, %v6826_v29, %v6834_v39  ;;  %v23775_v49 = vmov %v23772_v6  ;;  %17955 = vmatprep.subr.bf16.mxu1 %v19750_v17  ;;  %v19765_v17 = vld [vmem:[#allocation11 + $0x240] sm:$0xff]   ;;  %v19788_v13 = vld [vmem:[#allocation11 + $0x2a8] sm:$0xff]   ;;  %v19789_v1 = vld [vmem:[#allocation11 + $0x270] sm:$0xff]  }
 0x580   :  { %v22670_v46 = vsel %vm391_vm4, %v6834_v39, %v23775_v49  ;;  %v16651_v6 = vpack.c.bf16 %v22662_v47, %v22655_v19  ;;  %v23776_v41 = vrot.slane %v22470_v38, 1  ;;  %v23777_v39 = vrot.slane %v22423_v56, 1  ;;  %v19755_v56 = vld [vmem:[#allocation11 + $0x28] sm:$0xff]   ;;  %v19791_v42 = vld [vmem:[#allocation11 + $0x230] sm:$0xff]  }
 0x581   :  { %v16667_v54 = vpack.c.bf16 %v22670_v46, %v22665_v59  ;;  %v23778_v35 = vrot.slane %v22492_v61, 1  ;;  %v23779_v40 = vrot.slane %v22427_v15, 1  ;;  %17928 = vmatpush3.bf16.msra.mxu0 %v19751_v8  ;;  %17956 = vmatpush3.bf16.msra.mxu1 %v19752_v62  ;;  %v19757_v61 = vld [vmem:[#allocation11 + $0x70] sm:$0xff]   ;;  %v19764_v8 = vld [vmem:[#allocation11 + $0xb8] sm:$0xff]   ;;  %v19766_v62 = vld [vmem:[#allocation11 + $0x2c0] sm:$0xff]  }
 0x582   :  { %v22679_v29 = vsel %vm391_vm4, %v23776_v41, %v6828_v52  ;;  %v22684_v22 = vsel %vm391_vm4, %v6828_v52, %v23777_v39  ;;  %17929 = vmatprep.subr.bf16.mxu0 %v19753_v16  ;;  %v19756_v52 = vld [vmem:[#allocation11 + $0xa8] sm:$0xff]   ;;  %17957 = vmatprep.subr.bf16.mxu1 %v19754_v57  ;;  %v19758_v41 = vld [vmem:[#allocation11 + $0xf0] sm:$0xff]   ;;  %v19767_v16 = vld [vmem:[#allocation11 + $0x200] sm:$0xff]  }
 0x583   :  { %v22689_v20 = vsel %vm391_vm4, %v23778_v35, %v6832_v30  ;;  %v22694_v49 = vsel %vm391_vm4, %v6832_v30, %v23779_v40  ;;  %v16655_v38 = vpack.c.bf16 %v22684_v22, %v22679_v29  ;;  %v19759_v39 = vld [vmem:[#allocation11 + $0x30] sm:$0xff]   ;;  %v19761_v30 = vld [vmem:[#allocation11 + $0x78] sm:$0xff]   ;;  %v19768_v57 = vld [vmem:[#allocation11 + $0x280] sm:$0xff]  }
 0x584   :  { %v19760_v15 = vld [vmem:[#allocation11 + $0xb0] sm:$0xff]   ;;  %v19762_v35 = vld [vmem:[#allocation11 + $0xf8] sm:$0xff]   ;;  %v23784_v46 = vpack.c.bf16 %v22694_v49, %v22689_v20 }
 0x585   :  { %17930 = vmatpush3.bf16.msra.mxu0 %v19755_v56  ;;  %17958 = vmatpush3.bf16.msra.mxu1 %v19756_v52  ;;  %v19763_v40 = vld [vmem:[#allocation11 + $0x38] sm:$0xff]   ;;  %v19769_v56 = vld [vmem:[#allocation11 + $0x248] sm:$0xff]   ;;  %v23780_v52 = vpack.c.bf16 %v22453_v10, %v22542_v44  ;;  %v19773_v44 = vld [vmem:[#allocation11 + $0x250] sm:$0xff]  }
 0x586   :  { %17931 = vmatprep.subr.bf16.mxu0 %v19757_v61  ;;  %17959 = vmatprep.subr.bf16.mxu1 %v19758_v41  ;;  %v19770_v61 = vld [vmem:[#allocation11 + $0x2c8] sm:$0xff]   ;;  %v23781_v41 = vpack.c.bf16 %v22478_v3, %v22560_v36  ;;  %v19774_v36 = vld [vmem:[#allocation11 + $0x2d0] sm:$0xff]  }
 0x587   :  { %v19771_v10 = vld [vmem:[#allocation11 + $0x208] sm:$0xff]   ;;  %v19792_v7 = vld [vmem:[#allocation11 + $0x2b0] sm:$0xff]  }
 0x588   :  { %v19772_v3 = vld [vmem:[#allocation11 + $0x288] sm:$0xff]  }
 0x589   :  { %17932 = vmatpush3.bf16.msra.mxu0 %v19759_v39  ;;  %17960 = vmatpush3.bf16.msra.mxu1 %v19760_v15  ;;  %v19794_v39 = vld [vmem:[#allocation11 + $0x2f8] sm:$0xff]  }
 0x58a   :  { %17933 = vmatprep.subr.bf16.mxu0 %v19761_v30  ;;  %17961 = vmatprep.subr.bf16.mxu1 %v19762_v35  ;;  %v19795_v15 = vld [vmem:[#allocation11 + $0x238] sm:$0xff]  }
 0x58b   :  { %v19796_v30 = vld [vmem:[#allocation11 + $0x2b8] sm:$0xff]  }
 0x58c   :  { %v19799_v35 = vld [vmem:[#allocation14 + $0x404] ss:$16 sps:$4 sm:$0xff]   ;;  %v19812_v19 = vld [vmem:[#allocation14 + $0x448] ss:$16 sps:$4 sm:$0xff]   ;;  %v19820_v59 = vld [vmem:[#allocation14 + $0x46c] ss:$16 sps:$4 sm:$0xff]  }
 0x58d   :  { %17934 = vmatpush3.bf16.msra.mxu0 %v19763_v40  ;;  %17962 = vmatpush3.bf16.msra.mxu1 %v19764_v8  ;;  %v19802_v40 = vld [vmem:[#allocation14 + $0x40c] ss:$16 sps:$4 sm:$0xff]   ;;  %v19797_v8 = vld [vmem:[#allocation14 + $0x400] ss:$16 sps:$4 sm:$0xff]   ;;  %v19817_v47 = vld [vmem:[#allocation14 + $0x464] ss:$16 sps:$4 sm:$0xff]  }
 0x58e   :  { %17975 = vmatprep.subr.bf16.mxu0 %v19765_v17  ;;  %18003 = vmatprep.subr.bf16.mxu1 %v19766_v62  ;;  %v19775_v17 = vld [vmem:[#allocation11 + $0x210] sm:$0xff]   ;;  %v19800_v62 = vld [vmem:[#allocation14 + $0x408] ss:$16 sps:$4 sm:$0xff]  }
 0x58f   :  { %v19823_v29 = vld [vmem:[#allocation14 + $0x484] ss:$16 sps:$4 sm:$0xff]   ;;  %v19826_v22 = vld [vmem:[#allocation14 + $0x48c] ss:$16 sps:$4 sm:$0xff]   ;;  %v19824_v20 = vld [vmem:[#allocation14 + $0x488] ss:$16 sps:$4 sm:$0xff]  }
 0x590   :  { %16584 = vmatmul.mubr.msk.bf16.vlgmr.msra.gmra.mrb[24].mxu0 %vm21812_vm3, %v23780_v52  ;;  %16600 = vmatmul.mubr.msk.bf16.vlgmr.msra.gmra.mrb[24].mxu1 %vm21812_vm3, %v23781_v41  ;;  %v23783_v52 = vpack.c.bf16 %v22521_v14, %v22483_v53  ;;  %v19806_v53 = vld [vmem:[#allocation14 + $0x428] ss:$16 sps:$4 sm:$0xff]   ;;  %v19814_v14 = vld [vmem:[#allocation14 + $0x44c] ss:$16 sps:$4 sm:$0xff]   ;;  %v19829_v49 = vld [vmem:[#allocation14 + $0x4a4] ss:$16 sps:$4 sm:$0xff]  }
 0x591   :  { %16588 = vmatprep.mubr.msk.bf16.mxu0 %vm21867_vm6, %v16587_v4  ;;  %16604 = vmatprep.mubr.msk.bf16.mxu1 %vm21867_vm6, %v16603_v24  ;;  %v19779_v4 = vld [vmem:[#allocation11 + $0x218] sm:$0xff]   ;;  %v19781_v24 = vld [vmem:[#allocation11 + $0x260] sm:$0xff]  }
 0x592   :  { %17976 = vmatpush3.bf16.msra.mxu0 %v19767_v16  ;;  %18004 = vmatpush3.bf16.msra.mxu1 %v19768_v57  ;;  %v19805_v16 = vld [vmem:[#allocation14 + $0x424] ss:$16 sps:$4 sm:$0xff]   ;;  %v23782_v57 = vpack.c.bf16 %v22500_v60, %v22458_v43  ;;  %v19803_v43 = vld [vmem:[#allocation14 + $0x420] ss:$16 sps:$4 sm:$0xff]   ;;  %v19832_v41 = vld [vmem:[#allocation14 + $0x4ac] ss:$16 sps:$4 sm:$0xff]  }
 0x593   :  { %17977 = vmatprep.subr.bf16.mxu0 %v19769_v56  ;;  %18005 = vmatprep.subr.bf16.mxu1 %v19770_v61  ;;  %v19808_v56 = vld [vmem:[#allocation14 + $0x42c] ss:$16 sps:$4 sm:$0xff]   ;;  %v19811_v60 = vld [vmem:[#allocation14 + $0x444] ss:$16 sps:$4 sm:$0xff]   ;;  %v19809_v61 = vld [vmem:[#allocation14 + $0x440] ss:$16 sps:$4 sm:$0xff]  }
 0x596   :  { %17978 = vmatpush3.bf16.msra.mxu0 %v19771_v10  ;;  %18006 = vmatpush3.bf16.msra.mxu1 %v19772_v3  ;;  %v19827_v10 = vld [vmem:[#allocation14 + $0x4a0] ss:$16 sps:$4 sm:$0xff]   ;;  %v19830_v3 = vld [vmem:[#allocation14 + $0x4a8] ss:$16 sps:$4 sm:$0xff]  }
 0x597   :  { %17979 = vmatprep.subr.bf16.mxu0 %v19773_v44  ;;  %18007 = vmatprep.subr.bf16.mxu1 %v19774_v36  ;;  %v19838_v44 = vld [vmem:[#allocation14 + $0x4cc] ss:$16 sps:$4 sm:$0xff]   ;;  %v19833_v36 = vld [vmem:[#allocation14 + $0x4c0] ss:$16 sps:$4 sm:$0xff]  }
 0x598   :  { %16592 = vmatmul.mubr.msk.bf16.gmra.mrb[28].mxu0 %vm21867_vm6, %v16591_v45  ;;  %16608 = vmatmul.mubr.msk.bf16.gmra.mrb[28].mxu1 %vm21867_vm6, %v16607_v21  ;;  %v19784_v45 = vld [vmem:[#allocation11 + $0x2a0] sm:$0xff]   ;;  %v19787_v21 = vld [vmem:[#allocation11 + $0x228] sm:$0xff]  }
 0x599   :  { %16644 = vmatprep.mubr.msk.bf16.mxu0 %vm21974_vm8, %v16643_v32  ;;  %16660 = vmatprep.mubr.msk.bf16.mxu1 %vm21974_vm8, %v16659_v31  ;;  %v19790_v32 = vld [vmem:[#allocation11 + $0x2f0] sm:$0xff]   ;;  %v19793_v31 = vld [vmem:[#allocation11 + $0x278] sm:$0xff]  }
 0x59a   :  { %17980 = vmatpush3.bf16.msra.mxu0 %v19775_v17  ;;  %18008 = vmatpush3.bf16.msra.mxu1 %v19776_v5  ;;  %v19836_v17 = vld [vmem:[#allocation14 + $0x4c8] ss:$16 sps:$4 sm:$0xff]   ;;  %v19841_v5 = vld [vmem:[#allocation14 + $0x4e4] ss:$16 sps:$4 sm:$0xff]  }
 0x59b   :  { %17981 = vmatprep.subr.bf16.mxu0 %v19777_v12  ;;  %18009 = vmatprep.subr.bf16.mxu1 %v19778_v48  ;;  %v19844_v12 = vld [vmem:[#allocation14 + $0x4ec] ss:$16 sps:$4 sm:$0xff]   ;;  %v19839_v48 = vld [vmem:[#allocation14 + $0x4e0] ss:$16 sps:$4 sm:$0xff]  }
 0x59e   :  { %17982 = vmatpush3.bf16.msra.mxu0 %v19779_v4  ;;  %18010 = vmatpush3.bf16.msra.mxu1 %v19780_v18  ;;  %v19842_v4 = vld [vmem:[#allocation14 + $0x4e8] ss:$16 sps:$4 sm:$0xff]   ;;  %v19847_v18 = vld [vmem:[#allocation14 + $0x504] ss:$16 sps:$4 sm:$0xff]  }
 0x59f   :  { %17983 = vmatprep.subr.bf16.mxu0 %v19781_v24  ;;  %18011 = vmatprep.subr.bf16.mxu1 %v19782_v58  ;;  %v19850_v24 = vld [vmem:[#allocation14 + $0x50c] ss:$16 sps:$4 sm:$0xff]   ;;  %v19845_v58 = vld [vmem:[#allocation14 + $0x500] ss:$16 sps:$4 sm:$0xff]  }
 0x5a2   :  { %17984 = vmatpush3.bf16.msra.mxu0 %v19783_v2  ;;  %18012 = vmatpush3.bf16.msra.mxu1 %v19784_v45  ;;  %v19848_v2 = vld [vmem:[#allocation14 + $0x508] ss:$16 sps:$4 sm:$0xff]   ;;  %v19853_v45 = vld [vmem:[#allocation14 + $0x524] ss:$16 sps:$4 sm:$0xff]  }
 0x5a3   :  { %17985 = vmatprep.subr.bf16.mxu0 %v19785_v11  ;;  %18013 = vmatprep.subr.bf16.mxu1 %v19786_v26  ;;  %v19856_v11 = vld [vmem:[#allocation14 + $0x52c] ss:$16 sps:$4 sm:$0xff]   ;;  %v19851_v26 = vld [vmem:[#allocation14 + $0x520] ss:$16 sps:$4 sm:$0xff]  }
 0x5a6   :  { %17986 = vmatpush3.bf16.msra.mxu0 %v19787_v21  ;;  %18014 = vmatpush3.bf16.msra.mxu1 %v19788_v13  ;;  %v19854_v21 = vld [vmem:[#allocation14 + $0x528] ss:$16 sps:$4 sm:$0xff]   ;;  %v19859_v13 = vld [vmem:[#allocation14 + $0x544] ss:$16 sps:$4 sm:$0xff]  }
 0x5a7   :  { %17987 = vmatprep.subr.bf16.mxu0 %v19789_v1  ;;  %18015 = vmatprep.subr.bf16.mxu1 %v19790_v32  ;;  %v19862_v1 = vld [vmem:[#allocation14 + $0x54c] ss:$16 sps:$4 sm:$0xff]   ;;  %v19857_v32 = vld [vmem:[#allocation14 + $0x540] ss:$16 sps:$4 sm:$0xff]  }
 0x5aa   :  { %17988 = vmatpush3.bf16.msra.mxu0 %v19791_v42  ;;  %18016 = vmatpush3.bf16.msra.mxu1 %v19792_v7  ;;  %v19860_v42 = vld [vmem:[#allocation14 + $0x548] ss:$16 sps:$4 sm:$0xff]   ;;  %v19865_v7 = vld [vmem:[#allocation14 + $0x564] ss:$16 sps:$4 sm:$0xff]  }
 0x5ab   :  { %17989 = vmatprep.subr.bf16.mxu0 %v19793_v31  ;;  %18017 = vmatprep.subr.bf16.mxu1 %v19794_v39  ;;  %v19868_v31 = vld [vmem:[#allocation14 + $0x56c] ss:$16 sps:$4 sm:$0xff]   ;;  %v19863_v39 = vld [vmem:[#allocation14 + $0x560] ss:$16 sps:$4 sm:$0xff]  }
 0x5ae   :  { %17990 = vmatpush3.bf16.msra.mxu0 %v19795_v15  ;;  %18018 = vmatpush3.bf16.msra.mxu1 %v19796_v30  ;;  %v19866_v15 = vld [vmem:[#allocation14 + $0x568] ss:$16 sps:$4 sm:$0xff]   ;;  %v19871_v30 = vld [vmem:[#allocation14 + $0x584] ss:$16 sps:$4 sm:$0xff]  }
 0x5af   :  { %8876 = vmatprep.subr.bf16.mxu0 %v19799_v35  ;;  %8982 = vmatprep.subr.bf16.mxu1 %v19802_v40  ;;  %v19874_v35 = vld [vmem:[#allocation14 + $0x58c] ss:$16 sps:$4 sm:$0xff]   ;;  %v19869_v40 = vld [vmem:[#allocation14 + $0x580] ss:$16 sps:$4 sm:$0xff]  }
 0x5b1   :  { %16648 = vmatmul.mubr.msk.bf16.vlgmr.msra.gmra.mrb[32].mxu0 %vm21974_vm8, %v23782_v57  ;;  %16664 = vmatmul.mubr.msk.bf16.vlgmr.msra.gmra.mrb[32].mxu1 %vm21974_vm8, %v23783_v52  ;;  %v19875_v57 = vld [vmem:[#allocation14 + $0x5a0] ss:$16 sps:$4 sm:$0xff]   ;;  %v19883_v52 = vld [vmem:[#allocation14 + $0x5c4] ss:$16 sps:$4 sm:$0xff]  }
 0x5b2   :  { %16652 = vmatprep.mubr.msk.bf16.mxu0 %vm21988_vm10, %v16651_v6  ;;  %16668 = vmatprep.mubr.msk.bf16.mxu1 %vm21988_vm10, %v16667_v54  ;;  %v19815_v6 = vld [vmem:[#allocation14 + $0x460] ss:$16 sps:$4 sm:$0xff]   ;;  %v19818_v54 = vld [vmem:[#allocation14 + $0x468] ss:$16 sps:$4 sm:$0xff]  }
 0x5b3   :  { %8877 = vmatpush1.bf16.msra.mxu0 %v19797_v8  ;;  %8983 = vmatpush1.bf16.msra.mxu1 %v19800_v62  ;;  %v19872_v8 = vld [vmem:[#allocation14 + $0x588] ss:$16 sps:$4 sm:$0xff]   ;;  %v19877_v62 = vld [vmem:[#allocation14 + $0x5a4] ss:$16 sps:$4 sm:$0xff]  }
 0x5b4   :  { %8878 = vmatprep.subr.bf16.mxu0 %v19805_v16  ;;  %8984 = vmatprep.subr.bf16.mxu1 %v19808_v56  ;;  %v19880_v16 = vld [vmem:[#allocation14 + $0x5ac] ss:$16 sps:$4 sm:$0xff]   ;;  %v19878_v56 = vld [vmem:[#allocation14 + $0x5a8] ss:$16 sps:$4 sm:$0xff]  }
 0x5b7   :  { %8879 = vmatpush1.bf16.msra.mxu0 %v19803_v43  ;;  %8985 = vmatpush1.bf16.msra.mxu1 %v19806_v53  ;;  %v19886_v43 = vld [vmem:[#allocation14 + $0x5cc] ss:$16 sps:$4 sm:$0xff]   ;;  %v19881_v53 = vld [vmem:[#allocation14 + $0x5c0] ss:$16 sps:$4 sm:$0xff]  }
 0x5b8   :  { %8880 = vmatprep.subr.bf16.mxu0 %v19811_v60  ;;  %8986 = vmatprep.subr.bf16.mxu1 %v19814_v14  ;;  %v19884_v60 = vld [vmem:[#allocation14 + $0x5c8] ss:$16 sps:$4 sm:$0xff]   ;;  %v19889_v14 = vld [vmem:[#allocation14 + $0x5e4] ss:$16 sps:$4 sm:$0xff]  }
 0x5b9   :  { %16656 = vmatmul.mubr.msk.bf16.gmra.mrb[36].mxu0 %vm21988_vm10, %v16655_v38  ;;  %16672 = vmatmul.mubr.msk.bf16.gmra.mrb[36].mxu1 %vm21988_vm10, %v23784_v46  ;;  %v19821_v38 = vld [vmem:[#allocation14 + $0x480] ss:$16 sps:$4 sm:$0xff]   ;;  %v19898_v46 = vld [vmem:[#allocation14 + $0x60c] ss:$16 sps:$4 sm:$0xff]  }
 0x5ba   :  { %8908 = vmatprep.mubr.bf16.mxu0 %v21680_v51  ;;  %9014 = vmatprep.mubr.bf16.mxu1 %v21680_v51  ;;  %v19835_v51 = vld [vmem:[#allocation14 + $0x4c4] ss:$16 sps:$4 sm:$0xff]  }
 0x5bb   :  { %8881 = vmatpush1.bf16.msra.mxu0 %v19809_v61  ;;  %8987 = vmatpush1.bf16.msra.mxu1 %v19812_v19  ;;  %v19892_v61 = vld [vmem:[#allocation14 + $0x5ec] ss:$16 sps:$4 sm:$0xff]   ;;  %v19887_v19 = vld [vmem:[#allocation14 + $0x5e0] ss:$16 sps:$4 sm:$0xff]  }
 0x5bc   :  { %8882 = vmatprep.subr.bf16.mxu0 %v19817_v47  ;;  %8988 = vmatprep.subr.bf16.mxu1 %v19820_v59  ;;  %v19890_v47 = vld [vmem:[#allocation14 + $0x5e8] ss:$16 sps:$4 sm:$0xff]   ;;  %v19895_v59 = vld [vmem:[#allocation14 + $0x604] ss:$16 sps:$4 sm:$0xff]  }
 0x5bf   :  { %8883 = vmatpush1.bf16.msra.mxu0 %v19815_v6  ;;  %8989 = vmatpush1.bf16.msra.mxu1 %v19818_v54  ;;  %v19893_v6 = vld [vmem:[#allocation14 + $0x600] ss:$16 sps:$4 sm:$0xff]   ;;  %v19896_v54 = vld [vmem:[#allocation14 + $0x608] ss:$16 sps:$4 sm:$0xff]  }
 0x5c0   :  { %8884 = vmatprep.subr.bf16.mxu0 %v19823_v29  ;;  %8990 = vmatprep.subr.bf16.mxu1 %v19826_v22  ;;  %v19901_v29 = vld [vmem:[#allocation14 + $0x624] ss:$16 sps:$4 sm:$0xff]   ;;  %v19904_v22 = vld [vmem:[#allocation14 + $0x62c] ss:$16 sps:$4 sm:$0xff]  }
 0x5c3   :  { %8885 = vmatpush1.bf16.msra.mxu0 %v19821_v38  ;;  %8991 = vmatpush1.bf16.msra.mxu1 %v19824_v20  ;;  %v19899_v38 = vld [vmem:[#allocation14 + $0x620] ss:$16 sps:$4 sm:$0xff]   ;;  %v19902_v20 = vld [vmem:[#allocation14 + $0x628] ss:$16 sps:$4 sm:$0xff]  }
 0x5c4   :  { %8886 = vmatprep.subr.bf16.mxu0 %v19829_v49  ;;  %8992 = vmatprep.subr.bf16.mxu1 %v19832_v41  ;;  %v19907_v49 = vld [vmem:[#allocation14 + $0x644] ss:$16 sps:$4 sm:$0xff]   ;;  %v19910_v41 = vld [vmem:[#allocation14 + $0x64c] ss:$16 sps:$4 sm:$0xff]  }
 0x5c7   :  { %8887 = vmatpush1.bf16.msra.mxu0 %v19827_v10  ;;  %8993 = vmatpush1.bf16.msra.mxu1 %v19830_v3  ;;  %v19905_v10 = vld [vmem:[#allocation14 + $0x640] ss:$16 sps:$4 sm:$0xff]   ;;  %v19908_v3 = vld [vmem:[#allocation14 + $0x648] ss:$16 sps:$4 sm:$0xff]  }
 0x5c8   :  { %8888 = vmatprep.subr.bf16.mxu0 %v19835_v51  ;;  %8994 = vmatprep.subr.bf16.mxu1 %v19838_v44  ;;  %v19913_v51 = vld [vmem:[#allocation14 + $0x664] ss:$16 sps:$4 sm:$0xff]   ;;  %v19916_v44 = vld [vmem:[#allocation14 + $0x66c] ss:$16 sps:$4 sm:$0xff]  }
 0x5cb   :  { %8889 = vmatpush1.bf16.msra.mxu0 %v19833_v36  ;;  %8995 = vmatpush1.bf16.msra.mxu1 %v19836_v17  ;;  %v19914_v36 = vld [vmem:[#allocation14 + $0x668] ss:$16 sps:$4 sm:$0xff]   ;;  %v19919_v17 = vld [vmem:[#allocation14 + $0x684] ss:$16 sps:$4 sm:$0xff]  }
 0x5cc   :  { %8890 = vmatprep.subr.bf16.mxu0 %v19841_v5  ;;  %8996 = vmatprep.subr.bf16.mxu1 %v19844_v12  ;;  %v19917_v5 = vld [vmem:[#allocation14 + $0x680] ss:$16 sps:$4 sm:$0xff]   ;;  %v19920_v12 = vld [vmem:[#allocation14 + $0x688] ss:$16 sps:$4 sm:$0xff]  }
 0x5cf   :  { %8891 = vmatpush1.bf16.msra.mxu0 %v19839_v48  ;;  %8997 = vmatpush1.bf16.msra.mxu1 %v19842_v4  ;;  %v19925_v48 = vld [vmem:[#allocation14 + $0x6a4] ss:$16 sps:$4 sm:$0xff]   ;;  %v19928_v4 = vld [vmem:[#allocation14 + $0x6ac] ss:$16 sps:$4 sm:$0xff]  }
 0x5d0   :  { %8892 = vmatprep.subr.bf16.mxu0 %v19847_v18  ;;  %8998 = vmatprep.subr.bf16.mxu1 %v19850_v24  ;;  %v19926_v18 = vld [vmem:[#allocation14 + $0x6a8] ss:$16 sps:$4 sm:$0xff]   ;;  %v19931_v24 = vld [vmem:[#allocation14 + $0x6c4] ss:$16 sps:$4 sm:$0xff]  }
 0x5d3   :  { %8893 = vmatpush1.bf16.msra.mxu0 %v19845_v58  ;;  %8999 = vmatpush1.bf16.msra.mxu1 %v19848_v2  ;;  %v19934_v58 = vld [vmem:[#allocation14 + $0x6cc] ss:$16 sps:$4 sm:$0xff]   ;;  %v19929_v2 = vld [vmem:[#allocation14 + $0x6c0] ss:$16 sps:$4 sm:$0xff]  }
 0x5d4   :  { %8894 = vmatprep.subr.bf16.mxu0 %v19853_v45  ;;  %9000 = vmatprep.subr.bf16.mxu1 %v19856_v11  ;;  %v19937_v45 = vld [vmem:[#allocation14 + $0x6e4] ss:$16 sps:$4 sm:$0xff]   ;;  %v19940_v11 = vld [vmem:[#allocation14 + $0x6ec] ss:$16 sps:$4 sm:$0xff]  }
 0x5d7   :  { %8895 = vmatpush1.bf16.msra.mxu0 %v19851_v26  ;;  %9001 = vmatpush1.bf16.msra.mxu1 %v19854_v21  ;;  %v19935_v26 = vld [vmem:[#allocation14 + $0x6e0] ss:$16 sps:$4 sm:$0xff]   ;;  %v19938_v21 = vld [vmem:[#allocation14 + $0x6e8] ss:$16 sps:$4 sm:$0xff]  }
 0x5d8   :  { %8896 = vmatprep.subr.bf16.mxu0 %v19859_v13  ;;  %9002 = vmatprep.subr.bf16.mxu1 %v19862_v1  ;;  %v19943_v13 = vld [vmem:[#allocation14 + $0x704] ss:$16 sps:$4 sm:$0xff]   ;;  %v19946_v1 = vld [vmem:[#allocation14 + $0x70c] ss:$16 sps:$4 sm:$0xff]  }
 0x5db   :  { %8897 = vmatpush1.bf16.msra.mxu0 %v19857_v32  ;;  %9003 = vmatpush1.bf16.msra.mxu1 %v19860_v42  ;;  %v19941_v32 = vld [vmem:[#allocation14 + $0x700] ss:$16 sps:$4 sm:$0xff]   ;;  %v19944_v42 = vld [vmem:[#allocation14 + $0x708] ss:$16 sps:$4 sm:$0xff]  }
 0x5dc   :  { %8898 = vmatprep.subr.bf16.mxu0 %v19865_v7  ;;  %9004 = vmatprep.subr.bf16.mxu1 %v19868_v31  ;;  %v19949_v7 = vld [vmem:[#allocation14 + $0x724] ss:$16 sps:$4 sm:$0xff]   ;;  %v19952_v31 = vld [vmem:[#allocation14 + $0x72c] ss:$16 sps:$4 sm:$0xff]  }
 0x5df   :  { %8899 = vmatpush1.bf16.msra.mxu0 %v19863_v39  ;;  %9005 = vmatpush1.bf16.msra.mxu1 %v19866_v15  ;;  %v19947_v39 = vld [vmem:[#allocation14 + $0x720] ss:$16 sps:$4 sm:$0xff]   ;;  %v19950_v15 = vld [vmem:[#allocation14 + $0x728] ss:$16 sps:$4 sm:$0xff]  }
 0x5e0   :  { %8900 = vmatprep.subr.bf16.mxu0 %v19871_v30  ;;  %9006 = vmatprep.subr.bf16.mxu1 %v19874_v35  ;;  %v19955_v30 = vld [vmem:[#allocation14 + $0x744] ss:$16 sps:$4 sm:$0xff]   ;;  %v19958_v35 = vld [vmem:[#allocation14 + $0x74c] ss:$16 sps:$4 sm:$0xff]  }
 0x5e3   :  { %8901 = vmatpush1.bf16.msra.mxu0 %v19869_v40  ;;  %9007 = vmatpush1.bf16.msra.mxu1 %v19872_v8  ;;  %v19953_v40 = vld [vmem:[#allocation14 + $0x740] ss:$16 sps:$4 sm:$0xff]   ;;  %v19956_v8 = vld [vmem:[#allocation14 + $0x748] ss:$16 sps:$4 sm:$0xff]  }
 0x5e4   :  { %8902 = vmatprep.subr.bf16.mxu0 %v19877_v62  ;;  %9008 = vmatprep.subr.bf16.mxu1 %v19880_v16  ;;  %v19961_v62 = vld [vmem:[#allocation14 + $0x764] ss:$16 sps:$4 sm:$0xff]   ;;  %v19964_v16 = vld [vmem:[#allocation14 + $0x76c] ss:$16 sps:$4 sm:$0xff]  }
 0x5e7   :  { %8903 = vmatpush1.bf16.msra.mxu0 %v19875_v57  ;;  %9009 = vmatpush1.bf16.msra.mxu1 %v19878_v56  ;;  %v19959_v57 = vld [vmem:[#allocation14 + $0x760] ss:$16 sps:$4 sm:$0xff]   ;;  %v19962_v56 = vld [vmem:[#allocation14 + $0x768] ss:$16 sps:$4 sm:$0xff]  }
 0x5e8   :  { %8904 = vmatprep.subr.bf16.mxu0 %v19883_v52  ;;  %9010 = vmatprep.subr.bf16.mxu1 %v19886_v43  ;;  %v19967_v52 = vld [vmem:[#allocation14 + $0x784] ss:$16 sps:$4 sm:$0xff]   ;;  %v19970_v43 = vld [vmem:[#allocation14 + $0x78c] ss:$16 sps:$4 sm:$0xff]  }
 0x5eb   :  { %8905 = vmatpush1.bf16.msra.mxu0 %v19881_v53  ;;  %9011 = vmatpush1.bf16.msra.mxu1 %v19884_v60  ;;  %v19965_v53 = vld [vmem:[#allocation14 + $0x780] ss:$16 sps:$4 sm:$0xff]   ;;  %v19968_v60 = vld [vmem:[#allocation14 + $0x788] ss:$16 sps:$4 sm:$0xff]  }
 0x5ec   :  { %8906 = vmatprep.subr.bf16.mxu0 %v19889_v14  ;;  %9012 = vmatprep.subr.bf16.mxu1 %v19892_v61  ;;  %v19973_v14 = vld [vmem:[#allocation14 + $0x7a4] ss:$16 sps:$4 sm:$0xff]   ;;  %v19976_v61 = vld [vmem:[#allocation14 + $0x7ac] ss:$16 sps:$4 sm:$0xff]  }
 0x5ef   :  { %8907 = vmatpush1.bf16.msra.mxu0 %v19887_v19  ;;  %9013 = vmatpush1.bf16.msra.mxu1 %v19890_v47  ;;  %v19971_v19 = vld [vmem:[#allocation14 + $0x7a0] ss:$16 sps:$4 sm:$0xff]   ;;  %v19974_v47 = vld [vmem:[#allocation14 + $0x7a8] ss:$16 sps:$4 sm:$0xff]  }
 0x5f0   :  { %8929 = vmatprep.subr.bf16.mxu0 %v19895_v59  ;;  %9035 = vmatprep.subr.bf16.mxu1 %v19898_v46  ;;  %v19979_v59 = vld [vmem:[#allocation14 + $0x7c4] ss:$16 sps:$4 sm:$0xff]   ;;  %v19982_v46 = vld [vmem:[#allocation14 + $0x7cc] ss:$16 sps:$4 sm:$0xff]  }
 0x5f2   :  { %8909 = vmatmul.mubr.bf16.vlgmr.msra.gmra.mrb[40].mxu0 %v21696_v9  ;;  %9015 = vmatmul.mubr.bf16.vlgmr.msra.gmra.mrb[40].mxu1 %v21696_v9  ;;  %v19911_v9 = vld [vmem:[#allocation14 + $0x660] ss:$16 sps:$4 sm:$0xff]  }
 0x5f3   :  { %8930 = vmatpush1.bf16.msra.mxu0 %v19893_v6  ;;  %9036 = vmatpush1.bf16.msra.mxu1 %v19896_v54  ;;  %v19977_v6 = vld [vmem:[#allocation14 + $0x7c0] ss:$16 sps:$4 sm:$0xff]   ;;  %v19980_v54 = vld [vmem:[#allocation14 + $0x7c8] ss:$16 sps:$4 sm:$0xff]  }
 0x5f4   :  { %8931 = vmatprep.subr.bf16.mxu0 %v19901_v29  ;;  %9037 = vmatprep.subr.bf16.mxu1 %v19904_v22  ;;  %v19985_v29 = vld [vmem:[#allocation14 + $0x7e4] ss:$16 sps:$4 sm:$0xff]   ;;  %v19988_v22 = vld [vmem:[#allocation14 + $0x7ec] ss:$16 sps:$4 sm:$0xff]  }
 0x5f5   :  { %8918 = vmatprep.mubr.bf16.mxu0 %v21710_v34  ;;  %9024 = vmatprep.mubr.bf16.mxu1 %v21710_v34  ;;  %v19922_v34 = vld [vmem:[#allocation14 + $0x68c] ss:$16 sps:$4 sm:$0xff]  }
 0x5f7   :  { %8932 = vmatpush1.bf16.msra.mxu0 %v19899_v38  ;;  %9038 = vmatpush1.bf16.msra.mxu1 %v19902_v20  ;;  %v19983_v38 = vld [vmem:[#allocation14 + $0x7e0] ss:$16 sps:$4 sm:$0xff]   ;;  %v19986_v20 = vld [vmem:[#allocation14 + $0x7e8] ss:$16 sps:$4 sm:$0xff]  }
 0x5f8   :  { %8933 = vmatprep.subr.bf16.mxu0 %v19907_v49  ;;  %9039 = vmatprep.subr.bf16.mxu1 %v19910_v41  ;;  %v19991_v49 = vld [vmem:[#allocation14 + $0x4] ss:$16 sps:$4 sm:$0xff]   ;;  %v19994_v41 = vld [vmem:[#allocation14 + $0xc] ss:$16 sps:$4 sm:$0xff]  }
 0x5fa   :  { %8919 = vmatmul.mubr.bf16.gmra.mrb[44].mxu0 %v21714_v37  ;;  %9025 = vmatmul.mubr.bf16.gmra.mrb[44].mxu1 %v21714_v37  ;;  %v19923_v37 = vld [vmem:[#allocation14 + $0x6a0] ss:$16 sps:$4 sm:$0xff]  }
 0x5fb   :  { %8934 = vmatpush1.bf16.msra.mxu0 %v19905_v10  ;;  %9040 = vmatpush1.bf16.msra.mxu1 %v19908_v3  ;;  %v19989_v10 = vld [vmem:[#allocation14] ss:$16 sps:$4 sm:$0xff]   ;;  %v19992_v3 = vld [vmem:[#allocation14 + $0x8] ss:$16 sps:$4 sm:$0xff]  }
 0x5fc   :  { %8935 = vmatprep.subr.bf16.mxu0 %v19913_v51  ;;  %9041 = vmatprep.subr.bf16.mxu1 %v19916_v44  ;;  %v19997_v51 = vld [vmem:[#allocation14 + $0x24] ss:$16 sps:$4 sm:$0xff]   ;;  %v20000_v44 = vld [vmem:[#allocation14 + $0x2c] ss:$16 sps:$4 sm:$0xff]  }
 0x5fd   :  { %8961 = vmatprep.mubr.bf16.mxu0 %v21735_v50  ;;  %9067 = vmatprep.mubr.bf16.mxu1 %v21735_v50  ;;  %v19932_v50 = vld [vmem:[#allocation14 + $0x6c8] ss:$16 sps:$4 sm:$0xff]  }
 0x5ff   :  { %8936 = vmatpush1.bf16.msra.mxu0 %v19911_v9  ;;  %9042 = vmatpush1.bf16.msra.mxu1 %v19914_v36  ;;  %v19995_v9 = vld [vmem:[#allocation14 + $0x20] ss:$16 sps:$4 sm:$0xff]   ;;  %v19998_v36 = vld [vmem:[#allocation14 + $0x28] ss:$16 sps:$4 sm:$0xff]  }
 0x600   :  { %8937 = vmatprep.subr.bf16.mxu0 %v19919_v17  ;;  %9043 = vmatprep.subr.bf16.mxu1 %v19922_v34  ;;  %v20003_v17 = vld [vmem:[#allocation14 + $0x44] ss:$16 sps:$4 sm:$0xff]   ;;  %v20006_v34 = vld [vmem:[#allocation14 + $0x4c] ss:$16 sps:$4 sm:$0xff]  }
 0x603   :  { %8938 = vmatpush1.bf16.msra.mxu0 %v19917_v5  ;;  %9044 = vmatpush1.bf16.msra.mxu1 %v19920_v12  ;;  %v20001_v5 = vld [vmem:[#allocation14 + $0x40] ss:$16 sps:$4 sm:$0xff]   ;;  %v20004_v12 = vld [vmem:[#allocation14 + $0x48] ss:$16 sps:$4 sm:$0xff]  }
 0x604   :  { %8939 = vmatprep.subr.bf16.mxu0 %v19925_v48  ;;  %9045 = vmatprep.subr.bf16.mxu1 %v19928_v4  ;;  %v20009_v48 = vld [vmem:[#allocation14 + $0x64] ss:$16 sps:$4 sm:$0xff]  }
 0x605   :  { %v23785_v4 = vld [vmem:[#allocation38_spill] sm:$0xff] }
 0x607   :  { %8940 = vmatpush1.bf16.msra.mxu0 %v19923_v37  ;;  %9046 = vmatpush1.bf16.msra.mxu1 %v19926_v18  ;;  %v20007_v37 = vld [vmem:[#allocation14 + $0x60] ss:$16 sps:$4 sm:$0xff]   ;;  %v20010_v18 = vld [vmem:[#allocation14 + $0x68] ss:$16 sps:$4 sm:$0xff]  }
 0x608   :  { %8941 = vmatprep.subr.bf16.mxu0 %v19931_v24  ;;  %9047 = vmatprep.subr.bf16.mxu1 %v19934_v58  ;;  %v20015_v24 = vld [vmem:[#allocation14 + $0x84] ss:$16 sps:$4 sm:$0xff]   ;;  %v23786_v58 = vld [vmem:[#allocation39_spill] sm:$0xff] }
 0x60b   :  { %8942 = vmatpush1.bf16.msra.mxu0 %v19929_v2  ;;  %9048 = vmatpush1.bf16.msra.mxu1 %v19932_v50  ;;  %v20013_v2 = vld [vmem:[#allocation14 + $0x80] ss:$16 sps:$4 sm:$0xff]   ;;  %v20016_v50 = vld [vmem:[#allocation14 + $0x88] ss:$16 sps:$4 sm:$0xff]  }
 0x60c   :  { %8943 = vmatprep.subr.bf16.mxu0 %v19937_v45  ;;  %9049 = vmatprep.subr.bf16.mxu1 %v19940_v11  ;;  %v20021_v45 = vld [vmem:[#allocation14 + $0xa4] ss:$16 sps:$4 sm:$0xff]   ;;  %v20024_v11 = vld [vmem:[#allocation14 + $0xac] ss:$16 sps:$4 sm:$0xff]  }
 0x60f   :  { %8944 = vmatpush1.bf16.msra.mxu0 %v19935_v26  ;;  %9050 = vmatpush1.bf16.msra.mxu1 %v19938_v21 }
 0x610   :  { %8945 = vmatprep.subr.bf16.mxu0 %v19943_v13  ;;  %9051 = vmatprep.subr.bf16.mxu1 %v19946_v1  ;;  %v20019_v13 = vld [vmem:[#allocation14 + $0xa0] ss:$16 sps:$4 sm:$0xff]   ;;  %v20022_v1 = vld [vmem:[#allocation14 + $0xa8] ss:$16 sps:$4 sm:$0xff]  }
 0x613   :  { %8946 = vmatpush1.bf16.msra.mxu0 %v19941_v32  ;;  %9052 = vmatpush1.bf16.msra.mxu1 %v19944_v42 }
 0x614   :  { %8947 = vmatprep.subr.bf16.mxu0 %v19949_v7  ;;  %9053 = vmatprep.subr.bf16.mxu1 %v19952_v31  ;;  %v20027_v7 = vld [vmem:[#allocation14 + $0xc4] ss:$16 sps:$4 sm:$0xff]  }
 0x617   :  { %8948 = vmatpush1.bf16.msra.mxu0 %v19947_v39  ;;  %9054 = vmatpush1.bf16.msra.mxu1 %v19950_v15 }
 0x618   :  { %8949 = vmatprep.subr.bf16.mxu0 %v19955_v30  ;;  %9055 = vmatprep.subr.bf16.mxu1 %v19958_v35  ;;  %v20030_v35 = vld [vmem:[#allocation14 + $0xcc] ss:$16 sps:$4 sm:$0xff]  }
 0x61b   :  { %8950 = vmatpush1.bf16.msra.mxu0 %v19953_v40  ;;  %9056 = vmatpush1.bf16.msra.mxu1 %v19956_v8 }
 0x61c   :  { %8951 = vmatprep.subr.bf16.mxu0 %v19961_v62  ;;  %9057 = vmatprep.subr.bf16.mxu1 %v19964_v16 }
 0x61f   :  { %8952 = vmatpush1.bf16.msra.mxu0 %v19959_v57  ;;  %9058 = vmatpush1.bf16.msra.mxu1 %v19962_v56  ;;  %v20025_v56 = vld [vmem:[#allocation14 + $0xc0] ss:$16 sps:$4 sm:$0xff]  }
 0x620   :  { %8953 = vmatprep.subr.bf16.mxu0 %v19967_v52  ;;  %9059 = vmatprep.subr.bf16.mxu1 %v19970_v43  ;;  %v20028_v52 = vld [vmem:[#allocation14 + $0xc8] ss:$16 sps:$4 sm:$0xff]   ;;  %v20033_v43 = vld [vmem:[#allocation14 + $0xe4] ss:$16 sps:$4 sm:$0xff]  }
 0x623   :  { %8954 = vmatpush1.bf16.msra.mxu0 %v19965_v53  ;;  %9060 = vmatpush1.bf16.msra.mxu1 %v19968_v60  ;;  %v20036_v60 = vld [vmem:[#allocation14 + $0xec] ss:$16 sps:$4 sm:$0xff]  }
 0x624   :  { %8955 = vmatprep.subr.bf16.mxu0 %v19973_v14  ;;  %9061 = vmatprep.subr.bf16.mxu1 %v19976_v61  ;;  %v20031_v61 = vld [vmem:[#allocation14 + $0xe0] ss:$16 sps:$4 sm:$0xff]  }
 0x627   :  { %8956 = vmatpush1.bf16.msra.mxu0 %v19971_v19  ;;  %9062 = vmatpush1.bf16.msra.mxu1 %v19974_v47  ;;  %v20034_v47 = vld [vmem:[#allocation14 + $0xe8] ss:$16 sps:$4 sm:$0xff]  }
 0x628   :  { %8957 = vmatprep.subr.bf16.mxu0 %v19979_v59  ;;  %9063 = vmatprep.subr.bf16.mxu1 %v19982_v46  ;;  %v20039_v46 = vld [vmem:[#allocation14 + $0x104] ss:$16 sps:$4 sm:$0xff]  }
 0x62b   :  { %8958 = vmatpush1.bf16.msra.mxu0 %v19977_v6  ;;  %9064 = vmatpush1.bf16.msra.mxu1 %v19980_v54 }
 0x62c   :  { %8959 = vmatprep.subr.bf16.mxu0 %v19985_v29  ;;  %9065 = vmatprep.subr.bf16.mxu1 %v19988_v22  ;;  %v20042_v22 = vld [vmem:[#allocation14 + $0x10c] ss:$16 sps:$4 sm:$0xff]  }
 0x62f   :  { %8960 = vmatpush1.bf16.msra.mxu0 %v19983_v38  ;;  %9066 = vmatpush1.bf16.msra.mxu1 %v19986_v20 }
 0x630   :  { %9728 = vmatprep.subr.bf16.mxu0 %v19991_v49  ;;  %9834 = vmatprep.subr.bf16.mxu1 %v19994_v41 }
 0x632   :  { %8962 = vmatmul.mubr.bf16.vlgmr.msra.gmra.mrb[40].mxu0 %v21762_v55  ;;  %9068 = vmatmul.mubr.bf16.vlgmr.msra.gmra.mrb[40].mxu1 %v21762_v55  ;;  %v20012_v55 = vld [vmem:[#allocation14 + $0x6c] ss:$16 sps:$4 sm:$0xff]  }
 0x633   :  { %9729 = vmatpush1.bf16.msra.mxu0 %v19989_v10  ;;  %9835 = vmatpush1.bf16.msra.mxu1 %v19992_v3  ;;  %v20037_v3 = vld [vmem:[#allocation14 + $0x100] ss:$16 sps:$4 sm:$0xff]  }
 0x634   :  { %9730 = vmatprep.subr.bf16.mxu0 %v19997_v51  ;;  %9836 = vmatprep.subr.bf16.mxu1 %v20000_v44 }
 0x635   :  { %8971 = vmatprep.mubr.bf16.mxu0 %v21778_v0  ;;  %9077 = vmatprep.mubr.bf16.mxu1 %v21778_v0  ;;  %v20018_v0 = vld [vmem:[#allocation14 + $0x8c] ss:$16 sps:$4 sm:$0xff]  }
 0x637   :  { %9731 = vmatpush1.bf16.msra.mxu0 %v19995_v9  ;;  %9837 = vmatpush1.bf16.msra.mxu1 %v19998_v36  ;;  %v20040_v9 = vld [vmem:[#allocation14 + $0x108] ss:$16 sps:$4 sm:$0xff]   ;;  %v20045_v36 = vld [vmem:[#allocation14 + $0x124] ss:$16 sps:$4 sm:$0xff]  }
 0x638   :  { %9732 = vmatprep.subr.bf16.mxu0 %v20003_v17  ;;  %9838 = vmatprep.subr.bf16.mxu1 %v20006_v34  ;;  %v20048_v17 = vld [vmem:[#allocation14 + $0x12c] ss:$16 sps:$4 sm:$0xff]  }
 0x63a   :  { %8972 = vmatmul.mubr.bf16.gmra.mrb[44].mxu0 %v23785_v4  ;;  %9078 = vmatmul.mubr.bf16.gmra.mrb[44].mxu1 %v23785_v4  ;;  %v20049_v4 = vld [vmem:[#allocation14 + $0x140] ss:$16 sps:$4 sm:$0xff]  }
 0x63b   :  { %9733 = vmatpush1.bf16.msra.mxu0 %v20001_v5  ;;  %9839 = vmatpush1.bf16.msra.mxu1 %v20004_v12  ;;  %v20043_v5 = vld [vmem:[#allocation14 + $0x120] ss:$16 sps:$4 sm:$0xff]   ;;  %v20046_v12 = vld [vmem:[#allocation14 + $0x128] ss:$16 sps:$4 sm:$0xff]  }
 0x63c   :  { %9734 = vmatprep.subr.bf16.mxu0 %v20009_v48  ;;  %9840 = vmatprep.subr.bf16.mxu1 %v20012_v55  ;;  %v20051_v48 = vld [vmem:[#allocation14 + $0x144] ss:$16 sps:$4 sm:$0xff]   ;;  %v20054_v55 = vld [vmem:[#allocation14 + $0x14c] ss:$16 sps:$4 sm:$0xff]  }
 0x63d   :  { %16933 = vmatprep.mubr.msk.bf16.mxu0 %vm21812_vm3, %v23786_v58  ;;  %16965 = vmatprep.mubr.msk.bf16.mxu1 %vm21812_vm3, %v23786_v58  ;;  %v20058_v58 = vld [vmem:[#allocation14 + $0x168] ss:$16 sps:$4 sm:$0xff]  }
 0x63f   :  { %9735 = vmatpush1.bf16.msra.mxu0 %v20007_v37  ;;  %9841 = vmatpush1.bf16.msra.mxu1 %v20010_v18  ;;  %v20052_v37 = vld [vmem:[#allocation14 + $0x148] ss:$16 sps:$4 sm:$0xff]   ;;  %v20057_v18 = vld [vmem:[#allocation14 + $0x164] ss:$16 sps:$4 sm:$0xff]  }
 0x640   :  { %9736 = vmatprep.subr.bf16.mxu0 %v20015_v24  ;;  %9842 = vmatprep.subr.bf16.mxu1 %v20018_v0  ;;  %v20060_v24 = vld [vmem:[#allocation14 + $0x16c] ss:$16 sps:$4 sm:$0xff]   ;;  %v20055_v0 = vld [vmem:[#allocation14 + $0x160] ss:$16 sps:$4 sm:$0xff]  }
 0x643   :  { %9737 = vmatpush1.bf16.msra.mxu0 %v20013_v2  ;;  %v17879_v26 = vpop.f32.mrb[16].mxu0  ;;  %v17907_v21 = vpop.f32.mrb[16].mxu1  ;;  %9843 = vmatpush1.bf16.msra.mxu1 %v20016_v50  ;;  %v20063_v2 = vld [vmem:[#allocation14 + $0x184] ss:$16 sps:$4 sm:$0xff]   ;;  %v20066_v50 = vld [vmem:[#allocation14 + $0x18c] ss:$16 sps:$4 sm:$0xff]  }
 0x644   :  { %9738 = vmatprep.subr.bf16.mxu0 %v20021_v45  ;;  %v17880_v32 = vpop.f32.mrb[17].mxu0  ;;  %v17908_v42 = vpop.f32.mrb[17].mxu1  ;;  %9844 = vmatprep.subr.bf16.mxu1 %v20024_v11  ;;  %v20061_v45 = vld [vmem:[#allocation14 + $0x180] ss:$16 sps:$4 sm:$0xff]   ;;  %v20064_v11 = vld [vmem:[#allocation14 + $0x188] ss:$16 sps:$4 sm:$0xff]  }
 0x645   :  { %v17881_v31 = vadd.f32 %v17880_v32, %v17879_v26  ;;  %v17909_v39 = vadd.f32 %v17908_v42, %v17907_v21  ;;  %v17882_v15 = vpop.f32.mrb[18].mxu0  ;;  %v17910_v30 = vpop.f32.mrb[18].mxu1  ;;  %v20069_v26 = vld [vmem:[#allocation14 + $0x1a4] ss:$16 sps:$4 sm:$0xff]   ;;  %v20072_v21 = vld [vmem:[#allocation14 + $0x1ac] ss:$16 sps:$4 sm:$0xff]  }
 0x646   :  { %v17883_v40 = vpop.f32.mrb[19].mxu0  ;;  %v17911_v8 = vpop.f32.mrb[19].mxu1 }
 0x647   :  { %v22792_v62 = vadd.f32 %v17909_v39, %v17881_v31  ;;  %9739 = vmatpush1.bf16.msra.mxu0 %v20019_v13  ;;  %v17884_v16 = vadd.f32 %v17883_v40, %v17882_v15  ;;  %v17912_v57 = vadd.f32 %v17911_v8, %v17910_v30  ;;  %9845 = vmatpush1.bf16.msra.mxu1 %v20022_v1  ;;  %v20067_v1 = vld [vmem:[#allocation14 + $0x1a0] ss:$16 sps:$4 sm:$0xff]   ;;  %v20075_v31 = vld [vmem:[#allocation14 + $0x1c4] ss:$16 sps:$4 sm:$0xff]  }
 0x648   :  { %9740 = vmatprep.subr.bf16.mxu0 %v20027_v7  ;;  %9846 = vmatprep.subr.bf16.mxu1 %v20030_v35  ;;  %v20070_v7 = vld [vmem:[#allocation14 + $0x1a8] ss:$16 sps:$4 sm:$0xff]   ;;  %v20078_v35 = vld [vmem:[#allocation14 + $0x1cc] ss:$16 sps:$4 sm:$0xff]  }
 0x649   :  { %v22794_v53 = vadd.f32 %v17912_v57, %v17884_v16 }
 0x64b   :  { %9741 = vmatpush1.bf16.msra.mxu0 %v20025_v56  ;;  %v17885_v14 = vpop.f32.mrb[20].mxu0  ;;  %9847 = vmatpush1.bf16.msra.mxu1 %v20028_v52  ;;  %v17913_v19 = vpop.f32.mrb[20].mxu1 }
 0x64c   :  { %9742 = vmatprep.subr.bf16.mxu0 %v20033_v43  ;;  %v17886_v59 = vpop.f32.mrb[21].mxu0  ;;  %9848 = vmatprep.subr.bf16.mxu1 %v20036_v60  ;;  %v17914_v54 = vpop.f32.mrb[21].mxu1  ;;  %v20073_v43 = vld [vmem:[#allocation14 + $0x1c0] ss:$16 sps:$4 sm:$0xff]  }
 0x64d   :  { %v17887_v6 = vadd.f32 %v17886_v59, %v17885_v14  ;;  %v17888_v29 = vpop.f32.mrb[22].mxu0  ;;  %v17915_v38 = vadd.f32 %v17914_v54, %v17913_v19  ;;  %v17916_v20 = vpop.f32.mrb[22].mxu1  ;;  %v20076_v14 = vld [vmem:[#allocation14 + $0x1c8] ss:$16 sps:$4 sm:$0xff]   ;;  %v20084_v59 = vld [vmem:[#allocation14 + $0x1ec] ss:$16 sps:$4 sm:$0xff]  }
 0x64e   :  { %v17889_v49 = vpop.f32.mrb[23].mxu0  ;;  %v17917_v10 = vpop.f32.mrb[23].mxu1 }
 0x64f   :  { %9743 = vmatpush1.bf16.msra.mxu0 %v20031_v61  ;;  %v17890_v41 = vadd.f32 %v17889_v49, %v17888_v29  ;;  %v22796_v51 = vadd.f32 %v17915_v38, %v17887_v6  ;;  %9849 = vmatpush1.bf16.msra.mxu1 %v20034_v47  ;;  %v17918_v44 = vadd.f32 %v17917_v10, %v17916_v20  ;;  %v20081_v61 = vld [vmem:[#allocation14 + $0x1e4] ss:$16 sps:$4 sm:$0xff]   ;;  %v20090_v10 = vld [vmem:[#allocation14 + $0x20c] ss:$16 sps:$4 sm:$0xff]  }
 0x650   :  { %9744 = vmatprep.subr.bf16.mxu0 %v20039_v46  ;;  %9850 = vmatprep.subr.bf16.mxu1 %v20042_v22  ;;  %v20082_v22 = vld [vmem:[#allocation14 + $0x1e8] ss:$16 sps:$4 sm:$0xff]   ;;  %v20087_v38 = vld [vmem:[#allocation14 + $0x204] ss:$16 sps:$4 sm:$0xff]  }
 0x651   :  { %v22798_v34 = vadd.f32 %v17918_v44, %v17890_v41 }
 0x653   :  { %9745 = vmatpush1.bf16.msra.mxu0 %v20037_v3  ;;  %9851 = vmatpush1.bf16.msra.mxu1 %v20040_v9 }
 0x654   :  { %9746 = vmatprep.subr.bf16.mxu0 %v20045_v36  ;;  %9852 = vmatprep.subr.bf16.mxu1 %v20048_v17 }
 0x657   :  { %9747 = vmatpush1.bf16.msra.mxu0 %v20043_v5  ;;  %9853 = vmatpush1.bf16.msra.mxu1 %v20046_v12  ;;  %v20085_v5 = vld [vmem:[#allocation14 + $0x200] ss:$16 sps:$4 sm:$0xff]  }
 0x658   :  { %9748 = vmatprep.subr.bf16.mxu0 %v20051_v48  ;;  %9854 = vmatprep.subr.bf16.mxu1 %v20054_v55  ;;  %v20088_v48 = vld [vmem:[#allocation14 + $0x208] ss:$16 sps:$4 sm:$0xff]   ;;  %v20093_v55 = vld [vmem:[#allocation14 + $0x224] ss:$16 sps:$4 sm:$0xff]  }
 0x65b   :  { %9749 = vmatpush1.bf16.msra.mxu0 %v20049_v4  ;;  %9855 = vmatpush1.bf16.msra.mxu1 %v20052_v37 }
 0x65c   :  { %9750 = vmatprep.subr.bf16.mxu0 %v20057_v18  ;;  %9856 = vmatprep.subr.bf16.mxu1 %v20060_v24  ;;  %v20096_v18 = vld [vmem:[#allocation14 + $0x22c] ss:$16 sps:$4 sm:$0xff]  }
 0x65d   :  { %v23787_v24 = vld [vmem:[#allocation35_spill] sm:$0xff] }
 0x65f   :  { %9751 = vmatpush1.bf16.msra.mxu0 %v20055_v0  ;;  %9857 = vmatpush1.bf16.msra.mxu1 %v20058_v58  ;;  %v20091_v0 = vld [vmem:[#allocation14 + $0x220] ss:$16 sps:$4 sm:$0xff]   ;;  %v20094_v58 = vld [vmem:[#allocation14 + $0x228] ss:$16 sps:$4 sm:$0xff]  }
 0x660   :  { %9752 = vmatprep.subr.bf16.mxu0 %v20063_v2  ;;  %9858 = vmatprep.subr.bf16.mxu1 %v20066_v50  ;;  %v20099_v2 = vld [vmem:[#allocation14 + $0x244] ss:$16 sps:$4 sm:$0xff]   ;;  %v23788_v50 = vld [vmem:[#allocation41_spill] sm:$0xff] }
 0x663   :  { %9753 = vmatpush1.bf16.msra.mxu0 %v20061_v45  ;;  %v17935_v13 = vpop.f32.mrb[24].mxu0  ;;  %9859 = vmatpush1.bf16.msra.mxu1 %v20064_v11  ;;  %v17963_v32 = vpop.f32.mrb[24].mxu1  ;;  %v20097_v45 = vld [vmem:[#allocation14 + $0x240] ss:$16 sps:$4 sm:$0xff]   ;;  %v20100_v11 = vld [vmem:[#allocation14 + $0x248] ss:$16 sps:$4 sm:$0xff]  }
 0x664   :  { %v17936_v42 = vpop.f32.mrb[25].mxu0  ;;  %9754 = vmatprep.subr.bf16.mxu0 %v20069_v26  ;;  %v17964_v15 = vpop.f32.mrb[25].mxu1  ;;  %9860 = vmatprep.subr.bf16.mxu1 %v20072_v21  ;;  %v20105_v26 = vld [vmem:[#allocation14 + $0x264] ss:$16 sps:$4 sm:$0xff]   ;;  %v20108_v21 = vld [vmem:[#allocation14 + $0x26c] ss:$16 sps:$4 sm:$0xff]  }
 0x665   :  { %v17937_v39 = vadd.f32 %v17936_v42, %v17935_v13  ;;  %v17938_v30 = vpop.f32.mrb[26].mxu0  ;;  %v17965_v40 = vadd.f32 %v17964_v15, %v17963_v32  ;;  %v17966_v8 = vpop.f32.mrb[26].mxu1  ;;  %v23789_v13 = vld [vmem:[#allocation36_spill] sm:$0xff] }
 0x666   :  { %v17939_v16 = vpop.f32.mrb[27].mxu0  ;;  %v17967_v52 = vpop.f32.mrb[27].mxu1  ;;  %v20106_v32 = vld [vmem:[#allocation14 + $0x268] ss:$16 sps:$4 sm:$0xff]   ;;  %v20111_v42 = vld [vmem:[#allocation14 + $0x284] ss:$16 sps:$4 sm:$0xff]  }
 0x667   :  { %v7538_v57 = vadd.f32 %v17937_v39, %v22792_v62  ;;  %9755 = vmatpush1.bf16.msra.mxu0 %v20067_v1  ;;  %v17940_v56 = vadd.f32 %v17939_v16, %v17938_v30  ;;  %9861 = vmatpush1.bf16.msra.mxu1 %v20070_v7  ;;  %v17968_v60 = vadd.f32 %v17967_v52, %v17966_v8  ;;  %v20079_v62 = vld [vmem:[#allocation14 + $0x1e0] ss:$16 sps:$4 sm:$0xff]   ;;  %v20114_v7 = vld [vmem:[#allocation14 + $0x28c] ss:$16 sps:$4 sm:$0xff]   ;;  %v20112_v15 = vld [vmem:[#allocation14 + $0x288] ss:$16 sps:$4 sm:$0xff]  }
 0x668   :  { %9756 = vmatprep.subr.bf16.mxu0 %v20075_v31  ;;  %9862 = vmatprep.subr.bf16.mxu1 %v20078_v35  ;;  %v20103_v1 = vld [vmem:[#allocation14 + $0x260] ss:$16 sps:$4 sm:$0xff]   ;;  %v20117_v30 = vld [vmem:[#allocation14 + $0x2a4] ss:$16 sps:$4 sm:$0xff]   ;;  %v20120_v35 = vld [vmem:[#allocation14 + $0x2ac] ss:$16 sps:$4 sm:$0xff]  }
 0x669   :  { %v22801_v19 = vadd.f32 %v17965_v40, %v7538_v57  ;;  %v7541_v47 = vadd.f32 %v17940_v56, %v22794_v53  ;;  %v23790_v31 = vld [vmem:[#allocation43_spill] sm:$0xff]  ;;  %v20123_v57 = vld [vmem:[#allocation14 + $0x2c4] ss:$16 sps:$4 sm:$0xff]  }
 0x66a   :  { %v20109_v39 = vld [vmem:[#allocation14 + $0x280] ss:$16 sps:$4 sm:$0xff]   ;;  %v20118_v16 = vld [vmem:[#allocation14 + $0x2a8] ss:$16 sps:$4 sm:$0xff]  }
 0x66b   :  { %v22804_v46 = vadd.f32 %v17968_v60, %v7541_v47  ;;  %9757 = vmatpush1.bf16.msra.mxu0 %v20073_v43  ;;  %v17941_v6 = vpop.f32.mrb[28].mxu0  ;;  %9863 = vmatpush1.bf16.msra.mxu1 %v20076_v14  ;;  %v17969_v54 = vpop.f32.mrb[28].mxu1  ;;  %v20115_v40 = vld [vmem:[#allocation14 + $0x2a0] ss:$16 sps:$4 sm:$0xff]   ;;  %v20126_v43 = vld [vmem:[#allocation14 + $0x2cc] ss:$16 sps:$4 sm:$0xff]  }
 0x66c   :  { %v17942_v29 = vpop.f32.mrb[29].mxu0  ;;  %9758 = vmatprep.subr.bf16.mxu0 %v20081_v61  ;;  %v17970_v49 = vpop.f32.mrb[29].mxu1  ;;  %9864 = vmatprep.subr.bf16.mxu1 %v20084_v59 }
 0x66d   :  { %v17943_v20 = vadd.f32 %v17942_v29, %v17941_v6  ;;  %v17944_v41 = vpop.f32.mrb[30].mxu0  ;;  %v17971_v3 = vadd.f32 %v17970_v49, %v17969_v54  ;;  %v17972_v53 = vpop.f32.mrb[30].mxu1 }
 0x66e   :  { %v17945_v44 = vpop.f32.mrb[31].mxu0  ;;  %v17973_v17 = vpop.f32.mrb[31].mxu1 }
 0x66f   :  { %v7546_v9 = vadd.f32 %v17943_v20, %v22796_v51  ;;  %9759 = vmatpush1.bf16.msra.mxu0 %v20079_v62  ;;  %v17946_v36 = vadd.f32 %v17945_v44, %v17944_v41  ;;  %9865 = vmatpush1.bf16.msra.mxu1 %v20082_v22  ;;  %v17974_v12 = vadd.f32 %v17973_v17, %v17972_v53  ;;  %v20121_v62 = vld [vmem:[#allocation14 + $0x2c0] ss:$16 sps:$4 sm:$0xff]   ;;  %v20124_v22 = vld [vmem:[#allocation14 + $0x2c8] ss:$16 sps:$4 sm:$0xff]   ;;  %v20132_v41 = vld [vmem:[#allocation14 + $0x2ec] ss:$16 sps:$4 sm:$0xff]  }
 0x670   :  { %9781 = vmatprep.subr.bf16.mxu0 %v20087_v38  ;;  %9887 = vmatprep.subr.bf16.mxu1 %v20090_v10  ;;  %v20129_v38 = vld [vmem:[#allocation14 + $0x2e4] ss:$16 sps:$4 sm:$0xff]   ;;  %v16673_v10 = vld [vmem:[#allocation13] ss:$0 sm:$0xff]  ;;  %v20127_v44 = vld [vmem:[#allocation14 + $0x2e0] ss:$16 sps:$4 sm:$0xff]  }
 0x671   :  { %v22807_v4 = vadd.f32 %v17971_v3, %v7546_v9  ;;  %v7549_v37 = vadd.f32 %v17946_v36, %v22798_v34  ;;  %v20102_v34 = vld [vmem:[#allocation14 + $0x24c] ss:$16 sps:$4 sm:$0xff]   ;;  %v20130_v36 = vld [vmem:[#allocation14 + $0x2e8] ss:$16 sps:$4 sm:$0xff]   ;;  %v20135_v17 = vld [vmem:[#allocation14 + $0x304] ss:$16 sps:$4 sm:$0xff]  }
 0x672   :  { %16937 = vmatmul.mubr.msk.bf16.vlgmr.msra.gmra.mrb[40].mxu0 %vm21812_vm3, %v23787_v24  ;;  %16969 = vmatmul.mubr.msk.bf16.vlgmr.msra.gmra.mrb[40].mxu1 %vm21812_vm3, %v23787_v24 }
 0x673   :  { %v22813_v51 = vadd.f32 %v17974_v12, %v7549_v37  ;;  %9782 = vmatpush1.bf16.msra.mxu0 %v20085_v5  ;;  %9888 = vmatpush1.bf16.msra.mxu1 %v20088_v48  ;;  %v20138_v37 = vld [vmem:[#allocation14 + $0x30c] ss:$16 sps:$4 sm:$0xff]  }
 0x674   :  { %9783 = vmatprep.subr.bf16.mxu0 %v20093_v55  ;;  %9889 = vmatprep.subr.bf16.mxu1 %v20096_v18 }
 0x675   :  { %16941 = vmatprep.mubr.msk.bf16.mxu0 %vm21867_vm6, %v23788_v50  ;;  %16973 = vmatprep.mubr.msk.bf16.mxu1 %vm21867_vm6, %v23788_v50  ;;  %v20133_v50 = vld [vmem:[#allocation14 + $0x300] ss:$16 sps:$4 sm:$0xff]  }
 0x677   :  { %9784 = vmatpush1.bf16.msra.mxu0 %v20091_v0  ;;  %9890 = vmatpush1.bf16.msra.mxu1 %v20094_v58 }
 0x678   :  { %9785 = vmatprep.subr.bf16.mxu0 %v20099_v2  ;;  %9891 = vmatprep.subr.bf16.mxu1 %v20102_v34 }
 0x67a   :  { %16945 = vmatmul.mubr.msk.bf16.gmra.mrb[44].mxu0 %vm21867_vm6, %v23789_v13  ;;  %16977 = vmatmul.mubr.msk.bf16.gmra.mrb[44].mxu1 %vm21867_vm6, %v23789_v13 }
 0x67b   :  { %9786 = vmatpush1.bf16.msra.mxu0 %v20097_v45  ;;  %9892 = vmatpush1.bf16.msra.mxu1 %v20100_v11 }
 0x67c   :  { %9787 = vmatprep.subr.bf16.mxu0 %v20105_v26  ;;  %9893 = vmatprep.subr.bf16.mxu1 %v20108_v21  ;;  %v20136_v26 = vld [vmem:[#allocation14 + $0x308] ss:$16 sps:$4 sm:$0xff]  }
 0x67d   :  { %16949 = vmatprep.mubr.msk.bf16.mxu0 %vm21812_vm3, %v23790_v31  ;;  %16981 = vmatprep.mubr.msk.bf16.mxu1 %vm21812_vm3, %v23790_v31  ;;  %v20142_v31 = vld [vmem:[#allocation14 + $0x328] ss:$16 sps:$4 sm:$0xff]  }
 0x67f   :  { %9788 = vmatpush1.bf16.msra.mxu0 %v20103_v1  ;;  %9894 = vmatpush1.bf16.msra.mxu1 %v20106_v32  ;;  %v20144_v1 = vld [vmem:[#allocation14 + $0x32c] ss:$16 sps:$4 sm:$0xff]  }
 0x680   :  { %9789 = vmatprep.subr.bf16.mxu0 %v20111_v42  ;;  %9895 = vmatprep.subr.bf16.mxu1 %v20114_v7  ;;  %v20139_v7 = vld [vmem:[#allocation14 + $0x320] ss:$16 sps:$4 sm:$0xff]  }
 0x683   :  { %9790 = vmatpush1.bf16.msra.mxu0 %v20109_v39  ;;  %9896 = vmatpush1.bf16.msra.mxu1 %v20112_v15  ;;  %v20147_v39 = vld [vmem:[#allocation14 + $0x344] ss:$16 sps:$4 sm:$0xff]  }
 0x684   :  { %v17991_v8 = vpop.f32.mrb[32].mxu0  ;;  %9791 = vmatprep.subr.bf16.mxu0 %v20117_v30  ;;  %v18019_v56 = vpop.f32.mrb[32].mxu1  ;;  %9897 = vmatprep.subr.bf16.mxu1 %v20120_v35  ;;  %v20150_v35 = vld [vmem:[#allocation14 + $0x34c] ss:$16 sps:$4 sm:$0xff]  }
 0x685   :  { %v17992_v52 = vpop.f32.mrb[33].mxu0  ;;  %v18020_v14 = vpop.f32.mrb[33].mxu1 }
 0x686   :  { %v17993_v60 = vadd.f32 %v17992_v52, %v17991_v8  ;;  %v17994_v61 = vpop.f32.mrb[34].mxu0  ;;  %v18021_v47 = vadd.f32 %v18020_v14, %v18019_v56  ;;  %v18022_v59 = vpop.f32.mrb[34].mxu1  ;;  %v20145_v8 = vld [vmem:[#allocation14 + $0x340] ss:$16 sps:$4 sm:$0xff]   ;;  %v20154_v52 = vld [vmem:[#allocation14 + $0x368] ss:$16 sps:$4 sm:$0xff]  }
 0x687   :  { %9792 = vmatpush1.bf16.msra.mxu0 %v20115_v40  ;;  %v17995_v6 = vpop.f32.mrb[35].mxu0  ;;  %9898 = vmatpush1.bf16.msra.mxu1 %v20118_v16  ;;  %v18023_v29 = vpop.f32.mrb[35].mxu1  ;;  %v20148_v16 = vld [vmem:[#allocation14 + $0x348] ss:$16 sps:$4 sm:$0xff]   ;;  %v20151_v56 = vld [vmem:[#allocation14 + $0x360] ss:$16 sps:$4 sm:$0xff]  }
 0x688   :  { %v17996_v54 = vadd.f32 %v17995_v6, %v17994_v61  ;;  %9793 = vmatprep.subr.bf16.mxu0 %v20123_v57  ;;  %v7950_v20 = vadd.f32 %v18021_v47, %v17993_v60  ;;  %v18024_v49 = vadd.f32 %v18023_v29, %v18022_v59  ;;  %9899 = vmatprep.subr.bf16.mxu1 %v20126_v43  ;;  %v20156_v57 = vld [vmem:[#allocation14 + $0x36c] ss:$16 sps:$4 sm:$0xff]   ;;  %v20159_v43 = vld [vmem:[#allocation14 + $0x384] ss:$16 sps:$4 sm:$0xff]   ;;  %v20157_v60 = vld [vmem:[#allocation14 + $0x380] ss:$16 sps:$4 sm:$0xff]  }
 0x689   :  { %v20160_v14 = vld [vmem:[#allocation14 + $0x388] ss:$16 sps:$4 sm:$0xff]   ;;  %v20165_v61 = vld [vmem:[#allocation14 + $0x3a4] ss:$16 sps:$4 sm:$0xff]   ;;  %v20168_v47 = vld [vmem:[#allocation14 + $0x3ac] ss:$16 sps:$4 sm:$0xff]  }
 0x68a   :  { %v7964_v3 = vadd.f32 %v7950_v20, %v22801_v19  ;;  %v7953_v53 = vadd.f32 %v18024_v49, %v17996_v54  ;;  %v20163_v59 = vld [vmem:[#allocation14 + $0x3a0] ss:$16 sps:$4 sm:$0xff]   ;;  %v20166_v6 = vld [vmem:[#allocation14 + $0x3a8] ss:$16 sps:$4 sm:$0xff]   ;;  %v20174_v54 = vld [vmem:[#allocation14 + $0x3cc] ss:$16 sps:$4 sm:$0xff]  }
 0x68b   :  { %9794 = vmatpush1.bf16.msra.mxu0 %v20121_v62  ;;  %9900 = vmatpush1.bf16.msra.mxu1 %v20124_v22  ;;  %v20171_v62 = vld [vmem:[#allocation14 + $0x3c4] ss:$16 sps:$4 sm:$0xff]   ;;  %v20169_v29 = vld [vmem:[#allocation14 + $0x3c0] ss:$16 sps:$4 sm:$0xff]   ;;  %v20172_v22 = vld [vmem:[#allocation14 + $0x3c8] ss:$16 sps:$4 sm:$0xff]  }
 0x68c   :  { %v17997_v9 = vpop.f32.mrb[36].mxu0  ;;  %9795 = vmatprep.subr.bf16.mxu0 %v20129_v38  ;;  %v7975_v5 = vadd.f32 %v16673_v10, %v7964_v3  ;;  %v7965_v12 = vadd.f32 %v7953_v53, %v22804_v46  ;;  %v18025_v48 = vpop.f32.mrb[36].mxu1  ;;  %9901 = vmatprep.subr.bf16.mxu1 %v20132_v41  ;;  %v20141_v46 = vld [vmem:[#allocation14 + $0x324] ss:$16 sps:$4 sm:$0xff]   ;;  %v20180_v20 = vld [vmem:[#allocation14 + $0x3ec] ss:$16 sps:$4 sm:$0xff]  }
 0x68d   :  { %v17998_v55 = vpop.f32.mrb[37].mxu0  ;;  %v18026_v24 = vpop.f32.mrb[37].mxu1  ;;  %v20177_v38 = vld [vmem:[#allocation14 + $0x3e4] ss:$16 sps:$4 sm:$0xff]   ;;  %v20175_v49 = vld [vmem:[#allocation14 + $0x3e0] ss:$16 sps:$4 sm:$0xff]  }
 0x68e   :  { %v17999_v18 = vadd.f32 %v17998_v55, %v17997_v9  ;;  %v18000_v0 = vpop.f32.mrb[38].mxu0  ;;  %15434 = vst [vmem:[#allocation23] sm:$0xff] %v7975_v5  ;;  %v7976_v19 = vadd.f32 %v16673_v10, %v7965_v12  ;;  %v18027_v58 = vadd.f32 %v18026_v24, %v18025_v48  ;;  %v18028_v2 = vpop.f32.mrb[38].mxu1  ;;  %v20178_v41 = vld [vmem:[#allocation14 + $0x3e8] ss:$16 sps:$4 sm:$0xff]  }
 0x68f   :  { %9796 = vmatpush1.bf16.msra.mxu0 %v20127_v44  ;;  %v18001_v34 = vpop.f32.mrb[39].mxu0  ;;  %9902 = vmatpush1.bf16.msra.mxu1 %v20130_v36  ;;  %v18029_v11 = vpop.f32.mrb[39].mxu1  ;;  %v20186_v3 = vld [vmem:[#allocation14 + $0x80c] ss:$16 sps:$4 sm:$0xff]   ;;  %v20181_v53 = vld [vmem:[#allocation14 + $0x800] ss:$16 sps:$4 sm:$0xff]  }
 0x690   :  { %v18002_v45 = vadd.f32 %v18001_v34, %v18000_v0  ;;  %9797 = vmatprep.subr.bf16.mxu0 %v20135_v17  ;;  %15435 = vst [vmem:[#allocation23 + $0x8] sm:$0xff] %v7976_v19  ;;  %v7958_v21 = vadd.f32 %v18027_v58, %v17999_v18  ;;  %v18030_v13 = vadd.f32 %v18029_v11, %v18028_v2  ;;  %v20184_v44 = vld [vmem:[#allocation14 + $0x808] ss:$16 sps:$4 sm:$0xff]   ;;  %v20189_v9 = vld [vmem:[#allocation14 + $0x824] ss:$16 sps:$4 sm:$0xff]  }
 0x691   :  { %9903 = vmatprep.subr.bf16.mxu1 %v20138_v37  ;;  %v20192_v36 = vld [vmem:[#allocation14 + $0x82c] ss:$16 sps:$4 sm:$0xff]   ;;  %v20187_v5 = vld [vmem:[#allocation14 + $0x820] ss:$16 sps:$4 sm:$0xff]   ;;  %v20190_v12 = vld [vmem:[#allocation14 + $0x828] ss:$16 sps:$4 sm:$0xff]  }
 0x692   :  { %v7966_v32 = vadd.f32 %v7958_v21, %v22807_v4  ;;  %v7961_v42 = vadd.f32 %v18030_v13, %v18002_v45  ;;  %v20153_v4 = vld [vmem:[#allocation14 + $0x364] ss:$16 sps:$4 sm:$0xff]   ;;  %v23791_v17 = vld [vmem:[#allocation37_spill] sm:$0xff] }
 0x693   :  { %9798 = vmatpush1.bf16.msra.mxu0 %v20133_v50  ;;  %9904 = vmatpush1.bf16.msra.mxu1 %v20136_v26  ;;  %v20195_v48 = vld [vmem:[#allocation14 + $0x844] ss:$16 sps:$4 sm:$0xff]   ;;  %v20198_v55 = vld [vmem:[#allocation14 + $0x84c] ss:$16 sps:$4 sm:$0xff]   ;;  %v20193_v18 = vld [vmem:[#allocation14 + $0x840] ss:$16 sps:$4 sm:$0xff]  }
 0x694   :  { %9799 = vmatprep.subr.bf16.mxu0 %v20141_v46  ;;  %v7977_v15 = vadd.f32 %v16673_v10, %v7966_v32  ;;  %v7967_v30 = vadd.f32 %v7961_v42, %v22813_v51  ;;  %9905 = vmatprep.subr.bf16.mxu1 %v20144_v1  ;;  %v20162_v51 = vld [vmem:[#allocation14 + $0x38c] ss:$16 sps:$4 sm:$0xff]   ;;  %v23792_v37 = vld [vmem:[#allocation46_spill] sm:$0xff]  ;;  %v23793_v58 = vld [vmem:[#allocation40_spill] sm:$0xff] }
 0x695   :  { %v20196_v24 = vld [vmem:[#allocation14 + $0x848] ss:$16 sps:$4 sm:$0xff]   ;;  %v20201_v0 = vld [vmem:[#allocation14 + $0x864] ss:$16 sps:$4 sm:$0xff]   ;;  %v20204_v19 = vld [vmem:[#allocation14 + $0x86c] ss:$16 sps:$4 sm:$0xff]  }
 0x696   :  { %15436 = vst [vmem:[#allocation23 + $0x10] sm:$0xff] %v7977_v15  ;;  %v7978_v40 = vadd.f32 %v16673_v10, %v7967_v30  ;;  %v20183_v10 = vld [vmem:[#allocation14 + $0x804] ss:$16 sps:$4 sm:$0xff]   ;;  %v20199_v2 = vld [vmem:[#allocation14 + $0x860] ss:$16 sps:$4 sm:$0xff]  }
 0x697   :  { %9800 = vmatpush1.bf16.msra.mxu0 %v20139_v7  ;;  %9906 = vmatpush1.bf16.msra.mxu1 %v20142_v31  ;;  %v20202_v34 = vld [vmem:[#allocation14 + $0x868] ss:$16 sps:$4 sm:$0xff]   ;;  %v20207_v50 = vld [vmem:[#allocation14 + $0x884] ss:$16 sps:$4 sm:$0xff]   ;;  %v20210_v45 = vld [vmem:[#allocation14 + $0x88c] ss:$16 sps:$4 sm:$0xff]  }
 0x698   :  { %9801 = vmatprep.subr.bf16.mxu0 %v20147_v39  ;;  %15437 = vst [vmem:[#allocation23 + $0x18] sm:$0xff] %v7978_v40  ;;  %9907 = vmatprep.subr.bf16.mxu1 %v20150_v35  ;;  %v23794_v11 = vld [vmem:[#allocation48_spill] sm:$0xff]  ;;  %v20216_v13 = vld [vmem:[#allocation14 + $0x8ac] ss:$16 sps:$4 sm:$0xff]  }
 0x699   :  { %v20205_v26 = vld [vmem:[#allocation14 + $0x880] ss:$16 sps:$4 sm:$0xff]   ;;  %v20208_v46 = vld [vmem:[#allocation14 + $0x888] ss:$16 sps:$4 sm:$0xff]   ;;  %v20213_v21 = vld [vmem:[#allocation14 + $0x8a4] ss:$16 sps:$4 sm:$0xff]  }
 0x69a   :  { %v20211_v1 = vld [vmem:[#allocation14 + $0x8a0] ss:$16 sps:$4 sm:$0xff]   ;;  %v20214_v32 = vld [vmem:[#allocation14 + $0x8a8] ss:$16 sps:$4 sm:$0xff]   ;;  %v20219_v42 = vld [vmem:[#allocation14 + $0x8c4] ss:$16 sps:$4 sm:$0xff]  }
 0x69b   :  { %9802 = vmatpush1.bf16.msra.mxu0 %v20145_v8  ;;  %9908 = vmatpush1.bf16.msra.mxu1 %v20148_v16  ;;  %v20222_v7 = vld [vmem:[#allocation14 + $0x8cc] ss:$16 sps:$4 sm:$0xff]   ;;  %v20217_v31 = vld [vmem:[#allocation14 + $0x8c0] ss:$16 sps:$4 sm:$0xff]   ;;  %v20220_v39 = vld [vmem:[#allocation14 + $0x8c8] ss:$16 sps:$4 sm:$0xff]  }
 0x69c   :  { %9803 = vmatprep.subr.bf16.mxu0 %v20153_v4  ;;  %9909 = vmatprep.subr.bf16.mxu1 %v20156_v57  ;;  %v20225_v15 = vld [vmem:[#allocation14 + $0x8e4] ss:$16 sps:$4 sm:$0xff]   ;;  %v20228_v30 = vld [vmem:[#allocation14 + $0x8ec] ss:$16 sps:$4 sm:$0xff]   ;;  %v20223_v35 = vld [vmem:[#allocation14 + $0x8e0] ss:$16 sps:$4 sm:$0xff]  }
 0x69d   :  { %v20226_v40 = vld [vmem:[#allocation14 + $0x8e8] ss:$16 sps:$4 sm:$0xff]   ;;  %v20231_v8 = vld [vmem:[#allocation14 + $0x904] ss:$16 sps:$4 sm:$0xff]   ;;  %v20234_v16 = vld [vmem:[#allocation14 + $0x90c] ss:$16 sps:$4 sm:$0xff]  }
 0x69e   :  { %v20229_v4 = vld [vmem:[#allocation14 + $0x900] ss:$16 sps:$4 sm:$0xff]   ;;  %v20232_v57 = vld [vmem:[#allocation14 + $0x908] ss:$16 sps:$4 sm:$0xff]  }
 0x69f   :  { %9804 = vmatpush1.bf16.msra.mxu0 %v20151_v56  ;;  %9910 = vmatpush1.bf16.msra.mxu1 %v20154_v52  ;;  %v20237_v56 = vld [vmem:[#allocation14 + $0x924] ss:$16 sps:$4 sm:$0xff]   ;;  %v20240_v52 = vld [vmem:[#allocation14 + $0x92c] ss:$16 sps:$4 sm:$0xff]  }
 0x6a0   :  { %9805 = vmatprep.subr.bf16.mxu0 %v20159_v43  ;;  %9911 = vmatprep.subr.bf16.mxu1 %v20162_v51  ;;  %v20235_v43 = vld [vmem:[#allocation14 + $0x920] ss:$16 sps:$4 sm:$0xff]   ;;  %v20238_v51 = vld [vmem:[#allocation14 + $0x928] ss:$16 sps:$4 sm:$0xff]  }
 0x6a3   :  { %9806 = vmatpush1.bf16.msra.mxu0 %v20157_v60  ;;  %9912 = vmatpush1.bf16.msra.mxu1 %v20160_v14  ;;  %v20243_v60 = vld [vmem:[#allocation14 + $0x944] ss:$16 sps:$4 sm:$0xff]   ;;  %v20246_v14 = vld [vmem:[#allocation14 + $0x94c] ss:$16 sps:$4 sm:$0xff]  }
 0x6a4   :  { %9807 = vmatprep.subr.bf16.mxu0 %v20165_v61  ;;  %9913 = vmatprep.subr.bf16.mxu1 %v20168_v47  ;;  %v20241_v61 = vld [vmem:[#allocation14 + $0x940] ss:$16 sps:$4 sm:$0xff]   ;;  %v20244_v47 = vld [vmem:[#allocation14 + $0x948] ss:$16 sps:$4 sm:$0xff]  }
 0x6a7   :  { %9808 = vmatpush1.bf16.msra.mxu0 %v20163_v59  ;;  %9914 = vmatpush1.bf16.msra.mxu1 %v20166_v6  ;;  %v20249_v59 = vld [vmem:[#allocation14 + $0x964] ss:$16 sps:$4 sm:$0xff]   ;;  %v20252_v6 = vld [vmem:[#allocation14 + $0x96c] ss:$16 sps:$4 sm:$0xff]  }
 0x6a8   :  { %9809 = vmatprep.subr.bf16.mxu0 %v20171_v62  ;;  %9915 = vmatprep.subr.bf16.mxu1 %v20174_v54  ;;  %v20247_v62 = vld [vmem:[#allocation14 + $0x960] ss:$16 sps:$4 sm:$0xff]   ;;  %v20250_v54 = vld [vmem:[#allocation14 + $0x968] ss:$16 sps:$4 sm:$0xff]  }
 0x6ab   :  { %9810 = vmatpush1.bf16.msra.mxu0 %v20169_v29  ;;  %9916 = vmatpush1.bf16.msra.mxu1 %v20172_v22  ;;  %v20255_v29 = vld [vmem:[#allocation14 + $0x984] ss:$16 sps:$4 sm:$0xff]   ;;  %v20258_v22 = vld [vmem:[#allocation14 + $0x98c] ss:$16 sps:$4 sm:$0xff]  }
 0x6ac   :  { %9811 = vmatprep.subr.bf16.mxu0 %v20177_v38  ;;  %9917 = vmatprep.subr.bf16.mxu1 %v20180_v20  ;;  %v20253_v38 = vld [vmem:[#allocation14 + $0x980] ss:$16 sps:$4 sm:$0xff]   ;;  %v20256_v20 = vld [vmem:[#allocation14 + $0x988] ss:$16 sps:$4 sm:$0xff]  }
 0x6af   :  { %9812 = vmatpush1.bf16.msra.mxu0 %v20175_v49  ;;  %9918 = vmatpush1.bf16.msra.mxu1 %v20178_v41  ;;  %v20261_v49 = vld [vmem:[#allocation14 + $0x9a4] ss:$16 sps:$4 sm:$0xff]   ;;  %v20264_v41 = vld [vmem:[#allocation14 + $0x9ac] ss:$16 sps:$4 sm:$0xff]  }
 0x6b0   :  { %10709 = vmatprep.subr.bf16.mxu0 %v20183_v10  ;;  %10815 = vmatprep.subr.bf16.mxu1 %v20186_v3  ;;  %v20259_v10 = vld [vmem:[#allocation14 + $0x9a0] ss:$16 sps:$4 sm:$0xff]   ;;  %v20262_v3 = vld [vmem:[#allocation14 + $0x9a8] ss:$16 sps:$4 sm:$0xff]  }
 0x6b2   :  { %16953 = vmatmul.mubr.msk.bf16.vlgmr.msra.gmra.mrb[40].mxu0 %vm21812_vm3, %v23791_v17  ;;  %16985 = vmatmul.mubr.msk.bf16.vlgmr.msra.gmra.mrb[40].mxu1 %vm21812_vm3, %v23791_v17  ;;  %v20273_v17 = vld [vmem:[#allocation14 + $0x9e4] ss:$16 sps:$4 sm:$0xff]  }
 0x6b3   :  { %10710 = vmatpush1.bf16.msra.mxu0 %v20181_v53  ;;  %10816 = vmatpush1.bf16.msra.mxu1 %v20184_v44  ;;  %v20267_v53 = vld [vmem:[#allocation14 + $0x9c4] ss:$16 sps:$4 sm:$0xff]   ;;  %v20270_v44 = vld [vmem:[#allocation14 + $0x9cc] ss:$16 sps:$4 sm:$0xff]  }
 0x6b4   :  { %10711 = vmatprep.subr.bf16.mxu0 %v20189_v9  ;;  %10817 = vmatprep.subr.bf16.mxu1 %v20192_v36  ;;  %v20265_v9 = vld [vmem:[#allocation14 + $0x9c0] ss:$16 sps:$4 sm:$0xff]   ;;  %v20268_v36 = vld [vmem:[#allocation14 + $0x9c8] ss:$16 sps:$4 sm:$0xff]  }
 0x6b5   :  { %16957 = vmatprep.mubr.msk.bf16.mxu0 %vm21867_vm6, %v23792_v37  ;;  %16989 = vmatprep.mubr.msk.bf16.mxu1 %vm21867_vm6, %v23792_v37  ;;  %v20282_v37 = vld [vmem:[#allocation14 + $0xa0c] ss:$16 sps:$4 sm:$0xff]  }
 0x6b7   :  { %10712 = vmatpush1.bf16.msra.mxu0 %v20187_v5  ;;  %10818 = vmatpush1.bf16.msra.mxu1 %v20190_v12  ;;  %v20276_v5 = vld [vmem:[#allocation14 + $0x9ec] ss:$16 sps:$4 sm:$0xff]   ;;  %v20271_v12 = vld [vmem:[#allocation14 + $0x9e0] ss:$16 sps:$4 sm:$0xff]  }
 0x6b8   :  { %10713 = vmatprep.subr.bf16.mxu0 %v20195_v48  ;;  %10819 = vmatprep.subr.bf16.mxu1 %v20198_v55  ;;  %v20274_v48 = vld [vmem:[#allocation14 + $0x9e8] ss:$16 sps:$4 sm:$0xff]   ;;  %v20279_v55 = vld [vmem:[#allocation14 + $0xa04] ss:$16 sps:$4 sm:$0xff]  }
 0x6ba   :  { %16961 = vmatmul.mubr.msk.bf16.gmra.mrb[44].mxu0 %vm21867_vm6, %v23793_v58  ;;  %16993 = vmatmul.mubr.msk.bf16.gmra.mrb[44].mxu1 %vm21867_vm6, %v23793_v58  ;;  %v23795_v58 = vld [vmem:[#allocation42_spill] sm:$0xff] }
 0x6bb   :  { %10714 = vmatpush1.bf16.msra.mxu0 %v20193_v18  ;;  %10820 = vmatpush1.bf16.msra.mxu1 %v20196_v24  ;;  %v20277_v18 = vld [vmem:[#allocation14 + $0xa00] ss:$16 sps:$4 sm:$0xff]   ;;  %v20280_v24 = vld [vmem:[#allocation14 + $0xa08] ss:$16 sps:$4 sm:$0xff]  }
 0x6bc   :  { %10715 = vmatprep.subr.bf16.mxu0 %v20201_v0  ;;  %10821 = vmatprep.subr.bf16.mxu1 %v20204_v19  ;;  %v20285_v0 = vld [vmem:[#allocation14 + $0xa24] ss:$16 sps:$4 sm:$0xff]   ;;  %v20288_v19 = vld [vmem:[#allocation14 + $0xa2c] ss:$16 sps:$4 sm:$0xff]  }
 0x6bd   :  { %17125 = vmatprep.mubr.msk.bf16.mxu0 %vm21974_vm8, %v23794_v11  ;;  %17157 = vmatprep.mubr.msk.bf16.mxu1 %vm21974_vm8, %v23794_v11  ;;  %v23796_v11 = vld [vmem:[#allocation49_spill] sm:$0xff] }
 0x6bf   :  { %10716 = vmatpush1.bf16.msra.mxu0 %v20199_v2  ;;  %10822 = vmatpush1.bf16.msra.mxu1 %v20202_v34  ;;  %v20283_v2 = vld [vmem:[#allocation14 + $0xa20] ss:$16 sps:$4 sm:$0xff]   ;;  %v20286_v34 = vld [vmem:[#allocation14 + $0xa28] ss:$16 sps:$4 sm:$0xff]  }
 0x6c0   :  { %10717 = vmatprep.subr.bf16.mxu0 %v20207_v50  ;;  %10823 = vmatprep.subr.bf16.mxu1 %v20210_v45  ;;  %v20291_v50 = vld [vmem:[#allocation14 + $0xa44] ss:$16 sps:$4 sm:$0xff]   ;;  %v20294_v45 = vld [vmem:[#allocation14 + $0xa4c] ss:$16 sps:$4 sm:$0xff]  }
 0x6c3   :  { %10718 = vmatpush1.bf16.msra.mxu0 %v20205_v26  ;;  %10824 = vmatpush1.bf16.msra.mxu1 %v20208_v46  ;;  %v20289_v26 = vld [vmem:[#allocation14 + $0xa40] ss:$16 sps:$4 sm:$0xff]   ;;  %v20292_v46 = vld [vmem:[#allocation14 + $0xa48] ss:$16 sps:$4 sm:$0xff]  }
 0x6c4   :  { %10719 = vmatprep.subr.bf16.mxu0 %v20213_v21  ;;  %10825 = vmatprep.subr.bf16.mxu1 %v20216_v13  ;;  %v20297_v21 = vld [vmem:[#allocation14 + $0xa64] ss:$16 sps:$4 sm:$0xff]   ;;  %v20300_v13 = vld [vmem:[#allocation14 + $0xa6c] ss:$16 sps:$4 sm:$0xff]  }
 0x6c7   :  { %10720 = vmatpush1.bf16.msra.mxu0 %v20211_v1  ;;  %10826 = vmatpush1.bf16.msra.mxu1 %v20214_v32  ;;  %v23797_v1 = vld [vmem:[#allocation44_spill] sm:$0xff] }
 0x6c8   :  { %10721 = vmatprep.subr.bf16.mxu0 %v20219_v42  ;;  %10827 = vmatprep.subr.bf16.mxu1 %v20222_v7  ;;  %v20295_v32 = vld [vmem:[#allocation14 + $0xa60] ss:$16 sps:$4 sm:$0xff]   ;;  %v20298_v42 = vld [vmem:[#allocation14 + $0xa68] ss:$16 sps:$4 sm:$0xff]   ;;  %v20303_v7 = vld [vmem:[#allocation14 + $0xa84] ss:$16 sps:$4 sm:$0xff]  }
 0x6cb   :  { %10722 = vmatpush1.bf16.msra.mxu0 %v20217_v31  ;;  %10828 = vmatpush1.bf16.msra.mxu1 %v20220_v39  ;;  %v20306_v31 = vld [vmem:[#allocation14 + $0xa8c] ss:$16 sps:$4 sm:$0xff]   ;;  %v23798_v39 = vld [vmem:[#allocation50_spill] sm:$0xff] }
 0x6cc   :  { %10723 = vmatprep.subr.bf16.mxu0 %v20225_v15  ;;  %10829 = vmatprep.subr.bf16.mxu1 %v20228_v30  ;;  %v20301_v15 = vld [vmem:[#allocation14 + $0xa80] ss:$16 sps:$4 sm:$0xff]   ;;  %v20304_v30 = vld [vmem:[#allocation14 + $0xa88] ss:$16 sps:$4 sm:$0xff]  }
 0x6cf   :  { %10724 = vmatpush1.bf16.msra.mxu0 %v20223_v35  ;;  %10830 = vmatpush1.bf16.msra.mxu1 %v20226_v40  ;;  %v20309_v35 = vld [vmem:[#allocation14 + $0xaa4] ss:$16 sps:$4 sm:$0xff]   ;;  %v20312_v40 = vld [vmem:[#allocation14 + $0xaac] ss:$16 sps:$4 sm:$0xff]  }
 0x6d0   :  { %10725 = vmatprep.subr.bf16.mxu0 %v20231_v8  ;;  %10831 = vmatprep.subr.bf16.mxu1 %v20234_v16  ;;  %v20307_v8 = vld [vmem:[#allocation14 + $0xaa0] ss:$16 sps:$4 sm:$0xff]   ;;  %v20310_v16 = vld [vmem:[#allocation14 + $0xaa8] ss:$16 sps:$4 sm:$0xff]  }
 0x6d3   :  { %10726 = vmatpush1.bf16.msra.mxu0 %v20229_v4  ;;  %10832 = vmatpush1.bf16.msra.mxu1 %v20232_v57  ;;  %v20315_v4 = vld [vmem:[#allocation14 + $0xac4] ss:$16 sps:$4 sm:$0xff]   ;;  %v20318_v57 = vld [vmem:[#allocation14 + $0xacc] ss:$16 sps:$4 sm:$0xff]  }
 0x6d4   :  { %10727 = vmatprep.subr.bf16.mxu0 %v20237_v56  ;;  %10833 = vmatprep.subr.bf16.mxu1 %v20240_v52  ;;  %v20313_v56 = vld [vmem:[#allocation14 + $0xac0] ss:$16 sps:$4 sm:$0xff]   ;;  %v20316_v52 = vld [vmem:[#allocation14 + $0xac8] ss:$16 sps:$4 sm:$0xff]  }
 0x6d7   :  { %10728 = vmatpush1.bf16.msra.mxu0 %v20235_v43  ;;  %10834 = vmatpush1.bf16.msra.mxu1 %v20238_v51  ;;  %v20321_v43 = vld [vmem:[#allocation14 + $0xae4] ss:$16 sps:$4 sm:$0xff]   ;;  %v20324_v51 = vld [vmem:[#allocation14 + $0xaec] ss:$16 sps:$4 sm:$0xff]  }
 0x6d8   :  { %10729 = vmatprep.subr.bf16.mxu0 %v20243_v60  ;;  %10835 = vmatprep.subr.bf16.mxu1 %v20246_v14  ;;  %v20319_v60 = vld [vmem:[#allocation14 + $0xae0] ss:$16 sps:$4 sm:$0xff]   ;;  %v20322_v14 = vld [vmem:[#allocation14 + $0xae8] ss:$16 sps:$4 sm:$0xff]  }
 0x6db   :  { %10730 = vmatpush1.bf16.msra.mxu0 %v20241_v61  ;;  %10836 = vmatpush1.bf16.msra.mxu1 %v20244_v47  ;;  %v20327_v61 = vld [vmem:[#allocation14 + $0xb04] ss:$16 sps:$4 sm:$0xff]   ;;  %v20330_v47 = vld [vmem:[#allocation14 + $0xb0c] ss:$16 sps:$4 sm:$0xff]  }
 0x6dc   :  { %10731 = vmatprep.subr.bf16.mxu0 %v20249_v59  ;;  %10837 = vmatprep.subr.bf16.mxu1 %v20252_v6  ;;  %v20325_v59 = vld [vmem:[#allocation14 + $0xb00] ss:$16 sps:$4 sm:$0xff]   ;;  %v20328_v6 = vld [vmem:[#allocation14 + $0xb08] ss:$16 sps:$4 sm:$0xff]  }
 0x6df   :  { %10732 = vmatpush1.bf16.msra.mxu0 %v20247_v62  ;;  %10838 = vmatpush1.bf16.msra.mxu1 %v20250_v54  ;;  %v20333_v62 = vld [vmem:[#allocation14 + $0xb24] ss:$16 sps:$4 sm:$0xff]   ;;  %v20336_v54 = vld [vmem:[#allocation14 + $0xb2c] ss:$16 sps:$4 sm:$0xff]  }
 0x6e0   :  { %10733 = vmatprep.subr.bf16.mxu0 %v20255_v29  ;;  %10839 = vmatprep.subr.bf16.mxu1 %v20258_v22  ;;  %v20331_v29 = vld [vmem:[#allocation14 + $0xb20] ss:$16 sps:$4 sm:$0xff]   ;;  %v20334_v22 = vld [vmem:[#allocation14 + $0xb28] ss:$16 sps:$4 sm:$0xff]  }
 0x6e3   :  { %10734 = vmatpush1.bf16.msra.mxu0 %v20253_v38  ;;  %10840 = vmatpush1.bf16.msra.mxu1 %v20256_v20  ;;  %v20339_v38 = vld [vmem:[#allocation14 + $0xb44] ss:$16 sps:$4 sm:$0xff]   ;;  %v20342_v20 = vld [vmem:[#allocation14 + $0xb4c] ss:$16 sps:$4 sm:$0xff]  }
 0x6e4   :  { %10735 = vmatprep.subr.bf16.mxu0 %v20261_v49  ;;  %10841 = vmatprep.subr.bf16.mxu1 %v20264_v41  ;;  %v20337_v49 = vld [vmem:[#allocation14 + $0xb40] ss:$16 sps:$4 sm:$0xff]   ;;  %v20340_v41 = vld [vmem:[#allocation14 + $0xb48] ss:$16 sps:$4 sm:$0xff]  }
 0x6e7   :  { %10736 = vmatpush1.bf16.msra.mxu0 %v20259_v10  ;;  %10842 = vmatpush1.bf16.msra.mxu1 %v20262_v3  ;;  %v20345_v10 = vld [vmem:[#allocation14 + $0xb64] ss:$16 sps:$4 sm:$0xff]   ;;  %v20348_v3 = vld [vmem:[#allocation14 + $0xb6c] ss:$16 sps:$4 sm:$0xff]  }
 0x6e8   :  { %10737 = vmatprep.subr.bf16.mxu0 %v20267_v53  ;;  %10843 = vmatprep.subr.bf16.mxu1 %v20270_v44  ;;  %v20343_v53 = vld [vmem:[#allocation14 + $0xb60] ss:$16 sps:$4 sm:$0xff]   ;;  %v20346_v44 = vld [vmem:[#allocation14 + $0xb68] ss:$16 sps:$4 sm:$0xff]  }
 0x6eb   :  { %10738 = vmatpush1.bf16.msra.mxu0 %v20265_v9  ;;  %10844 = vmatpush1.bf16.msra.mxu1 %v20268_v36  ;;  %v20351_v9 = vld [vmem:[#allocation14 + $0xb84] ss:$16 sps:$4 sm:$0xff]   ;;  %v20354_v36 = vld [vmem:[#allocation14 + $0xb8c] ss:$16 sps:$4 sm:$0xff]  }
 0x6ec   :  { %10739 = vmatprep.subr.bf16.mxu0 %v20273_v17  ;;  %10845 = vmatprep.subr.bf16.mxu1 %v20276_v5  ;;  %v20349_v17 = vld [vmem:[#allocation14 + $0xb80] ss:$16 sps:$4 sm:$0xff]   ;;  %v20352_v5 = vld [vmem:[#allocation14 + $0xb88] ss:$16 sps:$4 sm:$0xff]  }
 0x6ef   :  { %10740 = vmatpush1.bf16.msra.mxu0 %v20271_v12  ;;  %10846 = vmatpush1.bf16.msra.mxu1 %v20274_v48  ;;  %v20357_v12 = vld [vmem:[#allocation14 + $0xba4] ss:$16 sps:$4 sm:$0xff]   ;;  %v20360_v48 = vld [vmem:[#allocation14 + $0xbac] ss:$16 sps:$4 sm:$0xff]  }
 0x6f0   :  { %10762 = vmatprep.subr.bf16.mxu0 %v20279_v55  ;;  %10868 = vmatprep.subr.bf16.mxu1 %v20282_v37  ;;  %v20355_v55 = vld [vmem:[#allocation14 + $0xba0] ss:$16 sps:$4 sm:$0xff]   ;;  %v20358_v37 = vld [vmem:[#allocation14 + $0xba8] ss:$16 sps:$4 sm:$0xff]  }
 0x6f2   :  { %17129 = vmatmul.mubr.msk.bf16.vlgmr.msra.gmra.mrb[40].mxu0 %vm21974_vm8, %v23795_v58  ;;  %17161 = vmatmul.mubr.msk.bf16.vlgmr.msra.gmra.mrb[40].mxu1 %vm21974_vm8, %v23795_v58  ;;  %v20369_v58 = vld [vmem:[#allocation14 + $0xbe4] ss:$16 sps:$4 sm:$0xff]  }
 0x6f3   :  { %10763 = vmatpush1.bf16.msra.mxu0 %v20277_v18  ;;  %10869 = vmatpush1.bf16.msra.mxu1 %v20280_v24  ;;  %v20363_v18 = vld [vmem:[#allocation14 + $0xbc4] ss:$16 sps:$4 sm:$0xff]   ;;  %v20366_v24 = vld [vmem:[#allocation14 + $0xbcc] ss:$16 sps:$4 sm:$0xff]  }
 0x6f4   :  { %10764 = vmatprep.subr.bf16.mxu0 %v20285_v0  ;;  %10870 = vmatprep.subr.bf16.mxu1 %v20288_v19  ;;  %v20361_v0 = vld [vmem:[#allocation14 + $0xbc0] ss:$16 sps:$4 sm:$0xff]   ;;  %v20364_v19 = vld [vmem:[#allocation14 + $0xbc8] ss:$16 sps:$4 sm:$0xff]  }
 0x6f5   :  { %17133 = vmatprep.mubr.msk.bf16.mxu0 %vm21988_vm10, %v23796_v11  ;;  %17165 = vmatprep.mubr.msk.bf16.mxu1 %vm21988_vm10, %v23796_v11  ;;  %v20378_v11 = vld [vmem:[#allocation17 + $0x40c] ss:$16 sps:$4 sm:$0xff]  }
 0x6f7   :  { %10765 = vmatpush1.bf16.msra.mxu0 %v20283_v2  ;;  %10871 = vmatpush1.bf16.msra.mxu1 %v20286_v34  ;;  %v20372_v2 = vld [vmem:[#allocation14 + $0xbec] ss:$16 sps:$4 sm:$0xff]   ;;  %v20367_v34 = vld [vmem:[#allocation14 + $0xbe0] ss:$16 sps:$4 sm:$0xff]  }
 0x6f8   :  { %10766 = vmatprep.subr.bf16.mxu0 %v20291_v50  ;;  %10872 = vmatprep.subr.bf16.mxu1 %v20294_v45  ;;  %v20370_v50 = vld [vmem:[#allocation14 + $0xbe8] ss:$16 sps:$4 sm:$0xff]  }
 0x6f9   :  { %v20375_v45 = vld [vmem:[#allocation17 + $0x404] ss:$16 sps:$4 sm:$0xff]  }
 0x6fa   :  { %17137 = vmatmul.mubr.msk.bf16.gmra.mrb[44].mxu0 %vm21988_vm10, %v23797_v1  ;;  %17169 = vmatmul.mubr.msk.bf16.gmra.mrb[44].mxu1 %vm21988_vm10, %v23797_v1  ;;  %v20384_v1 = vld [vmem:[#allocation17 + $0x42c] ss:$16 sps:$4 sm:$0xff]  }
 0x6fb   :  { %10767 = vmatpush1.bf16.msra.mxu0 %v20289_v26  ;;  %10873 = vmatpush1.bf16.msra.mxu1 %v20292_v46  ;;  %v20373_v26 = vld [vmem:[#allocation17 + $0x400] ss:$16 sps:$4 sm:$0xff]   ;;  %v20376_v46 = vld [vmem:[#allocation17 + $0x408] ss:$16 sps:$4 sm:$0xff]  }
 0x6fc   :  { %10768 = vmatprep.subr.bf16.mxu0 %v20297_v21  ;;  %10874 = vmatprep.subr.bf16.mxu1 %v20300_v13  ;;  %v20381_v21 = vld [vmem:[#allocation17 + $0x424] ss:$16 sps:$4 sm:$0xff]  }
 0x6fd   :  { %17141 = vmatprep.mubr.msk.bf16.mxu0 %vm21974_vm8, %v23798_v39  ;;  %17173 = vmatprep.mubr.msk.bf16.mxu1 %vm21974_vm8, %v23798_v39  ;;  %v23799_v13 = vld [vmem:[#allocation45_spill] sm:$0xff] }
 0x6fe   :  { %v20390_v39 = vld [vmem:[#allocation17 + $0x44c] ss:$16 sps:$4 sm:$0xff]  }
 0x6ff   :  { %10769 = vmatpush1.bf16.msra.mxu0 %v20295_v32  ;;  %10875 = vmatpush1.bf16.msra.mxu1 %v20298_v42  ;;  %v23800_v32 = vld [vmem:[#allocation51_spill] sm:$0xff]  ;;  %v20379_v42 = vld [vmem:[#allocation17 + $0x420] ss:$16 sps:$4 sm:$0xff]  }
 0x700   :  { %10770 = vmatprep.subr.bf16.mxu0 %v20303_v7  ;;  %10876 = vmatprep.subr.bf16.mxu1 %v20306_v31  ;;  %v20382_v7 = vld [vmem:[#allocation17 + $0x428] ss:$16 sps:$4 sm:$0xff]   ;;  %v20387_v31 = vld [vmem:[#allocation17 + $0x444] ss:$16 sps:$4 sm:$0xff]  }
 0x703   :  { %10771 = vmatpush1.bf16.msra.mxu0 %v20301_v15  ;;  %10877 = vmatpush1.bf16.msra.mxu1 %v20304_v30  ;;  %v20385_v15 = vld [vmem:[#allocation17 + $0x440] ss:$16 sps:$4 sm:$0xff]   ;;  %v20388_v30 = vld [vmem:[#allocation17 + $0x448] ss:$16 sps:$4 sm:$0xff]  }
 0x704   :  { %10772 = vmatprep.subr.bf16.mxu0 %v20309_v35  ;;  %10878 = vmatprep.subr.bf16.mxu1 %v20312_v40  ;;  %v20393_v35 = vld [vmem:[#allocation17 + $0x464] ss:$16 sps:$4 sm:$0xff]  }
 0x705   :  { %v23801_v40 = vld [vmem:[#allocation47_spill] sm:$0xff] }
 0x707   :  { %10773 = vmatpush1.bf16.msra.mxu0 %v20307_v8  ;;  %10879 = vmatpush1.bf16.msra.mxu1 %v20310_v16  ;;  %v20396_v8 = vld [vmem:[#allocation17 + $0x46c] ss:$16 sps:$4 sm:$0xff]   ;;  %v20391_v16 = vld [vmem:[#allocation17 + $0x460] ss:$16 sps:$4 sm:$0xff]  }
 0x708   :  { %10774 = vmatprep.subr.bf16.mxu0 %v20315_v4  ;;  %10880 = vmatprep.subr.bf16.mxu1 %v20318_v57  ;;  %v20394_v4 = vld [vmem:[#allocation17 + $0x468] ss:$16 sps:$4 sm:$0xff]   ;;  %v20399_v57 = vld [vmem:[#allocation17 + $0x484] ss:$16 sps:$4 sm:$0xff]  }
 0x70b   :  { %10775 = vmatpush1.bf16.msra.mxu0 %v20313_v56  ;;  %10881 = vmatpush1.bf16.msra.mxu1 %v20316_v52  ;;  %v20402_v56 = vld [vmem:[#allocation17 + $0x48c] ss:$16 sps:$4 sm:$0xff]   ;;  %v20397_v52 = vld [vmem:[#allocation17 + $0x480] ss:$16 sps:$4 sm:$0xff]  }
 0x70c   :  { %10776 = vmatprep.subr.bf16.mxu0 %v20321_v43  ;;  %10882 = vmatprep.subr.bf16.mxu1 %v20324_v51  ;;  %v20400_v43 = vld [vmem:[#allocation17 + $0x488] ss:$16 sps:$4 sm:$0xff]   ;;  %v20405_v51 = vld [vmem:[#allocation17 + $0x4a4] ss:$16 sps:$4 sm:$0xff]  }
 0x70f   :  { %10777 = vmatpush1.bf16.msra.mxu0 %v20319_v60  ;;  %10883 = vmatpush1.bf16.msra.mxu1 %v20322_v14  ;;  %v20408_v60 = vld [vmem:[#allocation17 + $0x4ac] ss:$16 sps:$4 sm:$0xff]   ;;  %v20403_v14 = vld [vmem:[#allocation17 + $0x4a0] ss:$16 sps:$4 sm:$0xff]  }
 0x710   :  { %10778 = vmatprep.subr.bf16.mxu0 %v20327_v61  ;;  %10884 = vmatprep.subr.bf16.mxu1 %v20330_v47  ;;  %v20406_v61 = vld [vmem:[#allocation17 + $0x4a8] ss:$16 sps:$4 sm:$0xff]   ;;  %v20411_v47 = vld [vmem:[#allocation17 + $0x4c4] ss:$16 sps:$4 sm:$0xff]  }
 0x713   :  { %10779 = vmatpush1.bf16.msra.mxu0 %v20325_v59  ;;  %10885 = vmatpush1.bf16.msra.mxu1 %v20328_v6  ;;  %v20414_v59 = vld [vmem:[#allocation17 + $0x4cc] ss:$16 sps:$4 sm:$0xff]   ;;  %v20409_v6 = vld [vmem:[#allocation17 + $0x4c0] ss:$16 sps:$4 sm:$0xff]  }
 0x714   :  { %10780 = vmatprep.subr.bf16.mxu0 %v20333_v62  ;;  %10886 = vmatprep.subr.bf16.mxu1 %v20336_v54  ;;  %v20412_v62 = vld [vmem:[#allocation17 + $0x4c8] ss:$16 sps:$4 sm:$0xff]   ;;  %v20417_v54 = vld [vmem:[#allocation17 + $0x4e4] ss:$16 sps:$4 sm:$0xff]  }
 0x717   :  { %10781 = vmatpush1.bf16.msra.mxu0 %v20331_v29  ;;  %10887 = vmatpush1.bf16.msra.mxu1 %v20334_v22  ;;  %v20420_v29 = vld [vmem:[#allocation17 + $0x4ec] ss:$16 sps:$4 sm:$0xff]   ;;  %v20415_v22 = vld [vmem:[#allocation17 + $0x4e0] ss:$16 sps:$4 sm:$0xff]  }
 0x718   :  { %10782 = vmatprep.subr.bf16.mxu0 %v20339_v38  ;;  %10888 = vmatprep.subr.bf16.mxu1 %v20342_v20  ;;  %v20418_v38 = vld [vmem:[#allocation17 + $0x4e8] ss:$16 sps:$4 sm:$0xff]   ;;  %v20423_v20 = vld [vmem:[#allocation17 + $0x504] ss:$16 sps:$4 sm:$0xff]  }
 0x71b   :  { %10783 = vmatpush1.bf16.msra.mxu0 %v20337_v49  ;;  %10889 = vmatpush1.bf16.msra.mxu1 %v20340_v41  ;;  %v20426_v49 = vld [vmem:[#allocation17 + $0x50c] ss:$16 sps:$4 sm:$0xff]   ;;  %v20421_v41 = vld [vmem:[#allocation17 + $0x500] ss:$16 sps:$4 sm:$0xff]  }
 0x71c   :  { %10784 = vmatprep.subr.bf16.mxu0 %v20345_v10  ;;  %10890 = vmatprep.subr.bf16.mxu1 %v20348_v3  ;;  %v20424_v10 = vld [vmem:[#allocation17 + $0x508] ss:$16 sps:$4 sm:$0xff]   ;;  %v20429_v3 = vld [vmem:[#allocation17 + $0x524] ss:$16 sps:$4 sm:$0xff]  }
 0x71f   :  { %10785 = vmatpush1.bf16.msra.mxu0 %v20343_v53  ;;  %10891 = vmatpush1.bf16.msra.mxu1 %v20346_v44  ;;  %v20432_v53 = vld [vmem:[#allocation17 + $0x52c] ss:$16 sps:$4 sm:$0xff]   ;;  %v20427_v44 = vld [vmem:[#allocation17 + $0x520] ss:$16 sps:$4 sm:$0xff]  }
 0x720   :  { %10786 = vmatprep.subr.bf16.mxu0 %v20351_v9  ;;  %10892 = vmatprep.subr.bf16.mxu1 %v20354_v36  ;;  %v20430_v9 = vld [vmem:[#allocation17 + $0x528] ss:$16 sps:$4 sm:$0xff]   ;;  %v20435_v36 = vld [vmem:[#allocation17 + $0x544] ss:$16 sps:$4 sm:$0xff]  }
 0x723   :  { %10787 = vmatpush1.bf16.msra.mxu0 %v20349_v17  ;;  %10893 = vmatpush1.bf16.msra.mxu1 %v20352_v5  ;;  %v20438_v17 = vld [vmem:[#allocation17 + $0x54c] ss:$16 sps:$4 sm:$0xff]   ;;  %v20433_v5 = vld [vmem:[#allocation17 + $0x540] ss:$16 sps:$4 sm:$0xff]  }
 0x724   :  { %10788 = vmatprep.subr.bf16.mxu0 %v20357_v12  ;;  %10894 = vmatprep.subr.bf16.mxu1 %v20360_v48  ;;  %v20436_v12 = vld [vmem:[#allocation17 + $0x548] ss:$16 sps:$4 sm:$0xff]   ;;  %v20441_v48 = vld [vmem:[#allocation17 + $0x564] ss:$16 sps:$4 sm:$0xff]  }
 0x727   :  { %10789 = vmatpush1.bf16.msra.mxu0 %v20355_v55  ;;  %10895 = vmatpush1.bf16.msra.mxu1 %v20358_v37  ;;  %v20444_v55 = vld [vmem:[#allocation17 + $0x56c] ss:$16 sps:$4 sm:$0xff]   ;;  %v20439_v37 = vld [vmem:[#allocation17 + $0x560] ss:$16 sps:$4 sm:$0xff]  }
 0x728   :  { %10790 = vmatprep.subr.bf16.mxu0 %v20363_v18  ;;  %10896 = vmatprep.subr.bf16.mxu1 %v20366_v24  ;;  %v20442_v18 = vld [vmem:[#allocation17 + $0x568] ss:$16 sps:$4 sm:$0xff]   ;;  %v20447_v24 = vld [vmem:[#allocation17 + $0x584] ss:$16 sps:$4 sm:$0xff]  }
 0x72b   :  { %10791 = vmatpush1.bf16.msra.mxu0 %v20361_v0  ;;  %10897 = vmatpush1.bf16.msra.mxu1 %v20364_v19  ;;  %v20450_v0 = vld [vmem:[#allocation17 + $0x58c] ss:$16 sps:$4 sm:$0xff]   ;;  %v20445_v19 = vld [vmem:[#allocation17 + $0x580] ss:$16 sps:$4 sm:$0xff]  }
 0x72c   :  { %10792 = vmatprep.subr.bf16.mxu0 %v20369_v58  ;;  %10898 = vmatprep.subr.bf16.mxu1 %v20372_v2  ;;  %v20448_v58 = vld [vmem:[#allocation17 + $0x588] ss:$16 sps:$4 sm:$0xff]   ;;  %v20453_v2 = vld [vmem:[#allocation17 + $0x5a4] ss:$16 sps:$4 sm:$0xff]  }
 0x72f   :  { %10793 = vmatpush1.bf16.msra.mxu0 %v20367_v34  ;;  %10899 = vmatpush1.bf16.msra.mxu1 %v20370_v50  ;;  %v20456_v34 = vld [vmem:[#allocation17 + $0x5ac] ss:$16 sps:$4 sm:$0xff]   ;;  %v20451_v50 = vld [vmem:[#allocation17 + $0x5a0] ss:$16 sps:$4 sm:$0xff]  }
 0x730   :  { %12056 = vmatprep.subr.bf16.mxu0 %v20375_v45  ;;  %12162 = vmatprep.subr.bf16.mxu1 %v20378_v11  ;;  %v20454_v45 = vld [vmem:[#allocation17 + $0x5a8] ss:$16 sps:$4 sm:$0xff]   ;;  %v20459_v11 = vld [vmem:[#allocation17 + $0x5c4] ss:$16 sps:$4 sm:$0xff]  }
 0x732   :  { %17145 = vmatmul.mubr.msk.bf16.vlgmr.msra.gmra.mrb[40].mxu0 %vm21974_vm8, %v23799_v13  ;;  %17177 = vmatmul.mubr.msk.bf16.vlgmr.msra.gmra.mrb[40].mxu1 %vm21974_vm8, %v23799_v13  ;;  %v20463_v13 = vld [vmem:[#allocation17 + $0x5e0] ss:$16 sps:$4 sm:$0xff]  }
 0x733   :  { %17149 = vmatprep.mubr.msk.bf16.mxu0 %vm21988_vm10, %v23800_v32  ;;  %17181 = vmatprep.mubr.msk.bf16.mxu1 %vm21988_vm10, %v23800_v32  ;;  %v20466_v32 = vld [vmem:[#allocation17 + $0x5e8] ss:$16 sps:$4 sm:$0xff]  }
 0x734   :  { %12057 = vmatpush1.bf16.msra.mxu0 %v20373_v26  ;;  %12163 = vmatpush1.bf16.msra.mxu1 %v20376_v46  ;;  %v20462_v26 = vld [vmem:[#allocation17 + $0x5cc] ss:$16 sps:$4 sm:$0xff]   ;;  %v20457_v46 = vld [vmem:[#allocation17 + $0x5c0] ss:$16 sps:$4 sm:$0xff]  }
 0x735   :  { %12058 = vmatprep.subr.bf16.mxu0 %v20381_v21  ;;  %12164 = vmatprep.subr.bf16.mxu1 %v20384_v1  ;;  %v20460_v21 = vld [vmem:[#allocation17 + $0x5c8] ss:$16 sps:$4 sm:$0xff]   ;;  %v20465_v1 = vld [vmem:[#allocation17 + $0x5e4] ss:$16 sps:$4 sm:$0xff]  }
 0x738   :  { %12059 = vmatpush1.bf16.msra.mxu0 %v20379_v42  ;;  %12165 = vmatpush1.bf16.msra.mxu1 %v20382_v7  ;;  %v20468_v42 = vld [vmem:[#allocation17 + $0x5ec] ss:$16 sps:$4 sm:$0xff]   ;;  %v20471_v7 = vld [vmem:[#allocation17 + $0x604] ss:$16 sps:$4 sm:$0xff]  }
 0x739   :  { %12060 = vmatprep.subr.bf16.mxu0 %v20387_v31  ;;  %12166 = vmatprep.subr.bf16.mxu1 %v20390_v39  ;;  %v20474_v31 = vld [vmem:[#allocation17 + $0x60c] ss:$16 sps:$4 sm:$0xff]  }
 0x73a   :  { %17153 = vmatmul.mubr.msk.bf16.gmra.mrb[44].mxu0 %vm21988_vm10, %v23801_v40  ;;  %17185 = vmatmul.mubr.msk.bf16.gmra.mrb[44].mxu1 %vm21988_vm10, %v23801_v40  ;;  %v10937_v39 = vld [vmem:[#allocation16] sm:$0xf] }
 0x73c   :  { %12061 = vmatpush1.bf16.msra.mxu0 %v20385_v15  ;;  %12167 = vmatpush1.bf16.msra.mxu1 %v20388_v30  ;;  %v10942_v15 = vrot.slane %v10937_v39, %v22065_v27  ;;  %v22908_v30 = vrot.slane %v10937_v39, %v22068_v28 }
 0x73d   :  { %12062 = vmatprep.subr.bf16.mxu0 %v20393_v35  ;;  %12168 = vmatprep.subr.bf16.mxu1 %v20396_v8  ;;  %v23802_v35 = vld [vmem:[#allocation52_spill] sm:$0xff]  ;;  %v23803_v8 = vld [vmem:[#allocation53_spill] sm:$0xff] }
 0x73e   :  { %v22911_v40 = vrot.slane %v10937_v39, %v23802_v35 }
 0x740   :  { %12063 = vmatpush1.bf16.msra.mxu0 %v20391_v16  ;;  %12169 = vmatpush1.bf16.msra.mxu1 %v20394_v4  ;;  %v22914_v16 = vrot.slane %v10937_v39, %v23803_v8 }
 0x741   :  { %12064 = vmatprep.subr.bf16.mxu0 %v20399_v57  ;;  %12170 = vmatprep.subr.bf16.mxu1 %v20402_v56 }
 0x744   :  { %12065 = vmatpush1.bf16.msra.mxu0 %v20397_v52  ;;  %12171 = vmatpush1.bf16.msra.mxu1 %v20400_v43 }
 0x745   :  { %12066 = vmatprep.subr.bf16.mxu0 %v20405_v51  ;;  %12172 = vmatprep.subr.bf16.mxu1 %v20408_v60 }
 0x748   :  { %12067 = vmatpush1.bf16.msra.mxu0 %v20403_v14  ;;  %12173 = vmatpush1.bf16.msra.mxu1 %v20406_v61 }
 0x749   :  { %12068 = vmatprep.subr.bf16.mxu0 %v20411_v47  ;;  %12174 = vmatprep.subr.bf16.mxu1 %v20414_v59 }
 0x74c   :  { %12069 = vmatpush1.bf16.msra.mxu0 %v20409_v6  ;;  %12175 = vmatpush1.bf16.msra.mxu1 %v20412_v62 }
 0x74d   :  { %12070 = vmatprep.subr.bf16.mxu0 %v20417_v54  ;;  %12176 = vmatprep.subr.bf16.mxu1 %v20420_v29 }
 0x750   :  { %12071 = vmatpush1.bf16.msra.mxu0 %v20415_v22  ;;  %12177 = vmatpush1.bf16.msra.mxu1 %v20418_v38 }
 0x751   :  { %12072 = vmatprep.subr.bf16.mxu0 %v20423_v20  ;;  %12178 = vmatprep.subr.bf16.mxu1 %v20426_v49 }
 0x754   :  { %12073 = vmatpush1.bf16.msra.mxu0 %v20421_v41  ;;  %12179 = vmatpush1.bf16.msra.mxu1 %v20424_v10 }
 0x755   :  { %12074 = vmatprep.subr.bf16.mxu0 %v20429_v3  ;;  %12180 = vmatprep.subr.bf16.mxu1 %v20432_v53 }
 0x758   :  { %12075 = vmatpush1.bf16.msra.mxu0 %v20427_v44  ;;  %12181 = vmatpush1.bf16.msra.mxu1 %v20430_v9 }
 0x759   :  { %12076 = vmatprep.subr.bf16.mxu0 %v20435_v36  ;;  %12182 = vmatprep.subr.bf16.mxu1 %v20438_v17 }
 0x75c   :  { %12077 = vmatpush1.bf16.msra.mxu0 %v20433_v5  ;;  %12183 = vmatpush1.bf16.msra.mxu1 %v20436_v12 }
 0x75d   :  { %12078 = vmatprep.subr.bf16.mxu0 %v20441_v48  ;;  %12184 = vmatprep.subr.bf16.mxu1 %v20444_v55 }
 0x760   :  { %12079 = vmatpush1.bf16.msra.mxu0 %v20439_v37  ;;  %12185 = vmatpush1.bf16.msra.mxu1 %v20442_v18 }
 0x761   :  { %12080 = vmatprep.subr.bf16.mxu0 %v20447_v24  ;;  %12186 = vmatprep.subr.bf16.mxu1 %v20450_v0 }
 0x764   :  { %12081 = vmatpush1.bf16.msra.mxu0 %v20445_v19  ;;  %12187 = vmatpush1.bf16.msra.mxu1 %v20448_v58 }
 0x765   :  { %12082 = vmatprep.subr.bf16.mxu0 %v20453_v2  ;;  %12188 = vmatprep.subr.bf16.mxu1 %v20456_v34 }
 0x768   :  { %12083 = vmatpush1.bf16.msra.mxu0 %v20451_v50  ;;  %12189 = vmatpush1.bf16.msra.mxu1 %v20454_v45 }
 0x769   :  { %12084 = vmatprep.subr.bf16.mxu0 %v20459_v11  ;;  %12190 = vmatprep.subr.bf16.mxu1 %v20462_v26 }
 0x76c   :  { %12085 = vmatpush1.bf16.msra.mxu0 %v20457_v46  ;;  %12191 = vmatpush1.bf16.msra.mxu1 %v20460_v21 }
 0x76d   :  { %12086 = vmatprep.subr.bf16.mxu0 %v20465_v1  ;;  %12192 = vmatprep.subr.bf16.mxu1 %v20468_v42 }
 0x770   :  { %12087 = vmatpush1.bf16.msra.mxu0 %v20463_v13  ;;  %12193 = vmatpush1.bf16.msra.mxu1 %v20466_v32 }
 0x771   :  { %12109 = vmatprep.subr.bf16.mxu0 %v20471_v7  ;;  %12215 = vmatprep.subr.bf16.mxu1 %v20474_v31 }
 0x805   :  { %v10796_v4 = vpop.f32.mrb[40].mxu0  ;;  %v10902_v56 = vpop.f32.mrb[40].mxu1 }
 0x806   :  { %v10959_v57 = vadd.f32 %v10942_v15, %v10796_v4  ;;  %v10798_v52 = vpop.f32.mrb[41].mxu0  ;;  %v10961_v43 = vadd.f32 %v22908_v30, %v10902_v56  ;;  %v10904_v60 = vpop.f32.mrb[41].mxu1 }
 0x807   :  { %v10960_v51 = vadd.f32 %v22911_v40, %v10798_v52  ;;  %v10800_v14 = vpop.f32.mrb[42].mxu0  ;;  %v10962_v47 = vadd.f32 %v22914_v16, %v10904_v60  ;;  %v10906_v6 = vpop.f32.mrb[42].mxu1 }
 0x808   :  { %v22918_v61 = vmax.f32 %v10959_v57, 0.0  ;;  %v10963_v59 = vadd.f32 %v10942_v15, %v10800_v14  ;;  %v10802_v62 = vpop.f32.mrb[43].mxu0  ;;  %v22921_v54 = vmax.f32 %v10961_v43, 0.0  ;;  %v10965_v29 = vadd.f32 %v22908_v30, %v10906_v6  ;;  %v10908_v22 = vpop.f32.mrb[43].mxu1  ;;  %v20469_v6 = vld [vmem:[#allocation17 + $0x600] ss:$16 sps:$4 sm:$0xff]  }
 0x809   :  { %v22927_v49 = vmax.f32 %v10960_v51, 0.0  ;;  %v10964_v41 = vadd.f32 %v22911_v40, %v10802_v62  ;;  %v22931_v3 = vmax.f32 %v10962_v47, 0.0  ;;  %v10966_v37 = vadd.f32 %v22914_v16, %v10908_v22  ;;  %v20472_v62 = vld [vmem:[#allocation17 + $0x608] ss:$16 sps:$4 sm:$0xff]   ;;  %v20477_v22 = vld [vmem:[#allocation17 + $0x624] ss:$16 sps:$4 sm:$0xff]  }
 0x80a   :  { %v22924_v38 = vmax.f32 %v10963_v59, 0.0  ;;  %v11015_v20 = vrot.slane %v22918_v61, 7  ;;  %v23709_v10 = vrot.slane %v22918_v61, 1  ;;  %v11017_v9 = vrot.slane %v22921_v54, 7 }
 0x80b   :  { %v23707_v36 = vrot.slane %v22921_v54, 1  ;;  %v22939_v5 = vmax.f32 %v10965_v29, 0.0  ;;  %v22958_v34 = vmax.f32 %v10964_v41, 0.0  ;;  %v11016_v11 = vrot.slane %v22927_v49, 7 }
 0x80c   :  { %v11019_v53 = vrot.slane %v22924_v38, 7  ;;  %v11076_v44 = vrot.slane %v22924_v38, 1  ;;  %v11279_v17 = vpack.c.bf16 %v22924_v38, %v22918_v61  ;;  %v11078_v1 = vrot.slane %v22927_v49, 1 }
 0x80d   :  { %v10806_v12 = vpop.f32.mrb[44].mxu0  ;;  %v10912_v24 = vpop.f32.mrb[44].mxu1  ;;  %v11023_v19 = vrot.slane %v22939_v5, 7  ;;  %v11082_v58 = vrot.slane %v22939_v5, 1  ;;  %v22956_v2 = vpack.c.bf16 %v22939_v5, %v22921_v54  ;;  %v11018_v39 = vrot.slane %v22931_v3, 7 }
 0x80e   :  { %v22946_v48 = vsel %vm318_vm0, %v11015_v20, %v11019_v53  ;;  %v11077_v55 = vsel %vm391_vm4, %v23709_v10, %v11076_v44  ;;  %v10967_v18 = vadd.f32 %v10942_v15, %v10806_v12  ;;  %v10808_v0 = vpop.f32.mrb[45].mxu0  ;;  %v10914_v50 = vpop.f32.mrb[45].mxu1  ;;  %v10969_v46 = vadd.f32 %v22908_v30, %v10912_v24 }
 0x80f   :  { %v10810_v45 = vpop.f32.mrb[46].mxu0  ;;  %v10916_v21 = vpop.f32.mrb[46].mxu1  ;;  %v11024_v32 = vsel %vm318_vm0, %v11017_v9, %v11023_v19  ;;  %v11083_v42 = vsel %vm391_vm4, %v23707_v36, %v11082_v58  ;;  %v10968_v7 = vadd.f32 %v22911_v40, %v10808_v0  ;;  %v22976_v57 = vmax.f32 %v10966_v37, 0.0 }
 0x810   :  { %v22961_v26 = vmax.f32 %v10967_v18, 0.0  ;;  %v10812_v13 = vpop.f32.mrb[47].mxu0  ;;  %v10918_v31 = vpop.f32.mrb[47].mxu1  ;;  %v11021_v52 = vrot.slane %v22958_v34, 7  ;;  %v22980_v43 = vmax.f32 %v10969_v46, 0.0  ;;  %v10970_v51 = vadd.f32 %v22914_v16, %v10914_v50 }
 0x811   :  { %v10971_v60 = vadd.f32 %v10942_v15, %v10810_v45  ;;  %v10973_v47 = vadd.f32 %v22908_v30, %v10916_v21  ;;  %v11280_v59 = vpack.c.bf16 %v22958_v34, %v22927_v49  ;;  %v10972_v29 = vadd.f32 %v22911_v40, %v10812_v13  ;;  %v20480_v18 = vld [vmem:[#allocation17 + $0x62c] ss:$16 sps:$4 sm:$0xff]   ;;  %v20501_v49 = vld [vmem:[#allocation17 + $0x6a4] ss:$16 sps:$4 sm:$0xff]  }
 0x812   :  { %v11087_v56 = vrot.slane %v22961_v26, 1  ;;  %v11079_v41 = vrot.slane %v22958_v34, 1  ;;  %v23708_v15 = vrot.slane %v22980_v43, 1  ;;  %v22994_v37 = vmax.f32 %v10968_v7, 0.0  ;;  %v20475_v7 = vld [vmem:[#allocation17 + $0x620] ss:$16 sps:$4 sm:$0xff]  }
 0x813   :  { %v11027_v24 = vrot.slane %v22961_v26, 7  ;;  %v22999_v0 = vmax.f32 %v10971_v60, 0.0  ;;  %12088 = vmatprep.mubr.bf16.mxu0 %v11280_v59  ;;  %12194 = vmatprep.mubr.bf16.mxu1 %v11280_v59  ;;  %v23006_v50 = vmax.f32 %v10972_v29, 0.0  ;;  %v10974_v45 = vadd.f32 %v22914_v16, %v10918_v31  ;;  %v20478_v60 = vld [vmem:[#allocation17 + $0x628] ss:$16 sps:$4 sm:$0xff]  }
 0x814   :  { %v11088_v14 = vsel %vm391_vm4, %v11076_v44, %v11087_v56  ;;  %v11025_v44 = vrot.slane %v22976_v57, 7  ;;  %v11092_v40 = vsel %vm391_vm4, %v11082_v58, %v23708_v15  ;;  %12089 = vmatmul.mubr.bf16.vlgmr.msra.gmra.mrb[48].mxu0 %v11279_v17  ;;  %12195 = vmatmul.mubr.bf16.vlgmr.msra.gmra.mrb[48].mxu1 %v11279_v17  ;;  %v23011_v21 = vmax.f32 %v10970_v51, 0.0  ;;  %v20492_v30 = vld [vmem:[#allocation17 + $0x66c] ss:$16 sps:$4 sm:$0xff]  }
 0x815   :  { %v22991_v12 = vpack.c.bf16 %v11088_v14, %v11077_v55  ;;  %v23004_v55 = vmax.f32 %v10973_v47, 0.0  ;;  %v23009_v46 = vpack.c.bf16 %v11092_v40, %v11083_v42  ;;  %v10995_v13 = vrot.slane %v22999_v0, 7  ;;  %12110 = vmatpush1.bf16.msra.mxu0 %v20469_v6  ;;  %12216 = vmatpush1.bf16.msra.mxu1 %v20472_v62  ;;  %v20483_v42 = vld [vmem:[#allocation17 + $0x644] ss:$16 sps:$4 sm:$0xff]   ;;  %v20486_v6 = vld [vmem:[#allocation17 + $0x64c] ss:$16 sps:$4 sm:$0xff]  }
 0x816   :  { %v11283_v58 = vpack.c.bf16 %v22999_v0, %v22961_v26  ;;  %v11031_v14 = vrot.slane %v22980_v43, 7  ;;  %v11029_v47 = vrot.slane %v22994_v37, 7  ;;  %v10996_v17 = vrot.slane %v23006_v50, 7  ;;  %12111 = vmatprep.subr.bf16.mxu0 %v20477_v22  ;;  %12217 = vmatprep.subr.bf16.mxu1 %v20480_v18 }
 0x817   :  { %v10997_v16 = vrot.slane %v23004_v55, 7  ;;  %v11055_v31 = vsel %vm318_vm0, %v10995_v13, %v11015_v20  ;;  %v23023_v51 = vmax.f32 %v10974_v45, 0.0  ;;  %v11284_v59 = vpack.c.bf16 %v23006_v50, %v22994_v37 }
 0x818   :  { %v11282_v62 = vpack.c.bf16 %v22976_v57, %v22931_v3  ;;  %v23030_v29 = vpack.c.bf16 %v22946_v48, %v11055_v31  ;;  %v23037_v18 = vpack.c.bf16 %v23004_v55, %v22980_v43  ;;  %v11022_v20 = vsel %vm318_vm0, %v11016_v11, %v11021_v52  ;;  %v20481_v31 = vld [vmem:[#allocation17 + $0x640] ss:$16 sps:$4 sm:$0xff]  }
 0x819   :  { %v11057_v22 = vsel %vm318_vm0, %v10997_v16, %v11017_v9  ;;  %v11033_v40 = vrot.slane %v23011_v21, 7  ;;  %v10998_v48 = vrot.slane %v23023_v51, 7  ;;  %12112 = vmatpush1.bf16.msra.mxu0 %v20475_v7  ;;  %12218 = vmatpush1.bf16.msra.mxu1 %v20478_v60  ;;  %v20484_v9 = vld [vmem:[#allocation17 + $0x648] ss:$16 sps:$4 sm:$0xff]   ;;  %v23050_v36 = vpack.c.bf16 %v23023_v51, %v23011_v21 }
 0x81a   :  { %v23045_v45 = vpack.c.bf16 %v11024_v32, %v11057_v22  ;;  %v11089_v15 = vrot.slane %v22994_v37, 1  ;;  %12098 = vmatprep.mubr.bf16.mxu0 %v11284_v59  ;;  %12113 = vmatprep.subr.bf16.mxu0 %v20483_v42  ;;  %v11056_v4 = vsel %vm318_vm0, %v10996_v17, %v11016_v11  ;;  %v11030_v32 = vsel %vm318_vm0, %v11021_v52, %v11029_v47  ;;  %v20489_v22 = vld [vmem:[#allocation17 + $0x664] ss:$16 sps:$4 sm:$0xff]  }
 0x81b   :  { %v11036_v7 = vsel %vm318_vm0, %v11029_v47, %v10996_v17  ;;  %v11095_v60 = vrot.slane %v22999_v0, 1  ;;  %12204 = vmatprep.mubr.bf16.mxu1 %v11284_v59  ;;  %12219 = vmatprep.subr.bf16.mxu1 %v20486_v6  ;;  %v23061_v10 = vpack.c.bf16 %v11022_v20, %v11056_v4  ;;  %v11028_v11 = vsel %vm318_vm0, %v11019_v53, %v11027_v24  ;;  %v20487_v53 = vld [vmem:[#allocation17 + $0x660] ss:$16 sps:$4 sm:$0xff]   ;;  %v20495_v17 = vld [vmem:[#allocation17 + $0x684] ss:$16 sps:$4 sm:$0xff]  }
 0x81c   :  { %v23063_v37 = vpack.c.bf16 %v11036_v7, %v11030_v32  ;;  %v11097_v42 = vrot.slane %v23006_v50, 1  ;;  %12099 = vmatmul.mubr.bf16.gmra.mrb[52].mxu0 %v11283_v58  ;;  %12205 = vmatmul.mubr.bf16.gmra.mrb[52].mxu1 %v11283_v58  ;;  %v11035_v52 = vsel %vm318_vm0, %v11027_v24, %v10995_v13  ;;  %v11026_v0 = vsel %vm318_vm0, %v11018_v39, %v11025_v44  ;;  %v20490_v50 = vld [vmem:[#allocation17 + $0x668] ss:$16 sps:$4 sm:$0xff]  }
 0x81d   :  { %v11058_v4 = vsel %vm318_vm0, %v10998_v48, %v11018_v39  ;;  %v11093_v38 = vrot.slane %v23011_v21, 1  ;;  %12114 = vmatpush1.bf16.msra.mxu0 %v20481_v31  ;;  %12220 = vmatpush1.bf16.msra.mxu1 %v20484_v9  ;;  %v23079_v47 = vpack.c.bf16 %v11035_v52, %v11028_v11  ;;  %v11034_v24 = vsel %vm318_vm0, %v11025_v44, %v11033_v40  ;;  %v20498_v39 = vld [vmem:[#allocation17 + $0x68c] ss:$16 sps:$4 sm:$0xff]  }
 0x81e   :  { %v23081_v58 = vpack.c.bf16 %v11026_v0, %v11058_v4  ;;  %v11099_v13 = vrot.slane %v23004_v55, 1  ;;  %12141 = vmatprep.mubr.bf16.mxu0 %v11282_v62  ;;  %12247 = vmatprep.mubr.bf16.mxu1 %v11282_v62  ;;  %v11038_v21 = vsel %vm318_vm0, %v11033_v40, %v10998_v48  ;;  %v11032_v59 = vsel %vm318_vm0, %v11023_v19, %v11031_v14  ;;  %v20499_v4 = vld [vmem:[#allocation17 + $0x6a0] ss:$16 sps:$4 sm:$0xff]  }
 0x81f   :  { %v11037_v6 = vsel %vm318_vm0, %v11031_v14, %v10997_v16  ;;  %v11101_v20 = vrot.slane %v23023_v51, 1  ;;  %12115 = vmatprep.subr.bf16.mxu0 %v20489_v22  ;;  %12221 = vmatprep.subr.bf16.mxu1 %v20492_v30  ;;  %v23093_v31 = vpack.c.bf16 %v11038_v21, %v11034_v24  ;;  %v11080_v55 = vsel %vm391_vm4, %v11078_v1, %v11079_v41  ;;  %v20493_v16 = vld [vmem:[#allocation17 + $0x680] ss:$16 sps:$4 sm:$0xff]   ;;  %v20496_v51 = vld [vmem:[#allocation17 + $0x688] ss:$16 sps:$4 sm:$0xff]  }
 0x820   :  { %v23095_v44 = vpack.c.bf16 %v11037_v6, %v11032_v59  ;;  %v11090_v5 = vsel %vm391_vm4, %v11079_v41, %v11089_v15  ;;  %v11098_v19 = vsel %vm391_vm4, %v11089_v15, %v11097_v42  ;;  %v11124_v30 = vsel %vm391_vm4, %v11097_v42, %v11078_v1  ;;  %v20504_v1 = vld [vmem:[#allocation17 + $0x6ac] ss:$16 sps:$4 sm:$0xff]   ;;  %v20508_v24 = vld [vmem:[#allocation17 + $0x6c8] ss:$16 sps:$4 sm:$0xff]   ;;  %v20519_v21 = vld [vmem:[#allocation17 + $0x704] ss:$16 sps:$4 sm:$0xff]  }
 0x821   :  { %v11096_v14 = vsel %vm391_vm4, %v11087_v56, %v11095_v60  ;;  %12116 = vmatpush1.bf16.msra.mxu0 %v20487_v53  ;;  %12222 = vmatpush1.bf16.msra.mxu1 %v20490_v50  ;;  %v23112_v62 = vpack.c.bf16 %v11090_v5, %v11080_v55  ;;  %v23114_v40 = vpack.c.bf16 %v11124_v30, %v11098_v19  ;;  %v23804_v34 = vrot.slane %v22918_v61, 1  ;;  %v20502_v53 = vld [vmem:[#allocation17 + $0x6a8] ss:$16 sps:$4 sm:$0xff]   ;;  %v20522_v59 = vld [vmem:[#allocation17 + $0x70c] ss:$16 sps:$4 sm:$0xff]  }
 0x822   :  { %12117 = vmatprep.subr.bf16.mxu0 %v20495_v17  ;;  %12223 = vmatprep.subr.bf16.mxu1 %v20498_v39  ;;  %v23805_v26 = vrot.slane %v22976_v57, 1  ;;  %v23806_v56 = vrot.slane %v22931_v3, 1  ;;  %v11102_v61 = vsel %vm391_vm4, %v11093_v38, %v11101_v20  ;;  %v23809_v11 = vrot.slane %v22980_v43, 1  ;;  %v20507_v3 = vld [vmem:[#allocation17 + $0x6c4] ss:$16 sps:$4 sm:$0xff]  }
 0x823   :  { %v11123_v41 = vsel %vm391_vm4, %v11095_v60, %v23804_v34  ;;  %v23810_v0 = vrot.slane %v22921_v54, 1  ;;  %v20505_v43 = vld [vmem:[#allocation17 + $0x6c0] ss:$16 sps:$4 sm:$0xff]   ;;  %v20513_v17 = vld [vmem:[#allocation17 + $0x6e4] ss:$16 sps:$4 sm:$0xff]  }
 0x824   :  { %v23119_v15 = vpack.c.bf16 %v11123_v41, %v11096_v14  ;;  %v11086_v48 = vsel %vm391_vm4, %v23806_v56, %v23805_v26  ;;  %v23807_v9 = vmov %v23805_v26  ;;  %v23808_v60 = vmov %v23806_v56  ;;  %v20516_v54 = vld [vmem:[#allocation17 + $0x6ec] ss:$16 sps:$4 sm:$0xff]   ;;  %v20514_v39 = vld [vmem:[#allocation17 + $0x6e8] ss:$16 sps:$4 sm:$0xff]   ;;  %v20517_v6 = vld [vmem:[#allocation17 + $0x700] ss:$16 sps:$4 sm:$0xff]  }
 0x825   :  { %v11094_v32 = vsel %vm391_vm4, %v23807_v9, %v11093_v38  ;;  %v11126_v22 = vsel %vm391_vm4, %v11101_v20, %v23808_v60  ;;  %v11100_v42 = vsel %vm391_vm4, %v23809_v11, %v11099_v13  ;;  %v11125_v57 = vsel %vm391_vm4, %v11099_v13, %v23810_v0  ;;  %12118 = vmatpush1.bf16.msra.mxu0 %v20493_v16  ;;  %v20510_v38 = vld [vmem:[#allocation17 + $0x6cc] ss:$16 sps:$4 sm:$0xff]   ;;  %v20511_v13 = vld [vmem:[#allocation17 + $0x6e0] ss:$16 sps:$4 sm:$0xff]   ;;  %v20520_v20 = vld [vmem:[#allocation17 + $0x708] ss:$16 sps:$4 sm:$0xff]  }
 0x826   :  { %v23129_v7 = vpack.c.bf16 %v11094_v32, %v11086_v48  ;;  %v23138_v52 = vpack.c.bf16 %v11126_v22, %v11102_v61  ;;  %12224 = vmatpush1.bf16.msra.mxu1 %v20496_v51  ;;  %v23143_v50 = vpack.c.bf16 %v11125_v57, %v11100_v42  ;;  %12119 = vmatprep.subr.bf16.mxu0 %v20501_v49  ;;  %v20525_v55 = vld [vmem:[#allocation17 + $0x724] ss:$16 sps:$4 sm:$0xff]   ;;  %v20528_v5 = vld [vmem:[#allocation17 + $0x72c] ss:$16 sps:$4 sm:$0xff]   ;;  %v20523_v19 = vld [vmem:[#allocation17 + $0x720] ss:$16 sps:$4 sm:$0xff]  }
 0x827   :  { %12225 = vmatprep.subr.bf16.mxu1 %v20504_v1  ;;  %v20526_v30 = vld [vmem:[#allocation17 + $0x728] ss:$16 sps:$4 sm:$0xff]   ;;  %v20531_v14 = vld [vmem:[#allocation17 + $0x744] ss:$16 sps:$4 sm:$0xff]   ;;  %v20534_v16 = vld [vmem:[#allocation17 + $0x74c] ss:$16 sps:$4 sm:$0xff]  }
 0x828   :  { %v20529_v51 = vld [vmem:[#allocation17 + $0x740] ss:$16 sps:$4 sm:$0xff]   ;;  %v20532_v34 = vld [vmem:[#allocation17 + $0x748] ss:$16 sps:$4 sm:$0xff]   ;;  %v20537_v41 = vld [vmem:[#allocation17 + $0x764] ss:$16 sps:$4 sm:$0xff]  }
 0x829   :  { %12120 = vmatpush1.bf16.msra.mxu0 %v20499_v4  ;;  %v20540_v49 = vld [vmem:[#allocation17 + $0x76c] ss:$16 sps:$4 sm:$0xff]   ;;  %v20535_v1 = vld [vmem:[#allocation17 + $0x760] ss:$16 sps:$4 sm:$0xff]   ;;  %v20538_v26 = vld [vmem:[#allocation17 + $0x768] ss:$16 sps:$4 sm:$0xff]  }
 0x82a   :  { %12226 = vmatpush1.bf16.msra.mxu1 %v20502_v53  ;;  %12121 = vmatprep.subr.bf16.mxu0 %v20507_v3  ;;  %v20543_v56 = vld [vmem:[#allocation17 + $0x784] ss:$16 sps:$4 sm:$0xff]   ;;  %v20546_v48 = vld [vmem:[#allocation17 + $0x78c] ss:$16 sps:$4 sm:$0xff]   ;;  %v20541_v9 = vld [vmem:[#allocation17 + $0x780] ss:$16 sps:$4 sm:$0xff]  }
 0x82b   :  { %12227 = vmatprep.subr.bf16.mxu1 %v20510_v38  ;;  %v20544_v32 = vld [vmem:[#allocation17 + $0x788] ss:$16 sps:$4 sm:$0xff]   ;;  %v20549_v61 = vld [vmem:[#allocation17 + $0x7a4] ss:$16 sps:$4 sm:$0xff]   ;;  %v20552_v60 = vld [vmem:[#allocation17 + $0x7ac] ss:$16 sps:$4 sm:$0xff]  }
 0x82c   :  { %v20547_v22 = vld [vmem:[#allocation17 + $0x7a0] ss:$16 sps:$4 sm:$0xff]   ;;  %v20550_v11 = vld [vmem:[#allocation17 + $0x7a8] ss:$16 sps:$4 sm:$0xff]   ;;  %v20555_v42 = vld [vmem:[#allocation17 + $0x7c4] ss:$16 sps:$4 sm:$0xff]  }
 0x82d   :  { %12122 = vmatpush1.bf16.msra.mxu0 %v20505_v43  ;;  %v20558_v0 = vld [vmem:[#allocation17 + $0x7cc] ss:$16 sps:$4 sm:$0xff]   ;;  %v20553_v57 = vld [vmem:[#allocation17 + $0x7c0] ss:$16 sps:$4 sm:$0xff]   ;;  %v20556_v4 = vld [vmem:[#allocation17 + $0x7c8] ss:$16 sps:$4 sm:$0xff]  }
 0x82e   :  { %12228 = vmatpush1.bf16.msra.mxu1 %v20508_v24  ;;  %12123 = vmatprep.subr.bf16.mxu0 %v20513_v17  ;;  %v20561_v53 = vld [vmem:[#allocation17 + $0x7e4] ss:$16 sps:$4 sm:$0xff]   ;;  %v20564_v3 = vld [vmem:[#allocation17 + $0x7ec] ss:$16 sps:$4 sm:$0xff]   ;;  %v20559_v38 = vld [vmem:[#allocation17 + $0x7e0] ss:$16 sps:$4 sm:$0xff]  }
 0x82f   :  { %12229 = vmatprep.subr.bf16.mxu1 %v20516_v54  ;;  %v20562_v43 = vld [vmem:[#allocation17 + $0x7e8] ss:$16 sps:$4 sm:$0xff]   ;;  %v20567_v24 = vld [vmem:[#allocation17 + $0x4] ss:$16 sps:$4 sm:$0xff]   ;;  %v20570_v17 = vld [vmem:[#allocation17 + $0xc] ss:$16 sps:$4 sm:$0xff]  }
 0x830   :  { %v20565_v54 = vld [vmem:[#allocation17] ss:$16 sps:$4 sm:$0xff]  }
 0x831   :  { %12124 = vmatpush1.bf16.msra.mxu0 %v20511_v13  ;;  %v20568_v13 = vld [vmem:[#allocation17 + $0x8] ss:$16 sps:$4 sm:$0xff]  }
 0x832   :  { %12230 = vmatpush1.bf16.msra.mxu1 %v20514_v39  ;;  %12125 = vmatprep.subr.bf16.mxu0 %v20519_v21  ;;  %v20573_v39 = vld [vmem:[#allocation17 + $0x24] ss:$16 sps:$4 sm:$0xff]   ;;  %v20576_v21 = vld [vmem:[#allocation17 + $0x2c] ss:$16 sps:$4 sm:$0xff]  }
 0x833   :  { %12231 = vmatprep.subr.bf16.mxu1 %v20522_v59  ;;  %v20571_v59 = vld [vmem:[#allocation17 + $0x20] ss:$16 sps:$4 sm:$0xff]  }
 0x835   :  { %12126 = vmatpush1.bf16.msra.mxu0 %v20517_v6  ;;  %v20574_v6 = vld [vmem:[#allocation17 + $0x28] ss:$16 sps:$4 sm:$0xff]  }
 0x836   :  { %12232 = vmatpush1.bf16.msra.mxu1 %v20520_v20  ;;  %12127 = vmatprep.subr.bf16.mxu0 %v20525_v55  ;;  %v20579_v20 = vld [vmem:[#allocation17 + $0x44] ss:$16 sps:$4 sm:$0xff]   ;;  %v20582_v55 = vld [vmem:[#allocation17 + $0x4c] ss:$16 sps:$4 sm:$0xff]  }
 0x837   :  { %12233 = vmatprep.subr.bf16.mxu1 %v20528_v5  ;;  %v20577_v5 = vld [vmem:[#allocation17 + $0x40] ss:$16 sps:$4 sm:$0xff]  }
 0x839   :  { %12128 = vmatpush1.bf16.msra.mxu0 %v20523_v19  ;;  %v20580_v19 = vld [vmem:[#allocation17 + $0x48] ss:$16 sps:$4 sm:$0xff]  }
 0x83a   :  { %12234 = vmatpush1.bf16.msra.mxu1 %v20526_v30  ;;  %12129 = vmatprep.subr.bf16.mxu0 %v20531_v14  ;;  %v20585_v30 = vld [vmem:[#allocation17 + $0x64] ss:$16 sps:$4 sm:$0xff]   ;;  %v20586_v14 = vld [vmem:[#allocation17 + $0x68] ss:$16 sps:$4 sm:$0xff]  }
 0x83b   :  { %12235 = vmatprep.subr.bf16.mxu1 %v20534_v16  ;;  %v20591_v16 = vld [vmem:[#allocation17 + $0x84] ss:$16 sps:$4 sm:$0xff]  }
 0x83d   :  { %12130 = vmatpush1.bf16.msra.mxu0 %v20529_v51  ;;  %v20594_v51 = vld [vmem:[#allocation17 + $0x8c] ss:$16 sps:$4 sm:$0xff]  }
 0x83e   :  { %12236 = vmatpush1.bf16.msra.mxu1 %v20532_v34  ;;  %12131 = vmatprep.subr.bf16.mxu0 %v20537_v41  ;;  %v20589_v34 = vld [vmem:[#allocation17 + $0x80] ss:$16 sps:$4 sm:$0xff]   ;;  %v20597_v41 = vld [vmem:[#allocation17 + $0xa4] ss:$16 sps:$4 sm:$0xff]  }
 0x83f   :  { %12237 = vmatprep.subr.bf16.mxu1 %v20540_v49  ;;  %v20600_v49 = vld [vmem:[#allocation17 + $0xac] ss:$16 sps:$4 sm:$0xff]  }
 0x841   :  { %12132 = vmatpush1.bf16.msra.mxu0 %v20535_v1  ;;  %v20595_v1 = vld [vmem:[#allocation17 + $0xa0] ss:$16 sps:$4 sm:$0xff]  }
 0x842   :  { %12238 = vmatpush1.bf16.msra.mxu1 %v20538_v26  ;;  %12133 = vmatprep.subr.bf16.mxu0 %v20543_v56  ;;  %v20603_v26 = vld [vmem:[#allocation17 + $0xc4] ss:$16 sps:$4 sm:$0xff]   ;;  %v20606_v56 = vld [vmem:[#allocation17 + $0xcc] ss:$16 sps:$4 sm:$0xff]  }
 0x843   :  { %12239 = vmatprep.subr.bf16.mxu1 %v20546_v48  ;;  %v20601_v48 = vld [vmem:[#allocation17 + $0xc0] ss:$16 sps:$4 sm:$0xff]  }
 0x845   :  { %12134 = vmatpush1.bf16.msra.mxu0 %v20541_v9  ;;  %v20604_v9 = vld [vmem:[#allocation17 + $0xc8] ss:$16 sps:$4 sm:$0xff]  }
 0x846   :  { %12240 = vmatpush1.bf16.msra.mxu1 %v20544_v32  ;;  %12135 = vmatprep.subr.bf16.mxu0 %v20549_v61  ;;  %v20609_v32 = vld [vmem:[#allocation17 + $0xe4] ss:$16 sps:$4 sm:$0xff]   ;;  %v20612_v61 = vld [vmem:[#allocation17 + $0xec] ss:$16 sps:$4 sm:$0xff]  }
 0x847   :  { %12241 = vmatprep.subr.bf16.mxu1 %v20552_v60  ;;  %v20607_v60 = vld [vmem:[#allocation17 + $0xe0] ss:$16 sps:$4 sm:$0xff]  }
 0x849   :  { %12136 = vmatpush1.bf16.msra.mxu0 %v20547_v22  ;;  %v20610_v22 = vld [vmem:[#allocation17 + $0xe8] ss:$16 sps:$4 sm:$0xff]  }
 0x84a   :  { %12242 = vmatpush1.bf16.msra.mxu1 %v20550_v11  ;;  %12137 = vmatprep.subr.bf16.mxu0 %v20555_v42  ;;  %v20615_v11 = vld [vmem:[#allocation17 + $0x104] ss:$16 sps:$4 sm:$0xff]   ;;  %v20618_v42 = vld [vmem:[#allocation17 + $0x10c] ss:$16 sps:$4 sm:$0xff]  }
 0x84b   :  { %12243 = vmatprep.subr.bf16.mxu1 %v20558_v0  ;;  %v20613_v0 = vld [vmem:[#allocation17 + $0x100] ss:$16 sps:$4 sm:$0xff]  }
 0x84d   :  { %12138 = vmatpush1.bf16.msra.mxu0 %v20553_v57  ;;  %v20616_v57 = vld [vmem:[#allocation17 + $0x108] ss:$16 sps:$4 sm:$0xff]  }
 0x84e   :  { %12244 = vmatpush1.bf16.msra.mxu1 %v20556_v4  ;;  %12139 = vmatprep.subr.bf16.mxu0 %v20561_v53  ;;  %v20621_v4 = vld [vmem:[#allocation17 + $0x124] ss:$16 sps:$4 sm:$0xff]   ;;  %v20624_v53 = vld [vmem:[#allocation17 + $0x12c] ss:$16 sps:$4 sm:$0xff]  }
 0x84f   :  { %12245 = vmatprep.subr.bf16.mxu1 %v20564_v3  ;;  %v20619_v3 = vld [vmem:[#allocation17 + $0x120] ss:$16 sps:$4 sm:$0xff]  }
 0x851   :  { %12140 = vmatpush1.bf16.msra.mxu0 %v20559_v38  ;;  %v20622_v38 = vld [vmem:[#allocation17 + $0x128] ss:$16 sps:$4 sm:$0xff]  }
 0x852   :  { %12246 = vmatpush1.bf16.msra.mxu1 %v20562_v43  ;;  %12908 = vmatprep.subr.bf16.mxu0 %v20567_v24  ;;  %v20627_v43 = vld [vmem:[#allocation17 + $0x144] ss:$16 sps:$4 sm:$0xff]   ;;  %v20630_v24 = vld [vmem:[#allocation17 + $0x14c] ss:$16 sps:$4 sm:$0xff]  }
 0x853   :  { %13014 = vmatprep.subr.bf16.mxu1 %v20570_v17  ;;  %v20625_v17 = vld [vmem:[#allocation17 + $0x140] ss:$16 sps:$4 sm:$0xff]  }
 0x854   :  { %12142 = vmatmul.mubr.bf16.vlgmr.msra.gmra.mrb[48].mxu0 %v22956_v2 }
 0x855   :  { %12248 = vmatmul.mubr.bf16.vlgmr.msra.gmra.mrb[48].mxu1 %v22956_v2  ;;  %12151 = vmatprep.mubr.bf16.mxu0 %v23050_v36  ;;  %v20588_v2 = vld [vmem:[#allocation17 + $0x6c] ss:$16 sps:$4 sm:$0xff]  }
 0x856   :  { %12257 = vmatprep.mubr.bf16.mxu1 %v23050_v36  ;;  %12909 = vmatpush1.bf16.msra.mxu0 %v20565_v54  ;;  %v20583_v36 = vld [vmem:[#allocation17 + $0x60] ss:$16 sps:$4 sm:$0xff]   ;;  %v20628_v54 = vld [vmem:[#allocation17 + $0x148] ss:$16 sps:$4 sm:$0xff]  }
 0x857   :  { %13015 = vmatpush1.bf16.msra.mxu1 %v20568_v13  ;;  %12910 = vmatprep.subr.bf16.mxu0 %v20573_v39  ;;  %v20633_v13 = vld [vmem:[#allocation17 + $0x164] ss:$16 sps:$4 sm:$0xff]   ;;  %v20636_v39 = vld [vmem:[#allocation17 + $0x16c] ss:$16 sps:$4 sm:$0xff]  }
 0x858   :  { %13016 = vmatprep.subr.bf16.mxu1 %v20576_v21  ;;  %v20631_v21 = vld [vmem:[#allocation17 + $0x160] ss:$16 sps:$4 sm:$0xff]  }
 0x85a   :  { %12911 = vmatpush1.bf16.msra.mxu0 %v20571_v59  ;;  %v20634_v59 = vld [vmem:[#allocation17 + $0x168] ss:$16 sps:$4 sm:$0xff]  }
 0x85b   :  { %13017 = vmatpush1.bf16.msra.mxu1 %v20574_v6  ;;  %12912 = vmatprep.subr.bf16.mxu0 %v20579_v20  ;;  %v20639_v6 = vld [vmem:[#allocation17 + $0x184] ss:$16 sps:$4 sm:$0xff]   ;;  %v20642_v20 = vld [vmem:[#allocation17 + $0x18c] ss:$16 sps:$4 sm:$0xff]  }
 0x85c   :  { %13018 = vmatprep.subr.bf16.mxu1 %v20582_v55  ;;  %12152 = vmatmul.mubr.bf16.gmra.mrb[52].mxu0 %v23037_v18  ;;  %v20637_v55 = vld [vmem:[#allocation17 + $0x180] ss:$16 sps:$4 sm:$0xff]  }
 0x85d   :  { %12258 = vmatmul.mubr.bf16.gmra.mrb[52].mxu1 %v23037_v18  ;;  %17445 = vmatprep.mubr.msk.bf16.mxu0 %vm21812_vm3, %v23061_v10  ;;  %v20592_v18 = vld [vmem:[#allocation17 + $0x88] ss:$16 sps:$4 sm:$0xff]  }
 0x85e   :  { %17477 = vmatprep.mubr.msk.bf16.mxu1 %vm21812_vm3, %v23061_v10  ;;  %12913 = vmatpush1.bf16.msra.mxu0 %v20577_v5  ;;  %v20598_v10 = vld [vmem:[#allocation17 + $0xa8] ss:$16 sps:$4 sm:$0xff]  }
 0x85f   :  { %13019 = vmatpush1.bf16.msra.mxu1 %v20580_v19  ;;  %12914 = vmatprep.subr.bf16.mxu0 %v20585_v30  ;;  %v20640_v5 = vld [vmem:[#allocation17 + $0x188] ss:$16 sps:$4 sm:$0xff]   ;;  %v20645_v19 = vld [vmem:[#allocation17 + $0x1a4] ss:$16 sps:$4 sm:$0xff]   ;;  %v20648_v30 = vld [vmem:[#allocation17 + $0x1ac] ss:$16 sps:$4 sm:$0xff]  }
 0x860   :  { %13020 = vmatprep.subr.bf16.mxu1 %v20588_v2  ;;  %v20643_v2 = vld [vmem:[#allocation17 + $0x1a0] ss:$16 sps:$4 sm:$0xff]  }
 0x862   :  { %12915 = vmatpush1.bf16.msra.mxu0 %v20583_v36  ;;  %v20646_v36 = vld [vmem:[#allocation17 + $0x1a8] ss:$16 sps:$4 sm:$0xff]  }
 0x863   :  { %13021 = vmatpush1.bf16.msra.mxu1 %v20586_v14  ;;  %12916 = vmatprep.subr.bf16.mxu0 %v20591_v16  ;;  %v20651_v14 = vld [vmem:[#allocation17 + $0x1c4] ss:$16 sps:$4 sm:$0xff]   ;;  %v20654_v16 = vld [vmem:[#allocation17 + $0x1cc] ss:$16 sps:$4 sm:$0xff]  }
 0x864   :  { %13022 = vmatprep.subr.bf16.mxu1 %v20594_v51  ;;  %v20649_v51 = vld [vmem:[#allocation17 + $0x1c0] ss:$16 sps:$4 sm:$0xff]  }
 0x866   :  { %12917 = vmatpush1.bf16.msra.mxu0 %v20589_v34  ;;  %v20652_v34 = vld [vmem:[#allocation17 + $0x1c8] ss:$16 sps:$4 sm:$0xff]  }
 0x867   :  { %13023 = vmatpush1.bf16.msra.mxu1 %v20592_v18  ;;  %12918 = vmatprep.subr.bf16.mxu0 %v20597_v41  ;;  %v20657_v18 = vld [vmem:[#allocation17 + $0x1e4] ss:$16 sps:$4 sm:$0xff]   ;;  %v20660_v41 = vld [vmem:[#allocation17 + $0x1ec] ss:$16 sps:$4 sm:$0xff]  }
 0x868   :  { %13024 = vmatprep.subr.bf16.mxu1 %v20600_v49  ;;  %v20655_v49 = vld [vmem:[#allocation17 + $0x1e0] ss:$16 sps:$4 sm:$0xff]  }
 0x86a   :  { %12919 = vmatpush1.bf16.msra.mxu0 %v20595_v1  ;;  %v20658_v1 = vld [vmem:[#allocation17 + $0x1e8] ss:$16 sps:$4 sm:$0xff]  }
 0x86b   :  { %13025 = vmatpush1.bf16.msra.mxu1 %v20598_v10  ;;  %12920 = vmatprep.subr.bf16.mxu0 %v20603_v26  ;;  %v20663_v10 = vld [vmem:[#allocation17 + $0x204] ss:$16 sps:$4 sm:$0xff]   ;;  %v20666_v26 = vld [vmem:[#allocation17 + $0x20c] ss:$16 sps:$4 sm:$0xff]  }
 0x86c   :  { %13026 = vmatprep.subr.bf16.mxu1 %v20606_v56  ;;  %v20661_v56 = vld [vmem:[#allocation17 + $0x200] ss:$16 sps:$4 sm:$0xff]  }
 0x86e   :  { %12921 = vmatpush1.bf16.msra.mxu0 %v20601_v48  ;;  %v20664_v48 = vld [vmem:[#allocation17 + $0x208] ss:$16 sps:$4 sm:$0xff]  }
 0x86f   :  { %13027 = vmatpush1.bf16.msra.mxu1 %v20604_v9  ;;  %12922 = vmatprep.subr.bf16.mxu0 %v20609_v32  ;;  %v20669_v9 = vld [vmem:[#allocation17 + $0x224] ss:$16 sps:$4 sm:$0xff]   ;;  %v20672_v32 = vld [vmem:[#allocation17 + $0x22c] ss:$16 sps:$4 sm:$0xff]  }
 0x870   :  { %13028 = vmatprep.subr.bf16.mxu1 %v20612_v61  ;;  %v20667_v61 = vld [vmem:[#allocation17 + $0x220] ss:$16 sps:$4 sm:$0xff]  }
 0x872   :  { %12923 = vmatpush1.bf16.msra.mxu0 %v20607_v60  ;;  %v20670_v60 = vld [vmem:[#allocation17 + $0x228] ss:$16 sps:$4 sm:$0xff]  }
 0x873   :  { %13029 = vmatpush1.bf16.msra.mxu1 %v20610_v22  ;;  %12924 = vmatprep.subr.bf16.mxu0 %v20615_v11  ;;  %v20675_v22 = vld [vmem:[#allocation17 + $0x244] ss:$16 sps:$4 sm:$0xff]   ;;  %v20678_v11 = vld [vmem:[#allocation17 + $0x24c] ss:$16 sps:$4 sm:$0xff]  }
 0x874   :  { %13030 = vmatprep.subr.bf16.mxu1 %v20618_v42  ;;  %v20673_v42 = vld [vmem:[#allocation17 + $0x240] ss:$16 sps:$4 sm:$0xff]  }
 0x876   :  { %12925 = vmatpush1.bf16.msra.mxu0 %v20613_v0  ;;  %v20681_v0 = vld [vmem:[#allocation17 + $0x264] ss:$16 sps:$4 sm:$0xff]  }
 0x877   :  { %13031 = vmatpush1.bf16.msra.mxu1 %v20616_v57  ;;  %12926 = vmatprep.subr.bf16.mxu0 %v20621_v4  ;;  %v20684_v57 = vld [vmem:[#allocation17 + $0x26c] ss:$16 sps:$4 sm:$0xff]   ;;  %v20682_v4 = vld [vmem:[#allocation17 + $0x268] ss:$16 sps:$4 sm:$0xff]  }
 0x878   :  { %13032 = vmatprep.subr.bf16.mxu1 %v20624_v53  ;;  %v20687_v53 = vld [vmem:[#allocation17 + $0x284] ss:$16 sps:$4 sm:$0xff]  }
 0x87a   :  { %12927 = vmatpush1.bf16.msra.mxu0 %v20619_v3  ;;  %v20690_v3 = vld [vmem:[#allocation17 + $0x28c] ss:$16 sps:$4 sm:$0xff]  }
 0x87b   :  { %13033 = vmatpush1.bf16.msra.mxu1 %v20622_v38  ;;  %12928 = vmatprep.subr.bf16.mxu0 %v20627_v43  ;;  %v20685_v38 = vld [vmem:[#allocation17 + $0x280] ss:$16 sps:$4 sm:$0xff]   ;;  %v20693_v43 = vld [vmem:[#allocation17 + $0x2a4] ss:$16 sps:$4 sm:$0xff]  }
 0x87c   :  { %13034 = vmatprep.subr.bf16.mxu1 %v20630_v24  ;;  %v20696_v24 = vld [vmem:[#allocation17 + $0x2ac] ss:$16 sps:$4 sm:$0xff]  }
 0x87e   :  { %12929 = vmatpush1.bf16.msra.mxu0 %v20625_v17  ;;  %v20691_v17 = vld [vmem:[#allocation17 + $0x2a0] ss:$16 sps:$4 sm:$0xff]  }
 0x87f   :  { %13035 = vmatpush1.bf16.msra.mxu1 %v20628_v54  ;;  %12930 = vmatprep.subr.bf16.mxu0 %v20633_v13  ;;  %v20694_v54 = vld [vmem:[#allocation17 + $0x2a8] ss:$16 sps:$4 sm:$0xff]   ;;  %v20699_v13 = vld [vmem:[#allocation17 + $0x2c4] ss:$16 sps:$4 sm:$0xff]  }
 0x880   :  { %13036 = vmatprep.subr.bf16.mxu1 %v20636_v39  ;;  %v20697_v39 = vld [vmem:[#allocation17 + $0x2c0] ss:$16 sps:$4 sm:$0xff]  }
 0x882   :  { %12931 = vmatpush1.bf16.msra.mxu0 %v20631_v21  ;;  %v20700_v21 = vld [vmem:[#allocation17 + $0x2c8] ss:$16 sps:$4 sm:$0xff]  }
 0x883   :  { %13037 = vmatpush1.bf16.msra.mxu1 %v20634_v59  ;;  %12932 = vmatprep.subr.bf16.mxu0 %v20639_v6  ;;  %v20705_v59 = vld [vmem:[#allocation17 + $0x2e4] ss:$16 sps:$4 sm:$0xff]   ;;  %v20708_v6 = vld [vmem:[#allocation17 + $0x2ec] ss:$16 sps:$4 sm:$0xff]  }
 0x884   :  { %13038 = vmatprep.subr.bf16.mxu1 %v20642_v20  ;;  %v20703_v20 = vld [vmem:[#allocation17 + $0x2e0] ss:$16 sps:$4 sm:$0xff]  }
 0x886   :  { %12933 = vmatpush1.bf16.msra.mxu0 %v20637_v55  ;;  %v20706_v55 = vld [vmem:[#allocation17 + $0x2e8] ss:$16 sps:$4 sm:$0xff]  }
 0x887   :  { %13039 = vmatpush1.bf16.msra.mxu1 %v20640_v5  ;;  %12934 = vmatprep.subr.bf16.mxu0 %v20645_v19  ;;  %v20711_v5 = vld [vmem:[#allocation17 + $0x304] ss:$16 sps:$4 sm:$0xff]   ;;  %v20714_v19 = vld [vmem:[#allocation17 + $0x30c] ss:$16 sps:$4 sm:$0xff]  }
 0x888   :  { %13040 = vmatprep.subr.bf16.mxu1 %v20648_v30  ;;  %v20709_v30 = vld [vmem:[#allocation17 + $0x300] ss:$16 sps:$4 sm:$0xff]  }
 0x88a   :  { %12935 = vmatpush1.bf16.msra.mxu0 %v20643_v2  ;;  %v20712_v2 = vld [vmem:[#allocation17 + $0x308] ss:$16 sps:$4 sm:$0xff]  }
 0x88b   :  { %13041 = vmatpush1.bf16.msra.mxu1 %v20646_v36  ;;  %12936 = vmatprep.subr.bf16.mxu0 %v20651_v14  ;;  %v20717_v36 = vld [vmem:[#allocation17 + $0x324] ss:$16 sps:$4 sm:$0xff]   ;;  %v20720_v14 = vld [vmem:[#allocation17 + $0x32c] ss:$16 sps:$4 sm:$0xff]  }
 0x88c   :  { %13042 = vmatprep.subr.bf16.mxu1 %v20654_v16  ;;  %v20715_v16 = vld [vmem:[#allocation17 + $0x320] ss:$16 sps:$4 sm:$0xff]  }
 0x88e   :  { %12937 = vmatpush1.bf16.msra.mxu0 %v20649_v51  ;;  %v20718_v51 = vld [vmem:[#allocation17 + $0x328] ss:$16 sps:$4 sm:$0xff]  }
 0x88f   :  { %13043 = vmatpush1.bf16.msra.mxu1 %v20652_v34  ;;  %12938 = vmatprep.subr.bf16.mxu0 %v20657_v18  ;;  %v20723_v34 = vld [vmem:[#allocation17 + $0x344] ss:$16 sps:$4 sm:$0xff]   ;;  %v20726_v18 = vld [vmem:[#allocation17 + $0x34c] ss:$16 sps:$4 sm:$0xff]  }
 0x890   :  { %13044 = vmatprep.subr.bf16.mxu1 %v20660_v41  ;;  %v20721_v41 = vld [vmem:[#allocation17 + $0x340] ss:$16 sps:$4 sm:$0xff]  }
 0x892   :  { %12939 = vmatpush1.bf16.msra.mxu0 %v20655_v49  ;;  %v20724_v49 = vld [vmem:[#allocation17 + $0x348] ss:$16 sps:$4 sm:$0xff]  }
 0x893   :  { %13045 = vmatpush1.bf16.msra.mxu1 %v20658_v1  ;;  %12961 = vmatprep.subr.bf16.mxu0 %v20663_v10  ;;  %v20729_v1 = vld [vmem:[#allocation17 + $0x364] ss:$16 sps:$4 sm:$0xff]   ;;  %v20732_v10 = vld [vmem:[#allocation17 + $0x36c] ss:$16 sps:$4 sm:$0xff]  }
 0x894   :  { %13067 = vmatprep.subr.bf16.mxu1 %v20666_v26  ;;  %v20727_v26 = vld [vmem:[#allocation17 + $0x360] ss:$16 sps:$4 sm:$0xff]  }
 0x895   :  { %17449 = vmatmul.mubr.msk.bf16.vlgmr.msra.gmra.mrb[48].mxu0 %vm21812_vm3, %v23030_v29 }
 0x896   :  { %17481 = vmatmul.mubr.msk.bf16.vlgmr.msra.gmra.mrb[48].mxu1 %vm21812_vm3, %v23030_v29  ;;  %17453 = vmatprep.mubr.msk.bf16.mxu0 %vm21867_vm6, %v23063_v37  ;;  %v20676_v29 = vld [vmem:[#allocation17 + $0x248] ss:$16 sps:$4 sm:$0xff]  }
 0x897   :  { %12962 = vmatpush1.bf16.msra.mxu0 %v20661_v56  ;;  %17485 = vmatprep.mubr.msk.bf16.mxu1 %vm21867_vm6, %v23063_v37  ;;  %v20679_v37 = vld [vmem:[#allocation17 + $0x260] ss:$16 sps:$4 sm:$0xff]   ;;  %v20730_v56 = vld [vmem:[#allocation17 + $0x368] ss:$16 sps:$4 sm:$0xff]  }
 0x898   :  { %13068 = vmatpush1.bf16.msra.mxu1 %v20664_v48  ;;  %12963 = vmatprep.subr.bf16.mxu0 %v20669_v9  ;;  %v20735_v48 = vld [vmem:[#allocation17 + $0x384] ss:$16 sps:$4 sm:$0xff]   ;;  %v20738_v9 = vld [vmem:[#allocation17 + $0x38c] ss:$16 sps:$4 sm:$0xff]  }
 0x899   :  { %13069 = vmatprep.subr.bf16.mxu1 %v20672_v32  ;;  %v20733_v32 = vld [vmem:[#allocation17 + $0x380] ss:$16 sps:$4 sm:$0xff]  }
 0x89b   :  { %12964 = vmatpush1.bf16.msra.mxu0 %v20667_v61  ;;  %v20736_v61 = vld [vmem:[#allocation17 + $0x388] ss:$16 sps:$4 sm:$0xff]  }
 0x89c   :  { %13070 = vmatpush1.bf16.msra.mxu1 %v20670_v60  ;;  %12965 = vmatprep.subr.bf16.mxu0 %v20675_v22  ;;  %v20741_v60 = vld [vmem:[#allocation17 + $0x3a4] ss:$16 sps:$4 sm:$0xff]   ;;  %v20744_v22 = vld [vmem:[#allocation17 + $0x3ac] ss:$16 sps:$4 sm:$0xff]  }
 0x89d   :  { %13071 = vmatprep.subr.bf16.mxu1 %v20678_v11  ;;  %17457 = vmatmul.mubr.msk.bf16.gmra.mrb[52].mxu0 %vm21867_vm6, %v23079_v47  ;;  %v20739_v11 = vld [vmem:[#allocation17 + $0x3a0] ss:$16 sps:$4 sm:$0xff]  }
 0x89e   :  { %17489 = vmatmul.mubr.msk.bf16.gmra.mrb[52].mxu1 %vm21867_vm6, %v23079_v47  ;;  %17461 = vmatprep.mubr.msk.bf16.mxu0 %vm21812_vm3, %v23081_v58  ;;  %v20688_v47 = vld [vmem:[#allocation17 + $0x288] ss:$16 sps:$4 sm:$0xff]  }
 0x89f   :  { %12966 = vmatpush1.bf16.msra.mxu0 %v20673_v42  ;;  %17493 = vmatprep.mubr.msk.bf16.mxu1 %vm21812_vm3, %v23081_v58  ;;  %v20702_v58 = vld [vmem:[#allocation17 + $0x2cc] ss:$16 sps:$4 sm:$0xff]   ;;  %v20742_v42 = vld [vmem:[#allocation17 + $0x3a8] ss:$16 sps:$4 sm:$0xff]  }
 0x8a0   :  { %13072 = vmatpush1.bf16.msra.mxu1 %v20676_v29  ;;  %12967 = vmatprep.subr.bf16.mxu0 %v20681_v0  ;;  %v20747_v29 = vld [vmem:[#allocation17 + $0x3c4] ss:$16 sps:$4 sm:$0xff]   ;;  %v20750_v0 = vld [vmem:[#allocation17 + $0x3cc] ss:$16 sps:$4 sm:$0xff]  }
 0x8a1   :  { %13073 = vmatprep.subr.bf16.mxu1 %v20684_v57  ;;  %v20745_v57 = vld [vmem:[#allocation17 + $0x3c0] ss:$16 sps:$4 sm:$0xff]  }
 0x8a3   :  { %12968 = vmatpush1.bf16.msra.mxu0 %v20679_v37  ;;  %v20748_v37 = vld [vmem:[#allocation17 + $0x3c8] ss:$16 sps:$4 sm:$0xff]  }
 0x8a4   :  { %13074 = vmatpush1.bf16.msra.mxu1 %v20682_v4  ;;  %12969 = vmatprep.subr.bf16.mxu0 %v20687_v53  ;;  %v20753_v4 = vld [vmem:[#allocation17 + $0x3e4] ss:$16 sps:$4 sm:$0xff]   ;;  %v20756_v53 = vld [vmem:[#allocation17 + $0x3ec] ss:$16 sps:$4 sm:$0xff]  }
 0x8a5   :  { %13075 = vmatprep.subr.bf16.mxu1 %v20690_v3  ;;  %v20751_v3 = vld [vmem:[#allocation17 + $0x3e0] ss:$16 sps:$4 sm:$0xff]  }
 0x8a7   :  { %12970 = vmatpush1.bf16.msra.mxu0 %v20685_v38  ;;  %v20754_v38 = vld [vmem:[#allocation17 + $0x3e8] ss:$16 sps:$4 sm:$0xff]  }
 0x8a8   :  { %13076 = vmatpush1.bf16.msra.mxu1 %v20688_v47  ;;  %12971 = vmatprep.subr.bf16.mxu0 %v20693_v43  ;;  %v20759_v47 = vld [vmem:[#allocation17 + $0x804] ss:$16 sps:$4 sm:$0xff]   ;;  %v20762_v43 = vld [vmem:[#allocation17 + $0x80c] ss:$16 sps:$4 sm:$0xff]  }
 0x8a9   :  { %13077 = vmatprep.subr.bf16.mxu1 %v20696_v24  ;;  %v20757_v24 = vld [vmem:[#allocation17 + $0x800] ss:$16 sps:$4 sm:$0xff]  }
 0x8ab   :  { %12972 = vmatpush1.bf16.msra.mxu0 %v20691_v17  ;;  %v20760_v17 = vld [vmem:[#allocation17 + $0x808] ss:$16 sps:$4 sm:$0xff]  }
 0x8ac   :  { %13078 = vmatpush1.bf16.msra.mxu1 %v20694_v54  ;;  %12973 = vmatprep.subr.bf16.mxu0 %v20699_v13  ;;  %v20765_v54 = vld [vmem:[#allocation17 + $0x824] ss:$16 sps:$4 sm:$0xff]   ;;  %v20768_v13 = vld [vmem:[#allocation17 + $0x82c] ss:$16 sps:$4 sm:$0xff]  }
 0x8ad   :  { %13079 = vmatprep.subr.bf16.mxu1 %v20702_v58  ;;  %v20763_v58 = vld [vmem:[#allocation17 + $0x820] ss:$16 sps:$4 sm:$0xff]  }
 0x8af   :  { %12974 = vmatpush1.bf16.msra.mxu0 %v20697_v39  ;;  %v20766_v39 = vld [vmem:[#allocation17 + $0x828] ss:$16 sps:$4 sm:$0xff]  }
 0x8b0   :  { %13080 = vmatpush1.bf16.msra.mxu1 %v20700_v21  ;;  %12975 = vmatprep.subr.bf16.mxu0 %v20705_v59  ;;  %v20771_v21 = vld [vmem:[#allocation17 + $0x844] ss:$16 sps:$4 sm:$0xff]   ;;  %v20774_v59 = vld [vmem:[#allocation17 + $0x84c] ss:$16 sps:$4 sm:$0xff]  }
 0x8b1   :  { %13081 = vmatprep.subr.bf16.mxu1 %v20708_v6  ;;  %v20769_v6 = vld [vmem:[#allocation17 + $0x840] ss:$16 sps:$4 sm:$0xff]  }
 0x8b3   :  { %12976 = vmatpush1.bf16.msra.mxu0 %v20703_v20  ;;  %v20777_v20 = vld [vmem:[#allocation17 + $0x864] ss:$16 sps:$4 sm:$0xff]  }
 0x8b4   :  { %13082 = vmatpush1.bf16.msra.mxu1 %v20706_v55  ;;  %12977 = vmatprep.subr.bf16.mxu0 %v20711_v5  ;;  %v20775_v55 = vld [vmem:[#allocation17 + $0x860] ss:$16 sps:$4 sm:$0xff]   ;;  %v20778_v5 = vld [vmem:[#allocation17 + $0x868] ss:$16 sps:$4 sm:$0xff]  }
 0x8b5   :  { %13083 = vmatprep.subr.bf16.mxu1 %v20714_v19  ;;  %v20783_v19 = vld [vmem:[#allocation17 + $0x884] ss:$16 sps:$4 sm:$0xff]  }
 0x8b7   :  { %12978 = vmatpush1.bf16.msra.mxu0 %v20709_v30  ;;  %v20786_v30 = vld [vmem:[#allocation17 + $0x88c] ss:$16 sps:$4 sm:$0xff]  }
 0x8b8   :  { %13084 = vmatpush1.bf16.msra.mxu1 %v20712_v2  ;;  %12979 = vmatprep.subr.bf16.mxu0 %v20717_v36  ;;  %v20781_v2 = vld [vmem:[#allocation17 + $0x880] ss:$16 sps:$4 sm:$0xff]   ;;  %v20789_v36 = vld [vmem:[#allocation17 + $0x8a4] ss:$16 sps:$4 sm:$0xff]  }
 0x8b9   :  { %13085 = vmatprep.subr.bf16.mxu1 %v20720_v14  ;;  %v20792_v14 = vld [vmem:[#allocation17 + $0x8ac] ss:$16 sps:$4 sm:$0xff]  }
 0x8bb   :  { %12980 = vmatpush1.bf16.msra.mxu0 %v20715_v16  ;;  %v20787_v16 = vld [vmem:[#allocation17 + $0x8a0] ss:$16 sps:$4 sm:$0xff]  }
 0x8bc   :  { %13086 = vmatpush1.bf16.msra.mxu1 %v20718_v51  ;;  %12981 = vmatprep.subr.bf16.mxu0 %v20723_v34  ;;  %v20795_v51 = vld [vmem:[#allocation17 + $0x8c4] ss:$16 sps:$4 sm:$0xff]   ;;  %v20798_v34 = vld [vmem:[#allocation17 + $0x8cc] ss:$16 sps:$4 sm:$0xff]  }
 0x8bd   :  { %13087 = vmatprep.subr.bf16.mxu1 %v20726_v18  ;;  %v20793_v18 = vld [vmem:[#allocation17 + $0x8c0] ss:$16 sps:$4 sm:$0xff]  }
 0x8bf   :  { %12982 = vmatpush1.bf16.msra.mxu0 %v20721_v41  ;;  %v20796_v41 = vld [vmem:[#allocation17 + $0x8c8] ss:$16 sps:$4 sm:$0xff]  }
 0x8c0   :  { %13088 = vmatpush1.bf16.msra.mxu1 %v20724_v49  ;;  %12983 = vmatprep.subr.bf16.mxu0 %v20729_v1  ;;  %v20801_v49 = vld [vmem:[#allocation17 + $0x8e4] ss:$16 sps:$4 sm:$0xff]   ;;  %v20804_v1 = vld [vmem:[#allocation17 + $0x8ec] ss:$16 sps:$4 sm:$0xff]  }
 0x8c1   :  { %13089 = vmatprep.subr.bf16.mxu1 %v20732_v10  ;;  %v20799_v10 = vld [vmem:[#allocation17 + $0x8e0] ss:$16 sps:$4 sm:$0xff]  }
 0x8c3   :  { %12984 = vmatpush1.bf16.msra.mxu0 %v20727_v26  ;;  %v20802_v26 = vld [vmem:[#allocation17 + $0x8e8] ss:$16 sps:$4 sm:$0xff]  }
 0x8c4   :  { %13090 = vmatpush1.bf16.msra.mxu1 %v20730_v56  ;;  %12985 = vmatprep.subr.bf16.mxu0 %v20735_v48  ;;  %v20807_v56 = vld [vmem:[#allocation17 + $0x904] ss:$16 sps:$4 sm:$0xff]   ;;  %v20810_v48 = vld [vmem:[#allocation17 + $0x90c] ss:$16 sps:$4 sm:$0xff]  }
 0x8c5   :  { %13091 = vmatprep.subr.bf16.mxu1 %v20738_v9  ;;  %v20805_v9 = vld [vmem:[#allocation17 + $0x900] ss:$16 sps:$4 sm:$0xff]  }
 0x8c7   :  { %12986 = vmatpush1.bf16.msra.mxu0 %v20733_v32  ;;  %v20808_v32 = vld [vmem:[#allocation17 + $0x908] ss:$16 sps:$4 sm:$0xff]  }
 0x8c8   :  { %13092 = vmatpush1.bf16.msra.mxu1 %v20736_v61  ;;  %12987 = vmatprep.subr.bf16.mxu0 %v20741_v60  ;;  %v20813_v61 = vld [vmem:[#allocation17 + $0x924] ss:$16 sps:$4 sm:$0xff]   ;;  %v20816_v60 = vld [vmem:[#allocation17 + $0x92c] ss:$16 sps:$4 sm:$0xff]  }
 0x8c9   :  { %13093 = vmatprep.subr.bf16.mxu1 %v20744_v22  ;;  %v20811_v22 = vld [vmem:[#allocation17 + $0x920] ss:$16 sps:$4 sm:$0xff]  }
 0x8cb   :  { %12988 = vmatpush1.bf16.msra.mxu0 %v20739_v11  ;;  %v20814_v11 = vld [vmem:[#allocation17 + $0x928] ss:$16 sps:$4 sm:$0xff]  }
 0x8cc   :  { %13094 = vmatpush1.bf16.msra.mxu1 %v20742_v42  ;;  %12989 = vmatprep.subr.bf16.mxu0 %v20747_v29  ;;  %v20819_v42 = vld [vmem:[#allocation17 + $0x944] ss:$16 sps:$4 sm:$0xff]   ;;  %v20822_v29 = vld [vmem:[#allocation17 + $0x94c] ss:$16 sps:$4 sm:$0xff]  }
 0x8cd   :  { %13095 = vmatprep.subr.bf16.mxu1 %v20750_v0  ;;  %v20817_v0 = vld [vmem:[#allocation17 + $0x940] ss:$16 sps:$4 sm:$0xff]  }
 0x8cf   :  { %12990 = vmatpush1.bf16.msra.mxu0 %v20745_v57  ;;  %v20820_v57 = vld [vmem:[#allocation17 + $0x948] ss:$16 sps:$4 sm:$0xff]  }
 0x8d0   :  { %13096 = vmatpush1.bf16.msra.mxu1 %v20748_v37  ;;  %12991 = vmatprep.subr.bf16.mxu0 %v20753_v4  ;;  %v20825_v37 = vld [vmem:[#allocation17 + $0x964] ss:$16 sps:$4 sm:$0xff]   ;;  %v20828_v4 = vld [vmem:[#allocation17 + $0x96c] ss:$16 sps:$4 sm:$0xff]  }
 0x8d1   :  { %13097 = vmatprep.subr.bf16.mxu1 %v20756_v53  ;;  %v20823_v53 = vld [vmem:[#allocation17 + $0x960] ss:$16 sps:$4 sm:$0xff]  }
 0x8d3   :  { %12992 = vmatpush1.bf16.msra.mxu0 %v20751_v3  ;;  %v20826_v3 = vld [vmem:[#allocation17 + $0x968] ss:$16 sps:$4 sm:$0xff]  }
 0x8d4   :  { %13098 = vmatpush1.bf16.msra.mxu1 %v20754_v38  ;;  %13897 = vmatprep.subr.bf16.mxu0 %v20759_v47  ;;  %v20831_v38 = vld [vmem:[#allocation17 + $0x984] ss:$16 sps:$4 sm:$0xff]   ;;  %v20834_v47 = vld [vmem:[#allocation17 + $0x98c] ss:$16 sps:$4 sm:$0xff]  }
 0x8d5   :  { %14003 = vmatprep.subr.bf16.mxu1 %v20762_v43  ;;  %v20829_v43 = vld [vmem:[#allocation17 + $0x980] ss:$16 sps:$4 sm:$0xff]  }
 0x8d6   :  { %17465 = vmatmul.mubr.msk.bf16.vlgmr.msra.gmra.mrb[48].mxu0 %vm21812_vm3, %v23045_v45 }
 0x8d7   :  { %17497 = vmatmul.mubr.msk.bf16.vlgmr.msra.gmra.mrb[48].mxu1 %vm21812_vm3, %v23045_v45  ;;  %17469 = vmatprep.mubr.msk.bf16.mxu0 %vm21867_vm6, %v23093_v31  ;;  %v20772_v45 = vld [vmem:[#allocation17 + $0x848] ss:$16 sps:$4 sm:$0xff]  }
 0x8d8   :  { %17501 = vmatprep.mubr.msk.bf16.mxu1 %vm21867_vm6, %v23093_v31  ;;  %13898 = vmatpush1.bf16.msra.mxu0 %v20757_v24  ;;  %v20780_v31 = vld [vmem:[#allocation17 + $0x86c] ss:$16 sps:$4 sm:$0xff]   ;;  %v20832_v24 = vld [vmem:[#allocation17 + $0x988] ss:$16 sps:$4 sm:$0xff]  }
 0x8d9   :  { %14004 = vmatpush1.bf16.msra.mxu1 %v20760_v17  ;;  %13899 = vmatprep.subr.bf16.mxu0 %v20765_v54  ;;  %v20837_v17 = vld [vmem:[#allocation17 + $0x9a4] ss:$16 sps:$4 sm:$0xff]   ;;  %v20840_v54 = vld [vmem:[#allocation17 + $0x9ac] ss:$16 sps:$4 sm:$0xff]  }
 0x8da   :  { %14005 = vmatprep.subr.bf16.mxu1 %v20768_v13  ;;  %v20835_v13 = vld [vmem:[#allocation17 + $0x9a0] ss:$16 sps:$4 sm:$0xff]  }
 0x8dc   :  { %13900 = vmatpush1.bf16.msra.mxu0 %v20763_v58  ;;  %v20838_v58 = vld [vmem:[#allocation17 + $0x9a8] ss:$16 sps:$4 sm:$0xff]  }
 0x8dd   :  { %14006 = vmatpush1.bf16.msra.mxu1 %v20766_v39  ;;  %13901 = vmatprep.subr.bf16.mxu0 %v20771_v21  ;;  %v20843_v39 = vld [vmem:[#allocation17 + $0x9c4] ss:$16 sps:$4 sm:$0xff]   ;;  %v20846_v21 = vld [vmem:[#allocation17 + $0x9cc] ss:$16 sps:$4 sm:$0xff]  }
 0x8de   :  { %17473 = vmatmul.mubr.msk.bf16.gmra.mrb[52].mxu0 %vm21867_vm6, %v23095_v44  ;;  %14007 = vmatprep.subr.bf16.mxu1 %v20774_v59  ;;  %v20841_v59 = vld [vmem:[#allocation17 + $0x9c0] ss:$16 sps:$4 sm:$0xff]  }
 0x8df   :  { %17505 = vmatmul.mubr.msk.bf16.gmra.mrb[52].mxu1 %vm21867_vm6, %v23095_v44  ;;  %17637 = vmatprep.mubr.msk.bf16.mxu0 %vm21974_vm8, %v23112_v62  ;;  %v20784_v44 = vld [vmem:[#allocation17 + $0x888] ss:$16 sps:$4 sm:$0xff]  }
 0x8e0   :  { %13902 = vmatpush1.bf16.msra.mxu0 %v20769_v6  ;;  %17669 = vmatprep.mubr.msk.bf16.mxu1 %vm21974_vm8, %v23112_v62  ;;  %v20790_v62 = vld [vmem:[#allocation17 + $0x8a8] ss:$16 sps:$4 sm:$0xff]  }
 0x8e1   :  { %14008 = vmatpush1.bf16.msra.mxu1 %v20772_v45  ;;  %13903 = vmatprep.subr.bf16.mxu0 %v20777_v20  ;;  %v20844_v6 = vld [vmem:[#allocation17 + $0x9c8] ss:$16 sps:$4 sm:$0xff]   ;;  %v20849_v45 = vld [vmem:[#allocation17 + $0x9e4] ss:$16 sps:$4 sm:$0xff]   ;;  %v20852_v20 = vld [vmem:[#allocation17 + $0x9ec] ss:$16 sps:$4 sm:$0xff]  }
 0x8e2   :  { %14009 = vmatprep.subr.bf16.mxu1 %v20780_v31  ;;  %v20847_v31 = vld [vmem:[#allocation17 + $0x9e0] ss:$16 sps:$4 sm:$0xff]  }
 0x8e4   :  { %13904 = vmatpush1.bf16.msra.mxu0 %v20775_v55  ;;  %v20850_v55 = vld [vmem:[#allocation17 + $0x9e8] ss:$16 sps:$4 sm:$0xff]  }
 0x8e5   :  { %14010 = vmatpush1.bf16.msra.mxu1 %v20778_v5  ;;  %13905 = vmatprep.subr.bf16.mxu0 %v20783_v19  ;;  %v20855_v5 = vld [vmem:[#allocation17 + $0xa04] ss:$16 sps:$4 sm:$0xff]   ;;  %v20858_v19 = vld [vmem:[#allocation17 + $0xa0c] ss:$16 sps:$4 sm:$0xff]  }
 0x8e6   :  { %14011 = vmatprep.subr.bf16.mxu1 %v20786_v30  ;;  %v20853_v30 = vld [vmem:[#allocation17 + $0xa00] ss:$16 sps:$4 sm:$0xff]  }
 0x8e8   :  { %13906 = vmatpush1.bf16.msra.mxu0 %v20781_v2  ;;  %v20856_v2 = vld [vmem:[#allocation17 + $0xa08] ss:$16 sps:$4 sm:$0xff]  }
 0x8e9   :  { %14012 = vmatpush1.bf16.msra.mxu1 %v20784_v44  ;;  %13907 = vmatprep.subr.bf16.mxu0 %v20789_v36  ;;  %v20861_v44 = vld [vmem:[#allocation17 + $0xa24] ss:$16 sps:$4 sm:$0xff]   ;;  %v20864_v36 = vld [vmem:[#allocation17 + $0xa2c] ss:$16 sps:$4 sm:$0xff]  }
 0x8ea   :  { %14013 = vmatprep.subr.bf16.mxu1 %v20792_v14  ;;  %v20859_v14 = vld [vmem:[#allocation17 + $0xa20] ss:$16 sps:$4 sm:$0xff]  }
 0x8ec   :  { %13908 = vmatpush1.bf16.msra.mxu0 %v20787_v16  ;;  %v20862_v16 = vld [vmem:[#allocation17 + $0xa28] ss:$16 sps:$4 sm:$0xff]  }
 0x8ed   :  { %14014 = vmatpush1.bf16.msra.mxu1 %v20790_v62  ;;  %13909 = vmatprep.subr.bf16.mxu0 %v20795_v51  ;;  %v20867_v62 = vld [vmem:[#allocation17 + $0xa44] ss:$16 sps:$4 sm:$0xff]   ;;  %v20870_v51 = vld [vmem:[#allocation17 + $0xa4c] ss:$16 sps:$4 sm:$0xff]  }
 0x8ee   :  { %14015 = vmatprep.subr.bf16.mxu1 %v20798_v34  ;;  %v20865_v34 = vld [vmem:[#allocation17 + $0xa40] ss:$16 sps:$4 sm:$0xff]  }
 0x8f0   :  { %13910 = vmatpush1.bf16.msra.mxu0 %v20793_v18  ;;  %v20873_v18 = vld [vmem:[#allocation17 + $0xa64] ss:$16 sps:$4 sm:$0xff]  }
 0x8f1   :  { %14016 = vmatpush1.bf16.msra.mxu1 %v20796_v41  ;;  %13911 = vmatprep.subr.bf16.mxu0 %v20801_v49  ;;  %v20876_v41 = vld [vmem:[#allocation17 + $0xa6c] ss:$16 sps:$4 sm:$0xff]   ;;  %v20874_v49 = vld [vmem:[#allocation17 + $0xa68] ss:$16 sps:$4 sm:$0xff]  }
 0x8f2   :  { %14017 = vmatprep.subr.bf16.mxu1 %v20804_v1  ;;  %v20879_v1 = vld [vmem:[#allocation17 + $0xa84] ss:$16 sps:$4 sm:$0xff]  }
 0x8f4   :  { %13912 = vmatpush1.bf16.msra.mxu0 %v20799_v10  ;;  %v20882_v10 = vld [vmem:[#allocation17 + $0xa8c] ss:$16 sps:$4 sm:$0xff]  }
 0x8f5   :  { %14018 = vmatpush1.bf16.msra.mxu1 %v20802_v26  ;;  %13913 = vmatprep.subr.bf16.mxu0 %v20807_v56  ;;  %v20877_v26 = vld [vmem:[#allocation17 + $0xa80] ss:$16 sps:$4 sm:$0xff]   ;;  %v20885_v56 = vld [vmem:[#allocation17 + $0xaa4] ss:$16 sps:$4 sm:$0xff]  }
 0x8f6   :  { %14019 = vmatprep.subr.bf16.mxu1 %v20810_v48  ;;  %v20888_v48 = vld [vmem:[#allocation17 + $0xaac] ss:$16 sps:$4 sm:$0xff]  }
 0x8f8   :  { %13914 = vmatpush1.bf16.msra.mxu0 %v20805_v9  ;;  %v20883_v9 = vld [vmem:[#allocation17 + $0xaa0] ss:$16 sps:$4 sm:$0xff]  }
 0x8f9   :  { %14020 = vmatpush1.bf16.msra.mxu1 %v20808_v32  ;;  %13915 = vmatprep.subr.bf16.mxu0 %v20813_v61  ;;  %v20891_v32 = vld [vmem:[#allocation17 + $0xac4] ss:$16 sps:$4 sm:$0xff]   ;;  %v20894_v61 = vld [vmem:[#allocation17 + $0xacc] ss:$16 sps:$4 sm:$0xff]  }
 0x8fa   :  { %14021 = vmatprep.subr.bf16.mxu1 %v20816_v60  ;;  %v20889_v60 = vld [vmem:[#allocation17 + $0xac0] ss:$16 sps:$4 sm:$0xff]  }
 0x8fc   :  { %13916 = vmatpush1.bf16.msra.mxu0 %v20811_v22  ;;  %v20892_v22 = vld [vmem:[#allocation17 + $0xac8] ss:$16 sps:$4 sm:$0xff]  }
 0x8fd   :  { %14022 = vmatpush1.bf16.msra.mxu1 %v20814_v11  ;;  %13917 = vmatprep.subr.bf16.mxu0 %v20819_v42  ;;  %v20897_v11 = vld [vmem:[#allocation17 + $0xae4] ss:$16 sps:$4 sm:$0xff]   ;;  %v20900_v42 = vld [vmem:[#allocation17 + $0xaec] ss:$16 sps:$4 sm:$0xff]  }
 0x8fe   :  { %14023 = vmatprep.subr.bf16.mxu1 %v20822_v29  ;;  %v20895_v29 = vld [vmem:[#allocation17 + $0xae0] ss:$16 sps:$4 sm:$0xff]  }
 0x900   :  { %13918 = vmatpush1.bf16.msra.mxu0 %v20817_v0  ;;  %v20898_v0 = vld [vmem:[#allocation17 + $0xae8] ss:$16 sps:$4 sm:$0xff]  }
 0x901   :  { %14024 = vmatpush1.bf16.msra.mxu1 %v20820_v57  ;;  %13919 = vmatprep.subr.bf16.mxu0 %v20825_v37  ;;  %v20903_v57 = vld [vmem:[#allocation17 + $0xb04] ss:$16 sps:$4 sm:$0xff]   ;;  %v20906_v37 = vld [vmem:[#allocation17 + $0xb0c] ss:$16 sps:$4 sm:$0xff]  }
 0x902   :  { %14025 = vmatprep.subr.bf16.mxu1 %v20828_v4  ;;  %v20901_v4 = vld [vmem:[#allocation17 + $0xb00] ss:$16 sps:$4 sm:$0xff]  }
 0x904   :  { %13920 = vmatpush1.bf16.msra.mxu0 %v20823_v53  ;;  %v20904_v53 = vld [vmem:[#allocation17 + $0xb08] ss:$16 sps:$4 sm:$0xff]  }
 0x905   :  { %14026 = vmatpush1.bf16.msra.mxu1 %v20826_v3  ;;  %13921 = vmatprep.subr.bf16.mxu0 %v20831_v38  ;;  %v20909_v3 = vld [vmem:[#allocation17 + $0xb24] ss:$16 sps:$4 sm:$0xff]   ;;  %v20912_v38 = vld [vmem:[#allocation17 + $0xb2c] ss:$16 sps:$4 sm:$0xff]  }
 0x906   :  { %14027 = vmatprep.subr.bf16.mxu1 %v20834_v47  ;;  %v20907_v47 = vld [vmem:[#allocation17 + $0xb20] ss:$16 sps:$4 sm:$0xff]  }
 0x908   :  { %13922 = vmatpush1.bf16.msra.mxu0 %v20829_v43  ;;  %v20910_v43 = vld [vmem:[#allocation17 + $0xb28] ss:$16 sps:$4 sm:$0xff]  }
 0x909   :  { %14028 = vmatpush1.bf16.msra.mxu1 %v20832_v24  ;;  %13923 = vmatprep.subr.bf16.mxu0 %v20837_v17  ;;  %v20915_v24 = vld [vmem:[#allocation17 + $0xb44] ss:$16 sps:$4 sm:$0xff]   ;;  %v20918_v17 = vld [vmem:[#allocation17 + $0xb4c] ss:$16 sps:$4 sm:$0xff]  }
 0x90a   :  { %14029 = vmatprep.subr.bf16.mxu1 %v20840_v54  ;;  %v20913_v54 = vld [vmem:[#allocation17 + $0xb40] ss:$16 sps:$4 sm:$0xff]  }
 0x90c   :  { %13924 = vmatpush1.bf16.msra.mxu0 %v20835_v13  ;;  %v20916_v13 = vld [vmem:[#allocation17 + $0xb48] ss:$16 sps:$4 sm:$0xff]  }
 0x90d   :  { %14030 = vmatpush1.bf16.msra.mxu1 %v20838_v58  ;;  %13925 = vmatprep.subr.bf16.mxu0 %v20843_v39  ;;  %v20921_v58 = vld [vmem:[#allocation17 + $0xb64] ss:$16 sps:$4 sm:$0xff]   ;;  %v20924_v39 = vld [vmem:[#allocation17 + $0xb6c] ss:$16 sps:$4 sm:$0xff]  }
 0x90e   :  { %14031 = vmatprep.subr.bf16.mxu1 %v20846_v21  ;;  %v20919_v21 = vld [vmem:[#allocation17 + $0xb60] ss:$16 sps:$4 sm:$0xff]  }
 0x910   :  { %13926 = vmatpush1.bf16.msra.mxu0 %v20841_v59  ;;  %v20922_v59 = vld [vmem:[#allocation17 + $0xb68] ss:$16 sps:$4 sm:$0xff]  }
 0x911   :  { %14032 = vmatpush1.bf16.msra.mxu1 %v20844_v6  ;;  %13927 = vmatprep.subr.bf16.mxu0 %v20849_v45  ;;  %v20927_v6 = vld [vmem:[#allocation17 + $0xb84] ss:$16 sps:$4 sm:$0xff]   ;;  %v20930_v45 = vld [vmem:[#allocation17 + $0xb8c] ss:$16 sps:$4 sm:$0xff]  }
 0x912   :  { %14033 = vmatprep.subr.bf16.mxu1 %v20852_v20  ;;  %v20925_v20 = vld [vmem:[#allocation17 + $0xb80] ss:$16 sps:$4 sm:$0xff]  }
 0x914   :  { %13928 = vmatpush1.bf16.msra.mxu0 %v20847_v31  ;;  %v20928_v31 = vld [vmem:[#allocation17 + $0xb88] ss:$16 sps:$4 sm:$0xff]  }
 0x915   :  { %14034 = vmatpush1.bf16.msra.mxu1 %v20850_v55  ;;  %13950 = vmatprep.subr.bf16.mxu0 %v20855_v5  ;;  %v20933_v55 = vld [vmem:[#allocation17 + $0xba4] ss:$16 sps:$4 sm:$0xff]   ;;  %v20936_v5 = vld [vmem:[#allocation17 + $0xbac] ss:$16 sps:$4 sm:$0xff]  }
 0x916   :  { %14056 = vmatprep.subr.bf16.mxu1 %v20858_v19  ;;  %v20931_v19 = vld [vmem:[#allocation17 + $0xba0] ss:$16 sps:$4 sm:$0xff]  }
 0x917   :  { %17641 = vmatmul.mubr.msk.bf16.vlgmr.msra.gmra.mrb[48].mxu0 %vm21974_vm8, %v22991_v12 }
 0x918   :  { %17673 = vmatmul.mubr.msk.bf16.vlgmr.msra.gmra.mrb[48].mxu1 %vm21974_vm8, %v22991_v12  ;;  %17645 = vmatprep.mubr.msk.bf16.mxu0 %vm21988_vm10, %v23114_v40  ;;  %v20868_v12 = vld [vmem:[#allocation17 + $0xa48] ss:$16 sps:$4 sm:$0xff]  }
 0x919   :  { %13951 = vmatpush1.bf16.msra.mxu0 %v20853_v30  ;;  %17677 = vmatprep.mubr.msk.bf16.mxu1 %vm21988_vm10, %v23114_v40  ;;  %v20871_v40 = vld [vmem:[#allocation17 + $0xa60] ss:$16 sps:$4 sm:$0xff]   ;;  %v20934_v30 = vld [vmem:[#allocation17 + $0xba8] ss:$16 sps:$4 sm:$0xff]  }
 0x91a   :  { %14057 = vmatpush1.bf16.msra.mxu1 %v20856_v2  ;;  %13952 = vmatprep.subr.bf16.mxu0 %v20861_v44  ;;  %v20939_v2 = vld [vmem:[#allocation17 + $0xbc4] ss:$16 sps:$4 sm:$0xff]   ;;  %v20942_v44 = vld [vmem:[#allocation17 + $0xbcc] ss:$16 sps:$4 sm:$0xff]  }
 0x91b   :  { %14058 = vmatprep.subr.bf16.mxu1 %v20864_v36  ;;  %v20937_v36 = vld [vmem:[#allocation17 + $0xbc0] ss:$16 sps:$4 sm:$0xff]  }
 0x91d   :  { %13953 = vmatpush1.bf16.msra.mxu0 %v20859_v14  ;;  %v20940_v14 = vld [vmem:[#allocation17 + $0xbc8] ss:$16 sps:$4 sm:$0xff]  }
 0x91e   :  { %14059 = vmatpush1.bf16.msra.mxu1 %v20862_v16  ;;  %13954 = vmatprep.subr.bf16.mxu0 %v20867_v62  ;;  %v20945_v16 = vld [vmem:[#allocation17 + $0xbe4] ss:$16 sps:$4 sm:$0xff]   ;;  %v20948_v62 = vld [vmem:[#allocation17 + $0xbec] ss:$16 sps:$4 sm:$0xff]  }
 0x91f   :  { %17649 = vmatmul.mubr.msk.bf16.gmra.mrb[52].mxu0 %vm21988_vm10, %v23119_v15  ;;  %14060 = vmatprep.subr.bf16.mxu1 %v20870_v51  ;;  %v20943_v51 = vld [vmem:[#allocation17 + $0xbe0] ss:$16 sps:$4 sm:$0xff]  }
 0x920   :  { %17681 = vmatmul.mubr.msk.bf16.gmra.mrb[52].mxu1 %vm21988_vm10, %v23119_v15  ;;  %17653 = vmatprep.mubr.msk.bf16.mxu0 %vm21974_vm8, %v23129_v7  ;;  %v20880_v15 = vld [vmem:[#allocation17 + $0xa88] ss:$16 sps:$4 sm:$0xff]  }
 0x921   :  { %13955 = vmatpush1.bf16.msra.mxu0 %v20865_v34  ;;  %17685 = vmatprep.mubr.msk.bf16.mxu1 %vm21974_vm8, %v23129_v7  ;;  %v20886_v7 = vld [vmem:[#allocation17 + $0xaa8] ss:$16 sps:$4 sm:$0xff]  }
 0x922   :  { %14061 = vmatpush1.bf16.msra.mxu1 %v20868_v12  ;;  %13956 = vmatprep.subr.bf16.mxu0 %v20873_v18  ;;  %v20946_v34 = vld [vmem:[#allocation17 + $0xbe8] ss:$16 sps:$4 sm:$0xff]  }
 0x923   :  { %14062 = vmatprep.subr.bf16.mxu1 %v20876_v41  ;;  %v20949_v12 = vld [vmem:[#allocation20 + $0x140] sm:$0xff]  }
 0x924   :  { %v20950_v18 = vld [vmem:[#allocation20 + $0x1c0] sm:$0xff]  }
 0x925   :  { %13957 = vmatpush1.bf16.msra.mxu0 %v20871_v40  ;;  %v20951_v41 = vld [vmem:[#allocation20 + $0x100] sm:$0xff]  }
 0x926   :  { %14063 = vmatpush1.bf16.msra.mxu1 %v20874_v49  ;;  %13958 = vmatprep.subr.bf16.mxu0 %v20879_v1  ;;  %v20952_v40 = vld [vmem:[#allocation20 + $0x180] sm:$0xff]   ;;  %v20953_v49 = vld [vmem:[#allocation20 + $0x148] sm:$0xff]  }
 0x927   :  { %14064 = vmatprep.subr.bf16.mxu1 %v20882_v10  ;;  %v20954_v1 = vld [vmem:[#allocation20 + $0x1c8] sm:$0xff]  }
 0x928   :  { %v20955_v10 = vld [vmem:[#allocation20 + $0x108] sm:$0xff]  }
 0x929   :  { %13959 = vmatpush1.bf16.msra.mxu0 %v20877_v26  ;;  %v20956_v26 = vld [vmem:[#allocation20 + $0x188] sm:$0xff]  }
 0x92a   :  { %14065 = vmatpush1.bf16.msra.mxu1 %v20880_v15  ;;  %13960 = vmatprep.subr.bf16.mxu0 %v20885_v56  ;;  %v20957_v15 = vld [vmem:[#allocation20 + $0x150] sm:$0xff]  }
 0x92b   :  { %14066 = vmatprep.subr.bf16.mxu1 %v20888_v48  ;;  %v20958_v56 = vld [vmem:[#allocation20 + $0x1d0] sm:$0xff]  }
 0x92c   :  { %v20959_v48 = vld [vmem:[#allocation20 + $0x110] sm:$0xff]  }
 0x92d   :  { %13961 = vmatpush1.bf16.msra.mxu0 %v20883_v9  ;;  %v20961_v9 = vld [vmem:[#allocation20 + $0x158] sm:$0xff]  }
 0x92e   :  { %14067 = vmatpush1.bf16.msra.mxu1 %v20886_v7  ;;  %13962 = vmatprep.subr.bf16.mxu0 %v20891_v32  ;;  %v20963_v7 = vld [vmem:[#allocation20 + $0x118] sm:$0xff]  }
 0x92f   :  { %14068 = vmatprep.subr.bf16.mxu1 %v20894_v61  ;;  %v20964_v32 = vld [vmem:[#allocation20 + $0x198] sm:$0xff]   ;;  %v20965_v61 = vld [vmem:[#allocation20 + $0x160] sm:$0xff]  }
 0x931   :  { %13963 = vmatpush1.bf16.msra.mxu0 %v20889_v60  ;;  %v20966_v60 = vld [vmem:[#allocation20 + $0x1e0] sm:$0xff]  }
 0x932   :  { %14069 = vmatpush1.bf16.msra.mxu1 %v20892_v22  ;;  %13964 = vmatprep.subr.bf16.mxu0 %v20897_v11  ;;  %v20967_v22 = vld [vmem:[#allocation20 + $0x120] sm:$0xff]  }
 0x933   :  { %14070 = vmatprep.subr.bf16.mxu1 %v20900_v42  ;;  %v20968_v11 = vld [vmem:[#allocation20 + $0x1a0] sm:$0xff]   ;;  %v20969_v42 = vld [vmem:[#allocation20 + $0x168] sm:$0xff]  }
 0x935   :  { %13965 = vmatpush1.bf16.msra.mxu0 %v20895_v29  ;;  %v20970_v29 = vld [vmem:[#allocation20 + $0x1e8] sm:$0xff]  }
 0x936   :  { %14071 = vmatpush1.bf16.msra.mxu1 %v20898_v0  ;;  %13966 = vmatprep.subr.bf16.mxu0 %v20903_v57  ;;  %v20971_v0 = vld [vmem:[#allocation20 + $0x128] sm:$0xff]   ;;  %v20973_v57 = vld [vmem:[#allocation20 + $0x170] sm:$0xff]  }
 0x937   :  { %14072 = vmatprep.subr.bf16.mxu1 %v20906_v37  ;;  %v20974_v37 = vld [vmem:[#allocation20 + $0x1f0] sm:$0xff]  }
 0x939   :  { %13967 = vmatpush1.bf16.msra.mxu0 %v20901_v4  ;;  %v20975_v4 = vld [vmem:[#allocation20 + $0x130] sm:$0xff]  }
 0x93a   :  { %14073 = vmatpush1.bf16.msra.mxu1 %v20904_v53  ;;  %13968 = vmatprep.subr.bf16.mxu0 %v20909_v3  ;;  %v20976_v53 = vld [vmem:[#allocation20 + $0x1b0] sm:$0xff]   ;;  %v20977_v3 = vld [vmem:[#allocation20 + $0x178] sm:$0xff]  }
 0x93b   :  { %14074 = vmatprep.subr.bf16.mxu1 %v20912_v38  ;;  %v20978_v38 = vld [vmem:[#allocation20 + $0x1f8] sm:$0xff]  }
 0x93d   :  { %13969 = vmatpush1.bf16.msra.mxu0 %v20907_v47  ;;  %v20979_v47 = vld [vmem:[#allocation20 + $0x138] sm:$0xff]  }
 0x93e   :  { %14075 = vmatpush1.bf16.msra.mxu1 %v20910_v43  ;;  %13970 = vmatprep.subr.bf16.mxu0 %v20915_v24  ;;  %v20980_v43 = vld [vmem:[#allocation20 + $0x1b8] sm:$0xff]   ;;  %v20981_v24 = vld [vmem:[#allocation20 + $0x40] sm:$0xff]  }
 0x93f   :  { %14076 = vmatprep.subr.bf16.mxu1 %v20918_v17  ;;  %v20982_v17 = vld [vmem:[#allocation20 + $0xc0] sm:$0xff]  }
 0x941   :  { %13971 = vmatpush1.bf16.msra.mxu0 %v20913_v54  ;;  %v14125_v54 = vld [vmem:[#allocation19] sm:$0xf] }
 0x942   :  { %14077 = vmatpush1.bf16.msra.mxu1 %v20916_v13  ;;  %13972 = vmatprep.subr.bf16.mxu0 %v20921_v58  ;;  %v23248_v13 = vrot.slane %v14125_v54, %v22065_v27  ;;  %v23251_v58 = vrot.slane %v14125_v54, %v22068_v28 }
 0x943   :  { %14078 = vmatprep.subr.bf16.mxu1 %v20924_v39  ;;  %v23254_v39 = vrot.slane %v14125_v54, %v23802_v35 }
 0x945   :  { %13973 = vmatpush1.bf16.msra.mxu0 %v20919_v21  ;;  %v23257_v21 = vrot.slane %v14125_v54, %v23803_v8 }
 0x946   :  { %14079 = vmatpush1.bf16.msra.mxu1 %v20922_v59  ;;  %13974 = vmatprep.subr.bf16.mxu0 %v20927_v6 }
 0x947   :  { %14080 = vmatprep.subr.bf16.mxu1 %v20930_v45 }
 0x949   :  { %13975 = vmatpush1.bf16.msra.mxu0 %v20925_v20 }
 0x94a   :  { %14081 = vmatpush1.bf16.msra.mxu1 %v20928_v31  ;;  %13976 = vmatprep.subr.bf16.mxu0 %v20933_v55 }
 0x94b   :  { %14082 = vmatprep.subr.bf16.mxu1 %v20936_v5 }
 0x94d   :  { %13977 = vmatpush1.bf16.msra.mxu0 %v20931_v19 }
 0x94e   :  { %14083 = vmatpush1.bf16.msra.mxu1 %v20934_v30  ;;  %13978 = vmatprep.subr.bf16.mxu0 %v20939_v2 }
 0x94f   :  { %14084 = vmatprep.subr.bf16.mxu1 %v20942_v44 }
 0x951   :  { %13979 = vmatpush1.bf16.msra.mxu0 %v20937_v36 }
 0x952   :  { %14085 = vmatpush1.bf16.msra.mxu1 %v20940_v14  ;;  %13980 = vmatprep.subr.bf16.mxu0 %v20945_v16 }
 0x953   :  { %14086 = vmatprep.subr.bf16.mxu1 %v20948_v62 }
 0x955   :  { %13981 = vmatpush1.bf16.msra.mxu0 %v20943_v51 }
 0x956   :  { %14087 = vmatpush1.bf16.msra.mxu1 %v20946_v34  ;;  %18031 = vmatprep.subr.bf16.mxu0 %v20949_v12 }
 0x957   :  { %18059 = vmatprep.subr.bf16.mxu1 %v20950_v18 }
 0x958   :  { %17657 = vmatmul.mubr.msk.bf16.vlgmr.msra.gmra.mrb[48].mxu0 %vm21974_vm8, %v23009_v46 }
 0x959   :  { %17689 = vmatmul.mubr.msk.bf16.vlgmr.msra.gmra.mrb[48].mxu1 %vm21974_vm8, %v23009_v46  ;;  %17661 = vmatprep.mubr.msk.bf16.mxu0 %vm21988_vm10, %v23138_v52  ;;  %v20960_v46 = vld [vmem:[#allocation20 + $0x190] sm:$0xff]  }
 0x95a   :  { %17693 = vmatprep.mubr.msk.bf16.mxu1 %vm21988_vm10, %v23138_v52  ;;  %18032 = vmatpush3.bf16.msra.mxu0 %v20951_v41  ;;  %v20962_v52 = vld [vmem:[#allocation20 + $0x1d8] sm:$0xff]  }
 0x95b   :  { %18060 = vmatpush3.bf16.msra.mxu1 %v20952_v40  ;;  %18033 = vmatprep.subr.bf16.mxu0 %v20953_v49 }
 0x95c   :  { %18061 = vmatprep.subr.bf16.mxu1 %v20954_v1 }
 0x95e   :  { %18034 = vmatpush3.bf16.msra.mxu0 %v20955_v10 }
 0x95f   :  { %18062 = vmatpush3.bf16.msra.mxu1 %v20956_v26  ;;  %18035 = vmatprep.subr.bf16.mxu0 %v20957_v15 }
 0x960   :  { %17665 = vmatmul.mubr.msk.bf16.gmra.mrb[52].mxu0 %vm21988_vm10, %v23143_v50  ;;  %18063 = vmatprep.subr.bf16.mxu1 %v20958_v56 }
 0x961   :  { %17697 = vmatmul.mubr.msk.bf16.gmra.mrb[52].mxu1 %vm21988_vm10, %v23143_v50  ;;  %v20972_v50 = vld [vmem:[#allocation20 + $0x1a8] sm:$0xff]  }
 0x962   :  { %18036 = vmatpush3.bf16.msra.mxu0 %v20959_v48 }
 0x963   :  { %18064 = vmatpush3.bf16.msra.mxu1 %v20960_v46  ;;  %18037 = vmatprep.subr.bf16.mxu0 %v20961_v9 }
 0x964   :  { %18065 = vmatprep.subr.bf16.mxu1 %v20962_v52 }
 0x966   :  { %18038 = vmatpush3.bf16.msra.mxu0 %v20963_v7 }
 0x967   :  { %18066 = vmatpush3.bf16.msra.mxu1 %v20964_v32  ;;  %18039 = vmatprep.subr.bf16.mxu0 %v20965_v61 }
 0x968   :  { %18067 = vmatprep.subr.bf16.mxu1 %v20966_v60 }
 0x96a   :  { %18040 = vmatpush3.bf16.msra.mxu0 %v20967_v22 }
 0x96b   :  { %18068 = vmatpush3.bf16.msra.mxu1 %v20968_v11  ;;  %18041 = vmatprep.subr.bf16.mxu0 %v20969_v42 }
 0x96c   :  { %18069 = vmatprep.subr.bf16.mxu1 %v20970_v29 }
 0x96e   :  { %18042 = vmatpush3.bf16.msra.mxu0 %v20971_v0 }
 0x96f   :  { %18070 = vmatpush3.bf16.msra.mxu1 %v20972_v50  ;;  %18043 = vmatprep.subr.bf16.mxu0 %v20973_v57 }
 0x970   :  { %18071 = vmatprep.subr.bf16.mxu1 %v20974_v37 }
 0x972   :  { %18044 = vmatpush3.bf16.msra.mxu0 %v20975_v4 }
 0x973   :  { %18072 = vmatpush3.bf16.msra.mxu1 %v20976_v53  ;;  %18045 = vmatprep.subr.bf16.mxu0 %v20977_v3 }
 0x974   :  { %18073 = vmatprep.subr.bf16.mxu1 %v20978_v38 }
 0x976   :  { %18046 = vmatpush3.bf16.msra.mxu0 %v20979_v47 }
 0x977   :  { %18074 = vmatpush3.bf16.msra.mxu1 %v20980_v43  ;;  %18087 = vmatprep.subr.bf16.mxu0 %v20981_v24 }
 0x978   :  { %18115 = vmatprep.subr.bf16.mxu1 %v20982_v17 }
 0xa2b   :  { %v13984_v59 = vpop.f32.mrb[48].mxu0 }
 0xa2c   :  { %v14147_v6 = vadd.f32 %v23248_v13, %v13984_v59  ;;  %v14090_v45 = vpop.f32.mrb[48].mxu1  ;;  %v13986_v20 = vpop.f32.mrb[49].mxu0 }
 0xa2d   :  { %v14149_v31 = vadd.f32 %v23251_v58, %v14090_v45  ;;  %v14148_v55 = vadd.f32 %v23254_v39, %v13986_v20  ;;  %v14092_v27 = vpop.f32.mrb[49].mxu1  ;;  %v13988_v5 = vpop.f32.mrb[50].mxu0 }
 0xa2e   :  { %v23262_v19 = vmax.f32 %v14147_v6, 0.0  ;;  %v14150_v28 = vadd.f32 %v23257_v21, %v14092_v27  ;;  %v14151_v35 = vadd.f32 %v23248_v13, %v13988_v5  ;;  %v14094_v30 = vpop.f32.mrb[50].mxu1  ;;  %v13990_v8 = vpop.f32.mrb[51].mxu0 }
 0xa2f   :  { %v23266_v2 = vmax.f32 %v14149_v31, 0.0  ;;  %v14153_v44 = vadd.f32 %v23251_v58, %v14094_v30  ;;  %v14096_v36 = vpop.f32.mrb[51].mxu1  ;;  %v23272_v62 = vmax.f32 %v14148_v55, 0.0  ;;  %v14152_v51 = vadd.f32 %v23254_v39, %v13990_v8 }
 0xa30   :  { %v23269_v14 = vmax.f32 %v14151_v35, 0.0  ;;  %v14203_v16 = vrot.slane %v23262_v19, 7  ;;  %v14263_v34 = vrot.slane %v23262_v19, 1  ;;  %v23276_v12 = vmax.f32 %v14150_v28, 0.0  ;;  %v20983_v28 = vld [vmem:[#allocation20] sm:$0xff]  }
 0xa31   :  { %v14205_v40 = vrot.slane %v23266_v2, 7  ;;  %v23283_v1 = vmax.f32 %v14153_v44, 0.0  ;;  %v14154_v10 = vadd.f32 %v23257_v21, %v14096_v36  ;;  %v23710_v15 = vrot.slane %v23266_v2, 1  ;;  %v20984_v35 = vld [vmem:[#allocation20 + $0x80] sm:$0xff]   ;;  %v20985_v36 = vld [vmem:[#allocation20 + $0x48] sm:$0xff]  }
 0xa32   :  { %v14207_v18 = vrot.slane %v23269_v14, 7  ;;  %v14264_v41 = vrot.slane %v23269_v14, 1  ;;  %v14403_v49 = vpack.c.bf16 %v23269_v14, %v23262_v19  ;;  %v23304_v60 = vmax.f32 %v14152_v51, 0.0  ;;  %v20986_v51 = vld [vmem:[#allocation20 + $0xc8] sm:$0xff]  }
 0xa33   :  { %v13994_v26 = vpop.f32.mrb[52].mxu0  ;;  %v14211_v7 = vrot.slane %v23283_v1, 7  ;;  %v14270_v32 = vrot.slane %v23283_v1, 1  ;;  %v14405_v61 = vpack.c.bf16 %v23283_v1, %v23266_v2  ;;  %v14204_v42 = vrot.slane %v23272_v62, 7  ;;  %v21003_v19 = vld [vmem:[#allocation20 + $0x28] sm:$0xff]  }
 0xa34   :  { %v23292_v56 = vsel %vm318_vm0, %v14203_v16, %v14207_v18  ;;  %v23297_v48 = vsel %vm391_vm4, %v14263_v34, %v14264_v41  ;;  %v14155_v46 = vadd.f32 %v23248_v13, %v13994_v26  ;;  %v14100_v9 = vpop.f32.mrb[52].mxu1  ;;  %v13996_v52 = vpop.f32.mrb[53].mxu0  ;;  %v23307_v29 = vmax.f32 %v14154_v10, 0.0 }
 0xa35   :  { %v14102_v22 = vpop.f32.mrb[53].mxu1  ;;  %v13998_v11 = vpop.f32.mrb[54].mxu0  ;;  %v14157_v50 = vadd.f32 %v23251_v58, %v14100_v9  ;;  %v23317_v4 = vsel %vm318_vm0, %v14205_v40, %v14211_v7  ;;  %v23322_v53 = vsel %vm391_vm4, %v23710_v15, %v14270_v32  ;;  %v14156_v3 = vadd.f32 %v23254_v39, %v13996_v52  ;;  %v20992_v15 = vld [vmem:[#allocation20 + $0x90] sm:$0xff]  }
 0xa36   :  { %v23309_v0 = vmax.f32 %v14155_v46, 0.0  ;;  %v14104_v57 = vpop.f32.mrb[54].mxu1  ;;  %v14000_v37 = vpop.f32.mrb[55].mxu0  ;;  %v14158_v38 = vadd.f32 %v23257_v21, %v14102_v22  ;;  %v14266_v43 = vrot.slane %v23272_v62, 1  ;;  %v14206_v24 = vrot.slane %v23276_v12, 7 }
 0xa37   :  { %v14106_v47 = vpop.f32.mrb[55].mxu1  ;;  %v14272_v17 = vrot.slane %v23276_v12, 1  ;;  %v14209_v59 = vrot.slane %v23304_v60, 7  ;;  %v23331_v6 = vmax.f32 %v14157_v50, 0.0  ;;  %v23333_v45 = vmax.f32 %v14156_v3, 0.0  ;;  %v20987_v3 = vld [vmem:[#allocation20 + $0x8] sm:$0xff]  }
 0xa38   :  { %v14275_v54 = vrot.slane %v23309_v0, 1  ;;  %v14159_v20 = vadd.f32 %v23248_v13, %v13998_v11  ;;  %v14161_v55 = vadd.f32 %v23251_v58, %v14104_v57  ;;  %v14404_v27 = vpack.c.bf16 %v23304_v60, %v23272_v62  ;;  %v20991_v13 = vld [vmem:[#allocation20 + $0x10] sm:$0xff]  }
 0xa39   :  { %v14406_v5 = vpack.c.bf16 %v23307_v29, %v23276_v12  ;;  %v14267_v30 = vrot.slane %v23304_v60, 1  ;;  %v23711_v8 = vrot.slane %v23331_v6, 1  ;;  %v23350_v44 = vmax.f32 %v14158_v38, 0.0  ;;  %v21002_v12 = vld [vmem:[#allocation20 + $0xe8] sm:$0xff]  }
 0xa3a   :  { %v23339_v31 = vsel %vm391_vm4, %v14264_v41, %v14275_v54  ;;  %v14213_v58 = vrot.slane %v23307_v29, 7  ;;  %v14273_v41 = vrot.slane %v23307_v29, 1  ;;  %v14215_v10 = vrot.slane %v23309_v0, 7  ;;  %14700 = vmatprep.mubr.bf16.mxu0 %v14404_v27 }
 0xa3b   :  { %v23355_v26 = vmax.f32 %v14159_v20, 0.0  ;;  %14749 = vmatprep.mubr.bf16.mxu1 %v14406_v5  ;;  %v23360_v46 = vsel %vm391_vm4, %v14270_v32, %v23711_v8  ;;  %v23362_v9 = vmax.f32 %v14161_v55, 0.0  ;;  %v14160_v52 = vadd.f32 %v23254_v39, %v14000_v37  ;;  %14701 = vmatmul.mubr.bf16.vlgmr.msra.gmra.mrb[56].mxu0 %v14403_v49  ;;  %v20988_v32 = vld [vmem:[#allocation20 + $0x88] sm:$0xff]   ;;  %v20989_v37 = vld [vmem:[#allocation20 + $0x50] sm:$0xff]   ;;  %v20993_v8 = vld [vmem:[#allocation20 + $0x58] sm:$0xff]  }
 0xa3c   :  { %v14162_v22 = vadd.f32 %v23257_v21, %v14106_v47  ;;  %14750 = vmatmul.mubr.bf16.vlgmr.msra.gmra.mrb[56].mxu1 %v14405_v61  ;;  %v14217_v50 = vrot.slane %v23333_v45, 7  ;;  %18088 = vmatpush3.bf16.msra.mxu0 %v20983_v28  ;;  %v14221_v39 = vrot.slane %v23350_v44, 7  ;;  %v20990_v47 = vld [vmem:[#allocation20 + $0xd0] sm:$0xff]   ;;  %v14210_v27 = vsel %vm318_vm0, %v14204_v42, %v14209_v59 }
 0xa3d   :  { %v14183_v57 = vrot.slane %v23355_v26, 7  ;;  %18116 = vmatpush3.bf16.msra.mxu1 %v20984_v35  ;;  %v14407_v38 = vpack.c.bf16 %v23355_v26, %v23309_v0  ;;  %v14185_v21 = vrot.slane %v23362_v9, 7  ;;  %v23374_v49 = vmax.f32 %v14160_v52, 0.0  ;;  %18089 = vmatprep.subr.bf16.mxu0 %v20985_v36 }
 0xa3e   :  { %v23376_v61 = vmax.f32 %v14162_v22, 0.0  ;;  %18117 = vmatprep.subr.bf16.mxu1 %v20986_v51  ;;  %v14409_v55 = vpack.c.bf16 %v23362_v9, %v23331_v6  ;;  %v14214_v5 = vsel %vm318_vm0, %v14206_v24, %v14213_v58  ;;  %v14219_v28 = vrot.slane %v23331_v6, 7 }
 0xa3f   :  { %v23381_v20 = vsel %vm318_vm0, %v14183_v57, %v14203_v16  ;;  %v23399_v16 = vsel %vm318_vm0, %v14185_v21, %v14205_v40  ;;  %v14184_v36 = vrot.slane %v23374_v49, 7  ;;  %v14277_v51 = vrot.slane %v23333_v45, 1 }
 0xa40   :  { %v14186_v22 = vrot.slane %v23376_v61, 7  ;;  %18090 = vmatpush3.bf16.msra.mxu0 %v20987_v3  ;;  %v14408_v11 = vpack.c.bf16 %v23374_v49, %v23333_v45  ;;  %v14281_v35 = vrot.slane %v23350_v44, 1  ;;  %v14410_v40 = vpack.c.bf16 %v23376_v61, %v23350_v44 }
 0xa41   :  { %18118 = vmatpush3.bf16.msra.mxu1 %v20988_v32  ;;  %18091 = vmatprep.subr.bf16.mxu0 %v20989_v37  ;;  %v14244_v52 = vsel %vm318_vm0, %v14184_v36, %v14204_v42  ;;  %v23417_v3 = vsel %vm318_vm0, %v14209_v59, %v14217_v50  ;;  %v23423_v44 = vsel %vm318_vm0, %v14217_v50, %v14184_v36  ;;  %v14285_v42 = vrot.slane %v23374_v49, 1  ;;  %v20994_v59 = vld [vmem:[#allocation20 + $0xd8] sm:$0xff]   ;;  %v21001_v36 = vld [vmem:[#allocation20 + $0x68] sm:$0xff]  }
 0xa42   :  { %18119 = vmatprep.subr.bf16.mxu1 %v20990_v47  ;;  %14708 = vmatprep.mubr.bf16.mxu0 %v14408_v11  ;;  %v17764_v45 = vpack.c.bf16 %v14210_v27, %v14244_v52  ;;  %v14246_v32 = vsel %vm318_vm0, %v14186_v22, %v14206_v24  ;;  %v23426_v37 = vsel %vm318_vm0, %v14213_v58, %v14221_v39  ;;  %v14289_v24 = vrot.slane %v23376_v61, 1  ;;  %v20995_v50 = vld [vmem:[#allocation20 + $0x18] sm:$0xff]   ;;  %v20997_v61 = vld [vmem:[#allocation20 + $0x60] sm:$0xff]  }
 0xa43   :  { %14757 = vmatprep.mubr.bf16.mxu1 %v14410_v40  ;;  %14709 = vmatmul.mubr.bf16.gmra.mrb[60].mxu0 %v14407_v38  ;;  %v17780_v47 = vpack.c.bf16 %v14214_v5, %v14246_v32  ;;  %v17772_v11 = vpack.c.bf16 %v23423_v44, %v23417_v3  ;;  %v23432_v27 = vsel %vm318_vm0, %v14221_v39, %v14186_v22  ;;  %v14283_v49 = vrot.slane %v23355_v26, 1  ;;  %v21007_v32 = vld [vmem:[#allocation20 + $0x30] sm:$0xff]   ;;  %v21025_v44 = vld [vmem:[#allocation20 + $0x258] sm:$0xff]  }
 0xa44   :  { %14758 = vmatmul.mubr.bf16.gmra.mrb[60].mxu1 %v14409_v55  ;;  %18092 = vmatpush3.bf16.msra.mxu0 %v20991_v13  ;;  %v17788_v58 = vpack.c.bf16 %v23432_v27, %v23426_v37  ;;  %v23442_v38 = vsel %vm318_vm0, %v14207_v18, %v14215_v10  ;;  %v23447_v39 = vsel %vm318_vm0, %v14215_v10, %v14183_v57  ;;  %v20996_v13 = vld [vmem:[#allocation20 + $0x98] sm:$0xff]   ;;  %v14287_v10 = vrot.slane %v23362_v9, 1  ;;  %v21024_v3 = vld [vmem:[#allocation20 + $0x290] sm:$0xff]  }
 0xa45   :  { %18120 = vmatpush3.bf16.msra.mxu1 %v20992_v15  ;;  %17765 = vmatprep.mubr.msk.bf16.mxu0 %vm21812_vm3, %v17764_v45  ;;  %v17776_v55 = vpack.c.bf16 %v23447_v39, %v23442_v38  ;;  %v23457_v14 = vsel %vm318_vm0, %v14211_v7, %v14219_v28  ;;  %v23460_v18 = vsel %vm318_vm0, %v14219_v28, %v14185_v21  ;;  %v20998_v15 = vld [vmem:[#allocation20 + $0xe0] sm:$0xff]   ;;  %v23812_v22 = vrot.slane %v23266_v2, 1  ;;  %v21006_v45 = vld [vmem:[#allocation20 + $0xf0] sm:$0xff]   ;;  %v21026_v37 = vld [vmem:[#allocation20 + $0x2d8] sm:$0xff]  }
 0xa46   :  { %17781 = vmatprep.mubr.msk.bf16.mxu1 %vm21812_vm3, %v17780_v47  ;;  %18093 = vmatprep.subr.bf16.mxu0 %v20993_v8  ;;  %v17792_v26 = vpack.c.bf16 %v23460_v18, %v23457_v14  ;;  %v23472_v1 = vsel %vm391_vm4, %v14266_v43, %v14267_v30  ;;  %v23477_v7 = vsel %vm391_vm4, %v14267_v30, %v14277_v51  ;;  %v20999_v30 = vld [vmem:[#allocation20 + $0x20] sm:$0xff]   ;;  %v21008_v2 = vld [vmem:[#allocation20 + $0xb0] sm:$0xff]   ;;  %v21010_v47 = vld [vmem:[#allocation20 + $0xf8] sm:$0xff]  }
 0xa47   :  { %18121 = vmatprep.subr.bf16.mxu1 %v20994_v59  ;;  %v17828_v8 = vpack.c.bf16 %v23477_v7, %v23472_v1  ;;  %v23486_v9 = vsel %vm391_vm4, %v14272_v17, %v14273_v41  ;;  %v23491_v57 = vsel %vm391_vm4, %v14273_v41, %v14281_v35  ;;  %v23494_v60 = vsel %vm391_vm4, %v14277_v51, %v14285_v42  ;;  %v21000_v41 = vld [vmem:[#allocation20 + $0xa0] sm:$0xff]   ;;  %v21011_v59 = vld [vmem:[#allocation20 + $0x38] sm:$0xff]   ;;  %v21034_v14 = vld [vmem:[#allocation20 + $0x2e8] sm:$0xff]  }
 0xa48   :  { %18094 = vmatpush3.bf16.msra.mxu0 %v20995_v50  ;;  %v17844_v21 = vpack.c.bf16 %v23491_v57, %v23486_v9  ;;  %v23501_v5 = vsel %vm391_vm4, %v14285_v42, %v14266_v43  ;;  %v23504_v28 = vsel %vm391_vm4, %v14281_v35, %v14289_v24  ;;  %v23509_v29 = vsel %vm391_vm4, %v14289_v24, %v14272_v17  ;;  %v21009_v42 = vld [vmem:[#allocation20 + $0x78] sm:$0xff]   ;;  %v21013_v50 = vld [vmem:[#allocation20 + $0x240] sm:$0xff]   ;;  %v21035_v18 = vld [vmem:[#allocation20 + $0x228] sm:$0xff]  }
 0xa49   :  { %18122 = vmatpush3.bf16.msra.mxu1 %v20996_v13  ;;  %18095 = vmatprep.subr.bf16.mxu0 %v20997_v61  ;;  %v17836_v51 = vpack.c.bf16 %v23501_v5, %v23494_v60  ;;  %v17852_v62 = vpack.c.bf16 %v23509_v29, %v23504_v28  ;;  %v23518_v43 = vsel %vm391_vm4, %v14275_v54, %v14283_v49  ;;  %v23811_v35 = vrot.slane %v23331_v6, 1  ;;  %v21005_v6 = vld [vmem:[#allocation20 + $0x70] sm:$0xff]   ;;  %v21012_v24 = vld [vmem:[#allocation20 + $0xb8] sm:$0xff]   ;;  %v21015_v13 = vld [vmem:[#allocation20 + $0x200] sm:$0xff]  }
 0xa4a   :  { %18123 = vmatprep.subr.bf16.mxu1 %v20998_v15  ;;  %v23523_v17 = vsel %vm391_vm4, %v14283_v49, %v14263_v34  ;;  %v23533_v40 = vsel %vm391_vm4, %v14287_v10, %v23812_v22  ;;  %v21004_v34 = vld [vmem:[#allocation20 + $0xa8] sm:$0xff]   ;;  %v21014_v49 = vld [vmem:[#allocation20 + $0x2c0] sm:$0xff]   ;;  %v23813_v15 = vpack.c.bf16 %v23292_v56, %v23381_v20  ;;  %v21021_v20 = vld [vmem:[#allocation20 + $0x250] sm:$0xff]   ;;  %v23816_v22 = vpack.c.bf16 %v23360_v46, %v23322_v53 }
 0xa4b   :  { %v23528_v52 = vsel %vm391_vm4, %v23811_v35, %v14287_v10  ;;  %v17840_v0 = vpack.c.bf16 %v23523_v17, %v23518_v43  ;;  %v21016_v61 = vld [vmem:[#allocation20 + $0x280] sm:$0xff]   ;;  %v21017_v10 = vld [vmem:[#allocation20 + $0x248] sm:$0xff]   ;;  %v21028_v27 = vld [vmem:[#allocation20 + $0x298] sm:$0xff]   ;;  %v23815_v35 = vpack.c.bf16 %v23339_v31, %v23297_v48 }
 0xa4c   :  { %v17856_v54 = vpack.c.bf16 %v23533_v40, %v23528_v52  ;;  %18096 = vmatpush3.bf16.msra.mxu0 %v20999_v30  ;;  %v21018_v30 = vld [vmem:[#allocation20 + $0x2c8] sm:$0xff]   ;;  %v21031_v38 = vld [vmem:[#allocation20 + $0x220] sm:$0xff]   ;;  %v21037_v1 = vld [vmem:[#allocation20 + $0x270] sm:$0xff]  }
 0xa4d   :  { %18124 = vmatpush3.bf16.msra.mxu1 %v21000_v41  ;;  %18097 = vmatprep.subr.bf16.mxu0 %v21001_v36  ;;  %v23814_v41 = vpack.c.bf16 %v23317_v4, %v23399_v16  ;;  %v21019_v56 = vld [vmem:[#allocation20 + $0x208] sm:$0xff]   ;;  %v21023_v16 = vld [vmem:[#allocation20 + $0x210] sm:$0xff]   ;;  %v21032_v39 = vld [vmem:[#allocation20 + $0x2a0] sm:$0xff]  }
 0xa4e   :  { %18125 = vmatprep.subr.bf16.mxu1 %v21002_v12  ;;  %v21020_v4 = vld [vmem:[#allocation20 + $0x288] sm:$0xff]   ;;  %v21038_v7 = vld [vmem:[#allocation20 + $0x2f0] sm:$0xff]   ;;  %v21041_v57 = vld [vmem:[#allocation20 + $0x278] sm:$0xff]  }
 0xa4f   :  { %v21040_v9 = vld [vmem:[#allocation20 + $0x2b0] sm:$0xff]   ;;  %v21043_v36 = vld [vmem:[#allocation20 + $0x238] sm:$0xff]  }
 0xa50   :  { %18098 = vmatpush3.bf16.msra.mxu0 %v21003_v19  ;;  %v21044_v12 = vld [vmem:[#allocation20 + $0x2b8] sm:$0xff]  }
 0xa51   :  { %18126 = vmatpush3.bf16.msra.mxu1 %v21004_v34  ;;  %18099 = vmatprep.subr.bf16.mxu0 %v21005_v6 }
 0xa52   :  { %18127 = vmatprep.subr.bf16.mxu1 %v21006_v45 }
 0xa54   :  { %18100 = vmatpush3.bf16.msra.mxu0 %v21007_v32 }
 0xa55   :  { %18128 = vmatpush3.bf16.msra.mxu1 %v21008_v2  ;;  %18101 = vmatprep.subr.bf16.mxu0 %v21009_v42 }
 0xa56   :  { %18129 = vmatprep.subr.bf16.mxu1 %v21010_v47 }
 0xa58   :  { %18102 = vmatpush3.bf16.msra.mxu0 %v21011_v59 }
 0xa59   :  { %18130 = vmatpush3.bf16.msra.mxu1 %v21012_v24  ;;  %18143 = vmatprep.subr.bf16.mxu0 %v21013_v50 }
 0xa5a   :  { %18171 = vmatprep.subr.bf16.mxu1 %v21014_v49 }
 0xa5b   :  { %17769 = vmatmul.mubr.msk.bf16.vlgmr.msra.gmra.mrb[64].mxu0 %vm21812_vm3, %v23813_v15 }
 0xa5c   :  { %17785 = vmatmul.mubr.msk.bf16.vlgmr.msra.gmra.mrb[64].mxu1 %vm21812_vm3, %v23814_v41  ;;  %17773 = vmatprep.mubr.msk.bf16.mxu0 %vm21867_vm6, %v17772_v11  ;;  %v21027_v11 = vld [vmem:[#allocation20 + $0x218] sm:$0xff]  }
 0xa5d   :  { %17789 = vmatprep.mubr.msk.bf16.mxu1 %vm21867_vm6, %v17788_v58  ;;  %18144 = vmatpush3.bf16.msra.mxu0 %v21015_v13  ;;  %v21029_v58 = vld [vmem:[#allocation20 + $0x260] sm:$0xff]  }
 0xa5e   :  { %18172 = vmatpush3.bf16.msra.mxu1 %v21016_v61  ;;  %18145 = vmatprep.subr.bf16.mxu0 %v21017_v10 }
 0xa5f   :  { %18173 = vmatprep.subr.bf16.mxu1 %v21018_v30 }
 0xa61   :  { %18146 = vmatpush3.bf16.msra.mxu0 %v21019_v56 }
 0xa62   :  { %18174 = vmatpush3.bf16.msra.mxu1 %v21020_v4  ;;  %18147 = vmatprep.subr.bf16.mxu0 %v21021_v20 }
 0xa63   :  { %17777 = vmatmul.mubr.msk.bf16.gmra.mrb[68].mxu0 %vm21867_vm6, %v17776_v55  ;;  %18175 = vmatprep.subr.bf16.mxu1 %v21022_v25  ;;  %v21033_v55 = vld [vmem:[#allocation20 + $0x268] sm:$0xff]  }
 0xa64   :  { %17793 = vmatmul.mubr.msk.bf16.gmra.mrb[68].mxu1 %vm21867_vm6, %v17792_v26  ;;  %17829 = vmatprep.mubr.msk.bf16.mxu0 %vm21974_vm8, %v17828_v8  ;;  %v21036_v26 = vld [vmem:[#allocation20 + $0x2a8] sm:$0xff]   ;;  %v21039_v8 = vld [vmem:[#allocation20 + $0x230] sm:$0xff]  }
 0xa65   :  { %18148 = vmatpush3.bf16.msra.mxu0 %v21023_v16  ;;  %17845 = vmatprep.mubr.msk.bf16.mxu1 %vm21974_vm8, %v17844_v21  ;;  %v21042_v21 = vld [vmem:[#allocation20 + $0x2f8] sm:$0xff]  }
 0xa66   :  { %18176 = vmatpush3.bf16.msra.mxu1 %v21024_v3  ;;  %18149 = vmatprep.subr.bf16.mxu0 %v21025_v44 }
 0xa67   :  { %18177 = vmatprep.subr.bf16.mxu1 %v21026_v37 }
 0xa69   :  { %18150 = vmatpush3.bf16.msra.mxu0 %v21027_v11 }
 0xa6a   :  { %18178 = vmatpush3.bf16.msra.mxu1 %v21028_v27  ;;  %18151 = vmatprep.subr.bf16.mxu0 %v21029_v58 }
 0xa6b   :  { %18179 = vmatprep.subr.bf16.mxu1 %v21030_v63 }
 0xa6d   :  { %18152 = vmatpush3.bf16.msra.mxu0 %v21031_v38 }
 0xa6e   :  { %18180 = vmatpush3.bf16.msra.mxu1 %v21032_v39  ;;  %18153 = vmatprep.subr.bf16.mxu0 %v21033_v55 }
 0xa6f   :  { %18181 = vmatprep.subr.bf16.mxu1 %v21034_v14 }
 0xa71   :  { %18154 = vmatpush3.bf16.msra.mxu0 %v21035_v18 }
 0xa72   :  { %18182 = vmatpush3.bf16.msra.mxu1 %v21036_v26  ;;  %18155 = vmatprep.subr.bf16.mxu0 %v21037_v1 }
 0xa73   :  { %18183 = vmatprep.subr.bf16.mxu1 %v21038_v7 }
 0xa75   :  { %18156 = vmatpush3.bf16.msra.mxu0 %v21039_v8 }
 0xa76   :  { %18184 = vmatpush3.bf16.msra.mxu1 %v21040_v9  ;;  %18157 = vmatprep.subr.bf16.mxu0 %v21041_v57 }
 0xa77   :  { %18185 = vmatprep.subr.bf16.mxu1 %v21042_v21 }
 0xa79   :  { %18158 = vmatpush3.bf16.msra.mxu0 %v21043_v36 }
 0xa7a   :  { %18186 = vmatpush3.bf16.msra.mxu1 %v21044_v12 }
 0xa7c   :  { %17833 = vmatmul.mubr.msk.bf16.vlgmr.msra.gmra.mrb[72].mxu0 %vm21974_vm8, %v23815_v35 }
 0xa7d   :  { %17849 = vmatmul.mubr.msk.bf16.vlgmr.msra.gmra.mrb[72].mxu1 %vm21974_vm8, %v23816_v22  ;;  %17837 = vmatprep.mubr.msk.bf16.mxu0 %vm21988_vm10, %v17836_v51 }
 0xa7e   :  { %17853 = vmatprep.mubr.msk.bf16.mxu1 %vm21988_vm10, %v17852_v62 }
 0xa84   :  { %17841 = vmatmul.mubr.msk.bf16.gmra.mrb[76].mxu0 %vm21988_vm10, %v17840_v0 }
 0xa85   :  { %17857 = vmatmul.mubr.msk.bf16.gmra.mrb[76].mxu1 %vm21988_vm10, %v17856_v54 }
 0xa86   :  { %21342 = shalt.err (!%p21339_p10)
}
 0xa87   :  { %s21343_s16 = scalar_lea.hbm %s23652_s13, 512 }
 0xa88   :  { %p21344_p11 = scmp.ne.s32.totalorder %s23652_s13, %s21343_s16  ;;  %p21347_p12 = scmp.lt.u32.totalorder %s21343_s16, %s23652_s13 }
 0xa8a   :  { %p21349_p13 = pnand %p21347_p12, %p21344_p11 }
 0xa8c   :  { %21352 = shalt.err (!%p21349_p13)
}
 0xa8d   :  { %s21412_s27 = smov 128   ;;  %s21413_s17 = smov 8  }
 0xa8e   :  { %15453 = dma.vmem_to_hbm [thread:$0]  %s15448_s11, 512, %s23652_s13, [#allocation4], %s21412_s27, %s21412_s27, %s21413_s17  }
 0xa8f   :  { %s21414_s13 = smov [#allocation24]  }
 0xa90   :  { %s15459_s0 = sshll.u32 %s21414_s13, 4  ;;  %s15460_s0 = int_to_ptr.vmem [resolvable:$true] %s15459_s0 }
 0xa91   :  { %s21353_s8 = scalar_lea.vmem %s15460_s0, 512  ;;  %p21358_p1 = scmp.lt.s32.totalorder %s15460_s0, %s15460_s0 }
 0xa92   :  { %p21354_p0 = scmp.ne.s32.totalorder %s15460_s0, %s21353_s8  ;;  %p21359_p2 = scmp.lt.s32.totalorder %s21353_s8, %s21353_s8 }
 0xa94   :  { %p21360_p3 = por %p21359_p2, %p21358_p1 }
 0xa96   :  { %p21361_p4 = pnand %p21360_p3, %p21354_p0 }
 0xb0e   :  { %v18047_v33 = vpop.f32.mrb[56].mxu0 }
 0xb0f   :  { %v18075_v23 = vpop.f32.mrb[56].mxu1  ;;  %v18048_v48 = vpop.f32.mrb[57].mxu0 }
 0xb10   :  { %v18076_v53 = vpop.f32.mrb[57].mxu1  ;;  %v18049_v31 = vadd.f32 %v18048_v48, %v18047_v33  ;;  %v18050_v60 = vpop.f32.mrb[58].mxu0 }
 0xb11   :  { %v18077_v46 = vadd.f32 %v18076_v53, %v18075_v23  ;;  %v18078_v5 = vpop.f32.mrb[58].mxu1  ;;  %v18051_v28 = vpop.f32.mrb[59].mxu0 }
 0xb12   :  { %v18079_v29 = vpop.f32.mrb[59].mxu1  ;;  %v18052_v62 = vadd.f32 %v18051_v28, %v18050_v60 }
 0xb13   :  { %v14752_v51 = vadd.f32 %v18077_v46, %v18049_v31  ;;  %v18080_v43 = vadd.f32 %v18079_v29, %v18078_v5  ;;  %v17858_v29 = vld [vmem:[#allocation22] ss:$0 sm:$0xff] }
 0xb15   :  { %v14755_v17 = vadd.f32 %v18080_v43, %v18052_v62 }
 0xb16   :  { %v18053_v52 = vpop.f32.mrb[60].mxu0 }
 0xb17   :  { %v18081_v40 = vpop.f32.mrb[60].mxu1  ;;  %v18054_v0 = vpop.f32.mrb[61].mxu0 }
 0xb18   :  { %v18055_v54 = vadd.f32 %v18054_v0, %v18053_v52  ;;  %v18082_v19 = vpop.f32.mrb[61].mxu1  ;;  %v18056_v34 = vpop.f32.mrb[62].mxu0 }
 0xb19   :  { %v18083_v6 = vadd.f32 %v18082_v19, %v18081_v40  ;;  %v18084_v45 = vpop.f32.mrb[62].mxu1  ;;  %v18057_v32 = vpop.f32.mrb[63].mxu0 }
 0xb1a   :  { %v18058_v2 = vadd.f32 %v18057_v32, %v18056_v34  ;;  %v18085_v42 = vpop.f32.mrb[63].mxu1 }
 0xb1b   :  { %v14760_v47 = vadd.f32 %v18083_v6, %v18055_v54  ;;  %v18086_v59 = vadd.f32 %v18085_v42, %v18084_v45 }
 0xb1d   :  { %v14763_v24 = vadd.f32 %v18086_v59, %v18058_v2 }
 0xb2e   :  { %v18103_v50 = vpop.f32.mrb[64].mxu0 }
 0xb2f   :  { %v18131_v49 = vpop.f32.mrb[64].mxu1  ;;  %v18104_v13 = vpop.f32.mrb[65].mxu0 }
 0xb30   :  { %v18105_v61 = vadd.f32 %v18104_v13, %v18103_v50  ;;  %v18132_v10 = vpop.f32.mrb[65].mxu1  ;;  %v18106_v15 = vpop.f32.mrb[66].mxu0 }
 0xb31   :  { %v18133_v30 = vadd.f32 %v18132_v10, %v18131_v49  ;;  %v18134_v41 = vpop.f32.mrb[66].mxu1  ;;  %v18107_v56 = vpop.f32.mrb[67].mxu0 }
 0xb32   :  { %v14993_v4 = vadd.f32 %v18105_v61, %v14752_v51  ;;  %v18108_v20 = vadd.f32 %v18107_v56, %v18106_v15  ;;  %v18135_v25 = vpop.f32.mrb[67].mxu1 }
 0xb33   :  { %v18136_v16 = vadd.f32 %v18135_v25, %v18134_v41 }
 0xb34   :  { %v15042_v3 = vadd.f32 %v18133_v30, %v14993_v4  ;;  %v14996_v44 = vadd.f32 %v18108_v20, %v14755_v17 }
 0xb36   :  { %v15045_v37 = vadd.f32 %v18136_v16, %v14996_v44  ;;  %v18109_v11 = vpop.f32.mrb[68].mxu0 }
 0xb37   :  { %v18137_v27 = vpop.f32.mrb[68].mxu1  ;;  %v18110_v58 = vpop.f32.mrb[69].mxu0 }
 0xb38   :  { %v18111_v63 = vadd.f32 %v18110_v58, %v18109_v11  ;;  %v18138_v38 = vpop.f32.mrb[69].mxu1  ;;  %v18112_v39 = vpop.f32.mrb[70].mxu0 }
 0xb39   :  { %v18139_v55 = vadd.f32 %v18138_v38, %v18137_v27  ;;  %v18140_v14 = vpop.f32.mrb[70].mxu1  ;;  %v18113_v18 = vpop.f32.mrb[71].mxu0 }
 0xb3a   :  { %v15001_v26 = vadd.f32 %v18111_v63, %v14760_v47  ;;  %v18114_v1 = vadd.f32 %v18113_v18, %v18112_v39  ;;  %v18141_v7 = vpop.f32.mrb[71].mxu1 }
 0xb3b   :  { %v18142_v8 = vadd.f32 %v18141_v7, %v18140_v14 }
 0xb3c   :  { %v15050_v9 = vadd.f32 %v18139_v55, %v15001_v26  ;;  %v15004_v57 = vadd.f32 %v18114_v1, %v14763_v24 }
 0xb3e   :  { %v15053_v21 = vadd.f32 %v18142_v8, %v15004_v57 }
 0xb4f   :  { %v18159_v36 = vpop.f32.mrb[72].mxu0 }
 0xb50   :  { %v18187_v12 = vpop.f32.mrb[72].mxu1  ;;  %v18160_v35 = vpop.f32.mrb[73].mxu0 }
 0xb51   :  { %v18161_v22 = vadd.f32 %v18160_v35, %v18159_v36  ;;  %v18188_v33 = vpop.f32.mrb[73].mxu1  ;;  %v18162_v23 = vpop.f32.mrb[74].mxu0 }
 0xb52   :  { %v18189_v48 = vadd.f32 %v18188_v33, %v18187_v12  ;;  %v18190_v53 = vpop.f32.mrb[74].mxu1  ;;  %v18163_v31 = vpop.f32.mrb[75].mxu0 }
 0xb53   :  { %v18164_v46 = vadd.f32 %v18163_v31, %v18162_v23  ;;  %v18191_v60 = vpop.f32.mrb[75].mxu1 }
 0xb54   :  { %v15405_v5 = vadd.f32 %v18189_v48, %v18161_v22  ;;  %v18192_v28 = vadd.f32 %v18191_v60, %v18190_v53 }
 0xb56   :  { %v15419_v51 = vadd.f32 %v15405_v5, %v15042_v3  ;;  %v15408_v62 = vadd.f32 %v18192_v28, %v18164_v46 }
 0xb57   :  { %v18165_v43 = vpop.f32.mrb[76].mxu0 }
 0xb58   :  { %v15430_v17 = vadd.f32 %v17858_v29, %v15419_v51  ;;  %v15420_v52 = vadd.f32 %v15408_v62, %v15045_v37  ;;  %v18193_v40 = vpop.f32.mrb[76].mxu1  ;;  %v18166_v0 = vpop.f32.mrb[77].mxu0 }
 0xb59   :  { %v18167_v54 = vadd.f32 %v18166_v0, %v18165_v43  ;;  %v18194_v19 = vpop.f32.mrb[77].mxu1  ;;  %v18168_v34 = vpop.f32.mrb[78].mxu0 }
 0xb5a   :  { %15438 = vst [vmem:[#allocation24] sm:$0xff] %v15430_v17  ;;  %v15431_v6 = vadd.f32 %v17858_v29, %v15420_v52  ;;  %v18195_v45 = vadd.f32 %v18194_v19, %v18193_v40  ;;  %v18196_v32 = vpop.f32.mrb[78].mxu1  ;;  %v18169_v2 = vpop.f32.mrb[79].mxu0 }
 0xb5b   :  { %v18170_v42 = vadd.f32 %v18169_v2, %v18168_v34  ;;  %v18197_v47 = vpop.f32.mrb[79].mxu1 }
 0xb5c   :  { %15439 = vst [vmem:[#allocation24 + $0x8] sm:$0xff] %v15431_v6  ;;  %v15413_v59 = vadd.f32 %v18195_v45, %v18167_v54  ;;  %v18198_v24 = vadd.f32 %v18197_v47, %v18196_v32 }
 0xb5e   :  { %v15421_v50 = vadd.f32 %v15413_v59, %v15050_v9  ;;  %v15416_v49 = vadd.f32 %v18198_v24, %v18170_v42 }
 0xb60   :  { %v15432_v13 = vadd.f32 %v17858_v29, %v15421_v50  ;;  %v15422_v61 = vadd.f32 %v15416_v49, %v15053_v21 }
 0xb62   :  { %15440 = vst [vmem:[#allocation24 + $0x10] sm:$0xff] %v15432_v13  ;;  %v15433_v10 = vadd.f32 %v17858_v29, %v15422_v61 }
 0xb64   :  { %15441 = vst [vmem:[#allocation24 + $0x18] sm:$0xff] %v15433_v10 }
 0xb65   :  { %21364 = shalt.err (!%p21361_p4)
}
 0xb66   :  { %s21365_s28 = scalar_lea.hbm %s23653_s14, 512 }
 0xb67   :  { %p21366_p5 = scmp.ne.s32.totalorder %s23653_s14, %s21365_s28  ;;  %p21369_p6 = scmp.lt.u32.totalorder %s21365_s28, %s23653_s14 }
 0xb69   :  { %p21371_p7 = pnand %p21369_p6, %p21366_p5 }
 0xb6b   :  { %21374 = shalt.err (!%p21371_p7)
}
 0xb6c   :  { %15465 = dma.vmem_to_hbm [thread:$0]  %s15460_s0, 512, %s23653_s14, [#allocation25], %s21412_s27, %s21412_s27, %s21413_s17  }
 0xb6d   :  { %21389 = dma.done.wait [#allocation4], 512  }
 0xb6e   :  { %21390 = vsyncadd [#allocation4], 4294966784 }
 0xb6f   :  { %21391 = dma.done.wait [#allocation25], 512  }
 0xb70   :  { %21392 = vsyncadd [#allocation25], 4294966784 }
 0xb71   :  { %15472 = vsyncpa [#allocation3], 1 }
 0xb72   :  { %15473 = vsyncpa [#allocation6], 1 }
 0xb73   :  { %15474 = vsyncpa [#allocation9], 1 }
 0xb74   :  { %15475 = vsyncpa [#allocation12], 1 }
 0xb75   :  { %15476 = vsyncpa [#allocation15], 1 }
 0xb76   :  { %15477 = vsyncpa [#allocation18], 1 }
 0xb77   :  { %15478 = vsyncpa [#allocation21], 1 }
 0xb78   :  { %15479 = vsyncpa [#allocation4], 1 }
 0xb79   :  { %15480 = vsyncpa [#allocation25], 1 }

</bundles_post_ra>
